<compile_context>
chip_gen: v7x
topology: tpu7x:2x2x1
jax: 0.10.0
libtpu: 0.0.40
codegen_flags: <defaults>
</compile_context>

<pallas_src>
import functools

import numpy as np
import jax
import jax.numpy as jnp
from jax.experimental import pallas as pl
from jax.experimental.pallas import tpu as pltpu


# ----------------------------- geometry ----------------------------------- #
_H = _W = 64
_C_IN = 4
_K1, _S1, _C1 = 5, 3, 16          # conv1
_K2, _S2, _C2 = 4, 2, 32          # conv2
_K3, _S3, _C3 = 3, 1, 64          # conv3
_OH1 = (_H - _K1) // _S1 + 1      # 20
_OH2 = (_OH1 - _K2) // _S2 + 1    # 9
_OH3 = (_OH2 - _K3) // _S3 + 1    # 7
_K1LANES = _K1 * _W * _C_IN       # 1280 = kh x col x cin  (conv1 LHS lanes)
_N1 = _OH1 * _C1                  # 320  conv1 out lanes (ow1 x ci)
_N1PAD = 384                      # padded to 3 x 128 -> vreg-aligned concat
_N2 = _OH2 * _C2                  # 288  conv2 out lanes (ow2 x co)
_N2PAD = 384
_N3 = _OH3 * _C3                  # 448  conv3 out lanes (ow3 x c)
_N3PAD = 512                      # padded so flat segments are 128-aligned
_FLAT = _OH3 * _N3PAD             # 3584 flattened (zero-padded) fc1 input
_FC1_OUT = 512
_NA_PAD = 128                     # q-values padded to a lane-dense store
assert (_OH1, _OH2, _OH3) == (20, 9, 7)

# conv1 output rows are parity-ordered (row r <-> oh1 = 2*(r%10) + r//10) so
# conv2's 4 kh-taps become 4 CONTIGUOUS 9-row slices of the conv1 output.
_CONV2_STARTS = tuple((kh % 2) * 10 + kh // 2 for kh in range(_K2))   # (0,10,1,11)


# ----------------------------- Pallas kernel ------------------------------ #
def _dqn_kernel(x_ref, w1, b1, w2, b2, w3, b3, w4, b4, w5, b5, out_ref,
                flat_ref):
    f32 = jnp.float32
    cdt = w1.dtype                 # bf16 MXU operands, f32 accumulation
    tb = x_ref.shape[0]

    # Per-sample conv stage (small-M matmuls); FC head is batched below.
    @pl.loop(0, tb)
    def _(t):
        xs = x_ref[t]                                            # (20, 1280)
        # conv1: one full-K matmul -> (20, 384) lane-dense (ow1 x ci)
        y = jnp.dot(xs, w1[...], preferred_element_type=f32)
        y = jnp.maximum(y + b1[...], 0.0).astype(cdt)
        # conv2: lane-concat 4 contiguous row slices (vreg-aligned 384-lane
        # pieces), one (9, 1536) @ (1536, 384) matmul.
        lhs2 = jnp.concatenate([y[s:s + _OH2, :] for s in _CONV2_STARTS],
                               axis=1)                           # (9, 1536)
        z = jnp.dot(lhs2, w2[...], preferred_element_type=f32)
        z = jnp.maximum(z + b2[...], 0.0).astype(cdt)            # (9, 384)
        # conv3: lane-concat 3 row slices, one (7, 1152) @ (1152, 512) matmul.
        lhs3 = jnp.concatenate([z[kh:kh + _OH3, :] for kh in range(_K3)],
                               axis=1)                           # (7, 1152)
        a = jnp.dot(lhs3, w3[...], preferred_element_type=f32)
        a = jnp.maximum(a + b3[...], 0.0)                        # (7, 512) f32
        # Flatten: 7 aligned 512-lane segment stores (fc1 rows pre-permuted).
        for oh3 in range(_OH3):
            flat_ref[pl.ds(t, 1), oh3 * _N3PAD:(oh3 + 1) * _N3PAD] = (
                a[oh3:oh3 + 1, :])

    # Batched dense head: (TB, 3584) @ (3584, 512) and (TB, 512) @ (512, 128).
    h = jnp.dot(flat_ref[...].astype(cdt), w4[...], preferred_element_type=f32)
    h = jnp.maximum(h + b4[...], 0.0).astype(cdt)
    q = jnp.dot(h, w5[...], preferred_element_type=f32) + b5[...]
    out_ref[...] = q                                             # (TB, 128)


# ---------------------- one-time weight repacking -------------------------- #
def prepare_params(params, mxu_dtype=jnp.bfloat16):
    """Repack PyTorch-layout params into the kernel's dense-form layouts.

    Each conv weight becomes a zero-padded (K_lanes, N_lanes) matrix so the
    whole layer is a single full-depth MXU matmul; fc1 rows are permuted to
    the kernel's (oh3, ow3, c) flatten order with zero rows at lane padding.
    """
    w1, b1 = [np.asarray(a, np.float32) for a in params["conv1"]]   # (16,4,5,5)
    w2, b2 = [np.asarray(a, np.float32) for a in params["conv2"]]   # (32,16,4,4)
    w3, b3 = [np.asarray(a, np.float32) for a in params["conv3"]]   # (64,32,3,3)
    w4, b4 = [np.asarray(a, np.float32) for a in params["fc1"]]     # (512,3136)
    w5, b5 = [np.asarray(a, np.float32) for a in params["fc2"]]     # (A,512)
    n_actions = w5.shape[0]
    assert n_actions <= _NA_PAD

    # conv1: rows (kh, col, cin), cols (ow1, ci); value W1[ci,cin,kh,col-3*ow1]
    w1d = np.zeros((_K1LANES, _N1PAD), np.float32)
    for kh in range(_K1):
        for kw in range(_K1):
            for ow1 in range(_OH1):
                col = _S1 * ow1 + kw
                r0 = kh * (_W * _C_IN) + col * _C_IN
                w1d[r0:r0 + _C_IN, ow1 * _C1:(ow1 + 1) * _C1] = w1[:, :, kh, kw].T
    b1d = np.zeros((1, _N1PAD), np.float32)
    b1d[0, :_N1] = np.tile(b1, _OH1)

    # conv2: rows (kh, ow1, ci), cols (ow2, co); value W2[co,ci,kh,ow1-2*ow2]
    w2d = np.zeros((_K2 * _N1PAD, _N2PAD), np.float32)
    for kh in range(_K2):
        for kw in range(_K2):
            for ow2 in range(_OH2):
                ow1 = _S2 * ow2 + kw
                r0 = kh * _N1PAD + ow1 * _C1
                w2d[r0:r0 + _C1, ow2 * _C2:(ow2 + 1) * _C2] = w2[:, :, kh, kw].T
    b2d = np.zeros((1, _N2PAD), np.float32)
    b2d[0, :_N2] = np.tile(b2, _OH2)

    # conv3: rows (kh, ow2, co), cols (ow3, c); value W3[c,co,kh,ow2-ow3]
    w3d = np.zeros((_K3 * _N2PAD, _N3PAD), np.float32)
    for kh in range(_K3):
        for kw in range(_K3):
            for ow3 in range(_OH3):
                ow2 = _S3 * ow3 + kw
                r0 = kh * _N2PAD + ow2 * _C2
                w3d[r0:r0 + _C2, ow3 * _C3:(ow3 + 1) * _C3] = w3[:, :, kh, kw].T
    b3d = np.zeros((1, _N3PAD), np.float32)
    b3d[0, :_N3] = np.tile(b3, _OH3)

    # fc1: kernel flat lane = oh3*512 + ow3*64 + c  <->  PyTorch c*49 + oh3*7 + ow3
    w4r = w4.reshape(_FC1_OUT, _C3, _OH3, _OH3)          # (out, c, oh3, ow3)
    w4k = np.zeros((_FLAT, _FC1_OUT), np.float32)
    for oh3 in range(_OH3):
        blk = w4r[:, :, oh3, :].transpose(2, 1, 0).reshape(_OH3 * _C3, _FC1_OUT)
        w4k[oh3 * _N3PAD:oh3 * _N3PAD + _N3, :] = blk

    w5k = np.zeros((_FC1_OUT, _NA_PAD), np.float32)
    w5k[:, :n_actions] = w5.T
    b5k = np.zeros((1, _NA_PAD), np.float32)
    b5k[0, :n_actions] = b5

    as_w = lambda a: jnp.asarray(a, mxu_dtype)
    as_b = lambda a: jnp.asarray(a, jnp.float32)
    return {"w1": as_w(w1d), "b1": as_b(b1d),
            "w2": as_w(w2d), "b2": as_b(b2d),
            "w3": as_w(w3d), "b3": as_b(b3d),
            "w4": as_w(w4k), "b4": as_b(b4.reshape(1, _FC1_OUT)),
            "w5": as_w(w5k), "b5": as_b(b5k)}


# ------------------------------ JAX wrapper -------------------------------- #
def dqn_forward(kparams, state_t, *, n_actions, tb=16):
    """state_t: (batch, 4, 64, 64) float32 -> qvalues (batch, n_actions)."""
    N, C, H, W = state_t.shape
    assert (C, H, W) == (_C_IN, _H, _W), "Linear(64*49,512) implies 64x64 frames"
    assert tb >= 8 and tb % 8 == 0
    cdt = kparams["w1"].dtype

    # conv1 LHS in the wrapper (only HBM-crossing activation, ~50 KiB/sample
    # bf16): row = conv1 output row (parity-ordered), lanes = (kh, col, cin).
    xt = jnp.transpose(state_t, (0, 2, 3, 1))                       # (N,H,W,C)
    rows = [xt[:, kh:kh + _S1 * (_OH1 - 1) + 1:_S1, :, :] for kh in range(_K1)]
    lhs = jnp.stack(rows, axis=2).reshape(N, _OH1, _K1LANES)        # (N,20,1280)
    perm = jnp.asarray([2 * (r % 10) + (r // 10) for r in range(_OH1)],
                       jnp.int32)
    lhs = jnp.take(lhs, perm, axis=1).astype(cdt)

    nb = -(-N // tb)
    npad = nb * tb
    if npad != N:
        lhs = jnp.pad(lhs, ((0, npad - N), (0, 0), (0, 0)))

    wspec = lambda shp: pl.BlockSpec(shp, lambda b: (0, 0))   # VMEM-resident

    flops = 2 * npad * (_OH1 * _K1LANES * _N1PAD
                        + _OH2 * (_K2 * _N1PAD) * _N2PAD
                        + _OH3 * (_K3 * _N2PAD) * _N3PAD
                        + _FLAT * _FC1_OUT + _FC1_OUT * _NA_PAD)
    bytes_accessed = (npad * _OH1 * _K1LANES * lhs.dtype.itemsize
                      + sum(int(np.prod(v.shape)) * v.dtype.itemsize
                            for v in kparams.values())
                      + npad * _NA_PAD * 4)

    out = pl.pallas_call(
        _dqn_kernel,
        out_shape=jax.ShapeDtypeStruct((npad, _NA_PAD), jnp.float32),
        grid_spec=pltpu.PrefetchScalarGridSpec(
            num_scalar_prefetch=0,
            grid=(nb,),
            in_specs=[
                pl.BlockSpec((tb, _OH1, _K1LANES), lambda b: (b, 0, 0)),
                wspec((_K1LANES, _N1PAD)), wspec((1, _N1PAD)),       # conv1
                wspec((_K2 * _N1PAD, _N2PAD)), wspec((1, _N2PAD)),   # conv2
                wspec((_K3 * _N2PAD, _N3PAD)), wspec((1, _N3PAD)),   # conv3
                wspec((_FLAT, _FC1_OUT)), wspec((1, _FC1_OUT)),      # fc1
                wspec((_FC1_OUT, _NA_PAD)), wspec((1, _NA_PAD)),     # fc2
            ],
            out_specs=pl.BlockSpec((tb, _NA_PAD), lambda b: (b, 0)),
            scratch_shapes=[pltpu.VMEM((tb, _FLAT), jnp.float32)],
        ),
        compiler_params=pltpu.CompilerParams(
            dimension_semantics=("parallel",),        # shard batch blocks on TCs
            vmem_limit_bytes=32 * 1024 * 1024),
        cost_estimate=pl.CostEstimate(flops=flops, transcendentals=0,
                                      bytes_accessed=bytes_accessed),
    )(lhs, kparams["w1"], kparams["b1"], kparams["w2"], kparams["b2"],
      kparams["w3"], kparams["b3"], kparams["w4"], kparams["b4"],
      kparams["w5"], kparams["b5"])
    return out[:N, :n_actions]


# --------------------- pure-JAX f32 reference (self-check) ----------------- #
def _conv_relu_ref(x, w, b, stride):
    y = jax.lax.conv_general_dilated(x, w, (stride, stride), "VALID",
                                     dimension_numbers=("NCHW", "OIHW", "NCHW"))
    return jnp.maximum(y + b.reshape(1, -1, 1, 1), 0.0)


def dqn_forward_ref(params, state_t):
    x = _conv_relu_ref(state_t, *params["conv1"], _S1)
    x = _conv_relu_ref(x, *params["conv2"], _S2)
    x = _conv_relu_ref(x, *params["conv3"], _S3)
    flat = x.reshape(x.shape[0], -1)                 # NCHW flatten, like nn.Flatten
    w4, b4 = params["fc1"]
    w5, b5 = params["fc2"]
    h = jnp.maximum(flat @ w4.T + b4, 0.0)
    return h @ w5.T + b5


# ------------------------ deterministic parameters ------------------------- #
def init_params(key, state_dim, n_actions):
    """PyTorch-default-style uniform(-1/sqrt(fan_in), 1/sqrt(fan_in)) init."""
    def dense_init(k, fan_in, fan_out):
        k1, k2 = jax.random.split(k)
        bound = 1.0 / float(fan_in) ** 0.5
        w = jax.random.uniform(k1, (fan_out, fan_in), jnp.float32, -bound, bound)
        b = jax.random.uniform(k2, (fan_out,), jnp.float32, -bound, bound)
        return w, b

    def conv_init(k, out_c, in_c, ksize):
        k1, k2 = jax.random.split(k)
        fan_in = in_c * ksize * ksize
        bound = 1.0 / float(fan_in) ** 0.5
        w = jax.random.uniform(k1, (out_c, in_c, ksize, ksize), jnp.float32,
                               -bound, bound)
        b = jax.random.uniform(k2, (out_c,), jnp.float32, -bound, bound)
        return w, b

    ks = jax.random.split(key, 5)
    return {
        "conv1": conv_init(ks[0], _C1, state_dim, _K1),
        "conv2": conv_init(ks[1], _C2, _C1, _K2),
        "conv3": conv_init(ks[2], _C3, _C2, _K3),
        "fc1": dense_init(ks[3], _C3 * _OH3 * _OH3, _FC1_OUT),
        "fc2": dense_init(ks[4], _FC1_OUT, n_actions),
    }

# TODO(synk): get_qvalues / sample_actions are host-side numpy epsilon-greedy
# utilities (np.random.choice), not part of the device forward pass; omitted.


if __name__ == "__main__":
    batch = 2
    n_actions = 6

    key = jax.random.PRNGKey(0)
    pkey, xkey = jax.random.split(key)
    params = init_params(pkey, _C_IN, n_actions)
    kparams = prepare_params(params)                 # one-time weight repack
    state_t = jax.random.uniform(xkey, (batch, _C_IN, _H, _W), jnp.float32)

    fwd = jax.jit(functools.partial(dqn_forward, n_actions=n_actions, tb=8))
    qvalues = jax.block_until_ready(fwd(kparams, state_t))

    assert qvalues.shape == (batch, n_actions), qvalues.shape
    assert qvalues.dtype == jnp.float32
    assert bool(jnp.all(jnp.isfinite(qvalues)))

    q_ref = jax.block_until_ready(jax.jit(dqn_forward_ref)(params, state_t))
    max_err = float(jnp.max(jnp.abs(qvalues - q_ref)))
    assert max_err < 2.5e-2, f"kernel/reference mismatch: {max_err}"

    print("KERNEL_OK")
</pallas_src>

<mosaic_0001>
module attributes {stable_mosaic.version = 11 : i64} {
  func.func @_dqn_kernel(%arg0: i32, %arg1: memref<8x20x1280xbf16, #tpu.memory_space<vmem>>, %arg2: memref<1280x384xbf16, #tpu.memory_space<vmem>>, %arg3: memref<1x384xf32, #tpu.memory_space<vmem>>, %arg4: memref<1536x384xbf16, #tpu.memory_space<vmem>>, %arg5: memref<1x384xf32, #tpu.memory_space<vmem>>, %arg6: memref<1152x512xbf16, #tpu.memory_space<vmem>>, %arg7: memref<1x512xf32, #tpu.memory_space<vmem>>, %arg8: memref<3584x512xbf16, #tpu.memory_space<vmem>>, %arg9: memref<1x512xf32, #tpu.memory_space<vmem>>, %arg10: memref<512x128xbf16, #tpu.memory_space<vmem>>, %arg11: memref<1x128xf32, #tpu.memory_space<vmem>>, %arg12: memref<8x128xf32, #tpu.memory_space<vmem>>, %arg13: memref<8x3584xf32, #tpu.memory_space<vmem>>) attributes {dimension_semantics = [#tpu.dimension_semantics<parallel>], iteration_bounds = array<i64: 1>, scalar_prefetch = 0 : i64, scratch_operands = 1 : i64, tpu.core_type = #tpu.core_type<tc>, window_params = [{transform_indices = @transform_0, window_bounds = array<i64: 8, 20, 1280>}, {pipeline_mode = #tpu.pipeline_mode<synchronous>, transform_indices = @transform_1, window_bounds = array<i64: 1280, 384>}, {pipeline_mode = #tpu.pipeline_mode<synchronous>, transform_indices = @transform_2, window_bounds = array<i64: 1, 384>}, {pipeline_mode = #tpu.pipeline_mode<synchronous>, transform_indices = @transform_3, window_bounds = array<i64: 1536, 384>}, {pipeline_mode = #tpu.pipeline_mode<synchronous>, transform_indices = @transform_4, window_bounds = array<i64: 1, 384>}, {pipeline_mode = #tpu.pipeline_mode<synchronous>, transform_indices = @transform_5, window_bounds = array<i64: 1152, 512>}, {pipeline_mode = #tpu.pipeline_mode<synchronous>, transform_indices = @transform_6, window_bounds = array<i64: 1, 512>}, {pipeline_mode = #tpu.pipeline_mode<synchronous>, transform_indices = @transform_7, window_bounds = array<i64: 3584, 512>}, {pipeline_mode = #tpu.pipeline_mode<synchronous>, transform_indices = @transform_8, window_bounds = array<i64: 1, 512>}, {pipeline_mode = #tpu.pipeline_mode<synchronous>, transform_indices = @transform_9, window_bounds = array<i64: 512, 128>}, {pipeline_mode = #tpu.pipeline_mode<synchronous>, transform_indices = @transform_10, window_bounds = array<i64: 1, 128>}, {transform_indices = @transform_11, window_bounds = array<i64: 8, 128>}]} {
    %c0_i32 = arith.constant 0 : i32
    %c8_i32 = arith.constant 8 : i32
    %0 = arith.addi %c0_i32, %c8_i32 : i32
    %c1_i32 = arith.constant 1 : i32
    scf.for %arg14 = %c0_i32 to %0 step %c1_i32  : i32 {
      %c1_i32_14 = arith.constant 1 : i32
      %17 = arith.muli %arg14, %c1_i32_14 : i32
      %c0_i32_15 = arith.constant 0 : i32
      %18 = arith.addi %c0_i32_15, %17 : i32
      %19 = arith.index_cast %18 : i32 to index
      %c0_16 = arith.constant 0 : index
      %c0_17 = arith.constant 0 : index
      %20 = vector.load %arg1[%19, %c0_16, %c0_17] : memref<8x20x1280xbf16, #tpu.memory_space<vmem>>, vector<1x20x1280xbf16>
      %21 = vector.shape_cast %20 : vector<1x20x1280xbf16> to vector<20x1280xbf16>
      %c0_18 = arith.constant 0 : index
      %c0_19 = arith.constant 0 : index
      %22 = vector.load %arg2[%c0_18, %c0_19] : memref<1280x384xbf16, #tpu.memory_space<vmem>>, vector<1280x384xbf16>
      %cst_20 = arith.constant dense<0.000000e+00> : vector<20x384xf32>
      %23 = tpu.matmul %21, %22, %cst_20 {dimension_numbers = #tpu.dot_dimension_numbers<[1], [0], [0], [1], [0, 0, 1, 1], [], []>} : vector<20x1280xbf16>, vector<1280x384xbf16>, vector<20x384xf32> -> vector<20x384xf32>
      %c0_21 = arith.constant 0 : index
      %c0_22 = arith.constant 0 : index
      %24 = vector.load %arg3[%c0_21, %c0_22] : memref<1x384xf32, #tpu.memory_space<vmem>>, vector<1x384xf32>
      %25 = vector.broadcast %24 : vector<1x384xf32> to vector<20x384xf32>
      %26 = arith.addf %23, %25 : vector<20x384xf32>
      %cst_23 = arith.constant 0.000000e+00 : f32
      %27 = vector.broadcast %cst_23 : f32 to vector<20x384xf32>
      %28 = arith.maximumf %26, %27 : vector<20x384xf32>
      %29 = arith.truncf %28 : vector<20x384xf32> to vector<20x384xbf16>
      %30 = vector.extract_strided_slice %29 {offsets = [0, 0], sizes = [9, 384], strides = [1, 1]} : vector<20x384xbf16> to vector<9x384xbf16>
      %31 = vector.extract_strided_slice %29 {offsets = [10, 0], sizes = [9, 384], strides = [1, 1]} : vector<20x384xbf16> to vector<9x384xbf16>
      %32 = vector.extract_strided_slice %29 {offsets = [1, 0], sizes = [9, 384], strides = [1, 1]} : vector<20x384xbf16> to vector<9x384xbf16>
      %33 = vector.extract_strided_slice %29 {offsets = [11, 0], sizes = [9, 384], strides = [1, 1]} : vector<20x384xbf16> to vector<9x384xbf16>
      %34 = tpu.concatenate %30, %31, %32, %33 in 1 : vector<9x384xbf16>, vector<9x384xbf16>, vector<9x384xbf16>, vector<9x384xbf16> -> vector<9x1536xbf16>
      %c0_24 = arith.constant 0 : index
      %c0_25 = arith.constant 0 : index
      %35 = vector.load %arg4[%c0_24, %c0_25] : memref<1536x384xbf16, #tpu.memory_space<vmem>>, vector<1536x384xbf16>
      %cst_26 = arith.constant dense<0.000000e+00> : vector<9x384xf32>
      %36 = tpu.matmul %34, %35, %cst_26 {dimension_numbers = #tpu.dot_dimension_numbers<[1], [0], [0], [1], [0, 0, 1, 1], [], []>} : vector<9x1536xbf16>, vector<1536x384xbf16>, vector<9x384xf32> -> vector<9x384xf32>
      %c0_27 = arith.constant 0 : index
      %c0_28 = arith.constant 0 : index
      %37 = vector.load %arg5[%c0_27, %c0_28] : memref<1x384xf32, #tpu.memory_space<vmem>>, vector<1x384xf32>
      %38 = vector.broadcast %37 : vector<1x384xf32> to vector<9x384xf32>
      %39 = arith.addf %36, %38 : vector<9x384xf32>
      %cst_29 = arith.constant 0.000000e+00 : f32
      %40 = vector.broadcast %cst_29 : f32 to vector<9x384xf32>
      %41 = arith.maximumf %39, %40 : vector<9x384xf32>
      %42 = arith.truncf %41 : vector<9x384xf32> to vector<9x384xbf16>
      %43 = vector.extract_strided_slice %42 {offsets = [0, 0], sizes = [7, 384], strides = [1, 1]} : vector<9x384xbf16> to vector<7x384xbf16>
      %44 = vector.extract_strided_slice %42 {offsets = [1, 0], sizes = [7, 384], strides = [1, 1]} : vector<9x384xbf16> to vector<7x384xbf16>
      %45 = vector.extract_strided_slice %42 {offsets = [2, 0], sizes = [7, 384], strides = [1, 1]} : vector<9x384xbf16> to vector<7x384xbf16>
      %46 = tpu.concatenate %43, %44, %45 in 1 : vector<7x384xbf16>, vector<7x384xbf16>, vector<7x384xbf16> -> vector<7x1152xbf16>
      %c0_30 = arith.constant 0 : index
      %c0_31 = arith.constant 0 : index
      %47 = vector.load %arg6[%c0_30, %c0_31] : memref<1152x512xbf16, #tpu.memory_space<vmem>>, vector<1152x512xbf16>
      %cst_32 = arith.constant dense<0.000000e+00> : vector<7x512xf32>
      %48 = tpu.matmul %46, %47, %cst_32 {dimension_numbers = #tpu.dot_dimension_numbers<[1], [0], [0], [1], [0, 0, 1, 1], [], []>} : vector<7x1152xbf16>, vector<1152x512xbf16>, vector<7x512xf32> -> vector<7x512xf32>
      %c0_33 = arith.constant 0 : index
      %c0_34 = arith.constant 0 : index
      %49 = vector.load %arg7[%c0_33, %c0_34] : memref<1x512xf32, #tpu.memory_space<vmem>>, vector<1x512xf32>
      %50 = vector.broadcast %49 : vector<1x512xf32> to vector<7x512xf32>
      %51 = arith.addf %48, %50 : vector<7x512xf32>
      %cst_35 = arith.constant 0.000000e+00 : f32
      %52 = vector.broadcast %cst_35 : f32 to vector<7x512xf32>
      %53 = arith.maximumf %51, %52 : vector<7x512xf32>
      %54 = vector.extract_strided_slice %53 {offsets = [0, 0], sizes = [1, 512], strides = [1, 1]} : vector<7x512xf32> to vector<1x512xf32>
      %55 = arith.index_cast %18 : i32 to index
      %c0_36 = arith.constant 0 : index
      %56 = vector.load %arg13[%55, %c0_36] : memref<8x3584xf32, #tpu.memory_space<vmem>>, vector<1x512xf32>
      tpu.vector_store %arg13[%55, %c0_36], %54 {strides = array<i32>} : memref<8x3584xf32, #tpu.memory_space<vmem>>, vector<1x512xf32>,
      %57 = vector.extract_strided_slice %53 {offsets = [1, 0], sizes = [1, 512], strides = [1, 1]} : vector<7x512xf32> to vector<1x512xf32>
      %58 = arith.index_cast %18 : i32 to index
      %c512 = arith.constant 512 : index
      %59 = vector.load %arg13[%58, %c512] : memref<8x3584xf32, #tpu.memory_space<vmem>>, vector<1x512xf32>
      tpu.vector_store %arg13[%58, %c512], %57 {strides = array<i32>} : memref<8x3584xf32, #tpu.memory_space<vmem>>, vector<1x512xf32>,
      %60 = vector.extract_strided_slice %53 {offsets = [2, 0], sizes = [1, 512], strides = [1, 1]} : vector<7x512xf32> to vector<1x512xf32>
      %61 = arith.index_cast %18 : i32 to index
      %c1024 = arith.constant 1024 : index
      %62 = vector.load %arg13[%61, %c1024] : memref<8x3584xf32, #tpu.memory_space<vmem>>, vector<1x512xf32>
      tpu.vector_store %arg13[%61, %c1024], %60 {strides = array<i32>} : memref<8x3584xf32, #tpu.memory_space<vmem>>, vector<1x512xf32>,
      %63 = vector.extract_strided_slice %53 {offsets = [3, 0], sizes = [1, 512], strides = [1, 1]} : vector<7x512xf32> to vector<1x512xf32>
      %64 = arith.index_cast %18 : i32 to index
      %c1536 = arith.constant 1536 : index
      %65 = vector.load %arg13[%64, %c1536] : memref<8x3584xf32, #tpu.memory_space<vmem>>, vector<1x512xf32>
      tpu.vector_store %arg13[%64, %c1536], %63 {strides = array<i32>} : memref<8x3584xf32, #tpu.memory_space<vmem>>, vector<1x512xf32>,
      %66 = vector.extract_strided_slice %53 {offsets = [4, 0], sizes = [1, 512], strides = [1, 1]} : vector<7x512xf32> to vector<1x512xf32>
      %67 = arith.index_cast %18 : i32 to index
      %c2048 = arith.constant 2048 : index
      %68 = vector.load %arg13[%67, %c2048] : memref<8x3584xf32, #tpu.memory_space<vmem>>, vector<1x512xf32>
      tpu.vector_store %arg13[%67, %c2048], %66 {strides = array<i32>} : memref<8x3584xf32, #tpu.memory_space<vmem>>, vector<1x512xf32>,
      %69 = vector.extract_strided_slice %53 {offsets = [5, 0], sizes = [1, 512], strides = [1, 1]} : vector<7x512xf32> to vector<1x512xf32>
      %70 = arith.index_cast %18 : i32 to index
      %c2560 = arith.constant 2560 : index
      %71 = vector.load %arg13[%70, %c2560] : memref<8x3584xf32, #tpu.memory_space<vmem>>, vector<1x512xf32>
      tpu.vector_store %arg13[%70, %c2560], %69 {strides = array<i32>} : memref<8x3584xf32, #tpu.memory_space<vmem>>, vector<1x512xf32>,
      %72 = vector.extract_strided_slice %53 {offsets = [6, 0], sizes = [1, 512], strides = [1, 1]} : vector<7x512xf32> to vector<1x512xf32>
      %73 = arith.index_cast %18 : i32 to index
      %c3072 = arith.constant 3072 : index
      %74 = vector.load %arg13[%73, %c3072] : memref<8x3584xf32, #tpu.memory_space<vmem>>, vector<1x512xf32>
      tpu.vector_store %arg13[%73, %c3072], %72 {strides = array<i32>} : memref<8x3584xf32, #tpu.memory_space<vmem>>, vector<1x512xf32>,
    }
    %c8_i32_0 = arith.constant 8 : i32
    %c0 = arith.constant 0 : index
    %c0_1 = arith.constant 0 : index
    %1 = vector.load %arg13[%c0, %c0_1] : memref<8x3584xf32, #tpu.memory_space<vmem>>, vector<8x3584xf32>
    %2 = arith.truncf %1 : vector<8x3584xf32> to vector<8x3584xbf16>
    %c0_2 = arith.constant 0 : index
    %c0_3 = arith.constant 0 : index
    %3 = vector.load %arg8[%c0_2, %c0_3] : memref<3584x512xbf16, #tpu.memory_space<vmem>>, vector<3584x512xbf16>
    %cst = arith.constant dense<0.000000e+00> : vector<8x512xf32>
    %4 = tpu.matmul %2, %3, %cst {dimension_numbers = #tpu.dot_dimension_numbers<[1], [0], [0], [1], [0, 0, 1, 1], [], []>} : vector<8x3584xbf16>, vector<3584x512xbf16>, vector<8x512xf32> -> vector<8x512xf32>
    %c0_4 = arith.constant 0 : index
    %c0_5 = arith.constant 0 : index
    %5 = vector.load %arg9[%c0_4, %c0_5] : memref<1x512xf32, #tpu.memory_space<vmem>>, vector<1x512xf32>
    %6 = vector.broadcast %5 : vector<1x512xf32> to vector<8x512xf32>
    %7 = arith.addf %4, %6 : vector<8x512xf32>
    %cst_6 = arith.constant 0.000000e+00 : f32
    %8 = vector.broadcast %cst_6 : f32 to vector<8x512xf32>
    %9 = arith.maximumf %7, %8 : vector<8x512xf32>
    %10 = arith.truncf %9 : vector<8x512xf32> to vector<8x512xbf16>
    %c0_7 = arith.constant 0 : index
    %c0_8 = arith.constant 0 : index
    %11 = vector.load %arg10[%c0_7, %c0_8] : memref<512x128xbf16, #tpu.memory_space<vmem>>, vector<512x128xbf16>
    %cst_9 = arith.constant dense<0.000000e+00> : vector<8x128xf32>
    %12 = tpu.matmul %10, %11, %cst_9 {dimension_numbers = #tpu.dot_dimension_numbers<[1], [0], [0], [1], [0, 0, 1, 1], [], []>} : vector<8x512xbf16>, vector<512x128xbf16>, vector<8x128xf32> -> vector<8x128xf32>
    %c0_10 = arith.constant 0 : index
    %c0_11 = arith.constant 0 : index
    %13 = vector.load %arg11[%c0_10, %c0_11] : memref<1x128xf32, #tpu.memory_space<vmem>>, vector<1x128xf32>
    %14 = vector.broadcast %13 : vector<1x128xf32> to vector<8x128xf32>
    %15 = arith.addf %12, %14 : vector<8x128xf32>
    %c0_12 = arith.constant 0 : index
    %c0_13 = arith.constant 0 : index
    %16 = vector.load %arg12[%c0_12, %c0_13] : memref<8x128xf32, #tpu.memory_space<vmem>>, vector<8x128xf32>
    tpu.vector_store %arg12[%c0_12, %c0_13], %15 {strides = array<i32>} : memref<8x128xf32, #tpu.memory_space<vmem>>, vector<8x128xf32>,
    return
  }
  func.func @transform_0(%arg0: i32) -> (i32, i32, i32) {
    %c0_i32 = arith.constant 0 : i32
    %c0_i32_0 = arith.constant 0 : i32
    %c0_i32_1 = arith.constant 0 : i32
    return %arg0, %c0_i32, %c0_i32_0 : i32, i32, i32
  }
  func.func @transform_1(%arg0: i32) -> (i32, i32) {
    %c0_i32 = arith.constant 0 : i32
    %c0_i32_0 = arith.constant 0 : i32
    %c0_i32_1 = arith.constant 0 : i32
    return %c0_i32, %c0_i32_0 : i32, i32
  }
  func.func @transform_2(%arg0: i32) -> (i32, i32) {
    %c0_i32 = arith.constant 0 : i32
    %c0_i32_0 = arith.constant 0 : i32
    %c0_i32_1 = arith.constant 0 : i32
    return %c0_i32, %c0_i32_0 : i32, i32
  }
  func.func @transform_3(%arg0: i32) -> (i32, i32) {
    %c0_i32 = arith.constant 0 : i32
    %c0_i32_0 = arith.constant 0 : i32
    %c0_i32_1 = arith.constant 0 : i32
    return %c0_i32, %c0_i32_0 : i32, i32
  }
  func.func @transform_4(%arg0: i32) -> (i32, i32) {
    %c0_i32 = arith.constant 0 : i32
    %c0_i32_0 = arith.constant 0 : i32
    %c0_i32_1 = arith.constant 0 : i32
    return %c0_i32, %c0_i32_0 : i32, i32
  }
  func.func @transform_5(%arg0: i32) -> (i32, i32) {
    %c0_i32 = arith.constant 0 : i32
    %c0_i32_0 = arith.constant 0 : i32
    %c0_i32_1 = arith.constant 0 : i32
    return %c0_i32, %c0_i32_0 : i32, i32
  }
  func.func @transform_6(%arg0: i32) -> (i32, i32) {
    %c0_i32 = arith.constant 0 : i32
    %c0_i32_0 = arith.constant 0 : i32
    %c0_i32_1 = arith.constant 0 : i32
    return %c0_i32, %c0_i32_0 : i32, i32
  }
  func.func @transform_7(%arg0: i32) -> (i32, i32) {
    %c0_i32 = arith.constant 0 : i32
    %c0_i32_0 = arith.constant 0 : i32
    %c0_i32_1 = arith.constant 0 : i32
    return %c0_i32, %c0_i32_0 : i32, i32
  }
  func.func @transform_8(%arg0: i32) -> (i32, i32) {
    %c0_i32 = arith.constant 0 : i32
    %c0_i32_0 = arith.constant 0 : i32
    %c0_i32_1 = arith.constant 0 : i32
    return %c0_i32, %c0_i32_0 : i32, i32
  }
  func.func @transform_9(%arg0: i32) -> (i32, i32) {
    %c0_i32 = arith.constant 0 : i32
    %c0_i32_0 = arith.constant 0 : i32
    %c0_i32_1 = arith.constant 0 : i32
    return %c0_i32, %c0_i32_0 : i32, i32
  }
  func.func @transform_10(%arg0: i32) -> (i32, i32) {
    %c0_i32 = arith.constant 0 : i32
    %c0_i32_0 = arith.constant 0 : i32
    %c0_i32_1 = arith.constant 0 : i32
    return %c0_i32, %c0_i32_0 : i32, i32
  }
  func.func @transform_11(%arg0: i32) -> (i32, i32) {
    %c0_i32 = arith.constant 0 : i32
    %c0_i32_0 = arith.constant 0 : i32
    return %arg0, %c0_i32 : i32, i32
  }
}

</mosaic_0001>

<bundles_post_ra>
// kernel: dqn_forward.1
= control target key start
LH: loop header
LB: loop body
LE: loop exit
PB: predicated region body
PF: predicated region fallthrough
CT: control target
= control target key end

     0   :  { %16 = vsyncpa [#allocation4], 0  ;;  %s22229_s0 = inlined_call_operand.vmem [shape: bf16[8,20,1280], index: 0, kind: input, shape index: {}]   ;;  %s22230_s1 = inlined_call_operand.hbm [shape: bf16[1280,384], index: 1, kind: input, shape index: {}]   ;;  %s22231_s2 = inlined_call_operand.vmem [shape: f32[1,384], index: 2, kind: input, shape index: {}]   ;;  %s22232_s3 = inlined_call_operand.hbm [shape: bf16[1536,384], index: 3, kind: input, shape index: {}]   ;;  %s22233_s4 = inlined_call_operand.vmem [shape: f32[1,384], index: 4, kind: input, shape index: {}]   ;;  %s22234_s5 = inlined_call_operand.hbm [shape: bf16[1152,512], index: 5, kind: input, shape index: {}]   ;;  %s22235_s6 = inlined_call_operand.vmem [shape: f32[1,512], index: 6, kind: input, shape index: {}]   ;;  %s22236_s7 = inlined_call_operand.vmem [shape: bf16[3584,512], index: 7, kind: input, shape index: {}]   ;;  %s22237_s8 = inlined_call_operand.vmem [shape: f32[1,512], index: 8, kind: input, shape index: {}]   ;;  %s22238_s9 = inlined_call_operand.hbm [shape: bf16[512,128], index: 9, kind: input, shape index: {}]   ;;  %s22239_s10 = inlined_call_operand.vmem [shape: f32[1,128], index: 10, kind: input, shape index: {}]   ;;  %s22240_s11 = inlined_call_operand.vmem [shape: f32[8,128], index: 11, kind: output, shape index: {}]  }
   0x1   :  { %17 = vsyncpa [#allocation6], 0 }
   0x2   :  { %18 = vsyncpa [#allocation9], 0  ;;  %s19152_s17 = smov [#allocation5]   ;;  %s19153_s19 = smov [#allocation3]  }
   0x3   :  { %s40_s18 = sshll.u32 %s19152_s17, 4  ;;  %s26_s20 = sshll.u32 %s19153_s19, 4  ;;  %s41_s18 = int_to_ptr.vmem [resolvable:$true] %s40_s18  ;;  %s19224_s20 = int_to_ptr.vmem [resolvable:$true] %s26_s20 }
   0x4   :  { %s19050_s23 = scalar_lea.hbm %s22232_s3, 36864 }
   0x5   :  { %p19051_p0 = scmp.ne.s32.totalorder %s22232_s3, %s19050_s23  ;;  %p19054_p1 = scmp.lt.u32.totalorder %s19050_s23, %s22232_s3 }
   0x7   :  { %p19056_p2 = pnand %p19054_p1, %p19051_p0 }
   0x9   :  { %19059 = shalt.err (!%p19056_p2)
}
   0xa   :  { %s19060_s28 = scalar_lea.vmem %s41_s18, 36864  ;;  %p19065_p4 = scmp.lt.s32.totalorder %s41_s18, %s41_s18 }
   0xb   :  { %p19061_p3 = scmp.ne.s32.totalorder %s41_s18, %s19060_s28  ;;  %p19066_p5 = scmp.lt.s32.totalorder %s19060_s28, %s19060_s28 }
   0xd   :  { %p19067_p6 = por %p19066_p5, %p19065_p4 }
   0xf   :  { %p19068_p7 = pnand %p19067_p6, %p19061_p3 }
  0x11   :  { %19071 = shalt.err (!%p19068_p7)
}
  0x12   :  { %s19154_s29 = smov 192   ;;  %s19155_s30 = smov 12  }
  0x13   :  { %46 = dma.hbm_to_vmem [thread:$0]  %s22232_s3, 36864, %s41_s18, [#allocation6], %s19154_s29, %s19154_s29, %s19155_s30  }
  0x14   :  { %s19072_s16 = scalar_lea.hbm %s22230_s1, 30720 }
  0x15   :  { %p19073_p8 = scmp.ne.s32.totalorder %s22230_s1, %s19072_s16  ;;  %p19076_p9 = scmp.lt.u32.totalorder %s19072_s16, %s22230_s1 }
  0x17   :  { %p19078_p10 = pnand %p19076_p9, %p19073_p8 }
  0x19   :  { %19081 = shalt.err (!%p19078_p10)
}
  0x1a   :  { %s19082_s23 = scalar_lea.vmem %s19224_s20, 30720  ;;  %p19087_p12 = scmp.lt.s32.totalorder %s19224_s20, %s19224_s20 }
  0x1b   :  { %p19083_p11 = scmp.ne.s32.totalorder %s19224_s20, %s19082_s23  ;;  %p19088_p13 = scmp.lt.s32.totalorder %s19082_s23, %s19082_s23 }
  0x1d   :  { %p19089_p0 = por %p19088_p13, %p19087_p12 }
  0x1f   :  { %p19090_p1 = pnand %p19089_p0, %p19083_p11 }
  0x21   :  { %19093 = shalt.err (!%p19090_p1)
}
  0x22   :  { %32 = dma.hbm_to_vmem [thread:$0]  %s22230_s1, 30720, %s19224_s20, [#allocation4], %s19154_s29, %s19154_s29, %s19155_s30  }
  0x23   :  { %s19156_s24 = smov [#allocation7]   ;;  %s19094_s28 = scalar_lea.hbm %s22234_s5, 36864 }
  0x24   :  { %s54_s25 = sshll.u32 %s19156_s24, 4  ;;  %p19095_p2 = scmp.ne.s32.totalorder %s22234_s5, %s19094_s28  ;;  %s55_s25 = int_to_ptr.vmem [resolvable:$true] %s54_s25 }
  0x25   :  { %p19098_p3 = scmp.lt.u32.totalorder %s19094_s28, %s22234_s5 }
  0x27   :  { %p19100_p4 = pnand %p19098_p3, %p19095_p2 }
  0x29   :  { %19103 = shalt.err (!%p19100_p4)
}
  0x2a   :  { %s19104_s16 = scalar_lea.vmem %s55_s25, 36864  ;;  %p19109_p6 = scmp.lt.s32.totalorder %s55_s25, %s55_s25 }
  0x2b   :  { %p19105_p5 = scmp.ne.s32.totalorder %s55_s25, %s19104_s16  ;;  %p19110_p7 = scmp.lt.s32.totalorder %s19104_s16, %s19104_s16 }
  0x2d   :  { %p19111_p8 = por %p19110_p7, %p19109_p6 }
  0x2f   :  { %p19112_p9 = pnand %p19111_p8, %p19105_p5 }
  0x31   :  { %19115 = shalt.err (!%p19112_p9)
}
  0x32   :  { %s19157_s1 = smov 256   ;;  %s19158_s20 = smov 16  }
  0x33   :  { %60 = dma.hbm_to_vmem [thread:$0]  %s22234_s5, 36864, %s55_s25, [#allocation6], %s19157_s1, %s19157_s1, %s19158_s20  }
  0x34   :  { %s19159_s17 = smov [#allocation8]   ;;  %s19116_s23 = scalar_lea.hbm %s22238_s9, 4096 }
  0x35   :  { %s72_s19 = sshll.u32 %s19159_s17, 4  ;;  %p19117_p10 = scmp.ne.s32.totalorder %s22238_s9, %s19116_s23  ;;  %s73_s19 = int_to_ptr.vmem [resolvable:$true] %s72_s19 }
  0x36   :  { %p19120_p11 = scmp.lt.u32.totalorder %s19116_s23, %s22238_s9 }
  0x38   :  { %p19122_p12 = pnand %p19120_p11, %p19117_p10 }
  0x3a   :  { %19125 = shalt.err (!%p19122_p12)
}
  0x3b   :  { %s19126_s27 = scalar_lea.vmem %s73_s19, 4096  ;;  %p19131_p0 = scmp.lt.s32.totalorder %s73_s19, %s73_s19 }
  0x3c   :  { %p19127_p13 = scmp.ne.s32.totalorder %s73_s19, %s19126_s27  ;;  %p19132_p1 = scmp.lt.s32.totalorder %s19126_s27, %s19126_s27 }
  0x3e   :  { %p19133_p2 = por %p19132_p1, %p19131_p0 }
  0x40   :  { %p19134_p3 = pnand %p19133_p2, %p19127_p13 }
  0x42   :  { %19137 = shalt.err (!%p19134_p3)
}
  0x43   :  { %s19160_s5 = smov 64   ;;  %s19161_s25 = smov 4  }
  0x44   :  { %78 = dma.hbm_to_vmem [thread:$0]  %s22238_s9, 4096, %s73_s19, [#allocation9], %s19160_s5, %s19160_s5, %s19161_s25  }
  0x45   :  { %19142 = dma.done.wait [#allocation4], 30720  }
  0x46   :  { %19143 = vsyncadd [#allocation4], 4294936576 }
  0x47   :  { %19144 = dma.done.wait [#allocation6], 73728  }
  0x48   :  { %19145 = vsyncadd [#allocation6], 4294893568 }
  0x49   :  { %19146 = dma.done.wait [#allocation9], 4096  }
  0x4a   :  { %19147 = vsyncadd [#allocation9], 4294963200  ;;  %s19279_s13 = smov 0  }
  0x4b LB: > { %v16511_v0 = vld [vmem:[#allocation3 + $0x4] ss:$12 sps:$4 sm:$0xff]   ;;  %v16513_v1 = vld [vmem:[#allocation3] ss:$12 sps:$4 sm:$0xff]   ;;  %v16514_v2 = vld [vmem:[#allocation3 + $0x1c] ss:$12 sps:$4 sm:$0xff]   ;;  %s19150_s13 = sphi %s19279_s13, %s99_s13  }
  0x4c   : > { %1820 = vmatprep.subr.bf16.mxu0 %v16511_v0  ;;  %v16516_v3 = vld [vmem:[#allocation3 + $0x18] ss:$12 sps:$4 sm:$0xff]   ;;  %v16517_v4 = vld [vmem:[#allocation3 + $0x34] ss:$12 sps:$4 sm:$0xff]   ;;  %v16519_v5 = vld [vmem:[#allocation3 + $0x30] ss:$12 sps:$4 sm:$0xff]  }
  0x4d   : > { %1821 = vmatpush1.bf16.msra.mxu0 %v16513_v1  ;;  %v16520_v6 = vld [vmem:[#allocation3 + $0x4c] ss:$12 sps:$4 sm:$0xff]   ;;  %v16522_v7 = vld [vmem:[#allocation3 + $0x48] ss:$12 sps:$4 sm:$0xff]   ;;  %v16523_v8 = vld [vmem:[#allocation3 + $0x64] ss:$12 sps:$4 sm:$0xff]  }
  0x4e   : > { %1822 = vmatprep.subr.bf16.mxu0 %v16514_v2  ;;  %v16525_v9 = vld [vmem:[#allocation3 + $0x60] ss:$12 sps:$4 sm:$0xff]   ;;  %s15968_s9 = smul.u32 120, %s19150_s13  ;;  %v16526_v10 = vld [vmem:[#allocation3 + $0x7c] ss:$12 sps:$4 sm:$0xff]   ;;  %vm2336_vm0 = vcmask 1042432  }
  0x4f   : > { %v16528_v11 = vld [vmem:[#allocation3 + $0x78] ss:$12 sps:$4 sm:$0xff]   ;;  %v16529_v12 = vld [vmem:[#allocation3 + $0x94] ss:$12 sps:$4 sm:$0xff]   ;;  %v16531_v14 = vld [vmem:[#allocation3 + $0x90] ss:$12 sps:$4 sm:$0xff]  }
  0x50   : > { %s19288_s16 = scalar_lea.vmem %s22229_s0, %s15968_s9  ;;  %v16532_v15 = vld [vmem:[#allocation3 + $0xac] ss:$12 sps:$4 sm:$0xff]   ;;  %v16534_v16 = vld [vmem:[#allocation3 + $0xa8] ss:$12 sps:$4 sm:$0xff]   ;;  %v16535_v17 = vld [vmem:[#allocation3 + $0xc4] ss:$12 sps:$4 sm:$0xff]  }
  0x51   : > { %1823 = vmatpush1.bf16.msra.mxu0 %v16516_v3  ;;  %v16561_v13 = vld [vmem:[%s19288_s16 + $0x4] ss:$40 sps:$4 sm:$0xff]   ;;  %v16538_v19 = vld [vmem:[#allocation3 + $0xdc] ss:$12 sps:$4 sm:$0xff]   ;;  %v16541_v22 = vld [vmem:[#allocation3 + $0xf4] ss:$12 sps:$4 sm:$0xff]  }
  0x52   : > { %1824 = vmatprep.subr.bf16.mxu0 %v16517_v4  ;;  %1852 = vmatprep.mubr.bf16.mxu0 %v16561_v13  ;;  %v16537_v18 = vld [vmem:[#allocation3 + $0xc0] ss:$12 sps:$4 sm:$0xff]   ;;  %v16586_v20 = vld [vmem:[#allocation3 + $0xc8] ss:$12 sps:$4 sm:$0xff]   ;;  %v16540_v21 = vld [vmem:[#allocation3 + $0xd8] ss:$12 sps:$4 sm:$0xff]  }
  0x53   : > { %2107 = vmatprep.mubr.bf16.mxu1 %v16561_v13  ;;  %15969 = vmatprep.subr.bf16.mxu1 %v16586_v20  ;;  %v16590_v23 = vld [vmem:[#allocation3 + $0x8] ss:$12 sps:$4 sm:$0xff]   ;;  %v16591_v24 = vld [vmem:[#allocation3 + $0xe0] ss:$12 sps:$4 sm:$0xff]   ;;  %v16543_v25 = vld [vmem:[#allocation3 + $0xf0] ss:$12 sps:$4 sm:$0xff]  }
  0x54   : > { %v16544_v26 = vld [vmem:[#allocation3 + $0x10c] ss:$12 sps:$4 sm:$0xff]   ;;  %15970 = vmatpush3.bf16.msra.mxu1 %v16590_v23  ;;  %v16546_v29 = vld [vmem:[#allocation3 + $0x108] ss:$12 sps:$4 sm:$0xff]   ;;  %v16547_v30 = vld [vmem:[#allocation3 + $0x124] ss:$12 sps:$4 sm:$0xff]  }
  0x55   : > { %1825 = vmatpush1.bf16.msra.mxu0 %v16519_v5  ;;  %15971 = vmatprep.subr.bf16.mxu1 %v16591_v24  ;;  %v16595_v27 = vld [vmem:[#allocation3 + $0x20] ss:$12 sps:$4 sm:$0xff]   ;;  %v16596_v28 = vld [vmem:[#allocation3 + $0xf8] ss:$12 sps:$4 sm:$0xff]   ;;  %v16601_v32 = vld [vmem:[#allocation3 + $0x110] ss:$12 sps:$4 sm:$0xff]  }
  0x56   : > { %1826 = vmatprep.subr.bf16.mxu0 %v16520_v6  ;;  %v16600_v31 = vld [vmem:[#allocation3 + $0x38] ss:$12 sps:$4 sm:$0xff]   ;;  %v16549_v33 = vld [vmem:[#allocation3 + $0x120] ss:$12 sps:$4 sm:$0xff]   ;;  %v16605_v34 = vld [vmem:[#allocation3 + $0x50] ss:$12 sps:$4 sm:$0xff]  }
  0x57   : > { %v16606_v35 = vld [vmem:[#allocation3 + $0x128] ss:$12 sps:$4 sm:$0xff]   ;;  %v16552_v37 = vld [vmem:[#allocation3 + $0x138] ss:$12 sps:$4 sm:$0xff]   ;;  %v16611_v39 = vld [vmem:[#allocation3 + $0x140] ss:$12 sps:$4 sm:$0xff]  }
  0x58   : > { %15972 = vmatpush3.bf16.msra.mxu1 %v16595_v27  ;;  %v16550_v36 = vld [vmem:[#allocation3 + $0x13c] ss:$12 sps:$4 sm:$0xff]   ;;  %v16553_v40 = vld [vmem:[#allocation3 + $0x154] ss:$12 sps:$4 sm:$0xff]   ;;  %v16616_v43 = vld [vmem:[#allocation3 + $0x158] ss:$12 sps:$4 sm:$0xff]  }
  0x59   : > { %1827 = vmatpush1.bf16.msra.mxu0 %v16522_v7  ;;  %15973 = vmatprep.subr.bf16.mxu1 %v16596_v28  ;;  %v16610_v38 = vld [vmem:[#allocation3 + $0x68] ss:$12 sps:$4 sm:$0xff]   ;;  %v16615_v41 = vld [vmem:[#allocation3 + $0x80] ss:$12 sps:$4 sm:$0xff]   ;;  %v16555_v42 = vld [vmem:[#allocation3 + $0x150] ss:$12 sps:$4 sm:$0xff]  }
  0x5a   : > { %1828 = vmatprep.subr.bf16.mxu0 %v16523_v8  ;;  %v16556_v44 = vld [vmem:[#allocation3 + $0x16c] ss:$12 sps:$4 sm:$0xff]   ;;  %v16558_v45 = vld [vmem:[#allocation3 + $0x168] ss:$12 sps:$4 sm:$0xff]   ;;  %v16564_v46 = vld [vmem:[#allocation3 + $0x184] ss:$12 sps:$4 sm:$0xff]  }
  0x5b   : > { %v16621_v47 = vld [vmem:[#allocation3 + $0x98] ss:$12 sps:$4 sm:$0xff]   ;;  %v16623_v48 = vld [vmem:[#allocation3 + $0x170] ss:$12 sps:$4 sm:$0xff]   ;;  %v16559_v50 = vld [vmem:[%s19288_s16] ss:$40 sps:$4 sm:$0xff]  }
  0x5c   : > { %15974 = vmatpush3.bf16.msra.mxu1 %v16600_v31  ;;  %v113_v49 = vld [vmem:[%s19288_s16 + $0x50] sm:$0x33]  ;;  %v16562_v52 = vld [vmem:[#allocation3 + $0x180] ss:$12 sps:$4 sm:$0xff]   ;;  %v16567_v53 = vld [vmem:[#allocation3 + $0x19c] ss:$12 sps:$4 sm:$0xff]  }
  0x5d   : > { %1829 = vmatpush1.bf16.msra.mxu0 %v16525_v9  ;;  %15975 = vmatprep.subr.bf16.mxu1 %v16601_v32  ;;  %v16627_v51 = vld [vmem:[#allocation3 + $0xb0] ss:$12 sps:$4 sm:$0xff]   ;;  %v14201_v54 = vcombine.high %v113_v49, %v113_v49  ;;  %v16628_v55 = vld [vmem:[#allocation3 + $0x248] ss:$12 sps:$4 sm:$0xff]   ;;  %v16565_v56 = vld [vmem:[#allocation3 + $0x198] ss:$12 sps:$4 sm:$0xff]   ;;  %v14200_v62 = vcombine.low %v113_v49, %v113_v49 }
  0x5e   : > { %1830 = vmatprep.subr.bf16.mxu0 %v16526_v10  ;;  %v16635_v57 = vld [vmem:[#allocation3 + $0x188] ss:$12 sps:$4 sm:$0xff]   ;;  %v16636_v58 = vld [vmem:[#allocation3 + $0x260] ss:$12 sps:$4 sm:$0xff]   ;;  %v16568_v60 = vld [vmem:[#allocation3 + $0x1b0] ss:$12 sps:$4 sm:$0xff]  }
  0x5f   : > { %v16570_v59 = vld [vmem:[#allocation3 + $0x1b4] ss:$12 sps:$4 sm:$0xff]   ;;  %v16573_v61 = vld [vmem:[#allocation3 + $0x1cc] ss:$12 sps:$4 sm:$0xff]   ;;  %v16646_v4 = vld [vmem:[#allocation3 + $0x290] ss:$12 sps:$4 sm:$0xff]  }
  0x60   : > { %15976 = vmatpush3.bf16.msra.mxu1 %v16605_v34  ;;  %v16640_v63 = vld [vmem:[#allocation3 + $0x1a0] ss:$12 sps:$4 sm:$0xff]   ;;  %v16641_v1 = vld [vmem:[#allocation3 + $0x278] ss:$12 sps:$4 sm:$0xff]   ;;  %v16571_v2 = vld [vmem:[#allocation3 + $0x1c8] ss:$12 sps:$4 sm:$0xff]  }
  0x61   : > { %1831 = vmatpush1.bf16.msra.mxu0 %v16528_v11  ;;  %15977 = vmatprep.subr.bf16.mxu1 %v16606_v35  ;;  %v16631_v0 = vld [vmem:[%s19288_s16 + $0xc] ss:$40 sps:$4 sm:$0xff]   ;;  %v16645_v3 = vld [vmem:[#allocation3 + $0x1b8] ss:$12 sps:$4 sm:$0xff]   ;;  %v16650_v7 = vld [vmem:[#allocation3 + $0x1d0] ss:$12 sps:$4 sm:$0xff]  }
  0x62   : > { %1832 = vmatprep.subr.bf16.mxu0 %v16529_v12  ;;  %v16576_v5 = vld [vmem:[#allocation3 + $0x1e4] ss:$12 sps:$4 sm:$0xff]   ;;  %v16574_v6 = vld [vmem:[#allocation3 + $0x1e0] ss:$12 sps:$4 sm:$0xff]   ;;  %v16651_v8 = vld [vmem:[#allocation3 + $0x2a8] ss:$12 sps:$4 sm:$0xff]  }
  0x63   : > { %v16579_v9 = vld [vmem:[#allocation3 + $0x1fc] ss:$12 sps:$4 sm:$0xff]   ;;  %v16577_v11 = vld [vmem:[#allocation3 + $0x1f8] ss:$12 sps:$4 sm:$0xff]   ;;  %v16656_v12 = vld [vmem:[#allocation3 + $0x2c0] ss:$12 sps:$4 sm:$0xff]  }
  0x64   : > { %15978 = vmatpush3.bf16.msra.mxu1 %v16610_v38  ;;  %v16655_v10 = vld [vmem:[#allocation3 + $0x1e8] ss:$12 sps:$4 sm:$0xff]   ;;  %v16666_v20 = vld [vmem:[#allocation3 + $0x2f0] ss:$12 sps:$4 sm:$0xff]   ;;  %v16680_v31 = vld [vmem:[#allocation3 + $0x320] ss:$12 sps:$4 sm:$0xff]  }
  0x65   : > { %1833 = vmatpush1.bf16.msra.mxu0 %v16531_v14  ;;  %15979 = vmatprep.subr.bf16.mxu1 %v16611_v39  ;;  %v16582_v13 = vld [vmem:[#allocation3 + $0x214] ss:$12 sps:$4 sm:$0xff]   ;;  %v16580_v14 = vld [vmem:[#allocation3 + $0x210] ss:$12 sps:$4 sm:$0xff]   ;;  %v16604_v34 = vld [vmem:[#allocation3 + $0x28c] ss:$12 sps:$4 sm:$0xff]  }
  0x66   : > { %1834 = vmatprep.subr.bf16.mxu0 %v16532_v15  ;;  %v16660_v15 = vld [vmem:[#allocation3 + $0x200] ss:$12 sps:$4 sm:$0xff]   ;;  %v16670_v23 = vld [vmem:[#allocation3 + $0x230] ss:$12 sps:$4 sm:$0xff]   ;;  %v16671_v24 = vld [vmem:[#allocation3 + $0x3c8] ss:$12 sps:$4 sm:$0xff]  }
  0x67   : > { %v19295_v27 = vld [vmem:[%s19288_s16 + $0x8] ss:$40 sps:$4 sm:$0xff]   ;;  %v114_v39 = vld [vmem:[%s19288_s16 + $0x58] sm:$0x33]  ;;  %v16620_v49 = vld [vmem:[#allocation3 + $0x2d4] ss:$12 sps:$4 sm:$0xff]  }
  0x68   : > { %15980 = vmatpush3.bf16.msra.mxu1 %v16615_v41  ;;  %v16675_v28 = vld [vmem:[#allocation3 + $0x308] ss:$12 sps:$4 sm:$0xff]   ;;  %v16597_v32 = vld [vmem:[#allocation3 + $0x270] ss:$12 sps:$4 sm:$0xff]   ;;  %v19299_v41 = vcombine.low %v114_v39, %v114_v39  ;;  %vm2373_vm1 = vsmask.f32 2304 }
  0x69   : > { %1835 = vmatpush1.bf16.msra.mxu0 %v16534_v16  ;;  %15981 = vmatprep.subr.bf16.mxu1 %v16616_v43  ;;  %v16661_v16 = vld [vmem:[#allocation3 + $0x2d8] ss:$12 sps:$4 sm:$0xff]   ;;  %v16602_v35 = vld [vmem:[#allocation3 + $0x288] ss:$12 sps:$4 sm:$0xff]   ;;  %v16690_v43 = vld [vmem:[#allocation3 + $0x350] ss:$12 sps:$4 sm:$0xff]  }
  0x6a   : > { %1836 = vmatprep.subr.bf16.mxu0 %v16535_v17  ;;  %v16585_v17 = vld [vmem:[#allocation3 + $0x22c] ss:$12 sps:$4 sm:$0xff]   ;;  %v16609_v38 = vld [vmem:[#allocation3 + $0x2a4] ss:$12 sps:$4 sm:$0xff]   ;;  %s7093_s23 = sshra.s32 %s19150_s13, 3  ;;  %s7096_s18 = sand.u32 7, %s19150_s13 }
  0x6b   : > { %s15026_s3 = smul.u32 224, %s7093_s23  ;;  %s99_s13 = sadd.s32 1, %s19150_s13  }
  0x6c   : > { %15982 = vmatpush3.bf16.msra.mxu1 %v16621_v47  ;;  %v16695_v47 = vld [vmem:[#allocation3 + $0x368] ss:$12 sps:$4 sm:$0xff]   ;;  %p96_p4 = scmp.ge.s32.totalorder %s99_s13, 8  }
  0x6d   : > { %1837 = vmatpush1.bf16.msra.mxu0 %v16537_v18  ;;  %15983 = vmatprep.subr.bf16.mxu1 %v16623_v48  ;;  %v16583_v18 = vld [vmem:[#allocation3 + $0x228] ss:$12 sps:$4 sm:$0xff]   ;;  %v16696_v48 = vld [vmem:[#allocation3 + $0x440] ss:$12 sps:$4 sm:$0xff]   ;;  %s7099_s24 = sadd.s32 %s15026_s3, %s7096_s18 }
  0x6e   : > { %1838 = vmatprep.subr.bf16.mxu0 %v16538_v19  ;;  %v16665_v19 = vld [vmem:[#allocation3 + $0x218] ss:$12 sps:$4 sm:$0xff]   ;;  %s7100_s26 = scalar_lea.vmem [#allocation2], %s7099_s24 }
  0x70   : > { %15984 = vmatpush3.bf16.msra.mxu1 %v16627_v51  ;;  %v16618_v51 = vld [vmem:[#allocation3 + $0x2d0] ss:$12 sps:$4 sm:$0xff]  }
  0x71   : > { %1839 = vmatpush1.bf16.msra.mxu0 %v16540_v21  ;;  %15997 = vmatprep.subr.bf16.mxu1 %v16628_v55  ;;  %v16589_v21 = vld [vmem:[#allocation3 + $0x244] ss:$12 sps:$4 sm:$0xff]   ;;  %v16624_v55 = vld [vmem:[#allocation3 + $0x2e8] ss:$12 sps:$4 sm:$0xff]  }
  0x72   : > { %1840 = vmatprep.subr.bf16.mxu0 %v16541_v22  ;;  %v16587_v22 = vld [vmem:[#allocation3 + $0x240] ss:$12 sps:$4 sm:$0xff]  }
  0x73   : > { %2108 = vmatmul.mubr.bf16.vlgmr.msra.gmra.mrb[0].mxu1 %v16559_v50 }
  0x74   : > { %15998 = vmatpush3.bf16.msra.mxu1 %v16635_v57  ;;  %2115 = vmatprep.mubr.bf16.mxu1 %v14201_v54  ;;  %v16708_v57 = vld [vmem:[#allocation3 + $0x470] ss:$12 sps:$4 sm:$0xff]  }
  0x75   : > { %1841 = vmatpush1.bf16.msra.mxu0 %v16543_v25  ;;  %15999 = vmatprep.subr.bf16.mxu1 %v16636_v58  ;;  %v16594_v25 = vld [vmem:[#allocation3 + $0x25c] ss:$12 sps:$4 sm:$0xff]   ;;  %v16634_v58 = vld [vmem:[#allocation3 + $0x304] ss:$12 sps:$4 sm:$0xff]  }
  0x76   : > { %1842 = vmatprep.subr.bf16.mxu0 %v16544_v26  ;;  %v16592_v26 = vld [vmem:[#allocation3 + $0x258] ss:$12 sps:$4 sm:$0xff]  }
  0x78   : > { %16000 = vmatpush3.bf16.msra.mxu1 %v16640_v63  ;;  %v16637_v63 = vld [vmem:[#allocation3 + $0x318] ss:$12 sps:$4 sm:$0xff]  }
  0x79   : > { %1843 = vmatpush1.bf16.msra.mxu0 %v16546_v29  ;;  %16001 = vmatprep.subr.bf16.mxu1 %v16641_v1  ;;  %v16676_v29 = vld [vmem:[#allocation3 + $0x3e0] ss:$12 sps:$4 sm:$0xff]   ;;  %v16720_v1 = vld [vmem:[#allocation3 + $0x488] ss:$12 sps:$4 sm:$0xff]  }
  0x7a   : > { %1844 = vmatprep.subr.bf16.mxu0 %v16547_v30  ;;  %v16599_v30 = vld [vmem:[#allocation3 + $0x274] ss:$12 sps:$4 sm:$0xff]  }
  0x7b   : > { %2116 = vmatmul.mubr.bf16.gmra.mrb[4].mxu1 %v14200_v62 }
  0x7c   : > { %16002 = vmatpush3.bf16.msra.mxu1 %v16645_v3  ;;  %2155 = vmatprep.mubr.bf16.mxu1 %v16631_v0  ;;  %v16644_v3 = vld [vmem:[#allocation3 + $0x334] ss:$12 sps:$4 sm:$0xff]  }
  0x7d   : > { %1845 = vmatpush1.bf16.msra.mxu0 %v16549_v33  ;;  %16003 = vmatprep.subr.bf16.mxu1 %v16646_v4  ;;  %v16681_v33 = vld [vmem:[#allocation3 + $0x3f8] ss:$12 sps:$4 sm:$0xff]   ;;  %v16725_v4 = vld [vmem:[#allocation3 + $0x4a0] ss:$12 sps:$4 sm:$0xff]  }
  0x7e   : > { %1846 = vmatprep.subr.bf16.mxu0 %v16550_v36  ;;  %v16685_v36 = vld [vmem:[#allocation3 + $0x338] ss:$12 sps:$4 sm:$0xff]  }
  0x80   : > { %16004 = vmatpush3.bf16.msra.mxu1 %v16650_v7  ;;  %v16726_v7 = vld [vmem:[#allocation3 + $0x578] ss:$12 sps:$4 sm:$0xff]  }
  0x81   : > { %1847 = vmatpush1.bf16.msra.mxu0 %v16552_v37  ;;  %16005 = vmatprep.subr.bf16.mxu1 %v16651_v8  ;;  %v16686_v37 = vld [vmem:[#allocation3 + $0x410] ss:$12 sps:$4 sm:$0xff]   ;;  %v115_v8 = vld [vmem:[%s19288_s16 + $0x60] sm:$0x33] }
  0x82   : > { %1848 = vmatprep.subr.bf16.mxu0 %v16553_v40  ;;  %v14203_v40 = vcombine.high %v114_v39, %v114_v39  ;;  %v16766_v39 = vld [vmem:[#allocation3 + $0x6e0] ss:$12 sps:$4 sm:$0xff]  }
  0x84   : > { %16006 = vmatpush3.bf16.msra.mxu1 %v16655_v10  ;;  %v19309_v10 = vcombine.high %v115_v8, %v115_v8 }
  0x85   : > { %1849 = vmatpush1.bf16.msra.mxu0 %v16555_v42  ;;  %16007 = vmatprep.subr.bf16.mxu1 %v16656_v12  ;;  %v16607_v42 = vld [vmem:[#allocation3 + $0x2a0] ss:$12 sps:$4 sm:$0xff]   ;;  %v16731_v12 = vld [vmem:[#allocation3 + $0x590] ss:$12 sps:$4 sm:$0xff]  }
  0x86   : > { %1850 = vmatprep.subr.bf16.mxu0 %v16556_v44  ;;  %v16691_v44 = vld [vmem:[#allocation3 + $0x428] ss:$12 sps:$4 sm:$0xff]  }
  0x88   : > { %16008 = vmatpush3.bf16.msra.mxu1 %v16660_v15  ;;  %v16652_v15 = vld [vmem:[#allocation3 + $0x360] ss:$12 sps:$4 sm:$0xff]  }
  0x89   : > { %1851 = vmatpush1.bf16.msra.mxu0 %v16558_v45  ;;  %16009 = vmatprep.subr.bf16.mxu1 %v16661_v16  ;;  %v16614_v45 = vld [vmem:[#allocation3 + $0x2bc] ss:$12 sps:$4 sm:$0xff]  }
  0x8a   : > { %1871 = vmatprep.subr.bf16.mxu0 %v16564_v46  ;;  %v16612_v46 = vld [vmem:[#allocation3 + $0x2b8] ss:$12 sps:$4 sm:$0xff]   ;;  %v16735_v16 = vld [vmem:[#allocation3 + $0x4d0] ss:$12 sps:$4 sm:$0xff]  }
  0x8c   : > { %1853 = vmatmul.mubr.bf16.vlgmr.msra.gmra.mrb[0].mxu0 %v16559_v50  ;;  %16010 = vmatpush3.bf16.msra.mxu1 %v16665_v19  ;;  %v16715_v50 = vld [vmem:[%s19288_s16 + $0x14] ss:$40 sps:$4 sm:$0xff]  }
  0x8d   : > { %1872 = vmatpush1.bf16.msra.mxu0 %v16562_v52  ;;  %1862 = vmatprep.mubr.bf16.mxu0 %v14201_v54  ;;  %v16700_v52 = vld [vmem:[#allocation3 + $0x380] ss:$12 sps:$4 sm:$0xff]   ;;  %v19317_v19 = vld [vmem:[%s19288_s16 + $0x1c] ss:$40 sps:$4 sm:$0xff]  }
  0x8e   : > { %1873 = vmatprep.subr.bf16.mxu0 %v16567_v53  ;;  %16011 = vmatprep.subr.bf16.mxu1 %v16666_v20  ;;  %v16702_v53 = vld [vmem:[#allocation3 + $0x458] ss:$12 sps:$4 sm:$0xff]  }
  0x8f   : > { %v16626_v54 = vld [vmem:[#allocation3 + $0x2ec] ss:$12 sps:$4 sm:$0xff]  }
  0x90   : > { %16012 = vmatpush3.bf16.msra.mxu1 %v16670_v23  ;;  %v16657_v20 = vld [vmem:[#allocation3 + $0x378] ss:$12 sps:$4 sm:$0xff]   ;;  %v16664_v23 = vld [vmem:[#allocation3 + $0x394] ss:$12 sps:$4 sm:$0xff]  }
  0x91   : > { %1874 = vmatpush1.bf16.msra.mxu0 %v16565_v56  ;;  %16025 = vmatprep.subr.bf16.mxu1 %v16671_v24  ;;  %v16707_v56 = vld [vmem:[#allocation3 + $0x398] ss:$12 sps:$4 sm:$0xff]   ;;  %v16662_v24 = vld [vmem:[#allocation3 + $0x390] ss:$12 sps:$4 sm:$0xff]  }
  0x92   : > { %1875 = vmatprep.subr.bf16.mxu0 %v16570_v59  ;;  %v16712_v59 = vld [vmem:[#allocation3 + $0x3b0] ss:$12 sps:$4 sm:$0xff]  }
  0x93   : > { %2156 = vmatmul.mubr.bf16.vlgmr.msra.gmra.mrb[8].mxu1 %v19295_v27 }
  0x94   : > { %1863 = vmatmul.mubr.bf16.gmra.mrb[4].mxu0 %v14200_v62  ;;  %16026 = vmatpush3.bf16.msra.mxu1 %v16675_v28  ;;  %v16716_v62 = vld [vmem:[#allocation3 + $0x548] ss:$12 sps:$4 sm:$0xff]  }
  0x95   : > { %1876 = vmatpush1.bf16.msra.mxu0 %v16568_v60  ;;  %1903 = vmatprep.mubr.bf16.mxu0 %v16631_v0  ;;  %v16632_v60 = vld [vmem:[#allocation3 + $0x300] ss:$12 sps:$4 sm:$0xff]   ;;  %v19304_v0 = vld [vmem:[%s19288_s16 + $0x10] ss:$40 sps:$4 sm:$0xff]   ;;  %v16667_v28 = vld [vmem:[#allocation3 + $0x3a8] ss:$12 sps:$4 sm:$0xff]  }
  0x96   : > { %1877 = vmatprep.subr.bf16.mxu0 %v16573_v61  ;;  %16027 = vmatprep.subr.bf16.mxu1 %v16676_v29  ;;  %v16639_v61 = vld [vmem:[#allocation3 + $0x31c] ss:$12 sps:$4 sm:$0xff]   ;;  %v16752_v29 = vld [vmem:[#allocation3 + $0x518] ss:$12 sps:$4 sm:$0xff]  }
  0x97   : > { %2163 = vmatprep.mubr.bf16.mxu1 %v14203_v40 }
  0x98   : > { %16028 = vmatpush3.bf16.msra.mxu1 %v16680_v31  ;;  %v16674_v31 = vld [vmem:[#allocation3 + $0x3c4] ss:$12 sps:$4 sm:$0xff]  }
  0x99   : > { %1878 = vmatpush1.bf16.msra.mxu0 %v16571_v2  ;;  %16029 = vmatprep.subr.bf16.mxu1 %v16681_v33  ;;  %v16721_v2 = vld [vmem:[#allocation3 + $0x560] ss:$12 sps:$4 sm:$0xff]   ;;  %v16757_v33 = vld [vmem:[#allocation3 + $0x530] ss:$12 sps:$4 sm:$0xff]  }
  0x9a   : > { %1879 = vmatprep.subr.bf16.mxu0 %v16576_v5  ;;  %v16642_v5 = vld [vmem:[#allocation3 + $0x330] ss:$12 sps:$4 sm:$0xff]  }
  0x9b   : > { %2164 = vmatmul.mubr.bf16.gmra.mrb[12].mxu1 %v19299_v41 }
  0x9c   : > { %16030 = vmatpush3.bf16.msra.mxu1 %v16685_v36  ;;  %2203 = vmatprep.mubr.bf16.mxu1 %v16715_v50  ;;  %v19321_v36 = vld [vmem:[%s19288_s16 + $0x18] ss:$40 sps:$4 sm:$0xff]  }
  0x9d   : > { %1880 = vmatpush1.bf16.msra.mxu0 %v16574_v6  ;;  %16031 = vmatprep.subr.bf16.mxu1 %v16686_v37  ;;  %v16649_v6 = vld [vmem:[#allocation3 + $0x34c] ss:$12 sps:$4 sm:$0xff]   ;;  %v16765_v37 = vld [vmem:[#allocation3 + $0x608] ss:$12 sps:$4 sm:$0xff]  }
  0x9e   : > { %1881 = vmatprep.subr.bf16.mxu0 %v16579_v9  ;;  %v16647_v9 = vld [vmem:[#allocation3 + $0x348] ss:$12 sps:$4 sm:$0xff]  }
  0xa0   : > { %16032 = vmatpush3.bf16.msra.mxu1 %v16690_v43 }
  0xa1   : > { %1882 = vmatpush1.bf16.msra.mxu0 %v16577_v11  ;;  %16033 = vmatprep.subr.bf16.mxu1 %v16691_v44  ;;  %v16730_v11 = vld [vmem:[#allocation3 + $0x4b8] ss:$12 sps:$4 sm:$0xff]   ;;  %v16682_v44 = vld [vmem:[#allocation3 + $0x3f0] ss:$12 sps:$4 sm:$0xff]  }
  0xa2   : > { %1883 = vmatprep.subr.bf16.mxu0 %v16582_v13  ;;  %v16654_v13 = vld [vmem:[#allocation3 + $0x364] ss:$12 sps:$4 sm:$0xff]  }
  0xa4   : > { %16034 = vmatpush3.bf16.msra.mxu1 %v16695_v47 }
  0xa5   : > { %1884 = vmatpush1.bf16.msra.mxu0 %v16580_v14  ;;  %16035 = vmatprep.subr.bf16.mxu1 %v16696_v48  ;;  %v19312_v14 = vcombine.low %v115_v8, %v115_v8  ;;  %v16687_v48 = vld [vmem:[#allocation3 + $0x408] ss:$12 sps:$4 sm:$0xff]  }
  0xa6   : > { %1885 = vmatprep.subr.bf16.mxu0 %v16585_v17  ;;  %v16736_v17 = vld [vmem:[#allocation3 + $0x5a8] ss:$12 sps:$4 sm:$0xff]  }
  0xa7   : > { %v117_v8 = vld [vmem:[%s19288_s16 + $0x70] sm:$0x33] }
  0xa8   : > { %16036 = vmatpush3.bf16.msra.mxu1 %v16700_v52  ;;  %v19332_v52 = vld [vmem:[%s19288_s16 + $0x24] ss:$40 sps:$4 sm:$0xff]  }
  0xa9   : > { %1886 = vmatpush1.bf16.msra.mxu0 %v16583_v18  ;;  %16037 = vmatprep.subr.bf16.mxu1 %v16702_v53  ;;  %v16659_v18 = vld [vmem:[#allocation3 + $0x37c] ss:$12 sps:$4 sm:$0xff]  }
  0xaa   : > { %1887 = vmatprep.subr.bf16.mxu0 %v16589_v21  ;;  %v16740_v21 = vld [vmem:[#allocation3 + $0x4e8] ss:$12 sps:$4 sm:$0xff]   ;;  %v16780_v53 = vld [vmem:[#allocation3 + $0x650] ss:$12 sps:$4 sm:$0xff]  }
  0xac   : > { %16038 = vmatpush3.bf16.msra.mxu1 %v16707_v56  ;;  %v16699_v56 = vld [vmem:[#allocation3 + $0x43c] ss:$12 sps:$4 sm:$0xff]  }
  0xad   : > { %1888 = vmatpush1.bf16.msra.mxu0 %v16587_v22  ;;  %16039 = vmatprep.subr.bf16.mxu1 %v16708_v57  ;;  %v16741_v22 = vld [vmem:[#allocation3 + $0x5c0] ss:$12 sps:$4 sm:$0xff]   ;;  %v16697_v57 = vld [vmem:[#allocation3 + $0x438] ss:$12 sps:$4 sm:$0xff]  }
  0xae   : > { %1889 = vmatprep.subr.bf16.mxu0 %v16594_v25  ;;  %v16745_v25 = vld [vmem:[#allocation3 + $0x500] ss:$12 sps:$4 sm:$0xff]  }
  0xb0   : > { %16040 = vmatpush3.bf16.msra.mxu1 %v16712_v59  ;;  %v16786_v59 = vld [vmem:[#allocation3 + $0x740] ss:$12 sps:$4 sm:$0xff]  }
  0xb1   : > { %1890 = vmatpush1.bf16.msra.mxu0 %v16592_v26  ;;  %16053 = vmatprep.subr.bf16.mxu1 %v16716_v62  ;;  %v16747_v26 = vld [vmem:[#allocation3 + $0x5d8] ss:$12 sps:$4 sm:$0xff]   ;;  %v16790_v62 = vld [vmem:[#allocation3 + $0x680] ss:$12 sps:$4 sm:$0xff]  }
  0xb2   : > { %1891 = vmatprep.subr.bf16.mxu0 %v16599_v30  ;;  %v16753_v30 = vld [vmem:[#allocation3 + $0x5f0] ss:$12 sps:$4 sm:$0xff]  }
  0xb3   : > { %2204 = vmatmul.mubr.bf16.vlgmr.msra.gmra.mrb[16].mxu1 %v19304_v0 }
  0xb4   : > { %16054 = vmatpush3.bf16.msra.mxu1 %v16720_v1  ;;  %2211 = vmatprep.mubr.bf16.mxu1 %v19309_v10  ;;  %v16711_v1 = vld [vmem:[#allocation3 + $0x46c] ss:$12 sps:$4 sm:$0xff]  }
  0xb5   : > { %1892 = vmatpush1.bf16.msra.mxu0 %v16597_v32  ;;  %16055 = vmatprep.subr.bf16.mxu1 %v16721_v2  ;;  %v16672_v32 = vld [vmem:[#allocation3 + $0x3c0] ss:$12 sps:$4 sm:$0xff]   ;;  %v16709_v2 = vld [vmem:[#allocation3 + $0x468] ss:$12 sps:$4 sm:$0xff]  }
  0xb6   : > { %1893 = vmatprep.subr.bf16.mxu0 %v16604_v34  ;;  %v16761_v34 = vld [vmem:[#allocation3 + $0x6c8] ss:$12 sps:$4 sm:$0xff]  }
  0xb8   : > { %16056 = vmatpush3.bf16.msra.mxu1 %v16725_v4  ;;  %v16798_v4 = vld [vmem:[#allocation3 + $0x770] ss:$12 sps:$4 sm:$0xff]  }
  0xb9   : > { %1894 = vmatpush1.bf16.msra.mxu0 %v16602_v35  ;;  %16057 = vmatprep.subr.bf16.mxu1 %v16726_v7  ;;  %v16679_v35 = vld [vmem:[#allocation3 + $0x3dc] ss:$12 sps:$4 sm:$0xff]  }
  0xba   : > { %1895 = vmatprep.subr.bf16.mxu0 %v16609_v38  ;;  %v16677_v38 = vld [vmem:[#allocation3 + $0x3d8] ss:$12 sps:$4 sm:$0xff]   ;;  %v16802_v7 = vld [vmem:[#allocation3 + $0x6b0] ss:$12 sps:$4 sm:$0xff]  }
  0xbb   : > { %2212 = vmatmul.mubr.bf16.gmra.mrb[20].mxu1 %v19312_v14 }
  0xbc   : > { %16058 = vmatpush3.bf16.msra.mxu1 %v16730_v11  ;;  %2251 = vmatprep.mubr.bf16.mxu1 %v19317_v19  ;;  %v16803_v11 = vld [vmem:[%s19288_s16 + $0x20] ss:$40 sps:$4 sm:$0xff]  }
  0xbd   : > { %1896 = vmatpush1.bf16.msra.mxu0 %v16607_v42  ;;  %16059 = vmatprep.subr.bf16.mxu1 %v16731_v12  ;;  %v16770_v42 = vld [vmem:[#allocation3 + $0x620] ss:$12 sps:$4 sm:$0xff]   ;;  %v16722_v12 = vld [vmem:[#allocation3 + $0x498] ss:$12 sps:$4 sm:$0xff]  }
  0xbe   : > { %1897 = vmatprep.subr.bf16.mxu0 %v16614_v45  ;;  %v16771_v45 = vld [vmem:[#allocation3 + $0x6f8] ss:$12 sps:$4 sm:$0xff]  }
  0xc0   : > { %16060 = vmatpush3.bf16.msra.mxu1 %v16735_v16  ;;  %v16727_v16 = vld [vmem:[#allocation3 + $0x4b0] ss:$12 sps:$4 sm:$0xff]  }
  0xc1   : > { %1898 = vmatpush1.bf16.msra.mxu0 %v16612_v46  ;;  %16061 = vmatprep.subr.bf16.mxu1 %v16736_v17  ;;  %v16689_v46 = vld [vmem:[#allocation3 + $0x40c] ss:$12 sps:$4 sm:$0xff]  }
  0xc2   : > { %1899 = vmatprep.subr.bf16.mxu0 %v16620_v49  ;;  %v16775_v49 = vld [vmem:[#allocation3 + $0x638] ss:$12 sps:$4 sm:$0xff]  }
  0xc3   : > { %v16734_v17 = vld [vmem:[#allocation3 + $0x4cc] ss:$12 sps:$4 sm:$0xff]  }
  0xc4   : > { %16062 = vmatpush3.bf16.msra.mxu1 %v16740_v21  ;;  %v16737_v21 = vld [vmem:[#allocation3 + $0x4e0] ss:$12 sps:$4 sm:$0xff]  }
  0xc5   : > { %1900 = vmatpush1.bf16.msra.mxu0 %v16618_v51  ;;  %16063 = vmatprep.subr.bf16.mxu1 %v16741_v22  ;;  %v16694_v51 = vld [vmem:[#allocation3 + $0x424] ss:$12 sps:$4 sm:$0xff]  }
  0xc6   : > { %1901 = vmatprep.subr.bf16.mxu0 %v16626_v54  ;;  %v16692_v54 = vld [vmem:[#allocation3 + $0x420] ss:$12 sps:$4 sm:$0xff]   ;;  %v16742_v22 = vld [vmem:[#allocation3 + $0x4f8] ss:$12 sps:$4 sm:$0xff]  }
  0xc8   : > { %16064 = vmatpush3.bf16.msra.mxu1 %v16745_v25  ;;  %v16756_v25 = vld [vmem:[#allocation3 + $0x52c] ss:$12 sps:$4 sm:$0xff]  }
  0xc9   : > { %1902 = vmatpush1.bf16.msra.mxu0 %v16624_v55  ;;  %16065 = vmatprep.subr.bf16.mxu1 %v16747_v26  ;;  %v16781_v55 = vld [vmem:[#allocation3 + $0x728] ss:$12 sps:$4 sm:$0xff]  }
  0xca   : > { %1922 = vmatprep.subr.bf16.mxu0 %v16634_v58  ;;  %v16785_v58 = vld [vmem:[#allocation3 + $0x668] ss:$12 sps:$4 sm:$0xff]  }
  0xcb   : > { %v16754_v26 = vld [vmem:[#allocation3 + $0x528] ss:$12 sps:$4 sm:$0xff]  }
  0xcc   : > { %1904 = vmatmul.mubr.bf16.vlgmr.msra.gmra.mrb[0].mxu0 %v19295_v27  ;;  %v16669_v27 = vld [vmem:[#allocation3 + $0x3ac] ss:$12 sps:$4 sm:$0xff]   ;;  %16066 = vmatpush3.bf16.msra.mxu1 %v16752_v29  ;;  %v16774_v29 = vld [vmem:[#allocation3 + $0x574] ss:$12 sps:$4 sm:$0xff]  }
  0xcd   : > { %1923 = vmatpush1.bf16.msra.mxu0 %v16632_v60  ;;  %1913 = vmatprep.mubr.bf16.mxu0 %v14203_v40  ;;  %v16684_v40 = vld [vmem:[#allocation3 + $0x3f4] ss:$12 sps:$4 sm:$0xff]  }
  0xce   : > { %1924 = vmatprep.subr.bf16.mxu0 %v16639_v61  ;;  %16067 = vmatprep.subr.bf16.mxu1 %v16753_v30  ;;  %v16705_v60 = vld [vmem:[#allocation3 + $0x454] ss:$12 sps:$4 sm:$0xff]   ;;  %v16703_v61 = vld [vmem:[#allocation3 + $0x450] ss:$12 sps:$4 sm:$0xff]  }
  0xcf   : > { %v16772_v30 = vld [vmem:[#allocation3 + $0x570] ss:$12 sps:$4 sm:$0xff]  }
  0xd0   : > { %16068 = vmatpush3.bf16.msra.mxu1 %v16757_v33  ;;  %v16784_v33 = vld [vmem:[#allocation3 + $0x5a4] ss:$12 sps:$4 sm:$0xff]  }
  0xd1   : > { %1925 = vmatpush1.bf16.msra.mxu0 %v16637_v63  ;;  %16081 = vmatprep.subr.bf16.mxu1 %v16761_v34  ;;  %v16793_v63 = vld [vmem:[#allocation3 + $0x758] ss:$12 sps:$4 sm:$0xff]   ;;  %v16782_v34 = vld [vmem:[#allocation3 + $0x5a0] ss:$12 sps:$4 sm:$0xff]  }
  0xd2   : > { %1926 = vmatprep.subr.bf16.mxu0 %v16644_v3  ;;  %v16797_v3 = vld [vmem:[#allocation3 + $0x698] ss:$12 sps:$4 sm:$0xff]  }
  0xd3   : > { %2252 = vmatmul.mubr.bf16.vlgmr.msra.gmra.mrb[24].mxu1 %v19321_v36 }
  0xd4   : > { %1914 = vmatmul.mubr.bf16.gmra.mrb[4].mxu0 %v19299_v41  ;;  %v116_v41 = vld [vmem:[%s19288_s16 + $0x68] sm:$0x33]  ;;  %16082 = vmatpush3.bf16.msra.mxu1 %v16765_v37  ;;  %v16787_v37 = vld [vmem:[#allocation3 + $0x5b8] ss:$12 sps:$4 sm:$0xff]  }
  0xd5   : > { %1927 = vmatpush1.bf16.msra.mxu0 %v16642_v5  ;;  %1954 = vmatprep.mubr.bf16.mxu0 %v16715_v50  ;;  %v19325_v43 = vcombine.high %v116_v41, %v116_v41  ;;  %v19328_v47 = vcombine.low %v116_v41, %v116_v41  ;;  %v16776_v50 = vld [vmem:[#allocation3 + $0x710] ss:$12 sps:$4 sm:$0xff]   ;;  %v16799_v41 = vld [vmem:[#allocation3 + $0x5e8] ss:$12 sps:$4 sm:$0xff]  }
  0xd6   : > { %1928 = vmatprep.subr.bf16.mxu0 %v16649_v6  ;;  %16083 = vmatprep.subr.bf16.mxu1 %v16766_v39  ;;  %v16719_v5 = vld [vmem:[#allocation3 + $0x484] ss:$12 sps:$4 sm:$0xff]   ;;  %v16717_v6 = vld [vmem:[#allocation3 + $0x480] ss:$12 sps:$4 sm:$0xff]  }
  0xd7   : > { %2259 = vmatprep.mubr.bf16.mxu1 %v19325_v43  ;;  %v16794_v39 = vld [vmem:[#allocation3 + $0x5d0] ss:$12 sps:$4 sm:$0xff]  }
  0xd8   : > { %16084 = vmatpush3.bf16.msra.mxu1 %v16770_v42  ;;  %v16808_v42 = vld [vmem:[#allocation3 + $0x604] ss:$12 sps:$4 sm:$0xff]  }
  0xd9   : > { %1929 = vmatpush1.bf16.msra.mxu0 %v16647_v9  ;;  %16085 = vmatprep.subr.bf16.mxu1 %v16771_v45  ;;  %v16724_v9 = vld [vmem:[#allocation3 + $0x49c] ss:$12 sps:$4 sm:$0xff]  }
  0xda   : > { %1930 = vmatprep.subr.bf16.mxu0 %v16654_v13  ;;  %v16729_v13 = vld [vmem:[#allocation3 + $0x4b4] ss:$12 sps:$4 sm:$0xff]   ;;  %v16811_v45 = vld [vmem:[#allocation3 + $0x61c] ss:$12 sps:$4 sm:$0xff]  }
  0xdb   : > { %2260 = vmatmul.mubr.bf16.gmra.mrb[28].mxu1 %v19328_v47 }
  0xdc   : > { %16086 = vmatpush3.bf16.msra.mxu1 %v16775_v49  ;;  %2299 = vmatprep.mubr.bf16.mxu1 %v19332_v52  ;;  %v16814_v49 = vld [vmem:[#allocation3 + $0x630] ss:$12 sps:$4 sm:$0xff]  }
  0xdd   : > { %1931 = vmatpush1.bf16.msra.mxu0 %v16652_v15  ;;  %16087 = vmatprep.subr.bf16.mxu1 %v16776_v50  ;;  %v19338_v15 = vcombine.high %v117_v8, %v117_v8  ;;  %v16819_v50 = vld [vmem:[#allocation3 + $0x64c] ss:$12 sps:$4 sm:$0xff]  }
  0xde   : > { %1932 = vmatprep.subr.bf16.mxu0 %v16659_v18  ;;  %v19342_v18 = vcombine.low %v117_v8, %v117_v8 }
  0xe0   : > { %16088 = vmatpush3.bf16.msra.mxu1 %v16780_v53  ;;  %v16822_v53 = vld [vmem:[#allocation3 + $0x664] ss:$12 sps:$4 sm:$0xff]  }
  0xe1   : > { %1933 = vmatpush1.bf16.msra.mxu0 %v16657_v20  ;;  %16089 = vmatprep.subr.bf16.mxu1 %v16781_v55  ;;  %v16732_v20 = vld [vmem:[#allocation3 + $0x4c8] ss:$12 sps:$4 sm:$0xff]  }
  0xe2   : > { %1934 = vmatprep.subr.bf16.mxu0 %v16664_v23  ;;  %v16750_v23 = vld [vmem:[#allocation3 + $0x514] ss:$12 sps:$4 sm:$0xff]   ;;  %v16825_v55 = vld [vmem:[#allocation3 + $0x67c] ss:$12 sps:$4 sm:$0xff]  }
  0xe4   : > { %16090 = vmatpush3.bf16.msra.mxu1 %v16785_v58 }
  0xe5   : > { %1935 = vmatpush1.bf16.msra.mxu0 %v16662_v24  ;;  %16091 = vmatprep.subr.bf16.mxu1 %v16786_v59  ;;  %v16748_v24 = vld [vmem:[#allocation3 + $0x510] ss:$12 sps:$4 sm:$0xff]   ;;  %v16829_v59 = vld [vmem:[#allocation3 + $0x6a8] ss:$12 sps:$4 sm:$0xff]  }
  0xe6   : > { %1936 = vmatprep.subr.bf16.mxu0 %v16669_v27  ;;  %v16769_v27 = vld [vmem:[#allocation3 + $0x55c] ss:$12 sps:$4 sm:$0xff]  }
  0xe8   : > { %16092 = vmatpush3.bf16.msra.mxu1 %v16790_v62 }
  0xe9   : > { %1937 = vmatpush1.bf16.msra.mxu0 %v16667_v28  ;;  %16093 = vmatprep.subr.bf16.mxu1 %v16793_v63  ;;  %v16767_v28 = vld [vmem:[#allocation3 + $0x558] ss:$12 sps:$4 sm:$0xff]  }
  0xea   : > { %1938 = vmatprep.subr.bf16.mxu0 %v16674_v31  ;;  %v16779_v31 = vld [vmem:[#allocation3 + $0x58c] ss:$12 sps:$4 sm:$0xff]  }
  0xec   : > { %16094 = vmatpush3.bf16.msra.mxu1 %v16797_v3 }
  0xed   : > { %1939 = vmatpush1.bf16.msra.mxu0 %v16672_v32  ;;  %16095 = vmatprep.subr.bf16.mxu1 %v16798_v4  ;;  %v16777_v32 = vld [vmem:[#allocation3 + $0x588] ss:$12 sps:$4 sm:$0xff]   ;;  %v16835_v4 = vld [vmem:[#allocation3 + $0x6d8] ss:$12 sps:$4 sm:$0xff]  }
  0xee   : > { %1940 = vmatprep.subr.bf16.mxu0 %v16679_v35  ;;  %v16789_v35 = vld [vmem:[#allocation3 + $0x5bc] ss:$12 sps:$4 sm:$0xff]  }
  0xf0   : > { %16096 = vmatpush3.bf16.msra.mxu1 %v16802_v7 }
  0xf1   : > { %1941 = vmatpush1.bf16.msra.mxu0 %v16677_v38  ;;  %v16796_v38 = vld [vmem:[#allocation3 + $0x5d4] ss:$12 sps:$4 sm:$0xff]  }
  0xf2   : > { %1942 = vmatprep.subr.bf16.mxu0 %v16684_v40  ;;  %v16801_v40 = vld [vmem:[#allocation3 + $0x5ec] ss:$12 sps:$4 sm:$0xff]  }
  0xf3   : > { %2300 = vmatmul.mubr.bf16.vlgmr.msra.gmra.mrb[32].mxu1 %v16803_v11  ;;  %v16838_v11 = vld [vmem:[#allocation3 + $0x6f0] ss:$12 sps:$4 sm:$0xff]  }
  0xf4   : > { %2307 = vmatprep.mubr.bf16.mxu1 %v19338_v15 }
  0xf5   : > { %1943 = vmatpush1.bf16.msra.mxu0 %v16682_v44  ;;  %v16806_v44 = vld [vmem:[#allocation3 + $0x600] ss:$12 sps:$4 sm:$0xff]  }
  0xf6   : > { %1944 = vmatprep.subr.bf16.mxu0 %v16689_v46  ;;  %v16809_v46 = vld [vmem:[#allocation3 + $0x618] ss:$12 sps:$4 sm:$0xff]  }
  0xf9   : > { %1945 = vmatpush1.bf16.msra.mxu0 %v16687_v48  ;;  %v16816_v48 = vld [vmem:[#allocation3 + $0x634] ss:$12 sps:$4 sm:$0xff]  }
  0xfa   : > { %1946 = vmatprep.subr.bf16.mxu0 %v16694_v51  ;;  %v16817_v51 = vld [vmem:[#allocation3 + $0x648] ss:$12 sps:$4 sm:$0xff]  }
  0xfb   : > { %2308 = vmatmul.mubr.bf16.gmra.mrb[36].mxu1 %v19342_v18 }
  0xfd   : > { %1947 = vmatpush1.bf16.msra.mxu0 %v16692_v54  ;;  %v16820_v54 = vld [vmem:[#allocation3 + $0x660] ss:$12 sps:$4 sm:$0xff]  }
  0xfe   : > { %1948 = vmatprep.subr.bf16.mxu0 %v16699_v56  ;;  %v16828_v56 = vld [vmem:[#allocation3 + $0x694] ss:$12 sps:$4 sm:$0xff]  }
 0x101   : > { %1949 = vmatpush1.bf16.msra.mxu0 %v16697_v57  ;;  %v16831_v57 = vld [vmem:[#allocation3 + $0x6ac] ss:$12 sps:$4 sm:$0xff]  }
 0x102   : > { %1950 = vmatprep.subr.bf16.mxu0 %v16705_v60 }
 0x105   : > { %1951 = vmatpush1.bf16.msra.mxu0 %v16703_v61 }
 0x106   : > { %1952 = vmatprep.subr.bf16.mxu0 %v16711_v1  ;;  %v16832_v1 = vld [vmem:[#allocation3 + $0x6c0] ss:$12 sps:$4 sm:$0xff]  }
 0x109   : > { %1953 = vmatpush1.bf16.msra.mxu0 %v16709_v2  ;;  %v16837_v2 = vld [vmem:[#allocation3 + $0x6dc] ss:$12 sps:$4 sm:$0xff]  }
 0x10a   : > { %1973 = vmatprep.subr.bf16.mxu0 %v16719_v5 }
 0x10c   : > { %1955 = vmatmul.mubr.bf16.vlgmr.msra.gmra.mrb[0].mxu0 %v19304_v0  ;;  %v16739_v0 = vld [vmem:[#allocation3 + $0x4e4] ss:$12 sps:$4 sm:$0xff]  }
 0x10d   : > { %1974 = vmatpush1.bf16.msra.mxu0 %v16717_v6  ;;  %1964 = vmatprep.mubr.bf16.mxu0 %v19309_v10  ;;  %v16744_v10 = vld [vmem:[#allocation3 + $0x4fc] ss:$12 sps:$4 sm:$0xff]   ;;  %v16840_v6 = vld [vmem:[#allocation3 + $0x6f4] ss:$12 sps:$4 sm:$0xff]  }
 0x10e   : > { %1975 = vmatprep.subr.bf16.mxu0 %v16724_v9 }
 0x111   : > { %1976 = vmatpush1.bf16.msra.mxu0 %v16722_v12  ;;  %v16843_v12 = vld [vmem:[#allocation3 + $0x70c] ss:$12 sps:$4 sm:$0xff]  }
 0x112   : > { %1977 = vmatprep.subr.bf16.mxu0 %v16729_v13  ;;  %v440_v13 = vlaneseq }
 0x114   : > { %1965 = vmatmul.mubr.bf16.gmra.mrb[4].mxu0 %v19312_v14  ;;  %v16764_v14 = vld [vmem:[#allocation3 + $0x544] ss:$12 sps:$4 sm:$0xff]   ;;  %vm7091_vm2 = vcmp.lt.s32.totalorder %v440_v13, 512 }
 0x115   : > { %1978 = vmatpush1.bf16.msra.mxu0 %v16727_v16  ;;  %2005 = vmatprep.mubr.bf16.mxu0 %v19317_v19  ;;  %v16762_v19 = vld [vmem:[#allocation3 + $0x540] ss:$12 sps:$4 sm:$0xff]  }
 0x116   : > { %1979 = vmatprep.subr.bf16.mxu0 %v16734_v17  ;;  %v16856_v16 = vld [vmem:[#allocation5] ss:$12 sps:$4 sm:$0xff]   ;;  %v16858_v17 = vld [vmem:[#allocation5 + $0x4] ss:$12 sps:$4 sm:$0xff]  }
 0x117   : > { %4350 = vmatprep.subr.bf16.mxu1 %v16858_v17  ;;  %v16890_v17 = vld [vmem:[#allocation5 + $0xf0] ss:$12 sps:$4 sm:$0xff]  }
 0x118   : > { %4351 = vmatpush1.bf16.msra.mxu1 %v16856_v16  ;;  %v16908_v16 = vld [vmem:[#allocation5 + $0x140] ss:$12 sps:$4 sm:$0xff]  }
 0x119   : > { %1980 = vmatpush1.bf16.msra.mxu0 %v16732_v20  ;;  %v16841_v20 = vld [vmem:[#allocation3 + $0x708] ss:$12 sps:$4 sm:$0xff]  }
 0x11a   : > { %1981 = vmatprep.subr.bf16.mxu0 %v16739_v0  ;;  %v16861_v0 = vld [vmem:[#allocation5 + $0x1c] ss:$12 sps:$4 sm:$0xff]  }
 0x11b   : > { %4352 = vmatprep.subr.bf16.mxu1 %v16861_v0  ;;  %v16909_v0 = vld [vmem:[#allocation5 + $0x80] ss:$12 sps:$4 sm:$0xff]  }
 0x11d   : > { %1982 = vmatpush1.bf16.msra.mxu0 %v16737_v21  ;;  %v16846_v21 = vld [vmem:[#allocation3 + $0x724] ss:$12 sps:$4 sm:$0xff]  }
 0x11e   : > { %1983 = vmatprep.subr.bf16.mxu0 %v16744_v10  ;;  %v19354_v10 = vshrl.u32 %v440_v13, 7  ;;  %v17674_v13 = vld [vmem:[%s22236_s7 + $0x4] ss:$16 sps:$4 sm:$0xff] (%p96_p4)  }
 0x121   : > { %1984 = vmatpush1.bf16.msra.mxu0 %v16742_v22  ;;  %v16859_v22 = vld [vmem:[#allocation5 + $0x18] ss:$12 sps:$4 sm:$0xff]  }
 0x122   : > { %1985 = vmatprep.subr.bf16.mxu0 %v16750_v23  ;;  %v16864_v23 = vld [vmem:[#allocation5 + $0x34] ss:$12 sps:$4 sm:$0xff]   ;;  %4353 = vmatpush1.bf16.msra.mxu1 %v16859_v22 }
 0x123   : > { %4354 = vmatprep.subr.bf16.mxu1 %v16864_v23  ;;  %v16900_v22 = vld [vmem:[#allocation5 + $0x120] ss:$12 sps:$4 sm:$0xff]  }
 0x125   : > { %1986 = vmatpush1.bf16.msra.mxu0 %v16748_v24  ;;  %v16844_v24 = vld [vmem:[#allocation3 + $0x720] ss:$12 sps:$4 sm:$0xff]  }
 0x126   : > { %1987 = vmatprep.subr.bf16.mxu0 %v16756_v25  ;;  %v16849_v25 = vld [vmem:[#allocation3 + $0x73c] ss:$12 sps:$4 sm:$0xff]  }
 0x129   : > { %1988 = vmatpush1.bf16.msra.mxu0 %v16754_v26  ;;  %v19357_v26 = vsub.s32 2, %v19354_v10 }
 0x12a   : > { %1989 = vmatprep.subr.bf16.mxu0 %v16764_v14  ;;  %v438_v14 = vld [vmem:[%s22231_s2] sm:$0x7] }
 0x12d   : > { %1990 = vmatpush1.bf16.msra.mxu0 %v16762_v19  ;;  %v16862_v19 = vld [vmem:[#allocation5 + $0x30] ss:$12 sps:$4 sm:$0xff]  }
 0x12e   : > { %1991 = vmatprep.subr.bf16.mxu0 %v16769_v27  ;;  %v16867_v27 = vld [vmem:[#allocation5 + $0x4c] ss:$12 sps:$4 sm:$0xff]   ;;  %4355 = vmatpush1.bf16.msra.mxu1 %v16862_v19 }
 0x12f   : > { %4356 = vmatprep.subr.bf16.mxu1 %v16867_v27 }
 0x131   : > { %1992 = vmatpush1.bf16.msra.mxu0 %v16767_v28  ;;  %v16847_v28 = vld [vmem:[#allocation3 + $0x738] ss:$12 sps:$4 sm:$0xff]  }
 0x132   : > { %1993 = vmatprep.subr.bf16.mxu0 %v16774_v29  ;;  %v16852_v29 = vld [vmem:[#allocation3 + $0x754] ss:$12 sps:$4 sm:$0xff]  }
 0x135   : > { %1994 = vmatpush1.bf16.msra.mxu0 %v16772_v30  ;;  %v451_v30 = vrot.slane %v438_v14, %v19357_v26 }
 0x136   : > { %1995 = vmatprep.subr.bf16.mxu0 %v16779_v31  ;;  %v16865_v31 = vld [vmem:[#allocation5 + $0x48] ss:$12 sps:$4 sm:$0xff]  }
 0x137   : > { %4357 = vmatpush1.bf16.msra.mxu1 %v16865_v31 }
 0x139   : > { %1996 = vmatpush1.bf16.msra.mxu0 %v16777_v32  ;;  %v16850_v32 = vld [vmem:[#allocation3 + $0x750] ss:$12 sps:$4 sm:$0xff]  }
 0x13a   : > { %1997 = vmatprep.subr.bf16.mxu0 %v16784_v33  ;;  %v16855_v33 = vld [vmem:[#allocation3 + $0x76c] ss:$12 sps:$4 sm:$0xff]  }
 0x13d   : > { %1998 = vmatpush1.bf16.msra.mxu0 %v16782_v34  ;;  %v16870_v34 = vld [vmem:[#allocation5 + $0x64] ss:$12 sps:$4 sm:$0xff]  }
 0x13e   : > { %1999 = vmatprep.subr.bf16.mxu0 %v16789_v35  ;;  %v16868_v35 = vld [vmem:[#allocation5 + $0x60] ss:$12 sps:$4 sm:$0xff]   ;;  %4358 = vmatprep.subr.bf16.mxu1 %v16870_v34 }
 0x13f   : > { %4359 = vmatpush1.bf16.msra.mxu1 %v16868_v35 }
 0x141   : > { %2000 = vmatpush1.bf16.msra.mxu0 %v16787_v37 }
 0x142   : > { %2001 = vmatprep.subr.bf16.mxu0 %v16796_v38 }
 0x145   : > { %2002 = vmatpush1.bf16.msra.mxu0 %v16794_v39  ;;  %v16873_v39 = vld [vmem:[#allocation5 + $0x7c] ss:$12 sps:$4 sm:$0xff]  }
 0x146   : > { %2003 = vmatprep.subr.bf16.mxu0 %v16801_v40  ;;  %v15985_v58 = vpop.f32.mrb[0].mxu1  ;;  %v16853_v40 = vld [vmem:[#allocation3 + $0x768] ss:$12 sps:$4 sm:$0xff]   ;;  %4360 = vmatprep.subr.bf16.mxu1 %v16873_v39 }
 0x147   : > { %v15986_v60 = vpop.f32.mrb[1].mxu1 }
 0x148   : > { %v15987_v61 = vadd.f32 %v15986_v60, %v15985_v58  ;;  %v15988_v62 = vpop.f32.mrb[2].mxu1  ;;  %v17672_v58 = vld [vmem:[%s19288_s16 + $0x20] ss:$40 sps:$4 sm:$0xff]  }
 0x149   : > { %2004 = vmatpush1.bf16.msra.mxu0 %v16799_v41  ;;  %v16877_v60 = vld [vmem:[#allocation5 + $0xa8] ss:$12 sps:$4 sm:$0xff]  }
 0x14a   : > { %2024 = vmatprep.subr.bf16.mxu0 %v16808_v42  ;;  %v2110_v37 = vadd.f32 %v15987_v61, %v451_v30 }
 0x14c   : > { %2006 = vmatmul.mubr.bf16.vlgmr.msra.gmra.mrb[0].mxu0 %v19321_v36  ;;  %v16823_v36 = vld [vmem:[#allocation3 + $0x678] ss:$12 sps:$4 sm:$0xff]  }
 0x14d   : > { %2025 = vmatpush1.bf16.msra.mxu0 %v16806_v44  ;;  %2015 = vmatprep.mubr.bf16.mxu0 %v19325_v43  ;;  %v16826_v43 = vld [vmem:[#allocation3 + $0x690] ss:$12 sps:$4 sm:$0xff]  }
 0x14e   : > { %2026 = vmatprep.subr.bf16.mxu0 %v16811_v45 }
 0x151   : > { %2027 = vmatpush1.bf16.msra.mxu0 %v16809_v46  ;;  %v16883_v46 = vld [vmem:[#allocation5 + $0xc8] ss:$12 sps:$4 sm:$0xff]  }
 0x152   : > { %2028 = vmatprep.subr.bf16.mxu0 %v16816_v48 }
 0x154   : > { %2016 = vmatmul.mubr.bf16.gmra.mrb[4].mxu0 %v19328_v47  ;;  %v16834_v47 = vld [vmem:[#allocation3 + $0x6c4] ss:$12 sps:$4 sm:$0xff]  }
 0x155   : > { %2029 = vmatpush1.bf16.msra.mxu0 %v16814_v49  ;;  %2056 = vmatprep.mubr.bf16.mxu0 %v19332_v52  ;;  %v15989_v52 = vpop.f32.mrb[3].mxu1  ;;  %v16871_v49 = vld [vmem:[#allocation5 + $0x78] ss:$12 sps:$4 sm:$0xff]  }
 0x156   : > { %2030 = vmatprep.subr.bf16.mxu0 %v16819_v50  ;;  %v15990_v63 = vadd.f32 %v15989_v52, %v15988_v62  ;;  %v15991_v3 = vpop.f32.mrb[4].mxu1  ;;  %4361 = vmatpush1.bf16.msra.mxu1 %v16871_v49  ;;  %v16882_v62 = vld [vmem:[#allocation5 + $0xc4] ss:$12 sps:$4 sm:$0xff]  }
 0x157   : > { %v15992_v5 = vpop.f32.mrb[5].mxu1 }
 0x158   : > { %v19351_v7 = vadd.f32 %v15992_v5, %v15991_v3  ;;  %v15994_v8 = vpop.f32.mrb[6].mxu1  ;;  %v2113_v42 = vadd.f32 %v15990_v63, %v451_v30  ;;  %v16894_v63 = vld [vmem:[#allocation5 + $0x38] ss:$12 sps:$4 sm:$0xff]   ;;  %v16898_v3 = vld [vmem:[#allocation5 + $0x110] ss:$12 sps:$4 sm:$0xff]  }
 0x159   : > { %2031 = vmatpush1.bf16.msra.mxu0 %v16817_v51  ;;  %v15995_v9 = vpop.f32.mrb[7].mxu1  ;;  %v16880_v5 = vld [vmem:[#allocation5 + $0xc0] ss:$12 sps:$4 sm:$0xff]   ;;  %v16887_v8 = vld [vmem:[#allocation5 + $0xdc] ss:$12 sps:$4 sm:$0xff]  }
 0x15a   : > { %2032 = vmatprep.subr.bf16.mxu0 %v16822_v53  ;;  %v16876_v53 = vld [vmem:[#allocation5 + $0x94] ss:$12 sps:$4 sm:$0xff]   ;;  %v16885_v9 = vld [vmem:[#allocation5 + $0xd8] ss:$12 sps:$4 sm:$0xff]  }
 0x15b   : > { %4362 = vmatprep.subr.bf16.mxu1 %v16876_v53 }
 0x15d   : > { %2033 = vmatpush1.bf16.msra.mxu0 %v16820_v54  ;;  %v16884_v54 = vld [vmem:[#allocation5 + $0x8] ss:$12 sps:$4 sm:$0xff]  }
 0x15e   : > { %2034 = vmatprep.subr.bf16.mxu0 %v16825_v55 }
 0x161   : > { %2035 = vmatpush1.bf16.msra.mxu0 %v16823_v36  ;;  %v16888_v36 = vld [vmem:[#allocation5 + $0xe0] ss:$12 sps:$4 sm:$0xff]  }
 0x162   : > { %2036 = vmatprep.subr.bf16.mxu0 %v16828_v56  ;;  %v16874_v56 = vld [vmem:[#allocation5 + $0x90] ss:$12 sps:$4 sm:$0xff]  }
 0x163   : > { %4363 = vmatpush1.bf16.msra.mxu1 %v16874_v56  ;;  %v16913_v56 = vld [vmem:[#allocation5 + $0x158] ss:$12 sps:$4 sm:$0xff]  }
 0x165   : > { %2037 = vmatpush1.bf16.msra.mxu0 %v16826_v43  ;;  %v16879_v43 = vld [vmem:[#allocation5 + $0xac] ss:$12 sps:$4 sm:$0xff]  }
 0x166   : > { %2038 = vmatprep.subr.bf16.mxu0 %v16831_v57  ;;  %v16013_v38 = vpop.f32.mrb[8].mxu1  ;;  %v16889_v57 = vld [vmem:[#allocation5 + $0x20] ss:$12 sps:$4 sm:$0xff]   ;;  %4364 = vmatprep.subr.bf16.mxu1 %v16879_v43  ;;  %v16910_v43 = vld [vmem:[#allocation5 + $0x150] ss:$12 sps:$4 sm:$0xff]  }
 0x167   : > { %v16014_v41 = vpop.f32.mrb[9].mxu1  ;;  %4365 = vmatpush1.bf16.msra.mxu1 %v16877_v60  ;;  %v16917_v60 = vld [vmem:[#allocation5 + $0x16c] ss:$12 sps:$4 sm:$0xff]  }
 0x168   : > { %v16015_v44 = vadd.f32 %v16014_v41, %v16013_v38  ;;  %v16016_v45 = vpop.f32.mrb[10].mxu1  ;;  %4366 = vmatprep.subr.bf16.mxu1 %v16882_v62 }
 0x169   : > { %2039 = vmatpush1.bf16.msra.mxu0 %v16829_v59  ;;  %v16017_v48 = vpop.f32.mrb[11].mxu1  ;;  %v16893_v59 = vld [vmem:[#allocation5 + $0xf8] ss:$12 sps:$4 sm:$0xff]  }
 0x16a   : > { %2040 = vmatprep.subr.bf16.mxu0 %v16834_v47  ;;  %v19363_v50 = vadd.f32 %v16015_v44, %v2110_v37  ;;  %v16018_v51 = vadd.f32 %v16017_v48, %v16016_v45  ;;  %v2118_v47 = vadd.f32 %v19351_v7, %v451_v30  ;;  %v16903_v7 = vld [vmem:[#allocation5 + $0x128] ss:$12 sps:$4 sm:$0xff]  }
 0x16b   : > { %4367 = vmatpush1.bf16.msra.mxu1 %v16880_v5  ;;  %v16923_v5 = vld [vmem:[#allocation5 + $0x248] ss:$12 sps:$4 sm:$0xff]  }
 0x16c   : > { %v19365_v55 = vadd.f32 %v16018_v51, %v2113_v42  ;;  %4368 = vmatprep.subr.bf16.mxu1 %v16887_v8 }
 0x16d   : > { %2041 = vmatpush1.bf16.msra.mxu0 %v16832_v1 }
 0x16e   : > { %2042 = vmatprep.subr.bf16.mxu0 %v16837_v2  ;;  %v16019_v61 = vpop.f32.mrb[12].mxu1 }
 0x16f   : > { %v16020_v52 = vpop.f32.mrb[13].mxu1  ;;  %4369 = vmatpush1.bf16.msra.mxu1 %v16885_v9 }
 0x170   : > { %v16021_v1 = vadd.f32 %v16020_v52, %v16019_v61  ;;  %v16022_v2 = vpop.f32.mrb[14].mxu1  ;;  %v16915_v52 = vld [vmem:[#allocation5 + $0x168] ss:$12 sps:$4 sm:$0xff]  }
 0x171   : > { %2043 = vmatpush1.bf16.msra.mxu0 %v16835_v4  ;;  %v16023_v4 = vpop.f32.mrb[15].mxu1 }
 0x172   : > { %2044 = vmatprep.subr.bf16.mxu0 %v16840_v6  ;;  %v2166_v6 = vadd.f32 %v16021_v1, %v2118_v47  ;;  %v16918_v47 = vld [vmem:[#allocation5 + $0x170] ss:$12 sps:$4 sm:$0xff]  }
 0x173   : > { %v16922_v4 = vld [vmem:[#allocation5 + $0x184] ss:$12 sps:$4 sm:$0xff]  }
 0x175   : > { %2045 = vmatpush1.bf16.msra.mxu0 %v16838_v11  ;;  %v16892_v11 = vld [vmem:[#allocation5 + $0xf4] ss:$12 sps:$4 sm:$0xff]  }
 0x176   : > { %2046 = vmatprep.subr.bf16.mxu0 %v16843_v12  ;;  %v16904_v12 = vld [vmem:[#allocation5 + $0x68] ss:$12 sps:$4 sm:$0xff]   ;;  %4370 = vmatprep.subr.bf16.mxu1 %v16892_v11 }
 0x177   : > { %4371 = vmatpush1.bf16.msra.mxu1 %v16890_v17 }
 0x179   : > { %2047 = vmatpush1.bf16.msra.mxu0 %v16841_v20  ;;  %v16897_v20 = vld [vmem:[#allocation5 + $0x10c] ss:$12 sps:$4 sm:$0xff]  }
 0x17a   : > { %2048 = vmatprep.subr.bf16.mxu0 %v16846_v21  ;;  %v16895_v21 = vld [vmem:[#allocation5 + $0x108] ss:$12 sps:$4 sm:$0xff]   ;;  %4372 = vmatprep.subr.bf16.mxu1 %v16897_v20 }
 0x17b   : > { %4373 = vmatpush1.bf16.msra.mxu1 %v16895_v21  ;;  %v19381_v21 = vsub.s32 1, %v19354_v10 }
 0x17d   : > { %2049 = vmatpush1.bf16.msra.mxu0 %v16844_v24  ;;  %v16907_v24 = vld [vmem:[#allocation5 + $0x13c] ss:$12 sps:$4 sm:$0xff]  }
 0x17e   : > { %2050 = vmatprep.subr.bf16.mxu0 %v16849_v25 }
 0x181   : > { %2051 = vmatpush1.bf16.msra.mxu0 %v16847_v28  ;;  %v16905_v28 = vld [vmem:[#allocation5 + $0x138] ss:$12 sps:$4 sm:$0xff]  }
 0x182   : > { %2052 = vmatprep.subr.bf16.mxu0 %v16852_v29 }
 0x185   : > { %2053 = vmatpush1.bf16.msra.mxu0 %v16850_v32 }
 0x186   : > { %2054 = vmatprep.subr.bf16.mxu0 %v16855_v33  ;;  %v16041_v23 = vpop.f32.mrb[16].mxu1 }
 0x187   : > { %v16042_v25 = vpop.f32.mrb[17].mxu1 }
 0x188   : > { %v16043_v14 = vadd.f32 %v16042_v25, %v16041_v23  ;;  %v16044_v19 = vpop.f32.mrb[18].mxu1 }
 0x189   : > { %2055 = vmatpush1.bf16.msra.mxu0 %v16853_v40  ;;  %v16045_v27 = vpop.f32.mrb[19].mxu1 }
 0x18a   : > { %16109 = vmatprep.subr.bf16.mxu0 %v16883_v46  ;;  %v2206_v29 = vadd.f32 %v16043_v14, %v19363_v50  ;;  %v16046_v30 = vadd.f32 %v16045_v27, %v16044_v19 }
 0x18c   : > { %2057 = vmatmul.mubr.bf16.vlgmr.msra.gmra.mrb[0].mxu0 %v17672_v58  ;;  %v2209_v31 = vadd.f32 %v16046_v30, %v19365_v55 }
 0x18d   : > { %2066 = vmatprep.mubr.bf16.mxu0 %v19338_v15  ;;  %16110 = vmatpush3.bf16.msra.mxu0 %v16884_v54  ;;  %v16899_v15 = vld [vmem:[#allocation5 + $0x50] ss:$12 sps:$4 sm:$0xff]  }
 0x18e   : > { %16111 = vmatprep.subr.bf16.mxu0 %v16888_v36  ;;  %v16047_v32 = vpop.f32.mrb[20].mxu1  ;;  %v16912_v36 = vld [vmem:[#allocation5 + $0x154] ss:$12 sps:$4 sm:$0xff]  }
 0x18f   : > { %v16048_v33 = vpop.f32.mrb[21].mxu1 }
 0x190   : > { %v16049_v34 = vadd.f32 %v16048_v33, %v16047_v32  ;;  %v16050_v35 = vpop.f32.mrb[22].mxu1 }
 0x191   : > { %16112 = vmatpush3.bf16.msra.mxu0 %v16889_v57  ;;  %v16051_v37 = vpop.f32.mrb[23].mxu1  ;;  %v16914_v57 = vld [vmem:[#allocation5 + $0x98] ss:$12 sps:$4 sm:$0xff]  }
 0x192   : > { %16113 = vmatprep.subr.bf16.mxu0 %v16893_v59  ;;  %v2214_v38 = vadd.f32 %v16049_v34, %v2166_v6 }
 0x194   : > { %2067 = vmatmul.mubr.bf16.gmra.mrb[4].mxu0 %v19342_v18  ;;  %v16902_v18 = vld [vmem:[#allocation5 + $0x124] ss:$12 sps:$4 sm:$0xff]  }
 0x195   : > { %16114 = vmatpush3.bf16.msra.mxu0 %v16894_v63  ;;  %4374 = vmatprep.subr.bf16.mxu1 %v16902_v18  ;;  %v16919_v63 = vld [vmem:[#allocation5 + $0xb0] ss:$12 sps:$4 sm:$0xff]   ;;  %v17673_v18 = vld [vmem:[%s22231_s2] sm:$0x7] }
 0x196   : > { %16115 = vmatprep.subr.bf16.mxu0 %v16898_v3  ;;  %4375 = vmatpush1.bf16.msra.mxu1 %v16900_v22  ;;  %v447_v23 = vrot.slane %v17673_v18, %v19381_v21 }
 0x197   : > { %4376 = vmatprep.subr.bf16.mxu1 %v16907_v24 }
 0x199   : > { %16116 = vmatpush3.bf16.msra.mxu0 %v16899_v15 }
 0x19a   : > { %16117 = vmatprep.subr.bf16.mxu0 %v16903_v7  ;;  %4377 = vmatpush1.bf16.msra.mxu1 %v16905_v28 }
 0x19b   : > { %4378 = vmatprep.subr.bf16.mxu1 %v16912_v36 }
 0x19d   : > { %16118 = vmatpush3.bf16.msra.mxu0 %v16904_v12 }
 0x19e   : > { %16119 = vmatprep.subr.bf16.mxu0 %v16908_v16  ;;  %4379 = vmatpush1.bf16.msra.mxu1 %v16910_v43  ;;  %v16929_v43 = vld [vmem:[#allocation5 + $0x1a0] ss:$12 sps:$4 sm:$0xff]  }
 0x19f   : > { %4380 = vmatprep.subr.bf16.mxu1 %v16917_v60  ;;  %v16932_v60 = vld [vmem:[#allocation5 + $0x1b4] ss:$12 sps:$4 sm:$0xff]  }
 0x1a1   : > { %16120 = vmatpush3.bf16.msra.mxu0 %v16909_v0  ;;  %v19378_v0 = vsub.s32 0, %v19354_v10 }
 0x1a2   : > { %16121 = vmatprep.subr.bf16.mxu0 %v16913_v56  ;;  %4381 = vmatpush1.bf16.msra.mxu1 %v16915_v52 }
 0x1a3   : > { %4393 = vmatprep.subr.bf16.mxu1 %v16922_v4  ;;  %v443_v22 = vrot.slane %v17673_v18, %v19378_v0  ;;  %v16930_v4 = vld [vmem:[#allocation5 + $0x1b0] ss:$12 sps:$4 sm:$0xff]   ;;  %v16937_v18 = vld [vmem:[#allocation5 + $0x1cc] ss:$12 sps:$4 sm:$0xff]  }
 0x1a5   : > { %16122 = vmatpush3.bf16.msra.mxu0 %v16914_v57 }
 0x1a6   : > { %v16069_v39 = vpop.f32.mrb[24].mxu1  ;;  %16123 = vmatprep.subr.bf16.mxu0 %v16918_v47  ;;  %v16933_v47 = vld [vmem:[#allocation5 + $0x278] ss:$12 sps:$4 sm:$0xff]  }
 0x1a7   : > { %v16070_v40 = vpop.f32.mrb[25].mxu1 }
 0x1a8   : > { %v16071_v41 = vadd.f32 %v16070_v40, %v16069_v39  ;;  %v16072_v42 = vpop.f32.mrb[26].mxu1  ;;  %v16920_v39 = vld [vmem:[#allocation5 + $0x180] ss:$12 sps:$4 sm:$0xff]   ;;  %v16924_v40 = vld [vmem:[#allocation5 + $0x188] ss:$12 sps:$4 sm:$0xff]  }
 0x1a9   : > { %v16073_v44 = vpop.f32.mrb[27].mxu1  ;;  %16124 = vmatpush3.bf16.msra.mxu0 %v16919_v63 }
 0x1aa   : > { %v2254_v45 = vadd.f32 %v16071_v41, %v2206_v29  ;;  %v16074_v46 = vadd.f32 %v16073_v44, %v16072_v42  ;;  %16131 = vmatprep.subr.bf16.mxu0 %v16923_v5  ;;  %v16927_v44 = vld [vmem:[#allocation5 + $0x19c] ss:$12 sps:$4 sm:$0xff]  }
 0x1ac   : > { %v2257_v48 = vadd.f32 %v16074_v46, %v2209_v31 }
 0x1ae   : > { %v16075_v49 = vpop.f32.mrb[28].mxu1 }
 0x1af   : > { %v16076_v50 = vpop.f32.mrb[29].mxu1 }
 0x1b0   : > { %v16077_v51 = vadd.f32 %v16076_v50, %v16075_v49  ;;  %v16078_v53 = vpop.f32.mrb[30].mxu1 }
 0x1b1   : > { %v16079_v54 = vpop.f32.mrb[31].mxu1 }
 0x1b2   : > { %v2262_v55 = vadd.f32 %v16077_v51, %v2214_v38 }
 0x1c6   : > { %v16097_v58 = vpop.f32.mrb[32].mxu1 }
 0x1c7   : > { %v16098_v59 = vpop.f32.mrb[33].mxu1 }
 0x1c8   : > { %v16099_v61 = vadd.f32 %v16098_v59, %v16097_v58  ;;  %v16100_v62 = vpop.f32.mrb[34].mxu1 }
 0x1c9   : > { %v16101_v1 = vpop.f32.mrb[35].mxu1 }
 0x1ca   : > { %v2302_v2 = vadd.f32 %v16099_v61, %v2254_v45  ;;  %v16102_v3 = vadd.f32 %v16101_v1, %v16100_v62  ;;  %v16928_v45 = vld [vmem:[#allocation5 + $0x260] ss:$12 sps:$4 sm:$0xff]  }
 0x1cc   : > { %v2317_v6 = vmax.f32 %v2302_v2, 0.0  ;;  %v2305_v8 = vadd.f32 %v16102_v3, %v2257_v48 }
 0x1ce   : > { %v2320_v15 = vmax.f32 %v2305_v8, 0.0  ;;  %v16103_v7 = vpop.f32.mrb[36].mxu1 }
 0x1cf   : > { %v16104_v9 = vpop.f32.mrb[37].mxu1 }
 0x1d0   : > { %v19373_v11 = vpack.c.bf16 %v2320_v15, %v2317_v6  ;;  %v16105_v12 = vadd.f32 %v16104_v9, %v16103_v7  ;;  %v16106_v16 = vpop.f32.mrb[38].mxu1  ;;  %v16934_v7 = vld [vmem:[#allocation5 + $0x1b8] ss:$12 sps:$4 sm:$0xff]  }
 0x1d1   : > { %v16107_v17 = vpop.f32.mrb[39].mxu1 }
 0x1d2   : > { %v19375_v20 = vadd.f32 %v16105_v12, %v2262_v55  ;;  %v16925_v55 = vld [vmem:[#allocation5 + $0x198] ss:$12 sps:$4 sm:$0xff]  }
 0x25f   : > { %v2058_v24 = vpop.f32.mrb[0].mxu0 }
 0x260   : > { %v16285_v25 = vadd.f32 %v2058_v24, %v443_v22  ;;  %v2060_v14 = vpop.f32.mrb[1].mxu0 }
 0x261   : > { %v16286_v19 = vadd.f32 %v2060_v14, %v447_v23  ;;  %v2062_v27 = vpop.f32.mrb[2].mxu0 }
 0x262   : > { %v16287_v28 = vadd.f32 %v2062_v27, %v443_v22  ;;  %v2064_v29 = vpop.f32.mrb[3].mxu0  ;;  %v2315_v31 = vmax.f32 %v16285_v25, 0.0  ;;  %v16935_v27 = vld [vmem:[#allocation5 + $0x1c8] ss:$12 sps:$4 sm:$0xff]  }
 0x263   : > { %v16288_v30 = vadd.f32 %v2064_v29, %v447_v23  ;;  %v2316_v33 = vmax.f32 %v16286_v19, 0.0 }
 0x264   : > { %v2318_v32 = vmax.f32 %v16287_v28, 0.0  ;;  %v16939_v28 = vld [vmem:[#allocation5 + $0x1d0] ss:$12 sps:$4 sm:$0xff]  }
 0x265   : > { %v2319_v34 = vmax.f32 %v16288_v30, 0.0  ;;  %v16942_v30 = vld [vmem:[#allocation5 + $0x1e4] ss:$12 sps:$4 sm:$0xff]  }
 0x266   : > { %v19388_v35 = vpack.c.bf16 %v2318_v32, %v2315_v31  ;;  %v16943_v31 = vld [vmem:[#allocation5 + $0x2a8] ss:$12 sps:$4 sm:$0xff]  }
 0x267   : > { %v19390_v37 = vpack.c.bf16 %v2319_v34, %v2316_v33  ;;  %v2068_v38 = vpop.f32.mrb[4].mxu0  ;;  %v16940_v34 = vld [vmem:[#allocation5 + $0x1e0] ss:$12 sps:$4 sm:$0xff]  }
 0x268   : > { %v16289_v41 = vadd.f32 %v2068_v38, %v443_v22  ;;  %v2070_v42 = vpop.f32.mrb[5].mxu0  ;;  %v2350_v51 = vshrl.u32 %v19388_v35, 16  ;;  %v2352_v36 = vshll.u32 %v19388_v35, 16  ;;  %v2337_v62 = vrot.slane %v19388_v35, 5  ;;  %v16938_v22 = vld [vmem:[#allocation5 + $0x290] ss:$12 sps:$4 sm:$0xff]  }
 0x269   : > { %v16290_v46 = vadd.f32 %v2070_v42, %v447_v23  ;;  %v2072_v48 = vpop.f32.mrb[6].mxu0  ;;  %4382 = vmatprep.mubr.bf16.mxu1 %v19390_v37  ;;  %4640 = vmatprep.mubr.bf16.mxu0 %v19390_v37  ;;  %v2357_v49 = vshrl.u32 %v19390_v37, 16  ;;  %v2359_v50 = vshll.u32 %v19390_v37, 16  ;;  %v2340_v9 = vrot.slane %v19390_v37, 5  ;;  %v16944_v38 = vld [vmem:[#allocation5 + $0x1e8] ss:$12 sps:$4 sm:$0xff]  }
 0x26a   : > { %v2321_v53 = vmax.f32 %v16289_v41, 0.0  ;;  %v2073_v54 = vpop.f32.mrb[7].mxu0  ;;  %4383 = vmatmul.mubr.bf16.vlgmr.msra.gmra.mrb[40].mxu1 %v19388_v35  ;;  %4641 = vmatmul.mubr.bf16.vlgmr.msra.gmra.mrb[8].mxu0 %v19388_v35  ;;  %v2374_v52 = vrot.slane %v2350_v51, 5  ;;  %v2375_v5 = vrot.slane %v2352_v36, 6  ;;  %v16945_v41 = vld [vmem:[#allocation5 + $0x1f8] ss:$12 sps:$4 sm:$0xff]  }
 0x26b   : > { %v2322_v56 = vmax.f32 %v16290_v46, 0.0  ;;  %4394 = vmatpush1.bf16.msra.mxu1 %v16920_v39  ;;  %16132 = vmatpush3.bf16.msra.mxu0 %v16924_v40  ;;  %v2386_v57 = vrot.slane %v2357_v49, 5  ;;  %v2387_v58 = vrot.slane %v2359_v50, 6  ;;  %v16947_v39 = vld [vmem:[#allocation5 + $0x1fc] ss:$12 sps:$4 sm:$0xff]   ;;  %v2323_v46 = vmax.f32 %v19375_v20, 0.0 }
 0x26c   : > { %v2327_v59 = vpack.c.bf16 %v2321_v53, %v2321_v53  ;;  %4395 = vmatprep.subr.bf16.mxu1 %v16927_v44  ;;  %16133 = vmatprep.subr.bf16.mxu0 %v16928_v45  ;;  %v2376_v14 = vor.u32 %v2375_v5, %v2374_v52  ;;  %v16948_v40 = vld [vmem:[#allocation5 + $0x2c0] ss:$12 sps:$4 sm:$0xff]   ;;  %v16953_v45 = vld [vmem:[#allocation5 + $0x2d8] ss:$12 sps:$4 sm:$0xff]   ;;  %v16950_v48 = vld [vmem:[#allocation5 + $0x210] ss:$12 sps:$4 sm:$0xff]  }
 0x26d   : > { %v2328_v61 = vpack.c.bf16 %v2322_v56, %v2322_v56  ;;  %v2388_v63 = vor.u32 %v2387_v58, %v2386_v57  ;;  %v16949_v42 = vld [vmem:[#allocation5 + $0x200] ss:$12 sps:$4 sm:$0xff]   ;;  %v16954_v53 = vld [vmem:[#allocation5 + $0x218] ss:$12 sps:$4 sm:$0xff]   ;;  %v19421_v56 = vpack.c.bf16 %v2323_v46, %v2323_v46  ;;  %v16959_v57 = vld [vmem:[#allocation5 + $0x230] ss:$12 sps:$4 sm:$0xff]  }
 0x26e   : > { %v2338_v1 = vrot.slane %v2327_v59, 5  ;;  %v2378_v2 = vshrl.u32 %v2327_v59, 16  ;;  %v2381_v3 = vshll.u32 %v2327_v59, 16  ;;  %v16952_v44 = vld [vmem:[#allocation5 + $0x214] ss:$12 sps:$4 sm:$0xff]  }
 0x26f   : > { %v2341_v6 = vrot.slane %v2328_v61, 5  ;;  %v2390_v8 = vshrl.u32 %v2328_v61, 16  ;;  %v2393_v15 = vshll.u32 %v2328_v61, 16  ;;  %4396 = vmatpush1.bf16.msra.mxu1 %v16925_v55  ;;  %16134 = vmatpush3.bf16.msra.mxu0 %v16929_v43  ;;  %v16957_v54 = vld [vmem:[#allocation5 + $0x22c] ss:$12 sps:$4 sm:$0xff]   ;;  %v2344_v61 = vrot.slane %v19421_v56, 5 }
 0x270   : > { %v2380_v12 = vrot.slane %v2378_v2, 5  ;;  %v2383_v16 = vrot.slane %v2381_v3, 6  ;;  %4397 = vmatprep.subr.bf16.mxu1 %v16932_v60  ;;  %v2339_v17 = vsel %vm2336_vm0, %v2337_v62, %v2338_v1  ;;  %16135 = vmatprep.subr.bf16.mxu0 %v16933_v47  ;;  %v16958_v55 = vld [vmem:[#allocation5 + $0x2f0] ss:$12 sps:$4 sm:$0xff]   ;;  %v16955_v43 = vld [vmem:[#allocation5 + $0x228] ss:$12 sps:$4 sm:$0xff]  }
 0x271   : > { %v2392_v23 = vrot.slane %v2390_v8, 5  ;;  %v2395_v24 = vrot.slane %v2393_v15, 6  ;;  %4425 = vmatprep.mubr.bf16.mxu1 %v2339_v17  ;;  %4681 = vmatprep.mubr.bf16.mxu0 %v2339_v17  ;;  %v19412_v25 = vsel %vm2336_vm0, %v2340_v9, %v2341_v6  ;;  %v16962_v58 = vld [vmem:[#allocation5 + $0x244] ss:$12 sps:$4 sm:$0xff]   ;;  %v16963_v59 = vld [vmem:[#allocation5 + $0x3c8] ss:$12 sps:$4 sm:$0xff]  }
 0x272   : > { %v2384_v19 = vor.u32 %v2383_v16, %v2380_v12  ;;  %v16960_v20 = vld [vmem:[#allocation5 + $0x240] ss:$12 sps:$4 sm:$0xff]   ;;  %v16964_v60 = vld [vmem:[#allocation5 + $0x308] ss:$12 sps:$4 sm:$0xff]   ;;  %v2343_v47 = vrot.slane %v19373_v11, 5 }
 0x273   : > { %4398 = vmatpush1.bf16.msra.mxu1 %v16930_v4  ;;  %16136 = vmatpush3.bf16.msra.mxu0 %v16934_v7  ;;  %v2396_v29 = vor.u32 %v2395_v24, %v2392_v23  ;;  %v16967_v62 = vld [vmem:[#allocation5 + $0x25c] ss:$12 sps:$4 sm:$0xff]   ;;  %v16968_v52 = vld [vmem:[#allocation5 + $0x3e0] ss:$12 sps:$4 sm:$0xff]   ;;  %v16965_v1 = vld [vmem:[#allocation5 + $0x258] ss:$12 sps:$4 sm:$0xff]  }
 0x274   : > { %4399 = vmatprep.subr.bf16.mxu1 %v16937_v18  ;;  %16137 = vmatprep.subr.bf16.mxu0 %v16938_v22  ;;  %v19415_v32 = vsel %vm2373_vm1, %v2376_v14, %v2384_v19  ;;  %v16969_v2 = vld [vmem:[#allocation5 + $0x320] ss:$12 sps:$4 sm:$0xff]   ;;  %v16973_v4 = vld [vmem:[#allocation5 + $0x3f8] ss:$12 sps:$4 sm:$0xff]   ;;  %v16970_v5 = vld [vmem:[#allocation5 + $0x270] ss:$12 sps:$4 sm:$0xff]  }
 0x275   : > { %v19418_v33 = vsel %vm2373_vm1, %v2388_v63, %v2396_v29  ;;  %v19427_v63 = vsel %vm2336_vm0, %v2343_v47, %v2344_v61  ;;  %v16972_v3 = vld [vmem:[#allocation5 + $0x274] ss:$12 sps:$4 sm:$0xff]   ;;  %v16974_v6 = vld [vmem:[#allocation5 + $0x338] ss:$12 sps:$4 sm:$0xff]   ;;  %v16978_v15 = vld [vmem:[#allocation5 + $0x410] ss:$12 sps:$4 sm:$0xff]  }
 0x276   : > { %v16977_v8 = vld [vmem:[#allocation5 + $0x28c] ss:$12 sps:$4 sm:$0xff]   ;;  %v16975_v7 = vld [vmem:[#allocation5 + $0x288] ss:$12 sps:$4 sm:$0xff]   ;;  %v16979_v9 = vld [vmem:[#allocation5 + $0x350] ss:$12 sps:$4 sm:$0xff]  }
 0x277   : > { %4400 = vmatpush1.bf16.msra.mxu1 %v16935_v27  ;;  %16138 = vmatpush3.bf16.msra.mxu0 %v16939_v28  ;;  %v16982_v12 = vld [vmem:[#allocation5 + $0x2a4] ss:$12 sps:$4 sm:$0xff]   ;;  %v16983_v16 = vld [vmem:[#allocation5 + $0x428] ss:$12 sps:$4 sm:$0xff]   ;;  %v16980_v17 = vld [vmem:[#allocation5 + $0x2a0] ss:$12 sps:$4 sm:$0xff]  }
 0x278   : > { %4401 = vmatprep.subr.bf16.mxu1 %v16942_v30  ;;  %16139 = vmatprep.subr.bf16.mxu0 %v16943_v31  ;;  %v16984_v18 = vld [vmem:[#allocation5 + $0x368] ss:$12 sps:$4 sm:$0xff]   ;;  %v16988_v23 = vld [vmem:[#allocation5 + $0x440] ss:$12 sps:$4 sm:$0xff]   ;;  %v16985_v24 = vld [vmem:[#allocation5 + $0x2b8] ss:$12 sps:$4 sm:$0xff]  }
 0x279   : > { %v16987_v22 = vld [vmem:[#allocation5 + $0x2bc] ss:$12 sps:$4 sm:$0xff]   ;;  %v16989_v14 = vld [vmem:[#allocation5 + $0x380] ss:$12 sps:$4 sm:$0xff]   ;;  %v16993_v27 = vld [vmem:[#allocation5 + $0x458] ss:$12 sps:$4 sm:$0xff]  }
 0x27a   : > { %v16992_v19 = vld [vmem:[#allocation5 + $0x2d4] ss:$12 sps:$4 sm:$0xff]   ;;  %v16990_v28 = vld [vmem:[#allocation5 + $0x2d0] ss:$12 sps:$4 sm:$0xff]   ;;  %v16994_v29 = vld [vmem:[#allocation5 + $0x398] ss:$12 sps:$4 sm:$0xff]  }
 0x27b   : > { %4402 = vmatpush1.bf16.msra.mxu1 %v16940_v34  ;;  %16140 = vmatpush3.bf16.msra.mxu0 %v16944_v38  ;;  %v16997_v30 = vld [vmem:[#allocation5 + $0x2ec] ss:$12 sps:$4 sm:$0xff]   ;;  %v16998_v31 = vld [vmem:[#allocation5 + $0x470] ss:$12 sps:$4 sm:$0xff]   ;;  %v16995_v34 = vld [vmem:[#allocation5 + $0x2e8] ss:$12 sps:$4 sm:$0xff]  }
 0x27c   : > { %4403 = vmatprep.subr.bf16.mxu1 %v16947_v39  ;;  %16141 = vmatprep.subr.bf16.mxu0 %v16948_v40  ;;  %v16999_v38 = vld [vmem:[#allocation5 + $0x3b0] ss:$12 sps:$4 sm:$0xff]   ;;  %v17003_v40 = vld [vmem:[#allocation5 + $0x548] ss:$12 sps:$4 sm:$0xff]   ;;  %v17008_v46 = vld [vmem:[#allocation5 + $0x560] ss:$12 sps:$4 sm:$0xff]  }
 0x27d   : > { %v17002_v39 = vld [vmem:[#allocation5 + $0x304] ss:$12 sps:$4 sm:$0xff]   ;;  %v17017_v37 = vld [vmem:[#allocation5 + $0x34c] ss:$12 sps:$4 sm:$0xff]   ;;  %v17024_v61 = vld [vmem:[#allocation5 + $0x4e8] ss:$12 sps:$4 sm:$0xff]  }
 0x27e   : > { %v17020_v47 = vld [vmem:[#allocation5 + $0x360] ss:$12 sps:$4 sm:$0xff]   ;;  %v17054_v35 = vld [vmem:[#allocation5 + $0x638] ss:$12 sps:$4 sm:$0xff]  }
 0x27f   : > { %4404 = vmatpush1.bf16.msra.mxu1 %v16945_v41  ;;  %16142 = vmatpush3.bf16.msra.mxu0 %v16949_v42  ;;  %v2361_v41 = vrot.slane %v2359_v50, 1  ;;  %v17000_v42 = vld [vmem:[#allocation5 + $0x300] ss:$12 sps:$4 sm:$0xff]   ;;  %v17005_v50 = vld [vmem:[#allocation5 + $0x318] ss:$12 sps:$4 sm:$0xff]  }
 0x280   : > { %4405 = vmatprep.subr.bf16.mxu1 %v16952_v44  ;;  %16143 = vmatprep.subr.bf16.mxu0 %v16953_v45  ;;  %v17004_v44 = vld [vmem:[#allocation5 + $0x488] ss:$12 sps:$4 sm:$0xff]  }
 0x281   : > { %v17007_v45 = vld [vmem:[#allocation5 + $0x31c] ss:$12 sps:$4 sm:$0xff]  }
 0x283   : > { %4406 = vmatpush1.bf16.msra.mxu1 %v16950_v48  ;;  %16144 = vmatpush3.bf16.msra.mxu0 %v16954_v53  ;;  %v19436_v48 = vor.u32 %v2361_v41, %v2357_v49  ;;  %v17009_v53 = vld [vmem:[#allocation5 + $0x4a0] ss:$12 sps:$4 sm:$0xff]   ;;  %v17018_v49 = vld [vmem:[#allocation5 + $0x590] ss:$12 sps:$4 sm:$0xff]  }
 0x284   : > { %4407 = vmatprep.subr.bf16.mxu1 %v16957_v54  ;;  %16145 = vmatprep.subr.bf16.mxu0 %v16958_v55  ;;  %v17012_v54 = vld [vmem:[#allocation5 + $0x334] ss:$12 sps:$4 sm:$0xff]   ;;  %v17013_v55 = vld [vmem:[#allocation5 + $0x578] ss:$12 sps:$4 sm:$0xff]   ;;  %v17067_v41 = vld [vmem:[#allocation5 + $0x43c] ss:$12 sps:$4 sm:$0xff]  }
 0x287   : > { %4408 = vmatpush1.bf16.msra.mxu1 %v16955_v43  ;;  %16146 = vmatpush3.bf16.msra.mxu0 %v16959_v57  ;;  %v17010_v43 = vld [vmem:[#allocation5 + $0x330] ss:$12 sps:$4 sm:$0xff]   ;;  %v17014_v57 = vld [vmem:[#allocation5 + $0x4b8] ss:$12 sps:$4 sm:$0xff]  }
 0x288   : > { %4409 = vmatprep.subr.bf16.mxu1 %v16962_v58  ;;  %16153 = vmatprep.subr.bf16.mxu0 %v16963_v59  ;;  %v17015_v58 = vld [vmem:[#allocation5 + $0x348] ss:$12 sps:$4 sm:$0xff]   ;;  %v17019_v59 = vld [vmem:[#allocation5 + $0x4d0] ss:$12 sps:$4 sm:$0xff]  }
 0x28a   : > { %4682 = vmatmul.mubr.bf16.vlgmr.msra.gmra.mrb[12].mxu0 %v19373_v11 }
 0x28b   : > { %4410 = vmatpush1.bf16.msra.mxu1 %v16960_v20  ;;  %16154 = vmatpush3.bf16.msra.mxu0 %v16964_v60  ;;  %v17022_v20 = vld [vmem:[#allocation5 + $0x364] ss:$12 sps:$4 sm:$0xff]   ;;  %v17023_v60 = vld [vmem:[#allocation5 + $0x5a8] ss:$12 sps:$4 sm:$0xff]  }
 0x28c   : > { %4722 = vmatprep.mubr.bf16.mxu0 %v19427_v63  ;;  %4411 = vmatprep.subr.bf16.mxu1 %v16967_v62  ;;  %v17027_v62 = vld [vmem:[#allocation5 + $0x37c] ss:$12 sps:$4 sm:$0xff]  }
 0x28d   : > { %16155 = vmatprep.subr.bf16.mxu0 %v16968_v52  ;;  %v17028_v52 = vld [vmem:[#allocation5 + $0x5c0] ss:$12 sps:$4 sm:$0xff]  }
 0x28f   : > { %4412 = vmatpush1.bf16.msra.mxu1 %v16965_v1  ;;  %16156 = vmatpush3.bf16.msra.mxu0 %v16969_v2  ;;  %v17029_v1 = vld [vmem:[#allocation5 + $0x500] ss:$12 sps:$4 sm:$0xff]  }
 0x290   : > { %4413 = vmatprep.subr.bf16.mxu1 %v16972_v3  ;;  %16157 = vmatprep.subr.bf16.mxu0 %v16973_v4  ;;  %v17032_v2 = vld [vmem:[#allocation5 + $0x394] ss:$12 sps:$4 sm:$0xff]   ;;  %v17033_v3 = vld [vmem:[#allocation5 + $0x5d8] ss:$12 sps:$4 sm:$0xff]   ;;  %v17030_v4 = vld [vmem:[#allocation5 + $0x390] ss:$12 sps:$4 sm:$0xff]  }
 0x293   : > { %4414 = vmatpush1.bf16.msra.mxu1 %v16970_v5  ;;  %16158 = vmatpush3.bf16.msra.mxu0 %v16974_v6  ;;  %v17034_v5 = vld [vmem:[#allocation5 + $0x518] ss:$12 sps:$4 sm:$0xff]  }
 0x294   : > { %4415 = vmatprep.subr.bf16.mxu1 %v16977_v8  ;;  %16159 = vmatprep.subr.bf16.mxu0 %v16978_v15  ;;  %v17037_v6 = vld [vmem:[#allocation5 + $0x3ac] ss:$12 sps:$4 sm:$0xff]   ;;  %v17038_v8 = vld [vmem:[#allocation5 + $0x5f0] ss:$12 sps:$4 sm:$0xff]   ;;  %v17035_v15 = vld [vmem:[#allocation5 + $0x3a8] ss:$12 sps:$4 sm:$0xff]  }
 0x297   : > { %4416 = vmatpush1.bf16.msra.mxu1 %v16975_v7  ;;  %16160 = vmatpush3.bf16.msra.mxu0 %v16979_v9  ;;  %v17039_v7 = vld [vmem:[#allocation5 + $0x530] ss:$12 sps:$4 sm:$0xff]  }
 0x298   : > { %4417 = vmatprep.subr.bf16.mxu1 %v16982_v12  ;;  %16161 = vmatprep.subr.bf16.mxu0 %v16983_v16  ;;  %v17042_v9 = vld [vmem:[#allocation5 + $0x3c4] ss:$12 sps:$4 sm:$0xff]   ;;  %v2354_v12 = vrot.slane %v2352_v36, 1  ;;  %v17043_v16 = vld [vmem:[#allocation5 + $0x6c8] ss:$12 sps:$4 sm:$0xff]  }
 0x299   : > { %v17049_v36 = vld [vmem:[#allocation5 + $0x620] ss:$12 sps:$4 sm:$0xff]  }
 0x29b   : > { %4418 = vmatpush1.bf16.msra.mxu1 %v16980_v17  ;;  %16162 = vmatpush3.bf16.msra.mxu0 %v16984_v18  ;;  %v17040_v17 = vld [vmem:[#allocation5 + $0x3c0] ss:$12 sps:$4 sm:$0xff]   ;;  %v17044_v18 = vld [vmem:[#allocation5 + $0x608] ss:$12 sps:$4 sm:$0xff]  }
 0x29c   : > { %4419 = vmatprep.subr.bf16.mxu1 %v16987_v22  ;;  %16163 = vmatprep.subr.bf16.mxu0 %v16988_v23  ;;  %v19444_v22 = vor.u32 %v2354_v12, %v2350_v51  ;;  %v17047_v23 = vld [vmem:[#allocation5 + $0x3dc] ss:$12 sps:$4 sm:$0xff]   ;;  %v17057_v51 = vld [vmem:[#allocation5 + $0x40c] ss:$12 sps:$4 sm:$0xff]  }
 0x29d   : > { %v17093_v12 = vld [vmem:[#allocation5 + $0x878] ss:$12 sps:$4 sm:$0xff]  }
 0x29f   : > { %4420 = vmatpush1.bf16.msra.mxu1 %v16985_v24  ;;  %16164 = vmatpush3.bf16.msra.mxu0 %v16989_v14  ;;  %v17048_v24 = vld [vmem:[#allocation5 + $0x6e0] ss:$12 sps:$4 sm:$0xff]   ;;  %v17045_v14 = vld [vmem:[#allocation5 + $0x3d8] ss:$12 sps:$4 sm:$0xff]  }
 0x2a0   : > { %4421 = vmatprep.subr.bf16.mxu1 %v16992_v19  ;;  %16165 = vmatprep.subr.bf16.mxu0 %v16993_v27  ;;  %v17052_v19 = vld [vmem:[#allocation5 + $0x3f4] ss:$12 sps:$4 sm:$0xff]   ;;  %v17053_v27 = vld [vmem:[#allocation5 + $0x6f8] ss:$12 sps:$4 sm:$0xff]  }
 0x2a3   : > { %4422 = vmatpush1.bf16.msra.mxu1 %v16990_v28  ;;  %16166 = vmatpush3.bf16.msra.mxu0 %v16994_v29  ;;  %v17050_v28 = vld [vmem:[#allocation5 + $0x3f0] ss:$12 sps:$4 sm:$0xff]  }
 0x2a4   : > { %4423 = vmatprep.subr.bf16.mxu1 %v16997_v30  ;;  %16167 = vmatprep.subr.bf16.mxu0 %v16998_v31  ;;  %v17058_v29 = vld [vmem:[#allocation5 + $0x710] ss:$12 sps:$4 sm:$0xff]   ;;  %v17055_v30 = vld [vmem:[#allocation5 + $0x408] ss:$12 sps:$4 sm:$0xff]  }
 0x2a5   : > { %v17059_v31 = vld [vmem:[#allocation5 + $0x650] ss:$12 sps:$4 sm:$0xff]  }
 0x2a7   : > { %4424 = vmatpush1.bf16.msra.mxu1 %v16995_v34  ;;  %16168 = vmatpush3.bf16.msra.mxu0 %v16999_v38  ;;  %v17062_v34 = vld [vmem:[#allocation5 + $0x424] ss:$12 sps:$4 sm:$0xff]   ;;  %v17063_v38 = vld [vmem:[#allocation5 + $0x728] ss:$12 sps:$4 sm:$0xff]  }
 0x2a8   : > { %4436 = vmatprep.subr.bf16.mxu1 %v17002_v39  ;;  %16175 = vmatprep.subr.bf16.mxu0 %v17003_v40  ;;  %v17060_v39 = vld [vmem:[#allocation5 + $0x420] ss:$12 sps:$4 sm:$0xff]   ;;  %v17064_v40 = vld [vmem:[#allocation5 + $0x668] ss:$12 sps:$4 sm:$0xff]  }
 0x2aa   : > { %4426 = vmatmul.mubr.bf16.vlgmr.msra.gmra.mrb[40].mxu1 %v19373_v11  ;;  %4723 = vmatmul.mubr.bf16.vlgmr.msra.gmra.mrb[16].mxu0 %v19412_v25 }
 0x2ab   : > { %4437 = vmatpush1.bf16.msra.mxu1 %v17000_v42  ;;  %4468 = vmatprep.mubr.bf16.mxu1 %v19427_v63  ;;  %v17025_v63 = vld [vmem:[#allocation5 + $0x378] ss:$12 sps:$4 sm:$0xff]   ;;  %v17068_v42 = vld [vmem:[#allocation5 + $0x740] ss:$12 sps:$4 sm:$0xff]  }
 0x2ac   : > { %16176 = vmatpush3.bf16.msra.mxu0 %v17004_v44  ;;  %4763 = vmatprep.mubr.bf16.mxu0 %v19436_v48  ;;  %v17065_v44 = vld [vmem:[#allocation5 + $0x438] ss:$12 sps:$4 sm:$0xff]  }
 0x2ad   : > { %4438 = vmatprep.subr.bf16.mxu1 %v17007_v45  ;;  %16177 = vmatprep.subr.bf16.mxu0 %v17008_v46  ;;  %v17069_v45 = vld [vmem:[#allocation5 + $0x680] ss:$12 sps:$4 sm:$0xff]  }
 0x2ae   : > { %v17072_v46 = vld [vmem:[#allocation5 + $0x454] ss:$12 sps:$4 sm:$0xff]  }
 0x2af   : > { %4439 = vmatpush1.bf16.msra.mxu1 %v17005_v50  ;;  %v17073_v50 = vld [vmem:[#allocation5 + $0x758] ss:$12 sps:$4 sm:$0xff]  }
 0x2b0   : > { %16178 = vmatpush3.bf16.msra.mxu0 %v17009_v53  ;;  %4440 = vmatprep.subr.bf16.mxu1 %v17012_v54  ;;  %v17070_v53 = vld [vmem:[#allocation5 + $0x450] ss:$12 sps:$4 sm:$0xff]   ;;  %v2364_v54 = vshrl.u32 %v19373_v11, 16 }
 0x2b1   : > { %16179 = vmatprep.subr.bf16.mxu0 %v17013_v55  ;;  %v2402_v55 = vshrl.u32 %v19421_v56, 16 }
 0x2b3   : > { %4441 = vmatpush1.bf16.msra.mxu1 %v17010_v43  ;;  %v2405_v43 = vshll.u32 %v19421_v56, 16 }
 0x2b4   : > { %16180 = vmatpush3.bf16.msra.mxu0 %v17014_v57  ;;  %4442 = vmatprep.subr.bf16.mxu1 %v17017_v37  ;;  %v17074_v57 = vld [vmem:[#allocation5 + $0x698] ss:$12 sps:$4 sm:$0xff]  }
 0x2b5   : > { %16181 = vmatprep.subr.bf16.mxu0 %v17018_v49  ;;  %v17077_v37 = vld [vmem:[#allocation5 + $0x46c] ss:$12 sps:$4 sm:$0xff]   ;;  %v17078_v49 = vld [vmem:[#allocation5 + $0x770] ss:$12 sps:$4 sm:$0xff]  }
 0x2b7   : > { %4443 = vmatpush1.bf16.msra.mxu1 %v17015_v58  ;;  %v2366_v58 = vshll.u32 %v19373_v11, 16 }
 0x2b8   : > { %16182 = vmatpush3.bf16.msra.mxu0 %v17019_v59  ;;  %4444 = vmatprep.subr.bf16.mxu1 %v17022_v20  ;;  %v17075_v59 = vld [vmem:[#allocation5 + $0x468] ss:$12 sps:$4 sm:$0xff]   ;;  %v2398_v20 = vrot.slane %v2364_v54, 5 }
 0x2b9   : > { %16183 = vmatprep.subr.bf16.mxu0 %v17023_v60  ;;  %v2399_v60 = vrot.slane %v2366_v58, 6  ;;  %v2368_v56 = vrot.slane %v2366_v58, 1  ;;  %v17140_v58 = vld [vmem:[#allocation5 + $0x5d4] ss:$12 sps:$4 sm:$0xff]  }
 0x2bb   : > { %4445 = vmatpush1.bf16.msra.mxu1 %v17020_v47  ;;  %v17079_v47 = vld [vmem:[#allocation5 + $0x6b0] ss:$12 sps:$4 sm:$0xff]  }
 0x2bc   : > { %16184 = vmatpush3.bf16.msra.mxu0 %v17024_v61  ;;  %4446 = vmatprep.subr.bf16.mxu1 %v17027_v62  ;;  %v17082_v61 = vld [vmem:[#allocation5 + $0x484] ss:$12 sps:$4 sm:$0xff]   ;;  %v2404_v62 = vrot.slane %v2402_v55, 5  ;;  %v17129_v55 = vld [vmem:[#allocation5 + $0x588] ss:$12 sps:$4 sm:$0xff]  }
 0x2bd   : > { %16185 = vmatprep.subr.bf16.mxu0 %v17028_v52  ;;  %v2407_v52 = vrot.slane %v2405_v43, 6  ;;  %v17134_v43 = vld [vmem:[#allocation5 + $0x5a4] ss:$12 sps:$4 sm:$0xff]  }
 0x2bf   : > { %4447 = vmatpush1.bf16.msra.mxu1 %v17025_v63  ;;  %v17083_v63 = vld [vmem:[#allocation5 + $0x848] ss:$12 sps:$4 sm:$0xff]   ;;  %v2408_v11 = vor.u32 %v2407_v52, %v2404_v62  ;;  %v17147_v52 = vld [vmem:[#allocation5 + $0x618] ss:$12 sps:$4 sm:$0xff]  }
 0x2c0   : > { %16186 = vmatpush3.bf16.msra.mxu0 %v17029_v1  ;;  %4448 = vmatprep.subr.bf16.mxu1 %v17032_v2  ;;  %v17080_v1 = vld [vmem:[#allocation5 + $0x480] ss:$12 sps:$4 sm:$0xff]   ;;  %v17084_v2 = vld [vmem:[#allocation5 + $0x788] ss:$12 sps:$4 sm:$0xff]  }
 0x2c1   : > { %16187 = vmatprep.subr.bf16.mxu0 %v17033_v3  ;;  %v2400_v3 = vor.u32 %v2399_v60, %v2398_v20  ;;  %v17143_v20 = vld [vmem:[#allocation5 + $0x5ec] ss:$12 sps:$4 sm:$0xff]   ;;  %v17141_v60 = vld [vmem:[#allocation5 + $0x5e8] ss:$12 sps:$4 sm:$0xff]  }
 0x2c2   : > { %v17149_v62 = vld [vmem:[#allocation5 + $0x61c] ss:$12 sps:$4 sm:$0xff]  }
 0x2c3   : > { %4449 = vmatpush1.bf16.msra.mxu1 %v17030_v4  ;;  %v19452_v4 = vor.u32 %v2368_v56, %v2364_v54  ;;  %v17131_v54 = vld [vmem:[#allocation5 + $0x58c] ss:$12 sps:$4 sm:$0xff]   ;;  %v17152_v56 = vld [vmem:[#allocation5 + $0x634] ss:$12 sps:$4 sm:$0xff]  }
 0x2c4   : > { %16188 = vmatpush3.bf16.msra.mxu0 %v17034_v5  ;;  %4450 = vmatprep.subr.bf16.mxu1 %v17037_v6  ;;  %v17087_v5 = vld [vmem:[#allocation5 + $0x49c] ss:$12 sps:$4 sm:$0xff]   ;;  %v17088_v6 = vld [vmem:[#allocation5 + $0x860] ss:$12 sps:$4 sm:$0xff]  }
 0x2c5   : > { %16189 = vmatprep.subr.bf16.mxu0 %v17038_v8  ;;  %v17085_v8 = vld [vmem:[#allocation5 + $0x498] ss:$12 sps:$4 sm:$0xff]  }
 0x2c7   : > { %4451 = vmatpush1.bf16.msra.mxu1 %v17035_v15  ;;  %v19458_v15 = vsel %vm2373_vm1, %v2400_v3, %v2408_v11  ;;  %v17158_v3 = vld [vmem:[#allocation5 + $0x664] ss:$12 sps:$4 sm:$0xff]   ;;  %v17156_v11 = vld [vmem:[#allocation5 + $0x660] ss:$12 sps:$4 sm:$0xff]  }
 0x2c8   : > { %16190 = vmatpush3.bf16.msra.mxu0 %v17039_v7  ;;  %4452 = vmatprep.subr.bf16.mxu1 %v17042_v9  ;;  %v17089_v7 = vld [vmem:[#allocation5 + $0x7a0] ss:$12 sps:$4 sm:$0xff]  }
 0x2c9   : > { %16197 = vmatprep.subr.bf16.mxu0 %v17043_v16  ;;  %v17092_v9 = vld [vmem:[#allocation5 + $0x4b4] ss:$12 sps:$4 sm:$0xff]   ;;  %v17094_v16 = vld [vmem:[#allocation5 + $0x7b8] ss:$12 sps:$4 sm:$0xff]  }
 0x2cb   : > { %4764 = vmatmul.mubr.bf16.vlgmr.msra.gmra.mrb[20].mxu0 %v19444_v22  ;;  %4453 = vmatpush1.bf16.msra.mxu1 %v17040_v17  ;;  %v17097_v17 = vld [vmem:[#allocation5 + $0x4cc] ss:$12 sps:$4 sm:$0xff]  }
 0x2cc   : > { %16198 = vmatpush3.bf16.msra.mxu0 %v17044_v18  ;;  %4804 = vmatprep.mubr.bf16.mxu0 %v19415_v32  ;;  %v17098_v18 = vld [vmem:[#allocation5 + $0x890] ss:$12 sps:$4 sm:$0xff]  }
 0x2cd   : > { %4454 = vmatprep.subr.bf16.mxu1 %v17047_v23  ;;  %16199 = vmatprep.subr.bf16.mxu0 %v17048_v24  ;;  %v17099_v23 = vld [vmem:[#allocation5 + $0x7d0] ss:$12 sps:$4 sm:$0xff]  }
 0x2ce   : > { %v17102_v24 = vld [vmem:[#allocation5 + $0x4e4] ss:$12 sps:$4 sm:$0xff]  }
 0x2cf   : > { %4455 = vmatpush1.bf16.msra.mxu1 %v17045_v14  ;;  %v17103_v14 = vld [vmem:[#allocation5 + $0x8a8] ss:$12 sps:$4 sm:$0xff]  }
 0x2d0   : > { %16200 = vmatpush3.bf16.msra.mxu0 %v17049_v36  ;;  %4456 = vmatprep.subr.bf16.mxu1 %v17052_v19  ;;  %v17100_v36 = vld [vmem:[#allocation5 + $0x4e0] ss:$12 sps:$4 sm:$0xff]   ;;  %v17104_v19 = vld [vmem:[#allocation5 + $0x7e8] ss:$12 sps:$4 sm:$0xff]  }
 0x2d1   : > { %16201 = vmatprep.subr.bf16.mxu0 %v17053_v27  ;;  %v17107_v27 = vld [vmem:[#allocation5 + $0x4fc] ss:$12 sps:$4 sm:$0xff]  }
 0x2d3   : > { %4457 = vmatpush1.bf16.msra.mxu1 %v17050_v28  ;;  %v17108_v28 = vld [vmem:[#allocation5 + $0x8c0] ss:$12 sps:$4 sm:$0xff]  }
 0x2d4   : > { %16202 = vmatpush3.bf16.msra.mxu0 %v17054_v35  ;;  %4458 = vmatprep.subr.bf16.mxu1 %v17057_v51  ;;  %v17105_v35 = vld [vmem:[#allocation5 + $0x4f8] ss:$12 sps:$4 sm:$0xff]   ;;  %v17109_v51 = vld [vmem:[#allocation5 + $0x800] ss:$12 sps:$4 sm:$0xff]  }
 0x2d5   : > { %16203 = vmatprep.subr.bf16.mxu0 %v17058_v29  ;;  %v17112_v29 = vld [vmem:[#allocation5 + $0x514] ss:$12 sps:$4 sm:$0xff]  }
 0x2d7   : > { %4459 = vmatpush1.bf16.msra.mxu1 %v17055_v30  ;;  %v17113_v30 = vld [vmem:[#allocation5 + $0x8d8] ss:$12 sps:$4 sm:$0xff]  }
 0x2d8   : > { %16204 = vmatpush3.bf16.msra.mxu0 %v17059_v31  ;;  %4460 = vmatprep.subr.bf16.mxu1 %v17062_v34  ;;  %v17110_v31 = vld [vmem:[#allocation5 + $0x510] ss:$12 sps:$4 sm:$0xff]   ;;  %v17114_v34 = vld [vmem:[#allocation5 + $0x818] ss:$12 sps:$4 sm:$0xff]  }
 0x2d9   : > { %16205 = vmatprep.subr.bf16.mxu0 %v17063_v38  ;;  %v17117_v38 = vld [vmem:[#allocation5 + $0x52c] ss:$12 sps:$4 sm:$0xff]  }
 0x2db   : > { %4461 = vmatpush1.bf16.msra.mxu1 %v17060_v39  ;;  %v17118_v39 = vld [vmem:[#allocation5 + $0x8f0] ss:$12 sps:$4 sm:$0xff]  }
 0x2dc   : > { %16206 = vmatpush3.bf16.msra.mxu0 %v17064_v40  ;;  %4462 = vmatprep.subr.bf16.mxu1 %v17067_v41  ;;  %v17115_v40 = vld [vmem:[#allocation5 + $0x528] ss:$12 sps:$4 sm:$0xff]   ;;  %v17119_v41 = vld [vmem:[#allocation5 + $0x830] ss:$12 sps:$4 sm:$0xff]  }
 0x2dd   : > { %16207 = vmatprep.subr.bf16.mxu0 %v17068_v42  ;;  %v17122_v42 = vld [vmem:[#allocation5 + $0x544] ss:$12 sps:$4 sm:$0xff]  }
 0x2df   : > { %4463 = vmatpush1.bf16.msra.mxu1 %v17065_v44  ;;  %v17120_v44 = vld [vmem:[#allocation5 + $0x540] ss:$12 sps:$4 sm:$0xff]  }
 0x2e0   : > { %16208 = vmatpush3.bf16.msra.mxu0 %v17069_v45  ;;  %4464 = vmatprep.subr.bf16.mxu1 %v17072_v46  ;;  %v17125_v45 = vld [vmem:[#allocation5 + $0x55c] ss:$12 sps:$4 sm:$0xff]   ;;  %v17123_v46 = vld [vmem:[#allocation5 + $0x558] ss:$12 sps:$4 sm:$0xff]  }
 0x2e1   : > { %16209 = vmatprep.subr.bf16.mxu0 %v17073_v50  ;;  %v17128_v50 = vld [vmem:[#allocation5 + $0x574] ss:$12 sps:$4 sm:$0xff]  }
 0x2e3   : > { %4465 = vmatpush1.bf16.msra.mxu1 %v17070_v53  ;;  %v17126_v53 = vld [vmem:[#allocation5 + $0x570] ss:$12 sps:$4 sm:$0xff]  }
 0x2e4   : > { %16210 = vmatpush3.bf16.msra.mxu0 %v17074_v57  ;;  %4466 = vmatprep.subr.bf16.mxu1 %v17077_v37  ;;  %v17132_v57 = vld [vmem:[#allocation5 + $0x5a0] ss:$12 sps:$4 sm:$0xff]   ;;  %v17137_v37 = vld [vmem:[#allocation5 + $0x5bc] ss:$12 sps:$4 sm:$0xff]  }
 0x2e5   : > { %16211 = vmatprep.subr.bf16.mxu0 %v17078_v49  ;;  %v17135_v49 = vld [vmem:[#allocation5 + $0x5b8] ss:$12 sps:$4 sm:$0xff]  }
 0x2e7   : > { %4467 = vmatpush1.bf16.msra.mxu1 %v17075_v59  ;;  %v17138_v59 = vld [vmem:[#allocation5 + $0x5d0] ss:$12 sps:$4 sm:$0xff]  }
 0x2e8   : > { %16212 = vmatpush3.bf16.msra.mxu0 %v17079_v47  ;;  %4479 = vmatprep.subr.bf16.mxu1 %v17082_v61  ;;  %v17146_v47 = vld [vmem:[#allocation5 + $0x604] ss:$12 sps:$4 sm:$0xff]   ;;  %v17144_v61 = vld [vmem:[#allocation5 + $0x600] ss:$12 sps:$4 sm:$0xff]  }
 0x2e9   : > { %16219 = vmatprep.subr.bf16.mxu0 %v17083_v63  ;;  %v17150_v63 = vld [vmem:[#allocation5 + $0x630] ss:$12 sps:$4 sm:$0xff]  }
 0x2ea   : > { %4469 = vmatmul.mubr.bf16.vlgmr.msra.gmra.mrb[40].mxu1 %v19412_v25  ;;  %v17090_v25 = vld [vmem:[#allocation5 + $0x4b0] ss:$12 sps:$4 sm:$0xff]  }
 0x2eb   : > { %4805 = vmatmul.mubr.bf16.vlgmr.msra.gmra.mrb[24].mxu0 %v19452_v4  ;;  %4480 = vmatpush1.bf16.msra.mxu1 %v17080_v1  ;;  %v17155_v1 = vld [vmem:[#allocation5 + $0x64c] ss:$12 sps:$4 sm:$0xff]  }
 0x2ec   : > { %4511 = vmatprep.mubr.bf16.mxu1 %v19436_v48  ;;  %16220 = vmatpush3.bf16.msra.mxu0 %v17084_v2  ;;  %v17095_v48 = vld [vmem:[#allocation5 + $0x4c8] ss:$12 sps:$4 sm:$0xff]  }
 0x2ed   : > { %4845 = vmatprep.mubr.bf16.mxu0 %v19458_v15  ;;  %4481 = vmatprep.subr.bf16.mxu1 %v17087_v5  ;;  %v17153_v2 = vld [vmem:[#allocation5 + $0x648] ss:$12 sps:$4 sm:$0xff]  }
 0x2ee   : > { %16221 = vmatprep.subr.bf16.mxu0 %v17088_v6  ;;  %v17161_v5 = vld [vmem:[#allocation5 + $0x67c] ss:$12 sps:$4 sm:$0xff]   ;;  %v17164_v6 = vld [vmem:[#allocation5 + $0x694] ss:$12 sps:$4 sm:$0xff]  }
 0x2ef   : > { %4482 = vmatpush1.bf16.msra.mxu1 %v17085_v8 }
 0x2f0   : > { %16222 = vmatpush3.bf16.msra.mxu0 %v17089_v7  ;;  %4483 = vmatprep.subr.bf16.mxu1 %v17092_v9 }
 0x2f1   : > { %16223 = vmatprep.subr.bf16.mxu0 %v17093_v12  ;;  %v17162_v12 = vld [vmem:[#allocation5 + $0x690] ss:$12 sps:$4 sm:$0xff]  }
 0x2f3   : > { %4484 = vmatpush1.bf16.msra.mxu1 %v17090_v25 }
 0x2f4   : > { %16224 = vmatpush3.bf16.msra.mxu0 %v17094_v16  ;;  %4485 = vmatprep.subr.bf16.mxu1 %v17097_v17  ;;  %v17167_v16 = vld [vmem:[#allocation5 + $0x6ac] ss:$12 sps:$4 sm:$0xff]  }
 0x2f5   : > { %16225 = vmatprep.subr.bf16.mxu0 %v17098_v18  ;;  %v17165_v18 = vld [vmem:[#allocation5 + $0x6a8] ss:$12 sps:$4 sm:$0xff]  }
 0x2f7   : > { %4486 = vmatpush1.bf16.msra.mxu1 %v17095_v48  ;;  %v17170_v48 = vld [vmem:[#allocation5 + $0x6c4] ss:$12 sps:$4 sm:$0xff]  }
 0x2f8   : > { %16226 = vmatpush3.bf16.msra.mxu0 %v17099_v23  ;;  %4487 = vmatprep.subr.bf16.mxu1 %v17102_v24  ;;  %v17168_v23 = vld [vmem:[#allocation5 + $0x6c0] ss:$12 sps:$4 sm:$0xff]   ;;  %v17173_v24 = vld [vmem:[#allocation5 + $0x6dc] ss:$12 sps:$4 sm:$0xff]  }
 0x2f9   : > { %16227 = vmatprep.subr.bf16.mxu0 %v17103_v14  ;;  %v17171_v14 = vld [vmem:[#allocation5 + $0x6d8] ss:$12 sps:$4 sm:$0xff]  }
 0x2fb   : > { %4488 = vmatpush1.bf16.msra.mxu1 %v17100_v36  ;;  %v17176_v36 = vld [vmem:[#allocation5 + $0x6f4] ss:$12 sps:$4 sm:$0xff]  }
 0x2fc   : > { %16228 = vmatpush3.bf16.msra.mxu0 %v17104_v19  ;;  %4489 = vmatprep.subr.bf16.mxu1 %v17107_v27  ;;  %v17174_v19 = vld [vmem:[#allocation5 + $0x6f0] ss:$12 sps:$4 sm:$0xff]   ;;  %v17179_v27 = vld [vmem:[#allocation5 + $0x70c] ss:$12 sps:$4 sm:$0xff]  }
 0x2fd   : > { %16229 = vmatprep.subr.bf16.mxu0 %v17108_v28  ;;  %v17177_v28 = vld [vmem:[#allocation5 + $0x708] ss:$12 sps:$4 sm:$0xff]  }
 0x2ff   : > { %4490 = vmatpush1.bf16.msra.mxu1 %v17105_v35  ;;  %v17182_v35 = vld [vmem:[#allocation5 + $0x724] ss:$12 sps:$4 sm:$0xff]  }
 0x300   : > { %16230 = vmatpush3.bf16.msra.mxu0 %v17109_v51  ;;  %4491 = vmatprep.subr.bf16.mxu1 %v17112_v29  ;;  %v17180_v51 = vld [vmem:[#allocation5 + $0x720] ss:$12 sps:$4 sm:$0xff]  }
 0x301   : > { %16231 = vmatprep.subr.bf16.mxu0 %v17113_v30  ;;  %v19467_v29 = vld [vmem:[%s22233_s4] sm:$0x7]  ;;  %v17185_v30 = vld [vmem:[#allocation5 + $0x73c] ss:$12 sps:$4 sm:$0xff]  }
 0x303   : > { %4492 = vmatpush1.bf16.msra.mxu1 %v17110_v31  ;;  %v2810_v31 = vrot.slane %v19467_v29, %v19357_v26 }
 0x304   : > { %16232 = vmatpush3.bf16.msra.mxu0 %v17114_v34  ;;  %4493 = vmatprep.subr.bf16.mxu1 %v17117_v38  ;;  %v17183_v34 = vld [vmem:[#allocation5 + $0x738] ss:$12 sps:$4 sm:$0xff]   ;;  %v17188_v38 = vld [vmem:[#allocation5 + $0x754] ss:$12 sps:$4 sm:$0xff]  }
 0x305   : > { %16233 = vmatprep.subr.bf16.mxu0 %v17118_v39 }
 0x307   : > { %4494 = vmatpush1.bf16.msra.mxu1 %v17115_v40 }
 0x308   : > { %16234 = vmatpush3.bf16.msra.mxu0 %v17119_v41  ;;  %4495 = vmatprep.subr.bf16.mxu1 %v17122_v42 }
 0x30b   : > { %4846 = vmatmul.mubr.bf16.vlgmr.msra.gmra.mrb[28].mxu0 %v19418_v33  ;;  %4496 = vmatpush1.bf16.msra.mxu1 %v17120_v44 }
 0x30c   : > { %4497 = vmatprep.subr.bf16.mxu1 %v17125_v45  ;;  %v17186_v45 = vld [vmem:[#allocation5 + $0x750] ss:$12 sps:$4 sm:$0xff]  }
 0x30f   : > { %4498 = vmatpush1.bf16.msra.mxu1 %v17123_v46 }
 0x310   : > { %4499 = vmatprep.subr.bf16.mxu1 %v17128_v50  ;;  %v17191_v50 = vld [vmem:[#allocation5 + $0x76c] ss:$12 sps:$4 sm:$0xff]  }
 0x313   : > { %4500 = vmatpush1.bf16.msra.mxu1 %v17126_v53 }
 0x314   : > { %4501 = vmatprep.subr.bf16.mxu1 %v17131_v54 }
 0x317   : > { %4502 = vmatpush1.bf16.msra.mxu1 %v17129_v55 }
 0x318   : > { %4503 = vmatprep.subr.bf16.mxu1 %v17134_v43 }
 0x31b   : > { %4504 = vmatpush1.bf16.msra.mxu1 %v17132_v57  ;;  %v17189_v57 = vld [vmem:[#allocation5 + $0x768] ss:$12 sps:$4 sm:$0xff]  }
 0x31c   : > { %4505 = vmatprep.subr.bf16.mxu1 %v17137_v37  ;;  %v17194_v37 = vld [vmem:[#allocation5 + $0x784] ss:$12 sps:$4 sm:$0xff]  }
 0x31f   : > { %4506 = vmatpush1.bf16.msra.mxu1 %v17135_v49  ;;  %v17192_v49 = vld [vmem:[#allocation5 + $0x780] ss:$12 sps:$4 sm:$0xff]  }
 0x320   : > { %4507 = vmatprep.subr.bf16.mxu1 %v17140_v58  ;;  %v17197_v58 = vld [vmem:[#allocation5 + $0x79c] ss:$12 sps:$4 sm:$0xff]  }
 0x323   : > { %4508 = vmatpush1.bf16.msra.mxu1 %v17138_v59  ;;  %v17240_v59 = vld [vmem:[#allocation7] ss:$16 sps:$4 sm:$0xff]  }
 0x324   : > { %4509 = vmatprep.subr.bf16.mxu1 %v17143_v20  ;;  %v17242_v20 = vld [vmem:[#allocation7 + $0x4] ss:$16 sps:$4 sm:$0xff]  }
 0x325   : > { %6646 = vmatprep.subr.bf16.mxu0 %v17242_v20  ;;  %v17320_v20 = vld [vmem:[#allocation7 + $0x1a4] ss:$16 sps:$4 sm:$0xff]  }
 0x326   : > { %6647 = vmatpush1.bf16.msra.mxu0 %v17240_v59  ;;  %v17312_v59 = vld [vmem:[#allocation7 + $0x180] ss:$16 sps:$4 sm:$0xff]  }
 0x327   : > { %4510 = vmatpush1.bf16.msra.mxu1 %v17141_v60  ;;  %v17248_v60 = vld [vmem:[#allocation7 + $0x24] ss:$16 sps:$4 sm:$0xff]  }
 0x328   : > { %4522 = vmatprep.subr.bf16.mxu1 %v17146_v47  ;;  %v17195_v47 = vld [vmem:[#allocation5 + $0x798] ss:$12 sps:$4 sm:$0xff]   ;;  %6648 = vmatprep.subr.bf16.mxu0 %v17248_v60 }
 0x329   : > { %v17231_v60 = vld [vmem:[#allocation5 + $0x8b8] ss:$12 sps:$4 sm:$0xff]  }
 0x32a   : > { %4512 = vmatmul.mubr.bf16.vlgmr.msra.gmra.mrb[40].mxu1 %v19444_v22  ;;  %v17159_v22 = vld [vmem:[#allocation5 + $0x678] ss:$12 sps:$4 sm:$0xff]  }
 0x32b   : > { %4523 = vmatpush1.bf16.msra.mxu1 %v17144_v61  ;;  %4554 = vmatprep.mubr.bf16.mxu1 %v19415_v32  ;;  %v17200_v61 = vld [vmem:[#allocation5 + $0x7b4] ss:$12 sps:$4 sm:$0xff]  }
 0x32c   : > { %4524 = vmatprep.subr.bf16.mxu1 %v17149_v62  ;;  %v17246_v62 = vld [vmem:[#allocation7 + $0x20] ss:$16 sps:$4 sm:$0xff]  }
 0x32d   : > { %6649 = vmatpush1.bf16.msra.mxu0 %v17246_v62 }
 0x32f   : > { %4525 = vmatpush1.bf16.msra.mxu1 %v17147_v52  ;;  %v17254_v52 = vld [vmem:[#allocation7 + $0x44] ss:$16 sps:$4 sm:$0xff]  }
 0x330   : > { %4526 = vmatprep.subr.bf16.mxu1 %v17152_v56  ;;  %v17198_v56 = vld [vmem:[#allocation5 + $0x7b0] ss:$12 sps:$4 sm:$0xff]   ;;  %6650 = vmatprep.subr.bf16.mxu0 %v17254_v52 }
 0x333   : > { %4527 = vmatpush1.bf16.msra.mxu1 %v17150_v63  ;;  %v17203_v63 = vld [vmem:[#allocation5 + $0x7cc] ss:$12 sps:$4 sm:$0xff]  }
 0x334   : > { %4528 = vmatprep.subr.bf16.mxu1 %v17155_v1  ;;  %v17252_v1 = vld [vmem:[#allocation7 + $0x40] ss:$16 sps:$4 sm:$0xff]  }
 0x335   : > { %6651 = vmatpush1.bf16.msra.mxu0 %v17252_v1 }
 0x337   : > { %4529 = vmatpush1.bf16.msra.mxu1 %v17153_v2  ;;  %v17260_v2 = vld [vmem:[#allocation7 + $0x64] ss:$16 sps:$4 sm:$0xff]  }
 0x338   : > { %4530 = vmatprep.subr.bf16.mxu1 %v17158_v3  ;;  %v17206_v3 = vld [vmem:[#allocation5 + $0x7e4] ss:$12 sps:$4 sm:$0xff]   ;;  %6652 = vmatprep.subr.bf16.mxu0 %v17260_v2  ;;  %v17239_v2 = vld [vmem:[#allocation5 + $0x8ec] ss:$12 sps:$4 sm:$0xff]  }
 0x33b   : > { %4531 = vmatpush1.bf16.msra.mxu1 %v17156_v11  ;;  %v17266_v11 = vld [vmem:[#allocation7 + $0x84] ss:$16 sps:$4 sm:$0xff]  }
 0x33c   : > { %4532 = vmatprep.subr.bf16.mxu1 %v17161_v5  ;;  %v17204_v5 = vld [vmem:[#allocation5 + $0x7e0] ss:$12 sps:$4 sm:$0xff]  }
 0x33d   : > { %v16125_v32 = vpop.f32.mrb[8].mxu0 }
 0x33e   : > { %v16126_v8 = vpop.f32.mrb[9].mxu0 }
 0x33f   : > { %4533 = vmatpush1.bf16.msra.mxu1 %v17159_v22  ;;  %v16127_v7 = vadd.f32 %v16126_v8, %v16125_v32  ;;  %v16128_v9 = vpop.f32.mrb[10].mxu0  ;;  %v17209_v22 = vld [vmem:[#allocation5 + $0x7fc] ss:$12 sps:$4 sm:$0xff]   ;;  %v17272_v32 = vld [vmem:[#allocation7 + $0xa4] ss:$16 sps:$4 sm:$0xff]  }
 0x340   : > { %v16129_v25 = vpop.f32.mrb[11].mxu0  ;;  %4534 = vmatprep.subr.bf16.mxu1 %v17164_v6  ;;  %v17264_v6 = vld [vmem:[#allocation7 + $0x80] ss:$16 sps:$4 sm:$0xff]   ;;  %v17207_v8 = vld [vmem:[#allocation5 + $0x7f8] ss:$12 sps:$4 sm:$0xff]  }
 0x341   : > { %v16130_v17 = vadd.f32 %v16129_v25, %v16128_v9  ;;  %v4643_v41 = vadd.f32 %v16127_v7, %v2810_v31  ;;  %v17212_v7 = vld [vmem:[#allocation5 + $0x814] ss:$12 sps:$4 sm:$0xff]  }
 0x342   : > { %v17270_v9 = vld [vmem:[#allocation7 + $0xa0] ss:$16 sps:$4 sm:$0xff]   ;;  %v17278_v25 = vld [vmem:[#allocation7 + $0xc4] ss:$16 sps:$4 sm:$0xff]  }
 0x343   : > { %4535 = vmatpush1.bf16.msra.mxu1 %v17162_v12  ;;  %v4646_v53 = vadd.f32 %v16130_v17, %v2810_v31  ;;  %v17290_v31 = vld [vmem:[#allocation7 + $0x104] ss:$16 sps:$4 sm:$0xff]  }
 0x344   : > { %4536 = vmatprep.subr.bf16.mxu1 %v17167_v16 }
 0x347   : > { %4537 = vmatpush1.bf16.msra.mxu1 %v17165_v18 }
 0x348   : > { %4538 = vmatprep.subr.bf16.mxu1 %v17170_v48  ;;  %v17210_v48 = vld [vmem:[#allocation5 + $0x810] ss:$12 sps:$4 sm:$0xff]  }
 0x34b   : > { %4539 = vmatpush1.bf16.msra.mxu1 %v17168_v23 }
 0x34c   : > { %4540 = vmatprep.subr.bf16.mxu1 %v17173_v24  ;;  %v17215_v24 = vld [vmem:[#allocation5 + $0x82c] ss:$12 sps:$4 sm:$0xff]  }
 0x34f   : > { %4541 = vmatpush1.bf16.msra.mxu1 %v17171_v14  ;;  %v17276_v14 = vld [vmem:[#allocation7 + $0xc0] ss:$16 sps:$4 sm:$0xff]  }
 0x350   : > { %4542 = vmatprep.subr.bf16.mxu1 %v17176_v36 }
 0x353   : > { %4543 = vmatpush1.bf16.msra.mxu1 %v17174_v19 }
 0x354   : > { %4544 = vmatprep.subr.bf16.mxu1 %v17179_v27  ;;  %v17284_v27 = vld [vmem:[#allocation7 + $0xe4] ss:$16 sps:$4 sm:$0xff]  }
 0x357   : > { %4545 = vmatpush1.bf16.msra.mxu1 %v17177_v28 }
 0x358   : > { %4546 = vmatprep.subr.bf16.mxu1 %v17182_v35  ;;  %v17213_v35 = vld [vmem:[#allocation5 + $0x828] ss:$12 sps:$4 sm:$0xff]  }
 0x35b   : > { %4547 = vmatpush1.bf16.msra.mxu1 %v17180_v51  ;;  %v17218_v51 = vld [vmem:[#allocation5 + $0x844] ss:$12 sps:$4 sm:$0xff]  }
 0x35c   : > { %4548 = vmatprep.subr.bf16.mxu1 %v17185_v30  ;;  %v17282_v30 = vld [vmem:[#allocation7 + $0xe0] ss:$16 sps:$4 sm:$0xff]  }
 0x35d   : > { %v16147_v39 = vpop.f32.mrb[12].mxu0 }
 0x35e   : > { %v16148_v40 = vpop.f32.mrb[13].mxu0 }
 0x35f   : > { %v16149_v42 = vadd.f32 %v16148_v40, %v16147_v39  ;;  %4549 = vmatpush1.bf16.msra.mxu1 %v17183_v34  ;;  %v16150_v44 = vpop.f32.mrb[14].mxu0  ;;  %v17216_v34 = vld [vmem:[#allocation5 + $0x840] ss:$12 sps:$4 sm:$0xff]   ;;  %v17296_v40 = vld [vmem:[#allocation7 + $0x124] ss:$16 sps:$4 sm:$0xff]  }
 0x360   : > { %v16151_v46 = vpop.f32.mrb[15].mxu0  ;;  %4550 = vmatprep.subr.bf16.mxu1 %v17188_v38  ;;  %v17221_v38 = vld [vmem:[#allocation5 + $0x85c] ss:$12 sps:$4 sm:$0xff]   ;;  %v17288_v39 = vld [vmem:[#allocation7 + $0x100] ss:$16 sps:$4 sm:$0xff]  }
 0x361   : > { %v19471_v54 = vadd.f32 %v16149_v42, %v4643_v41  ;;  %v16152_v55 = vadd.f32 %v16151_v46, %v16150_v44  ;;  %v17219_v41 = vld [vmem:[#allocation5 + $0x858] ss:$12 sps:$4 sm:$0xff]   ;;  %v17224_v42 = vld [vmem:[#allocation5 + $0x874] ss:$12 sps:$4 sm:$0xff]   ;;  %v17222_v46 = vld [vmem:[#allocation5 + $0x870] ss:$12 sps:$4 sm:$0xff]  }
 0x362   : > { %v17294_v44 = vld [vmem:[#allocation7 + $0x120] ss:$16 sps:$4 sm:$0xff]  }
 0x363   : > { %v19473_v43 = vadd.f32 %v16152_v55, %v4646_v53  ;;  %4551 = vmatpush1.bf16.msra.mxu1 %v17186_v45  ;;  %v17302_v45 = vld [vmem:[#allocation7 + $0x144] ss:$16 sps:$4 sm:$0xff]   ;;  %v17300_v53 = vld [vmem:[#allocation7 + $0x140] ss:$16 sps:$4 sm:$0xff]  }
 0x364   : > { %4552 = vmatprep.subr.bf16.mxu1 %v17191_v50  ;;  %v17227_v50 = vld [vmem:[#allocation5 + $0x88c] ss:$12 sps:$4 sm:$0xff]   ;;  %v17225_v55 = vld [vmem:[#allocation5 + $0x888] ss:$12 sps:$4 sm:$0xff]  }
 0x367   : > { %4553 = vmatpush1.bf16.msra.mxu1 %v17189_v57  ;;  %v17306_v57 = vld [vmem:[#allocation7 + $0x160] ss:$16 sps:$4 sm:$0xff]  }
 0x368   : > { %4565 = vmatprep.subr.bf16.mxu1 %v17194_v37  ;;  %v17314_v37 = vld [vmem:[#allocation7 + $0x184] ss:$16 sps:$4 sm:$0xff]  }
 0x36a   : > { %4555 = vmatmul.mubr.bf16.vlgmr.msra.gmra.mrb[40].mxu1 %v19452_v4  ;;  %v17201_v4 = vld [vmem:[#allocation5 + $0x7c8] ss:$12 sps:$4 sm:$0xff]  }
 0x36b   : > { %4566 = vmatpush1.bf16.msra.mxu1 %v17192_v49  ;;  %4597 = vmatprep.mubr.bf16.mxu1 %v19458_v15  ;;  %v17258_v15 = vld [vmem:[#allocation7 + $0x60] ss:$16 sps:$4 sm:$0xff]  }
 0x36c   : > { %4567 = vmatprep.subr.bf16.mxu1 %v17197_v58  ;;  %6653 = vmatpush1.bf16.msra.mxu0 %v17258_v15  ;;  %v17228_v49 = vld [vmem:[#allocation5 + $0x8a0] ss:$12 sps:$4 sm:$0xff]   ;;  %v17233_v58 = vld [vmem:[#allocation5 + $0x8bc] ss:$12 sps:$4 sm:$0xff]  }
 0x36d   : > { %6654 = vmatprep.subr.bf16.mxu0 %v17266_v11  ;;  %v17237_v11 = vld [vmem:[#allocation5 + $0x8e8] ss:$12 sps:$4 sm:$0xff]  }
 0x36f   : > { %4568 = vmatpush1.bf16.msra.mxu1 %v17195_v47  ;;  %v17236_v47 = vld [vmem:[#allocation5 + $0x8d4] ss:$12 sps:$4 sm:$0xff]  }
 0x370   : > { %4569 = vmatprep.subr.bf16.mxu1 %v17200_v61  ;;  %6655 = vmatpush1.bf16.msra.mxu0 %v17264_v6  ;;  %v17318_v61 = vld [vmem:[#allocation7 + $0x1a0] ss:$16 sps:$4 sm:$0xff]   ;;  %v17243_v6 = vld [vmem:[#allocation7 + $0x8] ss:$16 sps:$4 sm:$0xff]  }
 0x371   : > { %6656 = vmatprep.subr.bf16.mxu0 %v17272_v32  ;;  %v17251_v32 = vld [vmem:[#allocation7 + $0x2c] ss:$16 sps:$4 sm:$0xff]  }
 0x373   : > { %4570 = vmatpush1.bf16.msra.mxu1 %v17198_v56  ;;  %v17234_v56 = vld [vmem:[#allocation5 + $0x8d0] ss:$12 sps:$4 sm:$0xff]  }
 0x374   : > { %4571 = vmatprep.subr.bf16.mxu1 %v17203_v63  ;;  %6657 = vmatpush1.bf16.msra.mxu0 %v17270_v9  ;;  %v17255_v9 = vld [vmem:[#allocation7 + $0x48] ss:$16 sps:$4 sm:$0xff]  }
 0x375   : > { %6658 = vmatprep.subr.bf16.mxu0 %v17278_v25  ;;  %v17261_v25 = vld [vmem:[#allocation7 + $0x68] ss:$16 sps:$4 sm:$0xff]  }
 0x377   : > { %4572 = vmatpush1.bf16.msra.mxu1 %v17201_v4 }
 0x378   : > { %4573 = vmatprep.subr.bf16.mxu1 %v17206_v3  ;;  %6659 = vmatpush1.bf16.msra.mxu0 %v17276_v14  ;;  %v17279_v14 = vld [vmem:[#allocation7 + $0xc8] ss:$16 sps:$4 sm:$0xff]  }
 0x379   : > { %6660 = vmatprep.subr.bf16.mxu0 %v17284_v27  ;;  %v17287_v27 = vld [vmem:[#allocation7 + $0xec] ss:$16 sps:$4 sm:$0xff]  }
 0x37b   : > { %4574 = vmatpush1.bf16.msra.mxu1 %v17204_v5 }
 0x37c   : > { %4575 = vmatprep.subr.bf16.mxu1 %v17209_v22  ;;  %6661 = vmatpush1.bf16.msra.mxu0 %v17282_v30  ;;  %v17245_v22 = vld [vmem:[#allocation7 + $0xc] ss:$16 sps:$4 sm:$0xff]   ;;  %v17285_v30 = vld [vmem:[#allocation7 + $0xe8] ss:$16 sps:$4 sm:$0xff]  }
 0x37d   : > { %v16169_v12 = vpop.f32.mrb[16].mxu0  ;;  %6662 = vmatprep.subr.bf16.mxu0 %v17290_v31 }
 0x37e   : > { %v16170_v16 = vpop.f32.mrb[17].mxu0 }
 0x37f   : > { %v16171_v17 = vadd.f32 %v16170_v16, %v16169_v12  ;;  %4576 = vmatpush1.bf16.msra.mxu1 %v17207_v8  ;;  %v16172_v18 = vpop.f32.mrb[18].mxu0  ;;  %v17249_v8 = vld [vmem:[#allocation7 + $0x28] ss:$16 sps:$4 sm:$0xff]   ;;  %v17263_v12 = vld [vmem:[#allocation7 + $0x6c] ss:$16 sps:$4 sm:$0xff]  }
 0x380   : > { %v16173_v23 = vpop.f32.mrb[19].mxu0  ;;  %4577 = vmatprep.subr.bf16.mxu1 %v17212_v7  ;;  %6663 = vmatpush1.bf16.msra.mxu0 %v17288_v39  ;;  %v17257_v7 = vld [vmem:[#allocation7 + $0x4c] ss:$16 sps:$4 sm:$0xff]  }
 0x381   : > { %v19478_v36 = vadd.f32 %v16171_v17, %v19471_v54  ;;  %v16174_v19 = vadd.f32 %v16173_v23, %v16172_v18  ;;  %6664 = vmatprep.subr.bf16.mxu0 %v17296_v40  ;;  %v17308_v54 = vld [vmem:[#allocation7 + $0x164] ss:$16 sps:$4 sm:$0xff]   ;;  %v17269_v16 = vld [vmem:[#allocation7 + $0x8c] ss:$16 sps:$4 sm:$0xff]   ;;  %v17267_v17 = vld [vmem:[#allocation7 + $0x88] ss:$16 sps:$4 sm:$0xff]  }
 0x382   : > { %v17275_v18 = vld [vmem:[#allocation7 + $0xac] ss:$16 sps:$4 sm:$0xff]   ;;  %v17297_v40 = vld [vmem:[#allocation7 + $0x128] ss:$16 sps:$4 sm:$0xff]  }
 0x383   : > { %v19481_v28 = vadd.f32 %v16174_v19, %v19473_v43  ;;  %4578 = vmatpush1.bf16.msra.mxu1 %v17210_v48  ;;  %v17230_v43 = vld [vmem:[#allocation5 + $0x8a4] ss:$12 sps:$4 sm:$0xff]   ;;  %v17273_v48 = vld [vmem:[#allocation7 + $0xa8] ss:$16 sps:$4 sm:$0xff]   ;;  %v17299_v39 = vld [vmem:[#allocation7 + $0x12c] ss:$16 sps:$4 sm:$0xff]  }
 0x384   : > { %4579 = vmatprep.subr.bf16.mxu1 %v17215_v24  ;;  %6665 = vmatpush1.bf16.msra.mxu0 %v17294_v44  ;;  %v17311_v44 = vld [vmem:[#allocation7 + $0x16c] ss:$16 sps:$4 sm:$0xff]  }
 0x385   : > { %6666 = vmatprep.subr.bf16.mxu0 %v17302_v45  ;;  %v17309_v45 = vld [vmem:[#allocation7 + $0x168] ss:$16 sps:$4 sm:$0xff]  }
 0x387   : > { %4580 = vmatpush1.bf16.msra.mxu1 %v17213_v35 }
 0x388   : > { %4581 = vmatprep.subr.bf16.mxu1 %v17218_v51  ;;  %6667 = vmatpush1.bf16.msra.mxu0 %v17300_v53  ;;  %v17323_v53 = vld [vmem:[#allocation7 + $0x1ac] ss:$16 sps:$4 sm:$0xff]  }
 0x389   : > { %6668 = vmatprep.subr.bf16.mxu0 %v17308_v54  ;;  %v17321_v54 = vld [vmem:[#allocation7 + $0x1a8] ss:$16 sps:$4 sm:$0xff]  }
 0x38b   : > { %4582 = vmatpush1.bf16.msra.mxu1 %v17216_v34  ;;  %v17293_v34 = vld [vmem:[#allocation7 + $0x10c] ss:$16 sps:$4 sm:$0xff]  }
 0x38c   : > { %4583 = vmatprep.subr.bf16.mxu1 %v17221_v38  ;;  %6669 = vmatpush1.bf16.msra.mxu0 %v17306_v57  ;;  %v17291_v38 = vld [vmem:[#allocation7 + $0x108] ss:$16 sps:$4 sm:$0xff]  }
 0x38d   : > { %6670 = vmatprep.subr.bf16.mxu0 %v17314_v37 }
 0x38f   : > { %4584 = vmatpush1.bf16.msra.mxu1 %v17219_v41  ;;  %v17305_v41 = vld [vmem:[#allocation7 + $0x14c] ss:$16 sps:$4 sm:$0xff]  }
 0x390   : > { %4585 = vmatprep.subr.bf16.mxu1 %v17224_v42  ;;  %6671 = vmatpush1.bf16.msra.mxu0 %v17312_v59  ;;  %v17303_v42 = vld [vmem:[#allocation7 + $0x148] ss:$16 sps:$4 sm:$0xff]  }
 0x391   : > { %6672 = vmatprep.subr.bf16.mxu0 %v17320_v20 }
 0x393   : > { %4586 = vmatpush1.bf16.msra.mxu1 %v17222_v46  ;;  %v17317_v46 = vld [vmem:[#allocation7 + $0x18c] ss:$16 sps:$4 sm:$0xff]  }
 0x394   : > { %4587 = vmatprep.subr.bf16.mxu1 %v17227_v50  ;;  %6673 = vmatpush1.bf16.msra.mxu0 %v17318_v61  ;;  %v17315_v50 = vld [vmem:[#allocation7 + $0x188] ss:$16 sps:$4 sm:$0xff]  }
 0x397   : > { %4588 = vmatpush1.bf16.msra.mxu1 %v17225_v55 }
 0x398   : > { %4589 = vmatprep.subr.bf16.mxu1 %v17230_v43 }
 0x39b   : > { %4590 = vmatpush1.bf16.msra.mxu1 %v17228_v49 }
 0x39c   : > { %4591 = vmatprep.subr.bf16.mxu1 %v17233_v58 }
 0x39e   : > { %v16191_v62 = vpop.f32.mrb[20].mxu0 }
 0x39f   : > { %v16192_v52 = vpop.f32.mrb[21].mxu0  ;;  %4592 = vmatpush1.bf16.msra.mxu1 %v17231_v60 }
 0x3a0   : > { %v16193_v63 = vadd.f32 %v16192_v52, %v16191_v62  ;;  %v16194_v1 = vpop.f32.mrb[22].mxu0  ;;  %4593 = vmatprep.subr.bf16.mxu1 %v17236_v47  ;;  %v17326_v62 = vld [vmem:[#allocation7 + $0x1c4] ss:$16 sps:$4 sm:$0xff]   ;;  %v17329_v52 = vld [vmem:[#allocation7 + $0x1cc] ss:$16 sps:$4 sm:$0xff]  }
 0x3a1   : > { %v16195_v4 = vpop.f32.mrb[23].mxu0  ;;  %6674 = vmatprep.subr.bf16.mxu0 %v17326_v62  ;;  %v17378_v62 = vld [vmem:[#allocation7 + $0x2e0] ss:$16 sps:$4 sm:$0xff]  }
 0x3a2   : > { %v4766_v3 = vadd.f32 %v16193_v63, %v19478_v36  ;;  %v16196_v15 = vadd.f32 %v16195_v4, %v16194_v1  ;;  %v17327_v63 = vld [vmem:[#allocation7 + $0x1c8] ss:$16 sps:$4 sm:$0xff]   ;;  %v17332_v1 = vld [vmem:[#allocation7 + $0x1e4] ss:$16 sps:$4 sm:$0xff]   ;;  %v17330_v4 = vld [vmem:[#allocation7 + $0x1e0] ss:$16 sps:$4 sm:$0xff]  }
 0x3a3   : > { %4594 = vmatpush1.bf16.msra.mxu1 %v17234_v56  ;;  %v17324_v56 = vld [vmem:[#allocation7 + $0x1c0] ss:$16 sps:$4 sm:$0xff]  }
 0x3a4   : > { %v4769_v5 = vadd.f32 %v16196_v15, %v19481_v28  ;;  %4595 = vmatprep.subr.bf16.mxu1 %v17239_v2  ;;  %6675 = vmatpush1.bf16.msra.mxu0 %v17324_v56  ;;  %v17335_v2 = vld [vmem:[#allocation7 + $0x1ec] ss:$16 sps:$4 sm:$0xff]   ;;  %v17338_v15 = vld [vmem:[#allocation7 + $0x204] ss:$16 sps:$4 sm:$0xff]  }
 0x3a5   : > { %6676 = vmatprep.subr.bf16.mxu0 %v17332_v1  ;;  %v17386_v56 = vld [vmem:[#allocation7 + $0x304] ss:$16 sps:$4 sm:$0xff]   ;;  %v17384_v1 = vld [vmem:[#allocation7 + $0x300] ss:$16 sps:$4 sm:$0xff]  }
 0x3a7   : > { %4596 = vmatpush1.bf16.msra.mxu1 %v17237_v11  ;;  %v17341_v11 = vld [vmem:[#allocation7 + $0x20c] ss:$16 sps:$4 sm:$0xff]  }
 0x3a8   : > { %6851 = vmatprep.subr.bf16.mxu1 %v17245_v22  ;;  %6677 = vmatpush1.bf16.msra.mxu0 %v17330_v4  ;;  %v2806_v22 = vrot.slane %v19467_v29, %v19381_v21  ;;  %v17392_v4 = vld [vmem:[#allocation7 + $0x324] ss:$16 sps:$4 sm:$0xff]  }
 0x3a9   : > { %6687 = vmatprep.subr.bf16.mxu0 %v17338_v15  ;;  %v17390_v15 = vld [vmem:[#allocation7 + $0x320] ss:$16 sps:$4 sm:$0xff]  }
 0x3aa   : > { %4598 = vmatmul.mubr.bf16.vlgmr.msra.gmra.mrb[40].mxu1 %v19418_v33  ;;  %v17281_v33 = vld [vmem:[#allocation7 + $0xcc] ss:$16 sps:$4 sm:$0xff]  }
 0x3ab   : > { %6852 = vmatpush1.bf16.msra.mxu1 %v17243_v6 }
 0x3ac   : > { %6853 = vmatprep.subr.bf16.mxu1 %v17251_v32 }
 0x3af   : > { %6854 = vmatpush1.bf16.msra.mxu1 %v17249_v8 }
 0x3b0   : > { %6855 = vmatprep.subr.bf16.mxu1 %v17257_v7 }
 0x3b3   : > { %6856 = vmatpush1.bf16.msra.mxu1 %v17255_v9 }
 0x3b4   : > { %6857 = vmatprep.subr.bf16.mxu1 %v17263_v12 }
 0x3b7   : > { %6858 = vmatpush1.bf16.msra.mxu1 %v17261_v25 }
 0x3b8   : > { %6859 = vmatprep.subr.bf16.mxu1 %v17269_v16 }
 0x3bb   : > { %6860 = vmatpush1.bf16.msra.mxu1 %v17267_v17 }
 0x3bc   : > { %6861 = vmatprep.subr.bf16.mxu1 %v17275_v18 }
 0x3be   : > { %v16213_v23 = vpop.f32.mrb[24].mxu0 }
 0x3bf   : > { %v16214_v24 = vpop.f32.mrb[25].mxu0  ;;  %6862 = vmatpush1.bf16.msra.mxu1 %v17273_v48 }
 0x3c0   : > { %v16215_v36 = vadd.f32 %v16214_v24, %v16213_v23  ;;  %v16216_v19 = vpop.f32.mrb[26].mxu0  ;;  %6863 = vmatprep.subr.bf16.mxu1 %v17281_v33 }
 0x3c1   : > { %v16217_v28 = vpop.f32.mrb[27].mxu0 }
 0x3c2   : > { %v4807_v35 = vadd.f32 %v16215_v36, %v4766_v3  ;;  %v16218_v51 = vadd.f32 %v16217_v28, %v16216_v19  ;;  %v17333_v3 = vld [vmem:[#allocation7 + $0x1e8] ss:$16 sps:$4 sm:$0xff]   ;;  %v17344_v19 = vld [vmem:[#allocation7 + $0x224] ss:$16 sps:$4 sm:$0xff]  }
 0x3c3   : > { %6864 = vmatpush1.bf16.msra.mxu1 %v17279_v14  ;;  %v17336_v14 = vld [vmem:[#allocation7 + $0x200] ss:$16 sps:$4 sm:$0xff]   ;;  %v17339_v36 = vld [vmem:[#allocation7 + $0x208] ss:$16 sps:$4 sm:$0xff]  }
 0x3c4   : > { %v4810_v31 = vadd.f32 %v16218_v51, %v4769_v5  ;;  %6865 = vmatprep.subr.bf16.mxu1 %v17287_v27  ;;  %v2802_v5 = vrot.slane %v19467_v29, %v19378_v0  ;;  %v17347_v29 = vld [vmem:[#allocation7 + $0x22c] ss:$16 sps:$4 sm:$0xff]   ;;  %v17342_v51 = vld [vmem:[#allocation7 + $0x220] ss:$16 sps:$4 sm:$0xff]  }
 0x3c7   : > { %6866 = vmatpush1.bf16.msra.mxu1 %v17285_v30  ;;  %v17345_v30 = vld [vmem:[#allocation7 + $0x228] ss:$16 sps:$4 sm:$0xff]  }
 0x3c8   : > { %6867 = vmatprep.subr.bf16.mxu1 %v17293_v34  ;;  %v17350_v34 = vld [vmem:[#allocation7 + $0x244] ss:$16 sps:$4 sm:$0xff]  }
 0x3cb   : > { %6868 = vmatpush1.bf16.msra.mxu1 %v17291_v38  ;;  %v17353_v38 = vld [vmem:[#allocation7 + $0x24c] ss:$16 sps:$4 sm:$0xff]  }
 0x3cc   : > { %6869 = vmatprep.subr.bf16.mxu1 %v17299_v39  ;;  %v17348_v39 = vld [vmem:[#allocation7 + $0x240] ss:$16 sps:$4 sm:$0xff]  }
 0x3cf   : > { %6870 = vmatpush1.bf16.msra.mxu1 %v17297_v40  ;;  %v17351_v40 = vld [vmem:[#allocation7 + $0x248] ss:$16 sps:$4 sm:$0xff]  }
 0x3d0   : > { %6871 = vmatprep.subr.bf16.mxu1 %v17305_v41  ;;  %v17356_v41 = vld [vmem:[#allocation7 + $0x264] ss:$16 sps:$4 sm:$0xff]  }
 0x3d3   : > { %6872 = vmatpush1.bf16.msra.mxu1 %v17303_v42  ;;  %v17359_v42 = vld [vmem:[#allocation7 + $0x26c] ss:$16 sps:$4 sm:$0xff]  }
 0x3d4   : > { %6873 = vmatprep.subr.bf16.mxu1 %v17311_v44  ;;  %v17354_v44 = vld [vmem:[#allocation7 + $0x260] ss:$16 sps:$4 sm:$0xff]  }
 0x3d7   : > { %6874 = vmatpush1.bf16.msra.mxu1 %v17309_v45  ;;  %v17357_v45 = vld [vmem:[#allocation7 + $0x268] ss:$16 sps:$4 sm:$0xff]  }
 0x3d8   : > { %6875 = vmatprep.subr.bf16.mxu1 %v17317_v46  ;;  %v17362_v46 = vld [vmem:[#allocation7 + $0x284] ss:$16 sps:$4 sm:$0xff]  }
 0x3db   : > { %6876 = vmatpush1.bf16.msra.mxu1 %v17315_v50  ;;  %v17365_v50 = vld [vmem:[#allocation7 + $0x28c] ss:$16 sps:$4 sm:$0xff]  }
 0x3dc   : > { %6877 = vmatprep.subr.bf16.mxu1 %v17323_v53  ;;  %v17360_v53 = vld [vmem:[#allocation7 + $0x280] ss:$16 sps:$4 sm:$0xff]  }
 0x3de   : > { %v16235_v55 = vpop.f32.mrb[28].mxu0 }
 0x3df   : > { %v16236_v43 = vpop.f32.mrb[29].mxu0  ;;  %6878 = vmatpush1.bf16.msra.mxu1 %v17321_v54  ;;  %v17363_v54 = vld [vmem:[#allocation7 + $0x288] ss:$16 sps:$4 sm:$0xff]  }
 0x3e0   : > { %v16237_v57 = vadd.f32 %v16236_v43, %v16235_v55  ;;  %v16238_v37 = vpop.f32.mrb[30].mxu0  ;;  %6879 = vmatprep.subr.bf16.mxu1 %v17329_v52  ;;  %v17368_v55 = vld [vmem:[#allocation7 + $0x2a4] ss:$16 sps:$4 sm:$0xff]   ;;  %v17371_v43 = vld [vmem:[#allocation7 + $0x2ac] ss:$16 sps:$4 sm:$0xff]  }
 0x3e1   : > { %v16239_v49 = vpop.f32.mrb[31].mxu0  ;;  %v17381_v52 = vld [vmem:[#allocation7 + $0x2e8] ss:$16 sps:$4 sm:$0xff]  }
 0x3e2   : > { %v4848_v58 = vadd.f32 %v16237_v57, %v4807_v35  ;;  %v16240_v59 = vadd.f32 %v16239_v49, %v16238_v37  ;;  %v17366_v57 = vld [vmem:[#allocation7 + $0x2a0] ss:$16 sps:$4 sm:$0xff]   ;;  %v17369_v37 = vld [vmem:[#allocation7 + $0x2a8] ss:$16 sps:$4 sm:$0xff]   ;;  %v17374_v49 = vld [vmem:[#allocation7 + $0x2c4] ss:$16 sps:$4 sm:$0xff]  }
 0x3e3   : > { %6880 = vmatpush1.bf16.msra.mxu1 %v17327_v63  ;;  %v17389_v63 = vld [vmem:[#allocation7 + $0x30c] ss:$16 sps:$4 sm:$0xff]  }
 0x3e4   : > { %v4851_v20 = vadd.f32 %v16240_v59, %v4810_v31  ;;  %v4856_v60 = vmax.f32 %v4848_v58, 0.0  ;;  %6881 = vmatprep.subr.bf16.mxu1 %v17335_v2  ;;  %v17377_v58 = vld [vmem:[#allocation7 + $0x2cc] ss:$16 sps:$4 sm:$0xff]   ;;  %v17372_v59 = vld [vmem:[#allocation7 + $0x2c0] ss:$16 sps:$4 sm:$0xff]  }
 0x3e5   : > { %v17387_v2 = vld [vmem:[#allocation7 + $0x308] ss:$16 sps:$4 sm:$0xff]  }
 0x3e6   : > { %v4859_v47 = vmax.f32 %v4851_v20, 0.0  ;;  %v17375_v20 = vld [vmem:[#allocation7 + $0x2c8] ss:$16 sps:$4 sm:$0xff]  }
 0x3e7   : > { %6882 = vmatpush1.bf16.msra.mxu1 %v17333_v3  ;;  %v17395_v3 = vld [vmem:[#allocation7 + $0x32c] ss:$16 sps:$4 sm:$0xff]  }
 0x3e8   : > { %v19486_v61 = vpack.c.bf16 %v4859_v47, %v4856_v60  ;;  %6892 = vmatprep.subr.bf16.mxu1 %v17341_v11  ;;  %v17380_v60 = vld [vmem:[#allocation7 + $0x2e4] ss:$16 sps:$4 sm:$0xff]   ;;  %v17383_v47 = vld [vmem:[#allocation7 + $0x2ec] ss:$16 sps:$4 sm:$0xff]   ;;  %v17393_v11 = vld [vmem:[#allocation7 + $0x328] ss:$16 sps:$4 sm:$0xff]  }
 0x47d   : > { %v4599_v6 = vpop.f32.mrb[40].mxu1 }
 0x47e   : > { %v16291_v32 = vadd.f32 %v4599_v6, %v2802_v5  ;;  %v4601_v8 = vpop.f32.mrb[41].mxu1  ;;  %v17396_v6 = vld [vmem:[#allocation7 + $0x340] ss:$16 sps:$4 sm:$0xff]  }
 0x47f   : > { %v16292_v7 = vadd.f32 %v4601_v8, %v2806_v22  ;;  %v4603_v9 = vpop.f32.mrb[42].mxu1  ;;  %v17404_v8 = vld [vmem:[#allocation7 + $0x364] ss:$16 sps:$4 sm:$0xff]  }
 0x480   : > { %v16293_v12 = vadd.f32 %v4603_v9, %v2802_v5  ;;  %v4605_v25 = vpop.f32.mrb[43].mxu1  ;;  %v4854_v17 = vmax.f32 %v16291_v32, 0.0  ;;  %v17398_v5 = vld [vmem:[#allocation7 + $0x344] ss:$16 sps:$4 sm:$0xff]   ;;  %v17399_v32 = vld [vmem:[#allocation7 + $0x348] ss:$16 sps:$4 sm:$0xff]  }
 0x481   : > { %v16294_v16 = vadd.f32 %v4605_v25, %v2806_v22  ;;  %v4855_v48 = vmax.f32 %v16292_v7, 0.0  ;;  %v17401_v22 = vld [vmem:[#allocation7 + $0x34c] ss:$16 sps:$4 sm:$0xff]   ;;  %v17402_v9 = vld [vmem:[#allocation7 + $0x360] ss:$16 sps:$4 sm:$0xff]  }
 0x482   : > { %v4857_v18 = vmax.f32 %v16293_v12, 0.0  ;;  %v17407_v7 = vld [vmem:[#allocation7 + $0x36c] ss:$16 sps:$4 sm:$0xff]   ;;  %v17405_v12 = vld [vmem:[#allocation7 + $0x368] ss:$16 sps:$4 sm:$0xff]  }
 0x483   : > { %v4858_v33 = vmax.f32 %v16294_v16, 0.0  ;;  %v17410_v25 = vld [vmem:[#allocation7 + $0x384] ss:$16 sps:$4 sm:$0xff]   ;;  %v17413_v16 = vld [vmem:[#allocation7 + $0x38c] ss:$16 sps:$4 sm:$0xff]  }
 0x484   : > { %v19492_v23 = vpack.c.bf16 %v4857_v18, %v4854_v17  ;;  %v17408_v17 = vld [vmem:[#allocation7 + $0x380] ss:$16 sps:$4 sm:$0xff]   ;;  %v17411_v18 = vld [vmem:[#allocation7 + $0x388] ss:$16 sps:$4 sm:$0xff]  }
 0x485   : > { %v19494_v24 = vpack.c.bf16 %v4858_v33, %v4855_v48  ;;  %v17416_v48 = vld [vmem:[#allocation7 + $0x3a4] ss:$16 sps:$4 sm:$0xff]   ;;  %v17419_v33 = vld [vmem:[#allocation7 + $0x3ac] ss:$16 sps:$4 sm:$0xff]  }
 0x486   : > { %v4866_v27 = vshll.u32 %v19492_v23, 16  ;;  %v4864_v28 = vshrl.u32 %v19492_v23, 16 }
 0x487   : > { %6678 = vmatprep.mubr.bf16.mxu0 %v19494_v24  ;;  %6883 = vmatprep.mubr.bf16.mxu1 %v19494_v24 }
 0x488   : > { %6679 = vmatmul.mubr.bf16.vlgmr.msra.gmra.mrb[32].mxu0 %v19492_v23  ;;  %6884 = vmatmul.mubr.bf16.vlgmr.msra.gmra.mrb[44].mxu1 %v19492_v23  ;;  %v4868_v35 = vrot.slane %v4866_v27, 1  ;;  %v17420_v27 = vld [vmem:[#allocation7 + $0x3c0] ss:$16 sps:$4 sm:$0xff]  }
 0x489   : > { %6688 = vmatpush1.bf16.msra.mxu0 %v17336_v14  ;;  %6893 = vmatpush1.bf16.msra.mxu1 %v17339_v36  ;;  %v17414_v14 = vld [vmem:[#allocation7 + $0x3a0] ss:$16 sps:$4 sm:$0xff]   ;;  %v17417_v36 = vld [vmem:[#allocation7 + $0x3a8] ss:$16 sps:$4 sm:$0xff]  }
 0x48a   : > { %6689 = vmatprep.subr.bf16.mxu0 %v17344_v19  ;;  %6894 = vmatprep.subr.bf16.mxu1 %v17347_v29  ;;  %v4869_v31 = vor.u32 %v4868_v35, %v4864_v28  ;;  %v17422_v19 = vld [vmem:[#allocation7 + $0x3c4] ss:$16 sps:$4 sm:$0xff]   ;;  %v17425_v29 = vld [vmem:[#allocation7 + $0x3cc] ss:$16 sps:$4 sm:$0xff]   ;;  %v17423_v28 = vld [vmem:[#allocation7 + $0x3c8] ss:$16 sps:$4 sm:$0xff]  }
 0x48b   : > { %v17428_v35 = vld [vmem:[#allocation7 + $0x3e4] ss:$16 sps:$4 sm:$0xff]  }
 0x48c   : > { %6719 = vmatprep.mubr.bf16.mxu0 %v4869_v31  ;;  %6924 = vmatprep.mubr.bf16.mxu1 %v4869_v31  ;;  %v17426_v31 = vld [vmem:[#allocation7 + $0x3e0] ss:$16 sps:$4 sm:$0xff]  }
 0x48d   : > { %6690 = vmatpush1.bf16.msra.mxu0 %v17342_v51  ;;  %6895 = vmatpush1.bf16.msra.mxu1 %v17345_v30  ;;  %v17431_v51 = vld [vmem:[#allocation7 + $0x3ec] ss:$16 sps:$4 sm:$0xff]   ;;  %v4880_v30 = vshll.u32 %v19486_v61, 16 }
 0x48e   : > { %6691 = vmatprep.subr.bf16.mxu0 %v17350_v34  ;;  %6896 = vmatprep.subr.bf16.mxu1 %v17353_v38  ;;  %v17429_v34 = vld [vmem:[#allocation7 + $0x3e8] ss:$16 sps:$4 sm:$0xff]   ;;  %v17434_v38 = vld [vmem:[#allocation7 + $0x404] ss:$16 sps:$4 sm:$0xff]  }
 0x491   : > { %6692 = vmatpush1.bf16.msra.mxu0 %v17348_v39  ;;  %6897 = vmatpush1.bf16.msra.mxu1 %v17351_v40  ;;  %v17437_v39 = vld [vmem:[#allocation7 + $0x40c] ss:$16 sps:$4 sm:$0xff]   ;;  %v4882_v40 = vrot.slane %v4880_v30, 1  ;;  %v17504_v30 = vld [vmem:[#allocation7 + $0x580] ss:$16 sps:$4 sm:$0xff]  }
 0x492   : > { %6693 = vmatprep.subr.bf16.mxu0 %v17356_v41  ;;  %6898 = vmatprep.subr.bf16.mxu1 %v17359_v42  ;;  %v17432_v41 = vld [vmem:[#allocation7 + $0x400] ss:$16 sps:$4 sm:$0xff]   ;;  %v4878_v42 = vshrl.u32 %v19486_v61, 16 }
 0x495   : > { %6694 = vmatpush1.bf16.msra.mxu0 %v17354_v44  ;;  %6899 = vmatpush1.bf16.msra.mxu1 %v17357_v45  ;;  %v17435_v44 = vld [vmem:[#allocation7 + $0x408] ss:$16 sps:$4 sm:$0xff]   ;;  %v4883_v45 = vor.u32 %v4882_v40, %v4878_v42  ;;  %v17521_v42 = vld [vmem:[#allocation7 + $0x5cc] ss:$16 sps:$4 sm:$0xff]  }
 0x496   : > { %6695 = vmatprep.subr.bf16.mxu0 %v17362_v46  ;;  %6900 = vmatprep.subr.bf16.mxu1 %v17365_v50  ;;  %v17440_v46 = vld [vmem:[#allocation7 + $0x424] ss:$16 sps:$4 sm:$0xff]   ;;  %v17443_v50 = vld [vmem:[#allocation7 + $0x42c] ss:$16 sps:$4 sm:$0xff]   ;;  %v17513_v40 = vld [vmem:[#allocation7 + $0x5a8] ss:$16 sps:$4 sm:$0xff]  }
 0x499   : > { %6696 = vmatpush1.bf16.msra.mxu0 %v17360_v53  ;;  %6901 = vmatpush1.bf16.msra.mxu1 %v17363_v54  ;;  %v17438_v53 = vld [vmem:[#allocation7 + $0x420] ss:$16 sps:$4 sm:$0xff]   ;;  %v17441_v54 = vld [vmem:[#allocation7 + $0x428] ss:$16 sps:$4 sm:$0xff]  }
 0x49a   : > { %6697 = vmatprep.subr.bf16.mxu0 %v17368_v55  ;;  %6902 = vmatprep.subr.bf16.mxu1 %v17371_v43  ;;  %v17446_v55 = vld [vmem:[#allocation7 + $0x444] ss:$16 sps:$4 sm:$0xff]   ;;  %v17449_v43 = vld [vmem:[#allocation7 + $0x44c] ss:$16 sps:$4 sm:$0xff]  }
 0x49d   : > { %6698 = vmatpush1.bf16.msra.mxu0 %v17366_v57  ;;  %6903 = vmatpush1.bf16.msra.mxu1 %v17369_v37  ;;  %v17444_v57 = vld [vmem:[#allocation7 + $0x440] ss:$16 sps:$4 sm:$0xff]   ;;  %v17447_v37 = vld [vmem:[#allocation7 + $0x448] ss:$16 sps:$4 sm:$0xff]  }
 0x49e   : > { %6699 = vmatprep.subr.bf16.mxu0 %v17374_v49  ;;  %6904 = vmatprep.subr.bf16.mxu1 %v17377_v58  ;;  %v17452_v49 = vld [vmem:[#allocation7 + $0x464] ss:$16 sps:$4 sm:$0xff]   ;;  %v17455_v58 = vld [vmem:[#allocation7 + $0x46c] ss:$16 sps:$4 sm:$0xff]  }
 0x4a1   : > { %6700 = vmatpush1.bf16.msra.mxu0 %v17372_v59  ;;  %6905 = vmatpush1.bf16.msra.mxu1 %v17375_v20  ;;  %v17450_v59 = vld [vmem:[#allocation7 + $0x460] ss:$16 sps:$4 sm:$0xff]   ;;  %v17453_v20 = vld [vmem:[#allocation7 + $0x468] ss:$16 sps:$4 sm:$0xff]  }
 0x4a2   : > { %6701 = vmatprep.subr.bf16.mxu0 %v17380_v60  ;;  %6906 = vmatprep.subr.bf16.mxu1 %v17383_v47  ;;  %v17458_v60 = vld [vmem:[#allocation7 + $0x484] ss:$16 sps:$4 sm:$0xff]   ;;  %v17461_v47 = vld [vmem:[#allocation7 + $0x48c] ss:$16 sps:$4 sm:$0xff]  }
 0x4a5   : > { %6702 = vmatpush1.bf16.msra.mxu0 %v17378_v62  ;;  %6907 = vmatpush1.bf16.msra.mxu1 %v17381_v52  ;;  %v17456_v62 = vld [vmem:[#allocation7 + $0x480] ss:$16 sps:$4 sm:$0xff]   ;;  %v17459_v52 = vld [vmem:[#allocation7 + $0x488] ss:$16 sps:$4 sm:$0xff]  }
 0x4a6   : > { %6703 = vmatprep.subr.bf16.mxu0 %v17386_v56  ;;  %6908 = vmatprep.subr.bf16.mxu1 %v17389_v63  ;;  %v17464_v56 = vld [vmem:[#allocation7 + $0x4a4] ss:$16 sps:$4 sm:$0xff]   ;;  %v17467_v63 = vld [vmem:[#allocation7 + $0x4ac] ss:$16 sps:$4 sm:$0xff]  }
 0x4a9   : > { %6704 = vmatpush1.bf16.msra.mxu0 %v17384_v1  ;;  %6909 = vmatpush1.bf16.msra.mxu1 %v17387_v2  ;;  %v17462_v1 = vld [vmem:[#allocation7 + $0x4a0] ss:$16 sps:$4 sm:$0xff]   ;;  %v17465_v2 = vld [vmem:[#allocation7 + $0x4a8] ss:$16 sps:$4 sm:$0xff]  }
 0x4aa   : > { %6705 = vmatprep.subr.bf16.mxu0 %v17392_v4  ;;  %6910 = vmatprep.subr.bf16.mxu1 %v17395_v3  ;;  %v17470_v4 = vld [vmem:[#allocation7 + $0x4c4] ss:$16 sps:$4 sm:$0xff]   ;;  %v17473_v3 = vld [vmem:[#allocation7 + $0x4cc] ss:$16 sps:$4 sm:$0xff]  }
 0x4ad   : > { %6706 = vmatpush1.bf16.msra.mxu0 %v17390_v15  ;;  %6911 = vmatpush1.bf16.msra.mxu1 %v17393_v11  ;;  %v17468_v15 = vld [vmem:[#allocation7 + $0x4c0] ss:$16 sps:$4 sm:$0xff]   ;;  %v17471_v11 = vld [vmem:[#allocation7 + $0x4c8] ss:$16 sps:$4 sm:$0xff]  }
 0x4ae   : > { %6707 = vmatprep.subr.bf16.mxu0 %v17398_v5  ;;  %6912 = vmatprep.subr.bf16.mxu1 %v17401_v22  ;;  %v17476_v5 = vld [vmem:[#allocation7 + $0x4e4] ss:$16 sps:$4 sm:$0xff]   ;;  %v17479_v22 = vld [vmem:[#allocation7 + $0x4ec] ss:$16 sps:$4 sm:$0xff]  }
 0x4b1   : > { %6708 = vmatpush1.bf16.msra.mxu0 %v17396_v6  ;;  %6913 = vmatpush1.bf16.msra.mxu1 %v17399_v32  ;;  %v17474_v6 = vld [vmem:[#allocation7 + $0x4e0] ss:$16 sps:$4 sm:$0xff]   ;;  %v17477_v32 = vld [vmem:[#allocation7 + $0x4e8] ss:$16 sps:$4 sm:$0xff]  }
 0x4b2   : > { %6709 = vmatprep.subr.bf16.mxu0 %v17404_v8  ;;  %6914 = vmatprep.subr.bf16.mxu1 %v17407_v7  ;;  %v17482_v8 = vld [vmem:[#allocation7 + $0x504] ss:$16 sps:$4 sm:$0xff]   ;;  %v17485_v7 = vld [vmem:[#allocation7 + $0x50c] ss:$16 sps:$4 sm:$0xff]  }
 0x4b5   : > { %6710 = vmatpush1.bf16.msra.mxu0 %v17402_v9  ;;  %6915 = vmatpush1.bf16.msra.mxu1 %v17405_v12  ;;  %v17480_v9 = vld [vmem:[#allocation7 + $0x500] ss:$16 sps:$4 sm:$0xff]   ;;  %v17483_v12 = vld [vmem:[#allocation7 + $0x508] ss:$16 sps:$4 sm:$0xff]  }
 0x4b6   : > { %6711 = vmatprep.subr.bf16.mxu0 %v17410_v25  ;;  %6916 = vmatprep.subr.bf16.mxu1 %v17413_v16  ;;  %v17488_v25 = vld [vmem:[#allocation7 + $0x524] ss:$16 sps:$4 sm:$0xff]   ;;  %v17491_v16 = vld [vmem:[#allocation7 + $0x52c] ss:$16 sps:$4 sm:$0xff]  }
 0x4b9   : > { %6712 = vmatpush1.bf16.msra.mxu0 %v17408_v17  ;;  %6917 = vmatpush1.bf16.msra.mxu1 %v17411_v18  ;;  %v17486_v17 = vld [vmem:[#allocation7 + $0x520] ss:$16 sps:$4 sm:$0xff]   ;;  %v17489_v18 = vld [vmem:[#allocation7 + $0x528] ss:$16 sps:$4 sm:$0xff]  }
 0x4ba   : > { %6713 = vmatprep.subr.bf16.mxu0 %v17416_v48  ;;  %6918 = vmatprep.subr.bf16.mxu1 %v17419_v33  ;;  %v17494_v48 = vld [vmem:[#allocation7 + $0x544] ss:$16 sps:$4 sm:$0xff]   ;;  %v17497_v33 = vld [vmem:[#allocation7 + $0x54c] ss:$16 sps:$4 sm:$0xff]  }
 0x4bd   : > { %6714 = vmatpush1.bf16.msra.mxu0 %v17414_v14  ;;  %6919 = vmatpush1.bf16.msra.mxu1 %v17417_v36  ;;  %v17492_v14 = vld [vmem:[#allocation7 + $0x540] ss:$16 sps:$4 sm:$0xff]   ;;  %v17495_v36 = vld [vmem:[#allocation7 + $0x548] ss:$16 sps:$4 sm:$0xff]  }
 0x4be   : > { %6715 = vmatprep.subr.bf16.mxu0 %v17422_v19  ;;  %6920 = vmatprep.subr.bf16.mxu1 %v17425_v29  ;;  %v17500_v19 = vld [vmem:[#allocation7 + $0x564] ss:$16 sps:$4 sm:$0xff]   ;;  %v17503_v29 = vld [vmem:[#allocation7 + $0x56c] ss:$16 sps:$4 sm:$0xff]  }
 0x4c1   : > { %6716 = vmatpush1.bf16.msra.mxu0 %v17420_v27  ;;  %6921 = vmatpush1.bf16.msra.mxu1 %v17423_v28  ;;  %v17498_v27 = vld [vmem:[#allocation7 + $0x560] ss:$16 sps:$4 sm:$0xff]   ;;  %v17501_v28 = vld [vmem:[#allocation7 + $0x568] ss:$16 sps:$4 sm:$0xff]  }
 0x4c2   : > { %6717 = vmatprep.subr.bf16.mxu0 %v17428_v35  ;;  %6922 = vmatprep.subr.bf16.mxu1 %v17431_v51  ;;  %v17506_v35 = vld [vmem:[#allocation7 + $0x584] ss:$16 sps:$4 sm:$0xff]   ;;  %v17509_v51 = vld [vmem:[#allocation7 + $0x58c] ss:$16 sps:$4 sm:$0xff]  }
 0x4c5   : > { %6718 = vmatpush1.bf16.msra.mxu0 %v17426_v31  ;;  %6923 = vmatpush1.bf16.msra.mxu1 %v17429_v34  ;;  %v17507_v31 = vld [vmem:[#allocation7 + $0x588] ss:$16 sps:$4 sm:$0xff]   ;;  %v17512_v34 = vld [vmem:[#allocation7 + $0x5a4] ss:$16 sps:$4 sm:$0xff]  }
 0x4c6   : > { %6728 = vmatprep.subr.bf16.mxu0 %v17434_v38  ;;  %6933 = vmatprep.subr.bf16.mxu1 %v17437_v39  ;;  %v17515_v38 = vld [vmem:[#allocation7 + $0x5ac] ss:$16 sps:$4 sm:$0xff]   ;;  %v17510_v39 = vld [vmem:[#allocation7 + $0x5a0] ss:$16 sps:$4 sm:$0xff]  }
 0x4c8   : > { %6720 = vmatmul.mubr.bf16.vlgmr.msra.gmra.mrb[32].mxu0 %v19486_v61  ;;  %6925 = vmatmul.mubr.bf16.vlgmr.msra.gmra.mrb[44].mxu1 %v19486_v61 }
 0x4c9   : > { %6729 = vmatpush1.bf16.msra.mxu0 %v17432_v41  ;;  %6760 = vmatprep.mubr.bf16.mxu0 %v4883_v45  ;;  %v17518_v41 = vld [vmem:[#allocation7 + $0x5c4] ss:$16 sps:$4 sm:$0xff]  }
 0x4ca   : > { %6934 = vmatpush1.bf16.msra.mxu1 %v17435_v44  ;;  %6965 = vmatprep.mubr.bf16.mxu1 %v4883_v45  ;;  %v17516_v44 = vld [vmem:[#allocation7 + $0x5c0] ss:$16 sps:$4 sm:$0xff]   ;;  %v17519_v45 = vld [vmem:[#allocation7 + $0x5c8] ss:$16 sps:$4 sm:$0xff]  }
 0x4cb   : > { %6730 = vmatprep.subr.bf16.mxu0 %v17440_v46  ;;  %6935 = vmatprep.subr.bf16.mxu1 %v17443_v50  ;;  %v17524_v46 = vld [vmem:[#allocation7 + $0x5e4] ss:$16 sps:$4 sm:$0xff]   ;;  %v4873_v50 = vshll.u32 %v19494_v24, 16 }
 0x4cd   : > { %6731 = vmatpush1.bf16.msra.mxu0 %v17438_v53  ;;  %v17527_v53 = vld [vmem:[#allocation7 + $0x5ec] ss:$16 sps:$4 sm:$0xff]  }
 0x4ce   : > { %6936 = vmatpush1.bf16.msra.mxu1 %v17441_v54  ;;  %6732 = vmatprep.subr.bf16.mxu0 %v17446_v55  ;;  %v17522_v54 = vld [vmem:[#allocation7 + $0x5e0] ss:$16 sps:$4 sm:$0xff]   ;;  %v17525_v55 = vld [vmem:[#allocation7 + $0x5e8] ss:$16 sps:$4 sm:$0xff]  }
 0x4cf   : > { %6937 = vmatprep.subr.bf16.mxu1 %v17449_v43  ;;  %v4875_v43 = vrot.slane %v4873_v50, 1  ;;  %v17605_v50 = vld [vmem:[#allocation7 + $0x78c] ss:$16 sps:$4 sm:$0xff]  }
 0x4d1   : > { %6733 = vmatpush1.bf16.msra.mxu0 %v17444_v57  ;;  %v17530_v57 = vld [vmem:[#allocation7 + $0x604] ss:$16 sps:$4 sm:$0xff]  }
 0x4d2   : > { %6938 = vmatpush1.bf16.msra.mxu1 %v17447_v37  ;;  %6734 = vmatprep.subr.bf16.mxu0 %v17452_v49  ;;  %v17533_v37 = vld [vmem:[#allocation7 + $0x60c] ss:$16 sps:$4 sm:$0xff]   ;;  %v4871_v49 = vshrl.u32 %v19494_v24, 16 }
 0x4d3   : > { %6939 = vmatprep.subr.bf16.mxu1 %v17455_v58  ;;  %v17528_v58 = vld [vmem:[#allocation7 + $0x600] ss:$16 sps:$4 sm:$0xff]  }
 0x4d5   : > { %6735 = vmatpush1.bf16.msra.mxu0 %v17450_v59  ;;  %v4876_v59 = vor.u32 %v4875_v43, %v4871_v49  ;;  %v17611_v43 = vld [vmem:[#allocation7 + $0x7ac] ss:$16 sps:$4 sm:$0xff]   ;;  %v17614_v49 = vld [vmem:[#allocation7 + $0x7c4] ss:$16 sps:$4 sm:$0xff]  }
 0x4d6   : > { %6940 = vmatpush1.bf16.msra.mxu1 %v17453_v20  ;;  %6736 = vmatprep.subr.bf16.mxu0 %v17458_v60  ;;  %v17531_v20 = vld [vmem:[#allocation7 + $0x608] ss:$16 sps:$4 sm:$0xff]   ;;  %v17536_v60 = vld [vmem:[#allocation7 + $0x624] ss:$16 sps:$4 sm:$0xff]  }
 0x4d7   : > { %6941 = vmatprep.subr.bf16.mxu1 %v17461_v47  ;;  %v4891_v47 = vrot.slane %v19494_v24, 1  ;;  %v17551_v24 = vld [vmem:[#allocation7 + $0x66c] ss:$16 sps:$4 sm:$0xff]  }
 0x4d9   : > { %6737 = vmatpush1.bf16.msra.mxu0 %v17456_v62  ;;  %v17539_v62 = vld [vmem:[#allocation7 + $0x62c] ss:$16 sps:$4 sm:$0xff]  }
 0x4da   : > { %6942 = vmatpush1.bf16.msra.mxu1 %v17459_v52  ;;  %6738 = vmatprep.subr.bf16.mxu0 %v17464_v56  ;;  %v17534_v52 = vld [vmem:[#allocation7 + $0x620] ss:$16 sps:$4 sm:$0xff]   ;;  %v17537_v56 = vld [vmem:[#allocation7 + $0x628] ss:$16 sps:$4 sm:$0xff]  }
 0x4db   : > { %6943 = vmatprep.subr.bf16.mxu1 %v17467_v63  ;;  %v17542_v63 = vld [vmem:[#allocation7 + $0x644] ss:$16 sps:$4 sm:$0xff]  }
 0x4dd   : > { %6739 = vmatpush1.bf16.msra.mxu0 %v17462_v1  ;;  %v17545_v1 = vld [vmem:[#allocation7 + $0x64c] ss:$16 sps:$4 sm:$0xff]  }
 0x4de   : > { %6944 = vmatpush1.bf16.msra.mxu1 %v17465_v2  ;;  %6740 = vmatprep.subr.bf16.mxu0 %v17470_v4  ;;  %v17540_v2 = vld [vmem:[#allocation7 + $0x640] ss:$16 sps:$4 sm:$0xff]   ;;  %v17543_v4 = vld [vmem:[#allocation7 + $0x648] ss:$16 sps:$4 sm:$0xff]  }
 0x4df   : > { %6945 = vmatprep.subr.bf16.mxu1 %v17473_v3  ;;  %v17548_v3 = vld [vmem:[#allocation7 + $0x664] ss:$16 sps:$4 sm:$0xff]  }
 0x4e1   : > { %6741 = vmatpush1.bf16.msra.mxu0 %v17468_v15  ;;  %v17546_v15 = vld [vmem:[#allocation7 + $0x660] ss:$16 sps:$4 sm:$0xff]  }
 0x4e2   : > { %6946 = vmatpush1.bf16.msra.mxu1 %v17471_v11  ;;  %6742 = vmatprep.subr.bf16.mxu0 %v17476_v5  ;;  %v17549_v11 = vld [vmem:[#allocation7 + $0x668] ss:$16 sps:$4 sm:$0xff]   ;;  %v17554_v5 = vld [vmem:[#allocation7 + $0x684] ss:$16 sps:$4 sm:$0xff]  }
 0x4e3   : > { %6947 = vmatprep.subr.bf16.mxu1 %v17479_v22  ;;  %v17557_v22 = vld [vmem:[#allocation7 + $0x68c] ss:$16 sps:$4 sm:$0xff]  }
 0x4e5   : > { %6743 = vmatpush1.bf16.msra.mxu0 %v17474_v6  ;;  %v17552_v6 = vld [vmem:[#allocation7 + $0x680] ss:$16 sps:$4 sm:$0xff]  }
 0x4e6   : > { %6948 = vmatpush1.bf16.msra.mxu1 %v17477_v32  ;;  %6744 = vmatprep.subr.bf16.mxu0 %v17482_v8  ;;  %v17555_v32 = vld [vmem:[#allocation7 + $0x688] ss:$16 sps:$4 sm:$0xff]   ;;  %v17560_v8 = vld [vmem:[#allocation7 + $0x6a4] ss:$16 sps:$4 sm:$0xff]  }
 0x4e7   : > { %6949 = vmatprep.subr.bf16.mxu1 %v17485_v7  ;;  %v17563_v7 = vld [vmem:[#allocation7 + $0x6ac] ss:$16 sps:$4 sm:$0xff]  }
 0x4e9   : > { %6745 = vmatpush1.bf16.msra.mxu0 %v17480_v9  ;;  %v17558_v9 = vld [vmem:[#allocation7 + $0x6a0] ss:$16 sps:$4 sm:$0xff]  }
 0x4ea   : > { %6950 = vmatpush1.bf16.msra.mxu1 %v17483_v12  ;;  %6746 = vmatprep.subr.bf16.mxu0 %v17488_v25  ;;  %v17561_v12 = vld [vmem:[#allocation7 + $0x6a8] ss:$16 sps:$4 sm:$0xff]   ;;  %v17566_v25 = vld [vmem:[#allocation7 + $0x6c4] ss:$16 sps:$4 sm:$0xff]  }
 0x4eb   : > { %6951 = vmatprep.subr.bf16.mxu1 %v17491_v16  ;;  %v17569_v16 = vld [vmem:[#allocation7 + $0x6cc] ss:$16 sps:$4 sm:$0xff]  }
 0x4ed   : > { %6747 = vmatpush1.bf16.msra.mxu0 %v17486_v17  ;;  %v17564_v17 = vld [vmem:[#allocation7 + $0x6c0] ss:$16 sps:$4 sm:$0xff]  }
 0x4ee   : > { %6952 = vmatpush1.bf16.msra.mxu1 %v17489_v18  ;;  %6748 = vmatprep.subr.bf16.mxu0 %v17494_v48  ;;  %v17567_v18 = vld [vmem:[#allocation7 + $0x6c8] ss:$16 sps:$4 sm:$0xff]   ;;  %v17572_v48 = vld [vmem:[#allocation7 + $0x6e4] ss:$16 sps:$4 sm:$0xff]  }
 0x4ef   : > { %6953 = vmatprep.subr.bf16.mxu1 %v17497_v33  ;;  %v17575_v33 = vld [vmem:[#allocation7 + $0x6ec] ss:$16 sps:$4 sm:$0xff]  }
 0x4f1   : > { %6749 = vmatpush1.bf16.msra.mxu0 %v17492_v14  ;;  %v17570_v14 = vld [vmem:[#allocation7 + $0x6e0] ss:$16 sps:$4 sm:$0xff]  }
 0x4f2   : > { %6954 = vmatpush1.bf16.msra.mxu1 %v17495_v36  ;;  %6750 = vmatprep.subr.bf16.mxu0 %v17500_v19  ;;  %v17573_v36 = vld [vmem:[#allocation7 + $0x6e8] ss:$16 sps:$4 sm:$0xff]   ;;  %v17578_v19 = vld [vmem:[#allocation7 + $0x704] ss:$16 sps:$4 sm:$0xff]  }
 0x4f3   : > { %6955 = vmatprep.subr.bf16.mxu1 %v17503_v29  ;;  %v17581_v29 = vld [vmem:[#allocation7 + $0x70c] ss:$16 sps:$4 sm:$0xff]  }
 0x4f5   : > { %6751 = vmatpush1.bf16.msra.mxu0 %v17498_v27  ;;  %v17576_v27 = vld [vmem:[#allocation7 + $0x700] ss:$16 sps:$4 sm:$0xff]  }
 0x4f6   : > { %6956 = vmatpush1.bf16.msra.mxu1 %v17501_v28  ;;  %6752 = vmatprep.subr.bf16.mxu0 %v17506_v35  ;;  %v17579_v28 = vld [vmem:[#allocation7 + $0x708] ss:$16 sps:$4 sm:$0xff]   ;;  %v17584_v35 = vld [vmem:[#allocation7 + $0x724] ss:$16 sps:$4 sm:$0xff]  }
 0x4f7   : > { %6957 = vmatprep.subr.bf16.mxu1 %v17509_v51  ;;  %v17587_v51 = vld [vmem:[#allocation7 + $0x72c] ss:$16 sps:$4 sm:$0xff]  }
 0x4f9   : > { %6753 = vmatpush1.bf16.msra.mxu0 %v17504_v30  ;;  %v17582_v30 = vld [vmem:[#allocation7 + $0x720] ss:$16 sps:$4 sm:$0xff]  }
 0x4fa   : > { %6958 = vmatpush1.bf16.msra.mxu1 %v17507_v31  ;;  %6754 = vmatprep.subr.bf16.mxu0 %v17512_v34  ;;  %v17585_v31 = vld [vmem:[#allocation7 + $0x728] ss:$16 sps:$4 sm:$0xff]   ;;  %v17590_v34 = vld [vmem:[#allocation7 + $0x744] ss:$16 sps:$4 sm:$0xff]  }
 0x4fb   : > { %6959 = vmatprep.subr.bf16.mxu1 %v17515_v38  ;;  %v17593_v38 = vld [vmem:[#allocation7 + $0x74c] ss:$16 sps:$4 sm:$0xff]  }
 0x4fd   : > { %6755 = vmatpush1.bf16.msra.mxu0 %v17510_v39  ;;  %v17588_v39 = vld [vmem:[#allocation7 + $0x740] ss:$16 sps:$4 sm:$0xff]  }
 0x4fe   : > { %6960 = vmatpush1.bf16.msra.mxu1 %v17513_v40  ;;  %6756 = vmatprep.subr.bf16.mxu0 %v17518_v41  ;;  %v17591_v40 = vld [vmem:[#allocation7 + $0x748] ss:$16 sps:$4 sm:$0xff]   ;;  %v17596_v41 = vld [vmem:[#allocation7 + $0x764] ss:$16 sps:$4 sm:$0xff]  }
 0x4ff   : > { %6961 = vmatprep.subr.bf16.mxu1 %v17521_v42  ;;  %v17599_v42 = vld [vmem:[#allocation7 + $0x76c] ss:$16 sps:$4 sm:$0xff]  }
 0x501   : > { %6757 = vmatpush1.bf16.msra.mxu0 %v17516_v44  ;;  %v17594_v44 = vld [vmem:[#allocation7 + $0x760] ss:$16 sps:$4 sm:$0xff]  }
 0x502   : > { %6962 = vmatpush1.bf16.msra.mxu1 %v17519_v45  ;;  %6758 = vmatprep.subr.bf16.mxu0 %v17524_v46  ;;  %v17597_v45 = vld [vmem:[#allocation7 + $0x768] ss:$16 sps:$4 sm:$0xff]   ;;  %v17602_v46 = vld [vmem:[#allocation7 + $0x784] ss:$16 sps:$4 sm:$0xff]  }
 0x503   : > { %6963 = vmatprep.subr.bf16.mxu1 %v17527_v53  ;;  %v17600_v53 = vld [vmem:[#allocation7 + $0x780] ss:$16 sps:$4 sm:$0xff]  }
 0x505   : > { %6759 = vmatpush1.bf16.msra.mxu0 %v17522_v54  ;;  %v17603_v54 = vld [vmem:[#allocation7 + $0x788] ss:$16 sps:$4 sm:$0xff]  }
 0x506   : > { %6964 = vmatpush1.bf16.msra.mxu1 %v17525_v55  ;;  %6769 = vmatprep.subr.bf16.mxu0 %v17530_v57  ;;  %v17608_v55 = vld [vmem:[#allocation7 + $0x7a4] ss:$16 sps:$4 sm:$0xff]   ;;  %v17606_v57 = vld [vmem:[#allocation7 + $0x7a0] ss:$16 sps:$4 sm:$0xff]  }
 0x507   : > { %6974 = vmatprep.subr.bf16.mxu1 %v17533_v37  ;;  %v17609_v37 = vld [vmem:[#allocation7 + $0x7a8] ss:$16 sps:$4 sm:$0xff]  }
 0x508   : > { %6761 = vmatmul.mubr.bf16.vlgmr.msra.gmra.mrb[32].mxu0 %v4876_v59 }
 0x509   : > { %6966 = vmatmul.mubr.bf16.vlgmr.msra.gmra.mrb[44].mxu1 %v4876_v59  ;;  %6770 = vmatpush1.bf16.msra.mxu0 %v17528_v58  ;;  %v17617_v58 = vld [vmem:[#allocation7 + $0x7cc] ss:$16 sps:$4 sm:$0xff]   ;;  %v17612_v59 = vld [vmem:[#allocation7 + $0x7c0] ss:$16 sps:$4 sm:$0xff]  }
 0x50a   : > { %6801 = vmatprep.mubr.bf16.mxu0 %v4891_v47  ;;  %6975 = vmatpush1.bf16.msra.mxu1 %v17531_v20  ;;  %v17615_v20 = vld [vmem:[#allocation7 + $0x7c8] ss:$16 sps:$4 sm:$0xff]  }
 0x50b   : > { %7006 = vmatprep.mubr.bf16.mxu1 %v4891_v47  ;;  %6771 = vmatprep.subr.bf16.mxu0 %v17536_v60  ;;  %v17620_v60 = vld [vmem:[#allocation7 + $0x7e4] ss:$16 sps:$4 sm:$0xff]   ;;  %v17623_v47 = vld [vmem:[#allocation7 + $0x7ec] ss:$16 sps:$4 sm:$0xff]  }
 0x50c   : > { %6976 = vmatprep.subr.bf16.mxu1 %v17539_v62  ;;  %v17618_v62 = vld [vmem:[#allocation7 + $0x7e0] ss:$16 sps:$4 sm:$0xff]  }
 0x50d   : > { %6772 = vmatpush1.bf16.msra.mxu0 %v17534_v52  ;;  %v17621_v52 = vld [vmem:[#allocation7 + $0x7e8] ss:$16 sps:$4 sm:$0xff]  }
 0x50e   : > { %6977 = vmatpush1.bf16.msra.mxu1 %v17537_v56  ;;  %6773 = vmatprep.subr.bf16.mxu0 %v17542_v63  ;;  %v17626_v56 = vld [vmem:[#allocation7 + $0x804] ss:$16 sps:$4 sm:$0xff]   ;;  %v17629_v63 = vld [vmem:[#allocation7 + $0x80c] ss:$16 sps:$4 sm:$0xff]  }
 0x50f   : > { %6978 = vmatprep.subr.bf16.mxu1 %v17545_v1  ;;  %v17624_v1 = vld [vmem:[#allocation7 + $0x800] ss:$16 sps:$4 sm:$0xff]  }
 0x511   : > { %6774 = vmatpush1.bf16.msra.mxu0 %v17540_v2  ;;  %v4890_v2 = vrot.slane %v19492_v23, 1  ;;  %v17636_v23 = vld [vmem:[#allocation7 + $0x840] ss:$16 sps:$4 sm:$0xff]  }
 0x512   : > { %6979 = vmatpush1.bf16.msra.mxu1 %v17543_v4  ;;  %6775 = vmatprep.subr.bf16.mxu0 %v17548_v3  ;;  %v17627_v4 = vld [vmem:[#allocation7 + $0x808] ss:$16 sps:$4 sm:$0xff]   ;;  %v17632_v3 = vld [vmem:[#allocation7 + $0x824] ss:$16 sps:$4 sm:$0xff]  }
 0x513   : > { %6980 = vmatprep.subr.bf16.mxu1 %v17551_v24  ;;  %v17635_v24 = vld [vmem:[#allocation7 + $0x82c] ss:$16 sps:$4 sm:$0xff]  }
 0x515   : > { %6776 = vmatpush1.bf16.msra.mxu0 %v17546_v15  ;;  %v17630_v15 = vld [vmem:[#allocation7 + $0x820] ss:$16 sps:$4 sm:$0xff]  }
 0x516   : > { %6981 = vmatpush1.bf16.msra.mxu1 %v17549_v11  ;;  %6777 = vmatprep.subr.bf16.mxu0 %v17554_v5  ;;  %v17633_v11 = vld [vmem:[#allocation7 + $0x828] ss:$16 sps:$4 sm:$0xff]   ;;  %v17638_v5 = vld [vmem:[#allocation7 + $0x844] ss:$16 sps:$4 sm:$0xff]  }
 0x517   : > { %6982 = vmatprep.subr.bf16.mxu1 %v17557_v22  ;;  %v17641_v22 = vld [vmem:[#allocation7 + $0x84c] ss:$16 sps:$4 sm:$0xff]  }
 0x519   : > { %6778 = vmatpush1.bf16.msra.mxu0 %v17552_v6  ;;  %v19162_v6 = vmov 0  }
 0x51a   : > { %6983 = vmatpush1.bf16.msra.mxu1 %v17555_v32  ;;  %6779 = vmatprep.subr.bf16.mxu0 %v17560_v8  ;;  %v17639_v32 = vld [vmem:[#allocation7 + $0x848] ss:$16 sps:$4 sm:$0xff]   ;;  %v17644_v8 = vld [vmem:[#allocation7 + $0x864] ss:$16 sps:$4 sm:$0xff]  }
 0x51b   : > { %6984 = vmatprep.subr.bf16.mxu1 %v17563_v7  ;;  %v17647_v7 = vld [vmem:[#allocation7 + $0x86c] ss:$16 sps:$4 sm:$0xff]  }
 0x51d   : > { %6780 = vmatpush1.bf16.msra.mxu0 %v17558_v9  ;;  %v17642_v9 = vld [vmem:[#allocation7 + $0x860] ss:$16 sps:$4 sm:$0xff]  }
 0x51e   : > { %6985 = vmatpush1.bf16.msra.mxu1 %v17561_v12  ;;  %6781 = vmatprep.subr.bf16.mxu0 %v17566_v25  ;;  %v17645_v12 = vld [vmem:[#allocation7 + $0x868] ss:$16 sps:$4 sm:$0xff]   ;;  %v17650_v25 = vld [vmem:[#allocation7 + $0x884] ss:$16 sps:$4 sm:$0xff]  }
 0x51f   : > { %6986 = vmatprep.subr.bf16.mxu1 %v17569_v16  ;;  %v17653_v16 = vld [vmem:[#allocation7 + $0x88c] ss:$16 sps:$4 sm:$0xff]  }
 0x521   : > { %6782 = vmatpush1.bf16.msra.mxu0 %v17564_v17  ;;  %v17648_v17 = vld [vmem:[#allocation7 + $0x880] ss:$16 sps:$4 sm:$0xff]  }
 0x522   : > { %6987 = vmatpush1.bf16.msra.mxu1 %v17567_v18  ;;  %6783 = vmatprep.subr.bf16.mxu0 %v17572_v48  ;;  %v17651_v18 = vld [vmem:[#allocation7 + $0x888] ss:$16 sps:$4 sm:$0xff]   ;;  %v17656_v48 = vld [vmem:[#allocation7 + $0x8a4] ss:$16 sps:$4 sm:$0xff]  }
 0x523   : > { %6988 = vmatprep.subr.bf16.mxu1 %v17575_v33  ;;  %v17659_v33 = vld [vmem:[#allocation7 + $0x8ac] ss:$16 sps:$4 sm:$0xff]  }
 0x525   : > { %6784 = vmatpush1.bf16.msra.mxu0 %v17570_v14  ;;  %v17654_v14 = vld [vmem:[#allocation7 + $0x8a0] ss:$16 sps:$4 sm:$0xff]  }
 0x526   : > { %6989 = vmatpush1.bf16.msra.mxu1 %v17573_v36  ;;  %6785 = vmatprep.subr.bf16.mxu0 %v17578_v19  ;;  %v17657_v36 = vld [vmem:[#allocation7 + $0x8a8] ss:$16 sps:$4 sm:$0xff]   ;;  %v17662_v19 = vld [vmem:[#allocation7 + $0x8c4] ss:$16 sps:$4 sm:$0xff]  }
 0x527   : > { %6990 = vmatprep.subr.bf16.mxu1 %v17581_v29  ;;  %v17665_v29 = vld [vmem:[#allocation7 + $0x8cc] ss:$16 sps:$4 sm:$0xff]  }
 0x529   : > { %6786 = vmatpush1.bf16.msra.mxu0 %v17576_v27  ;;  %v17660_v27 = vld [vmem:[#allocation7 + $0x8c0] ss:$16 sps:$4 sm:$0xff]  }
 0x52a   : > { %6991 = vmatpush1.bf16.msra.mxu1 %v17579_v28  ;;  %6787 = vmatprep.subr.bf16.mxu0 %v17584_v35  ;;  %v17663_v28 = vld [vmem:[#allocation7 + $0x8c8] ss:$16 sps:$4 sm:$0xff]   ;;  %v17668_v35 = vld [vmem:[#allocation7 + $0x8e4] ss:$16 sps:$4 sm:$0xff]  }
 0x52b   : > { %6992 = vmatprep.subr.bf16.mxu1 %v17587_v51  ;;  %v17671_v51 = vld [vmem:[#allocation7 + $0x8ec] ss:$16 sps:$4 sm:$0xff]  }
 0x52d   : > { %6788 = vmatpush1.bf16.msra.mxu0 %v17582_v30  ;;  %v17666_v30 = vld [vmem:[#allocation7 + $0x8e0] ss:$16 sps:$4 sm:$0xff]  }
 0x52e   : > { %6993 = vmatpush1.bf16.msra.mxu1 %v17585_v31  ;;  %6789 = vmatprep.subr.bf16.mxu0 %v17590_v34  ;;  %v17669_v31 = vld [vmem:[#allocation7 + $0x8e8] ss:$16 sps:$4 sm:$0xff]   ;;  %v4892_v34 = vrot.slane %v19486_v61, 1 }
 0x52f   : > { %6994 = vmatprep.subr.bf16.mxu1 %v17593_v38  ;;  %v5184_v38 = vld [vmem:[%s22235_s6] sm:$0xf] }
 0x531   : > { %6790 = vmatpush1.bf16.msra.mxu0 %v17588_v39  ;;  %v5200_v39 = vsub.s32 3, %v19354_v10 }
 0x532   : > { %6995 = vmatpush1.bf16.msra.mxu1 %v17591_v40  ;;  %6791 = vmatprep.subr.bf16.mxu0 %v17596_v41  ;;  %v19163_v40 = vmov 1966171168  }
 0x533   : > { %6996 = vmatprep.subr.bf16.mxu1 %v17599_v42  ;;  %v7067_v41 = vunpack.c.l.s4 %v19163_v40  ;;  %v5189_v42 = vrot.slane %v5184_v38, %v19378_v0  ;;  %v5201_v61 = vrot.slane %v5184_v38, %v5200_v39  ;;  %v17698_v40 = vld [vmem:[%s22236_s7 + $0x84] ss:$16 sps:$4 sm:$0xff] (%p96_p4)  }
 0x535   : > { %6792 = vmatpush1.bf16.msra.mxu0 %v17594_v44  ;;  %v5197_v44 = vrot.slane %v5184_v38, %v19357_v26 }
 0x536   : > { %6997 = vmatpush1.bf16.msra.mxu1 %v17597_v45  ;;  %6793 = vmatprep.subr.bf16.mxu0 %v17602_v46  ;;  %v5193_v45 = vrot.slane %v5184_v38, %v19381_v21  ;;  %v7068_v46 = vunpack.c.0.s8 %v7067_v41  ;;  %v17697_v38 = vld [vmem:[%s22236_s7 + $0x68] ss:$16 sps:$4 sm:$0xff] (%p96_p4)   ;;  %v17700_v41 = vld [vmem:[%s22236_s7 + $0x8c] ss:$16 sps:$4 sm:$0xff] (%p96_p4)  }
 0x537   : > { %6998 = vmatprep.subr.bf16.mxu1 %v17605_v50 }
 0x539   : > { %6794 = vmatpush1.bf16.msra.mxu0 %v17600_v53 }
 0x53a   : > { %6999 = vmatpush1.bf16.msra.mxu1 %v17603_v54  ;;  %6795 = vmatprep.subr.bf16.mxu0 %v17608_v55 }
 0x53b   : > { %7000 = vmatprep.subr.bf16.mxu1 %v17611_v43 }
 0x53d   : > { %6796 = vmatpush1.bf16.msra.mxu0 %v17606_v57 }
 0x53e   : > { %7001 = vmatpush1.bf16.msra.mxu1 %v17609_v37  ;;  %6797 = vmatprep.subr.bf16.mxu0 %v17614_v49 }
 0x53f   : > { %7002 = vmatprep.subr.bf16.mxu1 %v17617_v58 }
 0x541   : > { %6798 = vmatpush1.bf16.msra.mxu0 %v17612_v59 }
 0x542   : > { %7003 = vmatpush1.bf16.msra.mxu1 %v17615_v20  ;;  %6799 = vmatprep.subr.bf16.mxu0 %v17620_v60 }
 0x543   : > { %7004 = vmatprep.subr.bf16.mxu1 %v17623_v47  ;;  %v7071_v47 = vsub.s32 %v7068_v46, %v19354_v10  ;;  %v17708_v46 = vld [vmem:[%s22236_s7 + $0xa0] ss:$16 sps:$4 sm:$0xff] (%p96_p4)  }
 0x545   : > { %6800 = vmatpush1.bf16.msra.mxu0 %v17618_v62 }
 0x546   : > { %7005 = vmatpush1.bf16.msra.mxu1 %v17621_v52  ;;  %6810 = vmatprep.subr.bf16.mxu0 %v17626_v56 }
 0x547   : > { %7015 = vmatprep.subr.bf16.mxu1 %v17629_v63 }
 0x548   : > { %6802 = vmatmul.mubr.bf16.vlgmr.msra.gmra.mrb[32].mxu0 %v4890_v2 }
 0x549   : > { %7007 = vmatmul.mubr.bf16.vlgmr.msra.gmra.mrb[44].mxu1 %v4890_v2  ;;  %6811 = vmatpush1.bf16.msra.mxu0 %v17624_v1 }
 0x54a   : > { %7016 = vmatpush1.bf16.msra.mxu1 %v17627_v4  ;;  %6812 = vmatprep.subr.bf16.mxu0 %v17632_v3 }
 0x54b   : > { %7017 = vmatprep.subr.bf16.mxu1 %v17635_v24  ;;  %6842 = vmatprep.mubr.bf16.mxu0 %v19162_v6 }
 0x54c   : > { %7047 = vmatprep.mubr.bf16.mxu1 %v19162_v6 }
 0x54d   : > { %6813 = vmatpush1.bf16.msra.mxu0 %v17630_v15 }
 0x54e   : > { %7018 = vmatpush1.bf16.msra.mxu1 %v17633_v11  ;;  %6814 = vmatprep.subr.bf16.mxu0 %v17638_v5 }
 0x54f   : > { %7019 = vmatprep.subr.bf16.mxu1 %v17641_v22 }
 0x551   : > { %6815 = vmatpush1.bf16.msra.mxu0 %v17636_v23 }
 0x552   : > { %7020 = vmatpush1.bf16.msra.mxu1 %v17639_v32  ;;  %6816 = vmatprep.subr.bf16.mxu0 %v17644_v8 }
 0x553   : > { %7021 = vmatprep.subr.bf16.mxu1 %v17647_v7 }
 0x555   : > { %6817 = vmatpush1.bf16.msra.mxu0 %v17642_v9 }
 0x556   : > { %7022 = vmatpush1.bf16.msra.mxu1 %v17645_v12  ;;  %6818 = vmatprep.subr.bf16.mxu0 %v17650_v25 }
 0x557   : > { %7023 = vmatprep.subr.bf16.mxu1 %v17653_v16 }
 0x559   : > { %6819 = vmatpush1.bf16.msra.mxu0 %v17648_v17 }
 0x55a   : > { %7024 = vmatpush1.bf16.msra.mxu1 %v17651_v18  ;;  %6820 = vmatprep.subr.bf16.mxu0 %v17656_v48  ;;  %v17676_v18 = vld [vmem:[%s22236_s7 + $0xc] ss:$16 sps:$4 sm:$0xff] (%p96_p4)   ;;  %v17678_v48 = vld [vmem:[%s22236_s7] ss:$16 sps:$4 sm:$0xff] (%p96_p4)  }
 0x55b   : > { %7025 = vmatprep.subr.bf16.mxu1 %v17659_v33  ;;  %v17679_v33 = vld [vmem:[%s22236_s7 + $0x8] ss:$16 sps:$4 sm:$0xff] (%p96_p4)  }
 0x55d   : > { %6821 = vmatpush1.bf16.msra.mxu0 %v17654_v14  ;;  %v17680_v14 = vld [vmem:[%s22236_s7 + $0x24] ss:$16 sps:$4 sm:$0xff] (%p96_p4)  }
 0x55e   : > { %7026 = vmatpush1.bf16.msra.mxu1 %v17657_v36  ;;  %6822 = vmatprep.subr.bf16.mxu0 %v17662_v19  ;;  %v17682_v36 = vld [vmem:[%s22236_s7 + $0x2c] ss:$16 sps:$4 sm:$0xff] (%p96_p4)   ;;  %v17684_v19 = vld [vmem:[%s22236_s7 + $0x20] ss:$16 sps:$4 sm:$0xff] (%p96_p4)  }
 0x55f   : > { %7027 = vmatprep.subr.bf16.mxu1 %v17665_v29  ;;  %v17685_v29 = vld [vmem:[%s22236_s7 + $0x28] ss:$16 sps:$4 sm:$0xff] (%p96_p4)  }
 0x561   : > { %6823 = vmatpush1.bf16.msra.mxu0 %v17660_v27  ;;  %v17686_v27 = vld [vmem:[%s22236_s7 + $0x44] ss:$16 sps:$4 sm:$0xff] (%p96_p4)  }
 0x562   : > { %7028 = vmatpush1.bf16.msra.mxu1 %v17663_v28  ;;  %6824 = vmatprep.subr.bf16.mxu0 %v17668_v35  ;;  %v17688_v28 = vld [vmem:[%s22236_s7 + $0x4c] ss:$16 sps:$4 sm:$0xff] (%p96_p4)   ;;  %v17690_v35 = vld [vmem:[%s22236_s7 + $0x40] ss:$16 sps:$4 sm:$0xff] (%p96_p4)  }
 0x563   : > { %7029 = vmatprep.subr.bf16.mxu1 %v17671_v51  ;;  %v17691_v51 = vld [vmem:[%s22236_s7 + $0x48] ss:$16 sps:$4 sm:$0xff] (%p96_p4)  }
 0x565   : > { %6825 = vmatpush1.bf16.msra.mxu0 %v17666_v30  ;;  %v17692_v30 = vld [vmem:[%s22236_s7 + $0x64] ss:$16 sps:$4 sm:$0xff] (%p96_p4)  }
 0x566   : > { %7030 = vmatpush1.bf16.msra.mxu1 %v17669_v31  ;;  %12642 = vmatprep.subr.bf16.mxu0 (%p96_p4), %v17674_v13  ;;  %v17694_v31 = vld [vmem:[%s22236_s7 + $0x6c] ss:$16 sps:$4 sm:$0xff] (%p96_p4)  }
 0x567   :  { %13216 = vmatprep.subr.bf16.mxu1 (%p96_p4), %v17676_v18  ;;  %v17760_v13 = vld [vmem:[%s22236_s7 + $0x1cc] ss:$16 sps:$4 sm:$0xff] (%p96_p4)   ;;  %v17762_v18 = vld [vmem:[%s22236_s7 + $0x1c0] ss:$16 sps:$4 sm:$0xff] (%p96_p4)  }
 0x568   : > { %6843 = vmatmul.mubr.bf16.vlgmr.msra.gmra.mrb[32].mxu0 %v4892_v34 }
 0x569   : > { %7048 = vmatmul.mubr.bf16.vlgmr.msra.gmra.mrb[44].mxu1 %v4892_v34  ;;  %12643 = vmatpush1.bf16.msra.mxu0 (%p96_p4), %v17678_v48  ;;  %v17696_v34 = vld [vmem:[%s22236_s7 + $0x60] ss:$16 sps:$4 sm:$0xff] (%p96_p4)   ;;  %v17763_v48 = vld [vmem:[%s22236_s7 + $0x1c8] ss:$16 sps:$4 sm:$0xff] (%p96_p4)  }
 0x56a   :  { %13217 = vmatpush1.bf16.msra.mxu1 (%p96_p4), %v17679_v33  ;;  %12644 = vmatprep.subr.bf16.mxu0 (%p96_p4), %v17680_v14  ;;  %v17764_v33 = vld [vmem:[%s22236_s7 + $0x1e4] ss:$16 sps:$4 sm:$0xff] (%p96_p4)   ;;  %v17766_v14 = vld [vmem:[%s22236_s7 + $0x1ec] ss:$16 sps:$4 sm:$0xff] (%p96_p4)  }
 0x56b   :  { %13218 = vmatprep.subr.bf16.mxu1 (%p96_p4), %v17682_v36  ;;  %v17768_v36 = vld [vmem:[%s22236_s7 + $0x1e0] ss:$16 sps:$4 sm:$0xff] (%p96_p4)  }
 0x56d   :  { %12645 = vmatpush1.bf16.msra.mxu0 (%p96_p4), %v17684_v19  ;;  %v17769_v19 = vld [vmem:[%s22236_s7 + $0x1e8] ss:$16 sps:$4 sm:$0xff] (%p96_p4)  }
 0x56e   :  { %13219 = vmatpush1.bf16.msra.mxu1 (%p96_p4), %v17685_v29  ;;  %12646 = vmatprep.subr.bf16.mxu0 (%p96_p4), %v17686_v27  ;;  %v17772_v27 = vld [vmem:[%s22236_s7 + $0x204] ss:$16 sps:$4 sm:$0xff] (%p96_p4)  }
 0x56f   :  { %13220 = vmatprep.subr.bf16.mxu1 (%p96_p4), %v17688_v28  ;;  %v17775_v28 = vld [vmem:[%s22236_s7 + $0x20c] ss:$16 sps:$4 sm:$0xff] (%p96_p4)  }
 0x571   :  { %12647 = vmatpush1.bf16.msra.mxu0 (%p96_p4), %v17690_v35 }
 0x572   :  { %13221 = vmatpush1.bf16.msra.mxu1 (%p96_p4), %v17691_v51  ;;  %12648 = vmatprep.subr.bf16.mxu0 (%p96_p4), %v17692_v30  ;;  %v17770_v51 = vld [vmem:[%s22236_s7 + $0x200] ss:$16 sps:$4 sm:$0xff] (%p96_p4)   ;;  %v17773_v30 = vld [vmem:[%s22236_s7 + $0x208] ss:$16 sps:$4 sm:$0xff] (%p96_p4)  }
 0x573   :  { %13222 = vmatprep.subr.bf16.mxu1 (%p96_p4), %v17694_v31  ;;  %v17778_v31 = vld [vmem:[%s22236_s7 + $0x224] ss:$16 sps:$4 sm:$0xff] (%p96_p4)  }
 0x575   :  { %12649 = vmatpush1.bf16.msra.mxu0 (%p96_p4), %v17696_v34  ;;  %v17781_v34 = vld [vmem:[%s22236_s7 + $0x22c] ss:$16 sps:$4 sm:$0xff] (%p96_p4)  }
 0x576   :  { %13223 = vmatpush1.bf16.msra.mxu1 (%p96_p4), %v17697_v38  ;;  %12650 = vmatprep.subr.bf16.mxu0 (%p96_p4), %v17698_v40  ;;  %v17776_v38 = vld [vmem:[%s22236_s7 + $0x220] ss:$16 sps:$4 sm:$0xff] (%p96_p4)   ;;  %v17779_v40 = vld [vmem:[%s22236_s7 + $0x228] ss:$16 sps:$4 sm:$0xff] (%p96_p4)  }
 0x577   :  { %13224 = vmatprep.subr.bf16.mxu1 (%p96_p4), %v17700_v41  ;;  %v17784_v41 = vld [vmem:[%s22236_s7 + $0x244] ss:$16 sps:$4 sm:$0xff] (%p96_p4)  }
 0x63b   : > { %v6844_v50 = vpop.f32.mrb[32].mxu0 }
 0x63c   : > { %v16295_v53 = vadd.f32 %v6844_v50, %v5189_v42  ;;  %v7049_v54 = vpop.f32.mrb[44].mxu1  ;;  %v6846_v55 = vpop.f32.mrb[33].mxu0  ;;  %v17702_v42 = vld [vmem:[%s22236_s7 + $0x80] ss:$16 sps:$4 sm:$0xff] (%p96_p4)   ;;  %v17709_v50 = vld [vmem:[%s22236_s7 + $0xa8] ss:$16 sps:$4 sm:$0xff] (%p96_p4)  }
 0x63d   : > { %v16297_v43 = vadd.f32 %v7049_v54, %v5197_v44  ;;  %v16296_v57 = vadd.f32 %v6846_v55, %v5193_v45  ;;  %v7051_v37 = vpop.f32.mrb[45].mxu1  ;;  %v6848_v49 = vpop.f32.mrb[34].mxu0  ;;  %v17703_v44 = vld [vmem:[%s22236_s7 + $0x88] ss:$16 sps:$4 sm:$0xff] (%p96_p4)   ;;  %v17704_v45 = vld [vmem:[%s22236_s7 + $0xa4] ss:$16 sps:$4 sm:$0xff] (%p96_p4)   ;;  %12651 = vmatpush1.bf16.msra.mxu0 (%p96_p4), %v17702_v42 }
 0x63e   : > { %v7056_v58 = vmax.f32 %v16295_v53, 0.0  ;;  %v16298_v59 = vadd.f32 %v7051_v37, %v5201_v61  ;;  %v7053_v20 = vpop.f32.mrb[46].mxu1  ;;  %v6849_v60 = vpop.f32.mrb[35].mxu0  ;;  %v17706_v61 = vld [vmem:[%s22236_s7 + $0xac] ss:$16 sps:$4 sm:$0xff] (%p96_p4)   ;;  %13225 = vmatpush1.bf16.msra.mxu1 (%p96_p4), %v17703_v44  ;;  %12652 = vmatprep.subr.bf16.mxu0 (%p96_p4), %v17704_v45 }
 0x63f   : > { %v7058_v62 = vmax.f32 %v16297_v43, 0.0  ;;  %v7057_v52 = vmax.f32 %v16296_v57, 0.0  ;;  %v7054_v56 = vpop.f32.mrb[47].mxu1  ;;  %v17710_v53 = vld [vmem:[%s22236_s7 + $0xc4] ss:$16 sps:$4 sm:$0xff] (%p96_p4)   ;;  %13226 = vmatprep.subr.bf16.mxu1 (%p96_p4), %v17706_v61 }
 0x640   : > { %v7059_v63 = vmax.f32 %v16298_v59, 0.0  ;;  %v17712_v54 = vld [vmem:[%s22236_s7 + $0xcc] ss:$16 sps:$4 sm:$0xff] (%p96_p4)   ;;  %v17714_v55 = vld [vmem:[%s22236_s7 + $0xc0] ss:$16 sps:$4 sm:$0xff] (%p96_p4)  }
 0x641   : > { %v7064_v1 = vcombine.low %v7056_v58, %v7057_v52  ;;  %v7134_v2 = vcombine.high %v7056_v58, %v7057_v52  ;;  %v17715_v43 = vld [vmem:[%s22236_s7 + $0xc8] ss:$16 sps:$4 sm:$0xff] (%p96_p4)   ;;  %12653 = vmatpush1.bf16.msra.mxu0 (%p96_p4), %v17708_v46  ;;  %v17716_v57 = vld [vmem:[%s22236_s7 + $0xe4] ss:$16 sps:$4 sm:$0xff] (%p96_p4)   ;;  %v17718_v37 = vld [vmem:[%s22236_s7 + $0xec] ss:$16 sps:$4 sm:$0xff] (%p96_p4)  }
 0x642   : > { %v7065_v4 = vcombine.low %v7058_v62, %v7059_v63  ;;  %v7135_v3 = vcombine.high %v7058_v62, %v7059_v63  ;;  %13227 = vmatpush1.bf16.msra.mxu1 (%p96_p4), %v17709_v50  ;;  %12654 = vmatprep.subr.bf16.mxu0 (%p96_p4), %v17710_v53  ;;  %v17720_v49 = vld [vmem:[%s22236_s7 + $0xe0] ss:$16 sps:$4 sm:$0xff] (%p96_p4)   ;;  %v17721_v58 = vld [vmem:[%s22236_s7 + $0xe8] ss:$16 sps:$4 sm:$0xff] (%p96_p4)   ;;  %v17722_v59 = vld [vmem:[%s22236_s7 + $0x104] ss:$16 sps:$4 sm:$0xff] (%p96_p4)  }
 0x643   : > { %v7072_v24 = vrot.slane %v7064_v1, %v7071_v47  ;;  %v7142_v15 = vrot.slane %v7134_v2, %v7071_v47  ;;  %13228 = vmatprep.subr.bf16.mxu1 (%p96_p4), %v17712_v54  ;;  %v17724_v20 = vld [vmem:[%s22236_s7 + $0x10c] ss:$16 sps:$4 sm:$0xff] (%p96_p4)   ;;  %v17726_v60 = vld [vmem:[%s22236_s7 + $0x100] ss:$16 sps:$4 sm:$0xff] (%p96_p4)   ;;  %v17728_v62 = vld [vmem:[%s22236_s7 + $0x124] ss:$16 sps:$4 sm:$0xff] (%p96_p4)  }
 0x644   : > { %v7079_v11 = vrot.slane %v7065_v4, %v7071_v47  ;;  %v7149_v5 = vrot.slane %v7135_v3, %v7071_v47  ;;  %v17730_v52 = vld [vmem:[%s22236_s7 + $0x12c] ss:$16 sps:$4 sm:$0xff] (%p96_p4)   ;;  %v17732_v56 = vld [vmem:[%s22236_s7 + $0x120] ss:$16 sps:$4 sm:$0xff] (%p96_p4)   ;;  %v17733_v63 = vld [vmem:[%s22236_s7 + $0x128] ss:$16 sps:$4 sm:$0xff] (%p96_p4)  }
 0x645   :  { %12655 = vmatpush1.bf16.msra.mxu0 (%p96_p4), %v17714_v55  ;;  %v17734_v1 = vld [vmem:[%s22236_s7 + $0x144] ss:$16 sps:$4 sm:$0xff] (%p96_p4)   ;;  %v17736_v2 = vld [vmem:[%s22236_s7 + $0x14c] ss:$16 sps:$4 sm:$0xff] (%p96_p4)   ;;  %v17738_v4 = vld [vmem:[%s22236_s7 + $0x140] ss:$16 sps:$4 sm:$0xff] (%p96_p4)  }
 0x646   : > { %v7080_v22 = vcombine.low %v7072_v24, %v7079_v11  ;;  %v7103_v6 = vcombine.high %v7072_v24, %v7079_v11  ;;  %v7150_v23 = vcombine.low %v7142_v15, %v7149_v5  ;;  %v7165_v32 = vcombine.high %v7142_v15, %v7149_v5  ;;  %13229 = vmatpush1.bf16.msra.mxu1 (%p96_p4), %v17715_v43  ;;  %v17739_v3 = vld [vmem:[%s22236_s7 + $0x148] ss:$16 sps:$4 sm:$0xff] (%p96_p4)   ;;  %v17740_v24 = vld [vmem:[%s22236_s7 + $0x164] ss:$16 sps:$4 sm:$0xff] (%p96_p4)   ;;  %v17742_v15 = vld [vmem:[%s22236_s7 + $0x16c] ss:$16 sps:$4 sm:$0xff] (%p96_p4)  }
 0x647   :  { %98 = sbr.rel (!%p96_p4) target bundleno = 75 (0x4b), region = 95  ;;  %12656 = vmatprep.subr.bf16.mxu0 (%p96_p4), %v17716_v57  ;;  %13230 = vmatprep.subr.bf16.mxu1 (%p96_p4), %v17718_v37  ;;  %v17744_v5 = vld [vmem:[%s22236_s7 + $0x160] ss:$16 sps:$4 sm:$0xff] (%p96_p4)   ;;  %v17787_v42 = vld [vmem:[%s22236_s7 + $0x24c] ss:$16 sps:$4 sm:$0xff] (%p96_p4)  }
 0x648   : > { %v7087_v8 = vrot.slane %v7080_v22, %v7071_v47  ;;  %v7110_v7 = vrot.slane %v7103_v6, %v7071_v47  ;;  %v7157_v9 = vrot.slane %v7150_v23, %v7071_v47  ;;  %v7172_v12 = vrot.slane %v7165_v32, %v7071_v47  ;;  %v17727_v47 = vld [vmem:[%s22236_s7 + $0x108] ss:$16 sps:$4 sm:$0xff] (%p96_p4)   ;;  %v17746_v23 = vld [vmem:[%s22236_s7 + $0x184] ss:$16 sps:$4 sm:$0xff] (%p96_p4)   ;;  %v17748_v32 = vld [vmem:[%s22236_s7 + $0x18c] ss:$16 sps:$4 sm:$0xff] (%p96_p4)  }
 0x649   :  { %12657 = vmatpush1.bf16.msra.mxu0 (%p96_p4), %v17720_v49  ;;  %v17745_v6 = vld [vmem:[%s22236_s7 + $0x168] ss:$16 sps:$4 sm:$0xff] (%p96_p4)   ;;  %v17782_v44 = vld [vmem:[%s22236_s7 + $0x240] ss:$16 sps:$4 sm:$0xff] (%p96_p4)   ;;  %v17790_v61 = vld [vmem:[%s22236_s7 + $0x264] ss:$16 sps:$4 sm:$0xff] (%p96_p4)  }
 0x64a   : > { %7101 = vst.msk [vmem:[%s7100_s26] ss:$8 sm:$0xf] %vm7091_vm2, %v7087_v8  ;;  %15028 = vst.msk [vmem:[%s7100_s26 + $0x20] ss:$8 sm:$0xf] %vm7091_vm2, %v7110_v7  ;;  %v7118_v25 = vcombine.high %v7087_v8, %v7087_v8  ;;  %v7126_v16 = vcombine.high %v7110_v7, %v7110_v7  ;;  %v7180_v17 = vcombine.high %v7157_v9, %v7157_v9  ;;  %13231 = vmatpush1.bf16.msra.mxu1 (%p96_p4), %v17721_v58 }
 0x64b   : > { %15034 = vst.msk [vmem:[%s7100_s26 + $0x80] ss:$8 sm:$0xf] %vm7091_vm2, %v7157_v9  ;;  %15036 = vst.msk [vmem:[%s7100_s26 + $0xa0] ss:$8 sm:$0xf] %vm7091_vm2, %v7172_v12  ;;  %12658 = vmatprep.subr.bf16.mxu0 (%p96_p4), %v17722_v59  ;;  %13232 = vmatprep.subr.bf16.mxu1 (%p96_p4), %v17724_v20 }
 0x64c   : > { %15030 = vst.msk [vmem:[%s7100_s26 + $0x40] ss:$8 sm:$0xf] %vm7091_vm2, %v7118_v25  ;;  %15032 = vst.msk [vmem:[%s7100_s26 + $0x60] ss:$8 sm:$0xf] %vm7091_vm2, %v7126_v16 }
 0x64d   : > { %15038 = vst.msk [vmem:[%s7100_s26 + $0xc0] ss:$8 sm:$0xf] %vm7091_vm2, %v7180_v17  ;;  %12659 = vmatpush1.bf16.msra.mxu0 (%p96_p4), %v17726_v60  ;;  %v17750_v8 = vld [vmem:[%s22236_s7 + $0x180] ss:$16 sps:$4 sm:$0xff] (%p96_p4)  }
 0x64e   :  { %13233 = vmatpush1.bf16.msra.mxu1 %v17727_v47  ;;  %12660 = vmatprep.subr.bf16.mxu0 %v17728_v62  ;;  %v17751_v7 = vld [vmem:[%s22236_s7 + $0x188] ss:$16 sps:$4 sm:$0xff]   ;;  %v17752_v9 = vld [vmem:[%s22236_s7 + $0x1a4] ss:$16 sps:$4 sm:$0xff]   ;;  %v17754_v12 = vld [vmem:[%s22236_s7 + $0x1ac] ss:$16 sps:$4 sm:$0xff]  }
 0x64f   :  { %13234 = vmatprep.subr.bf16.mxu1 %v17730_v52  ;;  %v17756_v25 = vld [vmem:[%s22236_s7 + $0x1a0] ss:$16 sps:$4 sm:$0xff]   ;;  %v17757_v16 = vld [vmem:[%s22236_s7 + $0x1a8] ss:$16 sps:$4 sm:$0xff]   ;;  %v17758_v17 = vld [vmem:[%s22236_s7 + $0x1c4] ss:$16 sps:$4 sm:$0xff]  }
 0x650   :  { %v17785_v45 = vld [vmem:[%s22236_s7 + $0x248] ss:$16 sps:$4 sm:$0xff]   ;;  %v17793_v46 = vld [vmem:[%s22236_s7 + $0x26c] ss:$16 sps:$4 sm:$0xff]   ;;  %v17788_v50 = vld [vmem:[%s22236_s7 + $0x260] ss:$16 sps:$4 sm:$0xff]  }
 0x651   :  { %12661 = vmatpush1.bf16.msra.mxu0 %v17732_v56  ;;  %v17791_v53 = vld [vmem:[%s22236_s7 + $0x268] ss:$16 sps:$4 sm:$0xff]   ;;  %v17796_v54 = vld [vmem:[%s22236_s7 + $0x284] ss:$16 sps:$4 sm:$0xff]   ;;  %v17799_v55 = vld [vmem:[%s22236_s7 + $0x28c] ss:$16 sps:$4 sm:$0xff]  }
 0x652   :  { %13235 = vmatpush1.bf16.msra.mxu1 %v17733_v63  ;;  %12662 = vmatprep.subr.bf16.mxu0 %v17734_v1  ;;  %v17794_v43 = vld [vmem:[%s22236_s7 + $0x280] ss:$16 sps:$4 sm:$0xff]   ;;  %v17797_v57 = vld [vmem:[%s22236_s7 + $0x288] ss:$16 sps:$4 sm:$0xff]   ;;  %v17802_v37 = vld [vmem:[%s22236_s7 + $0x2a4] ss:$16 sps:$4 sm:$0xff]  }
 0x653   :  { %13236 = vmatprep.subr.bf16.mxu1 %v17736_v2  ;;  %v17805_v49 = vld [vmem:[%s22236_s7 + $0x2ac] ss:$16 sps:$4 sm:$0xff]   ;;  %v17800_v58 = vld [vmem:[%s22236_s7 + $0x2a0] ss:$16 sps:$4 sm:$0xff]   ;;  %v17803_v59 = vld [vmem:[%s22236_s7 + $0x2a8] ss:$16 sps:$4 sm:$0xff]  }
 0x654   :  { %v7189_v11 = vld [vmem:[#allocation2 + $0x8] sm:$0xff]  ;;  %v7188_v29 = vld [vmem:[#allocation2] sm:$0xff]  ;;  %v7191_v47 = vld [vmem:[#allocation2 + $0x18] sm:$0xff] }
 0x655   :  { %v7217_v22 = vpack.c.bf16 %v7189_v11, %v7189_v11  ;;  %12663 = vmatpush1.bf16.msra.mxu0 %v17738_v4  ;;  %v7216_v35 = vpack.c.bf16 %v7188_v29, %v7188_v29  ;;  %v17808_v20 = vld [vmem:[%s22236_s7 + $0x2c4] ss:$16 sps:$4 sm:$0xff]   ;;  %v17811_v60 = vld [vmem:[%s22236_s7 + $0x2cc] ss:$16 sps:$4 sm:$0xff]   ;;  %v17806_v62 = vld [vmem:[%s22236_s7 + $0x2c0] ss:$16 sps:$4 sm:$0xff]   ;;  %v7219_v52 = vpack.c.bf16 %v7191_v47, %v7191_v47 }
 0x656   :  { %13237 = vmatpush1.bf16.msra.mxu1 %v17739_v3  ;;  %12664 = vmatprep.subr.bf16.mxu0 %v17740_v24  ;;  %v17809_v56 = vld [vmem:[%s22236_s7 + $0x2c8] ss:$16 sps:$4 sm:$0xff]   ;;  %v17814_v63 = vld [vmem:[%s22236_s7 + $0x2e4] ss:$16 sps:$4 sm:$0xff]   ;;  %v17817_v1 = vld [vmem:[%s22236_s7 + $0x2ec] ss:$16 sps:$4 sm:$0xff]  }
 0x657   :  { %13238 = vmatprep.subr.bf16.mxu1 %v17742_v15  ;;  %12674 = vmatprep.mubr.bf16.mxu0 %v7217_v22  ;;  %v17812_v2 = vld [vmem:[%s22236_s7 + $0x2e0] ss:$16 sps:$4 sm:$0xff]   ;;  %v17815_v4 = vld [vmem:[%s22236_s7 + $0x2e8] ss:$16 sps:$4 sm:$0xff]   ;;  %v17820_v3 = vld [vmem:[%s22236_s7 + $0x304] ss:$16 sps:$4 sm:$0xff]  }
 0x658   :  { %13248 = vmatprep.mubr.bf16.mxu1 %v7217_v22  ;;  %v17823_v24 = vld [vmem:[%s22236_s7 + $0x30c] ss:$16 sps:$4 sm:$0xff]   ;;  %v17818_v15 = vld [vmem:[%s22236_s7 + $0x300] ss:$16 sps:$4 sm:$0xff]   ;;  %v17821_v11 = vld [vmem:[%s22236_s7 + $0x308] ss:$16 sps:$4 sm:$0xff]  }
 0x659   :  { %12665 = vmatpush1.bf16.msra.mxu0 %v17744_v5  ;;  %v17826_v5 = vld [vmem:[%s22236_s7 + $0x324] ss:$16 sps:$4 sm:$0xff]   ;;  %v17829_v22 = vld [vmem:[%s22236_s7 + $0x32c] ss:$16 sps:$4 sm:$0xff]   ;;  %v17851_v29 = vld [vmem:[%s22236_s7 + $0x3a8] ss:$16 sps:$4 sm:$0xff]  }
 0x65a   :  { %13239 = vmatpush1.bf16.msra.mxu1 %v17745_v6  ;;  %12666 = vmatprep.subr.bf16.mxu0 %v17746_v23  ;;  %v17824_v6 = vld [vmem:[%s22236_s7 + $0x320] ss:$16 sps:$4 sm:$0xff]   ;;  %v17827_v23 = vld [vmem:[%s22236_s7 + $0x328] ss:$16 sps:$4 sm:$0xff]  }
 0x65b   :  { %13240 = vmatprep.subr.bf16.mxu1 %v17748_v32  ;;  %v17832_v32 = vld [vmem:[%s22236_s7 + $0x344] ss:$16 sps:$4 sm:$0xff]   ;;  %v17887_v47 = vld [vmem:[%s22236_s7 + $0x468] ss:$16 sps:$4 sm:$0xff]  }
 0x65d   :  { %12667 = vmatpush1.bf16.msra.mxu0 %v17750_v8  ;;  %v17835_v8 = vld [vmem:[%s22236_s7 + $0x34c] ss:$16 sps:$4 sm:$0xff]  }
 0x65e   :  { %13241 = vmatpush1.bf16.msra.mxu1 %v17751_v7  ;;  %12668 = vmatprep.subr.bf16.mxu0 %v17752_v9  ;;  %v17830_v7 = vld [vmem:[%s22236_s7 + $0x340] ss:$16 sps:$4 sm:$0xff]   ;;  %v17833_v9 = vld [vmem:[%s22236_s7 + $0x348] ss:$16 sps:$4 sm:$0xff]  }
 0x65f   :  { %13242 = vmatprep.subr.bf16.mxu1 %v17754_v12  ;;  %v17838_v12 = vld [vmem:[%s22236_s7 + $0x364] ss:$16 sps:$4 sm:$0xff]  }
 0x661   :  { %12669 = vmatpush1.bf16.msra.mxu0 %v17756_v25  ;;  %v17841_v25 = vld [vmem:[%s22236_s7 + $0x36c] ss:$16 sps:$4 sm:$0xff]  }
 0x662   :  { %13243 = vmatpush1.bf16.msra.mxu1 %v17757_v16  ;;  %12670 = vmatprep.subr.bf16.mxu0 %v17758_v17  ;;  %v17836_v16 = vld [vmem:[%s22236_s7 + $0x360] ss:$16 sps:$4 sm:$0xff]   ;;  %v17839_v17 = vld [vmem:[%s22236_s7 + $0x368] ss:$16 sps:$4 sm:$0xff]  }
 0x663   :  { %13244 = vmatprep.subr.bf16.mxu1 %v17760_v13  ;;  %v17844_v13 = vld [vmem:[%s22236_s7 + $0x384] ss:$16 sps:$4 sm:$0xff]  }
 0x665   :  { %12671 = vmatpush1.bf16.msra.mxu0 %v17762_v18  ;;  %v17847_v18 = vld [vmem:[%s22236_s7 + $0x38c] ss:$16 sps:$4 sm:$0xff]  }
 0x666   :  { %13245 = vmatpush1.bf16.msra.mxu1 %v17763_v48  ;;  %12672 = vmatprep.subr.bf16.mxu0 %v17764_v33  ;;  %v17842_v48 = vld [vmem:[%s22236_s7 + $0x380] ss:$16 sps:$4 sm:$0xff]   ;;  %v17845_v33 = vld [vmem:[%s22236_s7 + $0x388] ss:$16 sps:$4 sm:$0xff]  }
 0x667   :  { %13246 = vmatprep.subr.bf16.mxu1 %v17766_v14  ;;  %v17850_v14 = vld [vmem:[%s22236_s7 + $0x3a4] ss:$16 sps:$4 sm:$0xff]  }
 0x669   :  { %12673 = vmatpush1.bf16.msra.mxu0 %v17768_v36  ;;  %v17853_v36 = vld [vmem:[%s22236_s7 + $0x3ac] ss:$16 sps:$4 sm:$0xff]  }
 0x66a   :  { %13247 = vmatpush1.bf16.msra.mxu1 %v17769_v19  ;;  %12683 = vmatprep.subr.bf16.mxu0 %v17772_v27  ;;  %v17848_v19 = vld [vmem:[%s22236_s7 + $0x3a0] ss:$16 sps:$4 sm:$0xff]   ;;  %v17856_v27 = vld [vmem:[%s22236_s7 + $0x3c4] ss:$16 sps:$4 sm:$0xff]  }
 0x66b   :  { %13257 = vmatprep.subr.bf16.mxu1 %v17775_v28  ;;  %v17859_v28 = vld [vmem:[%s22236_s7 + $0x3cc] ss:$16 sps:$4 sm:$0xff]  }
 0x66c   :  { %12675 = vmatmul.mubr.bf16.vlgmr.msra.gmra.mrb[0].mxu0 %v7216_v35 }
 0x66d   :  { %13249 = vmatmul.mubr.bf16.vlgmr.msra.gmra.mrb[0].mxu1 %v7216_v35  ;;  %12684 = vmatpush1.bf16.msra.mxu0 %v17770_v51  ;;  %v17854_v35 = vld [vmem:[%s22236_s7 + $0x3c0] ss:$16 sps:$4 sm:$0xff]   ;;  %v17857_v51 = vld [vmem:[%s22236_s7 + $0x3c8] ss:$16 sps:$4 sm:$0xff]  }
 0x66e   :  { %13258 = vmatpush1.bf16.msra.mxu1 %v17773_v30  ;;  %12685 = vmatprep.subr.bf16.mxu0 %v17778_v31  ;;  %v17862_v30 = vld [vmem:[%s22236_s7 + $0x3e4] ss:$16 sps:$4 sm:$0xff]   ;;  %v17865_v31 = vld [vmem:[%s22236_s7 + $0x3ec] ss:$16 sps:$4 sm:$0xff]  }
 0x66f   :  { %13259 = vmatprep.subr.bf16.mxu1 %v17781_v34  ;;  %12715 = vmatprep.mubr.bf16.mxu0 %v7219_v52  ;;  %v17860_v34 = vld [vmem:[%s22236_s7 + $0x3e0] ss:$16 sps:$4 sm:$0xff]  }
 0x670   :  { %13289 = vmatprep.mubr.bf16.mxu1 %v7219_v52  ;;  %v17895_v52 = vld [vmem:[%s22236_s7 + $0x48c] ss:$16 sps:$4 sm:$0xff]  }
 0x671   :  { %12686 = vmatpush1.bf16.msra.mxu0 %v17776_v38  ;;  %v17863_v38 = vld [vmem:[%s22236_s7 + $0x3e8] ss:$16 sps:$4 sm:$0xff]  }
 0x672   :  { %13260 = vmatpush1.bf16.msra.mxu1 %v17779_v40  ;;  %12687 = vmatprep.subr.bf16.mxu0 %v17784_v41  ;;  %v17868_v40 = vld [vmem:[%s22236_s7 + $0x404] ss:$16 sps:$4 sm:$0xff]  }
 0x673   :  { %13261 = vmatprep.subr.bf16.mxu1 %v17787_v42  ;;  %v7190_v41 = vld [vmem:[#allocation2 + $0x10] sm:$0xff]  ;;  %v17871_v42 = vld [vmem:[%s22236_s7 + $0x40c] ss:$16 sps:$4 sm:$0xff]  }
 0x675   :  { %12688 = vmatpush1.bf16.msra.mxu0 %v17782_v44  ;;  %v17866_v44 = vld [vmem:[%s22236_s7 + $0x400] ss:$16 sps:$4 sm:$0xff]  }
 0x676   :  { %13262 = vmatpush1.bf16.msra.mxu1 %v17785_v45  ;;  %12689 = vmatprep.subr.bf16.mxu0 %v17790_v61  ;;  %v17869_v45 = vld [vmem:[%s22236_s7 + $0x408] ss:$16 sps:$4 sm:$0xff]   ;;  %v7218_v61 = vpack.c.bf16 %v7190_v41, %v7190_v41  ;;  %v17952_v41 = vld [vmem:[%s22236_s7 + $0x5c4] ss:$16 sps:$4 sm:$0xff]  }
 0x677   :  { %13263 = vmatprep.subr.bf16.mxu1 %v17793_v46  ;;  %v17874_v46 = vld [vmem:[%s22236_s7 + $0x424] ss:$16 sps:$4 sm:$0xff]  }
 0x679   :  { %12690 = vmatpush1.bf16.msra.mxu0 %v17788_v50  ;;  %v17877_v50 = vld [vmem:[%s22236_s7 + $0x42c] ss:$16 sps:$4 sm:$0xff]  }
 0x67a   :  { %13264 = vmatpush1.bf16.msra.mxu1 %v17791_v53  ;;  %12691 = vmatprep.subr.bf16.mxu0 %v17796_v54  ;;  %v7193_v53 = vld [vmem:[#allocation2 + $0x28] sm:$0xff] }
 0x67b   :  { %13265 = vmatprep.subr.bf16.mxu1 %v17799_v55  ;;  %v7221_v54 = vpack.c.bf16 %v7193_v53, %v7193_v53  ;;  %v17872_v55 = vld [vmem:[%s22236_s7 + $0x420] ss:$16 sps:$4 sm:$0xff]   ;;  %v17959_v53 = vld [vmem:[%s22236_s7 + $0x5e8] ss:$16 sps:$4 sm:$0xff]  }
 0x67d   :  { %12692 = vmatpush1.bf16.msra.mxu0 %v17794_v43  ;;  %v17875_v43 = vld [vmem:[%s22236_s7 + $0x428] ss:$16 sps:$4 sm:$0xff]  }
 0x67e   :  { %13266 = vmatpush1.bf16.msra.mxu1 %v17797_v57  ;;  %12693 = vmatprep.subr.bf16.mxu0 %v17802_v37  ;;  %v17880_v57 = vld [vmem:[%s22236_s7 + $0x444] ss:$16 sps:$4 sm:$0xff]   ;;  %v17883_v37 = vld [vmem:[%s22236_s7 + $0x44c] ss:$16 sps:$4 sm:$0xff]  }
 0x67f   :  { %13267 = vmatprep.subr.bf16.mxu1 %v17805_v49  ;;  %v17878_v49 = vld [vmem:[%s22236_s7 + $0x440] ss:$16 sps:$4 sm:$0xff]  }
 0x681   :  { %12694 = vmatpush1.bf16.msra.mxu0 %v17800_v58  ;;  %v17881_v58 = vld [vmem:[%s22236_s7 + $0x448] ss:$16 sps:$4 sm:$0xff]  }
 0x682   :  { %13268 = vmatpush1.bf16.msra.mxu1 %v17803_v59  ;;  %12695 = vmatprep.subr.bf16.mxu0 %v17808_v20  ;;  %v17886_v59 = vld [vmem:[%s22236_s7 + $0x464] ss:$16 sps:$4 sm:$0xff]   ;;  %v17889_v20 = vld [vmem:[%s22236_s7 + $0x46c] ss:$16 sps:$4 sm:$0xff]  }
 0x683   :  { %13269 = vmatprep.subr.bf16.mxu1 %v17811_v60  ;;  %v17884_v60 = vld [vmem:[%s22236_s7 + $0x460] ss:$16 sps:$4 sm:$0xff]  }
 0x685   :  { %12696 = vmatpush1.bf16.msra.mxu0 %v17806_v62  ;;  %v17892_v62 = vld [vmem:[%s22236_s7 + $0x484] ss:$16 sps:$4 sm:$0xff]  }
 0x686   :  { %13270 = vmatpush1.bf16.msra.mxu1 %v17809_v56  ;;  %12697 = vmatprep.subr.bf16.mxu0 %v17814_v63  ;;  %v17890_v56 = vld [vmem:[%s22236_s7 + $0x480] ss:$16 sps:$4 sm:$0xff]   ;;  %v17893_v63 = vld [vmem:[%s22236_s7 + $0x488] ss:$16 sps:$4 sm:$0xff]  }
 0x687   :  { %13271 = vmatprep.subr.bf16.mxu1 %v17817_v1  ;;  %v17898_v1 = vld [vmem:[%s22236_s7 + $0x4a4] ss:$16 sps:$4 sm:$0xff]  }
 0x689   :  { %12698 = vmatpush1.bf16.msra.mxu0 %v17812_v2  ;;  %v17901_v2 = vld [vmem:[%s22236_s7 + $0x4ac] ss:$16 sps:$4 sm:$0xff]  }
 0x68a   :  { %13272 = vmatpush1.bf16.msra.mxu1 %v17815_v4  ;;  %12699 = vmatprep.subr.bf16.mxu0 %v17820_v3  ;;  %v17896_v4 = vld [vmem:[%s22236_s7 + $0x4a0] ss:$16 sps:$4 sm:$0xff]   ;;  %v17899_v3 = vld [vmem:[%s22236_s7 + $0x4a8] ss:$16 sps:$4 sm:$0xff]  }
 0x68b   :  { %13273 = vmatprep.subr.bf16.mxu1 %v17823_v24  ;;  %v17904_v24 = vld [vmem:[%s22236_s7 + $0x4c4] ss:$16 sps:$4 sm:$0xff]  }
 0x68d   :  { %12700 = vmatpush1.bf16.msra.mxu0 %v17818_v15  ;;  %v17907_v15 = vld [vmem:[%s22236_s7 + $0x4cc] ss:$16 sps:$4 sm:$0xff]  }
 0x68e   :  { %13274 = vmatpush1.bf16.msra.mxu1 %v17821_v11  ;;  %12701 = vmatprep.subr.bf16.mxu0 %v17826_v5  ;;  %v17902_v11 = vld [vmem:[%s22236_s7 + $0x4c0] ss:$16 sps:$4 sm:$0xff]   ;;  %v17905_v5 = vld [vmem:[%s22236_s7 + $0x4c8] ss:$16 sps:$4 sm:$0xff]  }
 0x68f   :  { %13275 = vmatprep.subr.bf16.mxu1 %v17829_v22  ;;  %v17910_v22 = vld [vmem:[%s22236_s7 + $0x4e4] ss:$16 sps:$4 sm:$0xff]  }
 0x691   :  { %12702 = vmatpush1.bf16.msra.mxu0 %v17824_v6  ;;  %v17913_v6 = vld [vmem:[%s22236_s7 + $0x4ec] ss:$16 sps:$4 sm:$0xff]  }
 0x692   :  { %13276 = vmatpush1.bf16.msra.mxu1 %v17827_v23  ;;  %12703 = vmatprep.subr.bf16.mxu0 %v17832_v32  ;;  %v17908_v23 = vld [vmem:[%s22236_s7 + $0x4e0] ss:$16 sps:$4 sm:$0xff]   ;;  %v17911_v32 = vld [vmem:[%s22236_s7 + $0x4e8] ss:$16 sps:$4 sm:$0xff]  }
 0x693   :  { %13277 = vmatprep.subr.bf16.mxu1 %v17835_v8  ;;  %v17916_v8 = vld [vmem:[%s22236_s7 + $0x504] ss:$16 sps:$4 sm:$0xff]  }
 0x695   :  { %12704 = vmatpush1.bf16.msra.mxu0 %v17830_v7  ;;  %v17919_v7 = vld [vmem:[%s22236_s7 + $0x50c] ss:$16 sps:$4 sm:$0xff]  }
 0x696   :  { %13278 = vmatpush1.bf16.msra.mxu1 %v17833_v9  ;;  %12705 = vmatprep.subr.bf16.mxu0 %v17838_v12  ;;  %v17914_v9 = vld [vmem:[%s22236_s7 + $0x500] ss:$16 sps:$4 sm:$0xff]   ;;  %v17917_v12 = vld [vmem:[%s22236_s7 + $0x508] ss:$16 sps:$4 sm:$0xff]  }
 0x697   :  { %13279 = vmatprep.subr.bf16.mxu1 %v17841_v25  ;;  %v17922_v25 = vld [vmem:[%s22236_s7 + $0x524] ss:$16 sps:$4 sm:$0xff]  }
 0x699   :  { %12706 = vmatpush1.bf16.msra.mxu0 %v17836_v16  ;;  %v17925_v16 = vld [vmem:[%s22236_s7 + $0x52c] ss:$16 sps:$4 sm:$0xff]  }
 0x69a   :  { %13280 = vmatpush1.bf16.msra.mxu1 %v17839_v17  ;;  %12707 = vmatprep.subr.bf16.mxu0 %v17844_v13  ;;  %v17920_v17 = vld [vmem:[%s22236_s7 + $0x520] ss:$16 sps:$4 sm:$0xff]   ;;  %v17923_v13 = vld [vmem:[%s22236_s7 + $0x528] ss:$16 sps:$4 sm:$0xff]  }
 0x69b   :  { %13281 = vmatprep.subr.bf16.mxu1 %v17847_v18  ;;  %v17928_v18 = vld [vmem:[%s22236_s7 + $0x544] ss:$16 sps:$4 sm:$0xff]  }
 0x69d   :  { %12708 = vmatpush1.bf16.msra.mxu0 %v17842_v48  ;;  %v17931_v48 = vld [vmem:[%s22236_s7 + $0x54c] ss:$16 sps:$4 sm:$0xff]  }
 0x69e   :  { %13282 = vmatpush1.bf16.msra.mxu1 %v17845_v33  ;;  %12709 = vmatprep.subr.bf16.mxu0 %v17850_v14  ;;  %v17926_v33 = vld [vmem:[%s22236_s7 + $0x540] ss:$16 sps:$4 sm:$0xff]   ;;  %v17929_v14 = vld [vmem:[%s22236_s7 + $0x548] ss:$16 sps:$4 sm:$0xff]  }
 0x69f   :  { %13283 = vmatprep.subr.bf16.mxu1 %v17853_v36  ;;  %v17934_v36 = vld [vmem:[%s22236_s7 + $0x564] ss:$16 sps:$4 sm:$0xff]  }
 0x6a1   :  { %12710 = vmatpush1.bf16.msra.mxu0 %v17848_v19  ;;  %v17937_v19 = vld [vmem:[%s22236_s7 + $0x56c] ss:$16 sps:$4 sm:$0xff]  }
 0x6a2   :  { %13284 = vmatpush1.bf16.msra.mxu1 %v17851_v29  ;;  %12711 = vmatprep.subr.bf16.mxu0 %v17856_v27  ;;  %v17932_v29 = vld [vmem:[%s22236_s7 + $0x560] ss:$16 sps:$4 sm:$0xff]   ;;  %v17935_v27 = vld [vmem:[%s22236_s7 + $0x568] ss:$16 sps:$4 sm:$0xff]  }
 0x6a3   :  { %13285 = vmatprep.subr.bf16.mxu1 %v17859_v28  ;;  %v17940_v28 = vld [vmem:[%s22236_s7 + $0x584] ss:$16 sps:$4 sm:$0xff]  }
 0x6a5   :  { %12712 = vmatpush1.bf16.msra.mxu0 %v17854_v35  ;;  %v17943_v35 = vld [vmem:[%s22236_s7 + $0x58c] ss:$16 sps:$4 sm:$0xff]  }
 0x6a6   :  { %13286 = vmatpush1.bf16.msra.mxu1 %v17857_v51  ;;  %12713 = vmatprep.subr.bf16.mxu0 %v17862_v30  ;;  %v17938_v51 = vld [vmem:[%s22236_s7 + $0x580] ss:$16 sps:$4 sm:$0xff]   ;;  %v17941_v30 = vld [vmem:[%s22236_s7 + $0x588] ss:$16 sps:$4 sm:$0xff]  }
 0x6a7   :  { %13287 = vmatprep.subr.bf16.mxu1 %v17865_v31  ;;  %v17946_v31 = vld [vmem:[%s22236_s7 + $0x5a4] ss:$16 sps:$4 sm:$0xff]  }
 0x6a9   :  { %12714 = vmatpush1.bf16.msra.mxu0 %v17860_v34  ;;  %v17949_v34 = vld [vmem:[%s22236_s7 + $0x5ac] ss:$16 sps:$4 sm:$0xff]  }
 0x6aa   :  { %13288 = vmatpush1.bf16.msra.mxu1 %v17863_v38  ;;  %12724 = vmatprep.subr.bf16.mxu0 %v17868_v40  ;;  %v17944_v38 = vld [vmem:[%s22236_s7 + $0x5a0] ss:$16 sps:$4 sm:$0xff]   ;;  %v17947_v40 = vld [vmem:[%s22236_s7 + $0x5a8] ss:$16 sps:$4 sm:$0xff]  }
 0x6ab   :  { %13298 = vmatprep.subr.bf16.mxu1 %v17871_v42  ;;  %v17955_v42 = vld [vmem:[%s22236_s7 + $0x5cc] ss:$16 sps:$4 sm:$0xff]  }
 0x6ac   :  { %12716 = vmatmul.mubr.bf16.vlgmr.msra.gmra.mrb[0].mxu0 %v7218_v61 }
 0x6ad   :  { %13290 = vmatmul.mubr.bf16.vlgmr.msra.gmra.mrb[0].mxu1 %v7218_v61  ;;  %12725 = vmatpush1.bf16.msra.mxu0 %v17866_v44  ;;  %v17950_v44 = vld [vmem:[%s22236_s7 + $0x5c0] ss:$16 sps:$4 sm:$0xff]   ;;  %v17958_v61 = vld [vmem:[%s22236_s7 + $0x5e4] ss:$16 sps:$4 sm:$0xff]  }
 0x6ae   :  { %13299 = vmatpush1.bf16.msra.mxu1 %v17869_v45  ;;  %12726 = vmatprep.subr.bf16.mxu0 %v17874_v46  ;;  %v17953_v45 = vld [vmem:[%s22236_s7 + $0x5c8] ss:$16 sps:$4 sm:$0xff]   ;;  %v17961_v46 = vld [vmem:[%s22236_s7 + $0x5ec] ss:$16 sps:$4 sm:$0xff]  }
 0x6af   :  { %13300 = vmatprep.subr.bf16.mxu1 %v17877_v50  ;;  %12756 = vmatprep.mubr.bf16.mxu0 %v7221_v54  ;;  %v17956_v50 = vld [vmem:[%s22236_s7 + $0x5e0] ss:$16 sps:$4 sm:$0xff]  }
 0x6b0   :  { %13330 = vmatprep.mubr.bf16.mxu1 %v7221_v54  ;;  %v17964_v54 = vld [vmem:[%s22236_s7 + $0x604] ss:$16 sps:$4 sm:$0xff]  }
 0x6b1   :  { %12727 = vmatpush1.bf16.msra.mxu0 %v17872_v55  ;;  %v7192_v55 = vld [vmem:[#allocation2 + $0x20] sm:$0xff] }
 0x6b2   :  { %13301 = vmatpush1.bf16.msra.mxu1 %v17875_v43  ;;  %12728 = vmatprep.subr.bf16.mxu0 %v17880_v57  ;;  %v17967_v43 = vld [vmem:[%s22236_s7 + $0x60c] ss:$16 sps:$4 sm:$0xff]   ;;  %v17962_v57 = vld [vmem:[%s22236_s7 + $0x600] ss:$16 sps:$4 sm:$0xff]  }
 0x6b3   :  { %13302 = vmatprep.subr.bf16.mxu1 %v17883_v37  ;;  %v17965_v37 = vld [vmem:[%s22236_s7 + $0x608] ss:$16 sps:$4 sm:$0xff]  }
 0x6b5   :  { %12729 = vmatpush1.bf16.msra.mxu0 %v17878_v49  ;;  %v7220_v49 = vpack.c.bf16 %v7192_v55, %v7192_v55  ;;  %v18048_v55 = vld [vmem:[%s22236_s7 + $0x7c4] ss:$16 sps:$4 sm:$0xff]  }
 0x6b6   :  { %13303 = vmatpush1.bf16.msra.mxu1 %v17881_v58  ;;  %12730 = vmatprep.subr.bf16.mxu0 %v17886_v59  ;;  %v7195_v58 = vld [vmem:[#allocation2 + $0x38] sm:$0xff]  ;;  %v17970_v59 = vld [vmem:[%s22236_s7 + $0x624] ss:$16 sps:$4 sm:$0xff]  }
 0x6b7   :  { %13304 = vmatprep.subr.bf16.mxu1 %v17889_v20  ;;  %v17973_v20 = vld [vmem:[%s22236_s7 + $0x62c] ss:$16 sps:$4 sm:$0xff]  }
 0x6b9   :  { %12731 = vmatpush1.bf16.msra.mxu0 %v17884_v60  ;;  %v7223_v60 = vpack.c.bf16 %v7195_v58, %v7195_v58  ;;  %v18057_v58 = vld [vmem:[%s22236_s7 + $0x7ec] ss:$16 sps:$4 sm:$0xff]  }
 0x6ba   :  { %13305 = vmatpush1.bf16.msra.mxu1 %v17887_v47  ;;  %12732 = vmatprep.subr.bf16.mxu0 %v17892_v62  ;;  %v17968_v47 = vld [vmem:[%s22236_s7 + $0x620] ss:$16 sps:$4 sm:$0xff]   ;;  %v17971_v62 = vld [vmem:[%s22236_s7 + $0x628] ss:$16 sps:$4 sm:$0xff]  }
 0x6bb   :  { %13306 = vmatprep.subr.bf16.mxu1 %v17895_v52  ;;  %v17976_v52 = vld [vmem:[%s22236_s7 + $0x644] ss:$16 sps:$4 sm:$0xff]  }
 0x6bd   :  { %12733 = vmatpush1.bf16.msra.mxu0 %v17890_v56  ;;  %v17979_v56 = vld [vmem:[%s22236_s7 + $0x64c] ss:$16 sps:$4 sm:$0xff]  }
 0x6be   :  { %13307 = vmatpush1.bf16.msra.mxu1 %v17893_v63  ;;  %12734 = vmatprep.subr.bf16.mxu0 %v17898_v1  ;;  %v17974_v63 = vld [vmem:[%s22236_s7 + $0x640] ss:$16 sps:$4 sm:$0xff]   ;;  %v17977_v1 = vld [vmem:[%s22236_s7 + $0x648] ss:$16 sps:$4 sm:$0xff]  }
 0x6bf   :  { %13308 = vmatprep.subr.bf16.mxu1 %v17901_v2  ;;  %v17982_v2 = vld [vmem:[%s22236_s7 + $0x664] ss:$16 sps:$4 sm:$0xff]  }
 0x6c1   :  { %12735 = vmatpush1.bf16.msra.mxu0 %v17896_v4  ;;  %v17985_v4 = vld [vmem:[%s22236_s7 + $0x66c] ss:$16 sps:$4 sm:$0xff]  }
 0x6c2   :  { %13309 = vmatpush1.bf16.msra.mxu1 %v17899_v3  ;;  %12736 = vmatprep.subr.bf16.mxu0 %v17904_v24  ;;  %v17980_v3 = vld [vmem:[%s22236_s7 + $0x660] ss:$16 sps:$4 sm:$0xff]   ;;  %v17983_v24 = vld [vmem:[%s22236_s7 + $0x668] ss:$16 sps:$4 sm:$0xff]  }
 0x6c3   :  { %13310 = vmatprep.subr.bf16.mxu1 %v17907_v15  ;;  %v17988_v15 = vld [vmem:[%s22236_s7 + $0x684] ss:$16 sps:$4 sm:$0xff]  }
 0x6c5   :  { %12737 = vmatpush1.bf16.msra.mxu0 %v17902_v11  ;;  %v17991_v11 = vld [vmem:[%s22236_s7 + $0x68c] ss:$16 sps:$4 sm:$0xff]  }
 0x6c6   :  { %13311 = vmatpush1.bf16.msra.mxu1 %v17905_v5  ;;  %12738 = vmatprep.subr.bf16.mxu0 %v17910_v22  ;;  %v17986_v5 = vld [vmem:[%s22236_s7 + $0x680] ss:$16 sps:$4 sm:$0xff]   ;;  %v17989_v22 = vld [vmem:[%s22236_s7 + $0x688] ss:$16 sps:$4 sm:$0xff]  }
 0x6c7   :  { %13312 = vmatprep.subr.bf16.mxu1 %v17913_v6  ;;  %v17994_v6 = vld [vmem:[%s22236_s7 + $0x6a4] ss:$16 sps:$4 sm:$0xff]  }
 0x6c9   :  { %12739 = vmatpush1.bf16.msra.mxu0 %v17908_v23  ;;  %v17997_v23 = vld [vmem:[%s22236_s7 + $0x6ac] ss:$16 sps:$4 sm:$0xff]  }
 0x6ca   :  { %13313 = vmatpush1.bf16.msra.mxu1 %v17911_v32  ;;  %12740 = vmatprep.subr.bf16.mxu0 %v17916_v8  ;;  %v17992_v32 = vld [vmem:[%s22236_s7 + $0x6a0] ss:$16 sps:$4 sm:$0xff]   ;;  %v17995_v8 = vld [vmem:[%s22236_s7 + $0x6a8] ss:$16 sps:$4 sm:$0xff]  }
 0x6cb   :  { %13314 = vmatprep.subr.bf16.mxu1 %v17919_v7  ;;  %v18000_v7 = vld [vmem:[%s22236_s7 + $0x6c4] ss:$16 sps:$4 sm:$0xff]  }
 0x6cd   :  { %12741 = vmatpush1.bf16.msra.mxu0 %v17914_v9  ;;  %v18003_v9 = vld [vmem:[%s22236_s7 + $0x6cc] ss:$16 sps:$4 sm:$0xff]  }
 0x6ce   :  { %13315 = vmatpush1.bf16.msra.mxu1 %v17917_v12  ;;  %12742 = vmatprep.subr.bf16.mxu0 %v17922_v25  ;;  %v17998_v12 = vld [vmem:[%s22236_s7 + $0x6c0] ss:$16 sps:$4 sm:$0xff]   ;;  %v18001_v25 = vld [vmem:[%s22236_s7 + $0x6c8] ss:$16 sps:$4 sm:$0xff]  }
 0x6cf   :  { %13316 = vmatprep.subr.bf16.mxu1 %v17925_v16  ;;  %v18006_v16 = vld [vmem:[%s22236_s7 + $0x6e4] ss:$16 sps:$4 sm:$0xff]  }
 0x6d1   :  { %12743 = vmatpush1.bf16.msra.mxu0 %v17920_v17  ;;  %v18009_v17 = vld [vmem:[%s22236_s7 + $0x6ec] ss:$16 sps:$4 sm:$0xff]  }
 0x6d2   :  { %13317 = vmatpush1.bf16.msra.mxu1 %v17923_v13  ;;  %12744 = vmatprep.subr.bf16.mxu0 %v17928_v18  ;;  %v18004_v13 = vld [vmem:[%s22236_s7 + $0x6e0] ss:$16 sps:$4 sm:$0xff]   ;;  %v18007_v18 = vld [vmem:[%s22236_s7 + $0x6e8] ss:$16 sps:$4 sm:$0xff]  }
 0x6d3   :  { %13318 = vmatprep.subr.bf16.mxu1 %v17931_v48  ;;  %v18012_v48 = vld [vmem:[%s22236_s7 + $0x704] ss:$16 sps:$4 sm:$0xff]  }
 0x6d5   :  { %12745 = vmatpush1.bf16.msra.mxu0 %v17926_v33  ;;  %v18015_v33 = vld [vmem:[%s22236_s7 + $0x70c] ss:$16 sps:$4 sm:$0xff]  }
 0x6d6   :  { %13319 = vmatpush1.bf16.msra.mxu1 %v17929_v14  ;;  %12746 = vmatprep.subr.bf16.mxu0 %v17934_v36  ;;  %v18010_v14 = vld [vmem:[%s22236_s7 + $0x700] ss:$16 sps:$4 sm:$0xff]   ;;  %v18013_v36 = vld [vmem:[%s22236_s7 + $0x708] ss:$16 sps:$4 sm:$0xff]  }
 0x6d7   :  { %13320 = vmatprep.subr.bf16.mxu1 %v17937_v19  ;;  %v18018_v19 = vld [vmem:[%s22236_s7 + $0x724] ss:$16 sps:$4 sm:$0xff]  }
 0x6d9   :  { %12747 = vmatpush1.bf16.msra.mxu0 %v17932_v29  ;;  %v18021_v29 = vld [vmem:[%s22236_s7 + $0x72c] ss:$16 sps:$4 sm:$0xff]  }
 0x6da   :  { %13321 = vmatpush1.bf16.msra.mxu1 %v17935_v27  ;;  %12748 = vmatprep.subr.bf16.mxu0 %v17940_v28  ;;  %v18016_v27 = vld [vmem:[%s22236_s7 + $0x720] ss:$16 sps:$4 sm:$0xff]   ;;  %v18019_v28 = vld [vmem:[%s22236_s7 + $0x728] ss:$16 sps:$4 sm:$0xff]  }
 0x6db   :  { %13322 = vmatprep.subr.bf16.mxu1 %v17943_v35  ;;  %v18024_v35 = vld [vmem:[%s22236_s7 + $0x744] ss:$16 sps:$4 sm:$0xff]  }
 0x6dd   :  { %12749 = vmatpush1.bf16.msra.mxu0 %v17938_v51  ;;  %v18027_v51 = vld [vmem:[%s22236_s7 + $0x74c] ss:$16 sps:$4 sm:$0xff]  }
 0x6de   :  { %13323 = vmatpush1.bf16.msra.mxu1 %v17941_v30  ;;  %12750 = vmatprep.subr.bf16.mxu0 %v17946_v31  ;;  %v18022_v30 = vld [vmem:[%s22236_s7 + $0x740] ss:$16 sps:$4 sm:$0xff]   ;;  %v18025_v31 = vld [vmem:[%s22236_s7 + $0x748] ss:$16 sps:$4 sm:$0xff]  }
 0x6df   :  { %13324 = vmatprep.subr.bf16.mxu1 %v17949_v34  ;;  %v18030_v34 = vld [vmem:[%s22236_s7 + $0x764] ss:$16 sps:$4 sm:$0xff]  }
 0x6e1   :  { %12751 = vmatpush1.bf16.msra.mxu0 %v17944_v38  ;;  %v18033_v38 = vld [vmem:[%s22236_s7 + $0x76c] ss:$16 sps:$4 sm:$0xff]  }
 0x6e2   :  { %13325 = vmatpush1.bf16.msra.mxu1 %v17947_v40  ;;  %12752 = vmatprep.subr.bf16.mxu0 %v17952_v41  ;;  %v18028_v40 = vld [vmem:[%s22236_s7 + $0x760] ss:$16 sps:$4 sm:$0xff]   ;;  %v18031_v41 = vld [vmem:[%s22236_s7 + $0x768] ss:$16 sps:$4 sm:$0xff]  }
 0x6e3   :  { %13326 = vmatprep.subr.bf16.mxu1 %v17955_v42  ;;  %v18036_v42 = vld [vmem:[%s22236_s7 + $0x784] ss:$16 sps:$4 sm:$0xff]  }
 0x6e5   :  { %12753 = vmatpush1.bf16.msra.mxu0 %v17950_v44  ;;  %v18039_v44 = vld [vmem:[%s22236_s7 + $0x78c] ss:$16 sps:$4 sm:$0xff]  }
 0x6e6   :  { %13327 = vmatpush1.bf16.msra.mxu1 %v17953_v45  ;;  %12754 = vmatprep.subr.bf16.mxu0 %v17958_v61  ;;  %v18034_v45 = vld [vmem:[%s22236_s7 + $0x780] ss:$16 sps:$4 sm:$0xff]   ;;  %v18037_v61 = vld [vmem:[%s22236_s7 + $0x788] ss:$16 sps:$4 sm:$0xff]  }
 0x6e7   :  { %13328 = vmatprep.subr.bf16.mxu1 %v17961_v46  ;;  %v18042_v46 = vld [vmem:[%s22236_s7 + $0x7a4] ss:$16 sps:$4 sm:$0xff]  }
 0x6e9   :  { %12755 = vmatpush1.bf16.msra.mxu0 %v17956_v50  ;;  %v18045_v50 = vld [vmem:[%s22236_s7 + $0x7ac] ss:$16 sps:$4 sm:$0xff]  }
 0x6ea   :  { %13329 = vmatpush1.bf16.msra.mxu1 %v17959_v53  ;;  %12765 = vmatprep.subr.bf16.mxu0 %v17964_v54  ;;  %v18040_v53 = vld [vmem:[%s22236_s7 + $0x7a0] ss:$16 sps:$4 sm:$0xff]   ;;  %v18043_v54 = vld [vmem:[%s22236_s7 + $0x7a8] ss:$16 sps:$4 sm:$0xff]  }
 0x6eb   :  { %13339 = vmatprep.subr.bf16.mxu1 %v17967_v43  ;;  %v18051_v43 = vld [vmem:[%s22236_s7 + $0x7cc] ss:$16 sps:$4 sm:$0xff]  }
 0x6ec   :  { %12757 = vmatmul.mubr.bf16.vlgmr.msra.gmra.mrb[0].mxu0 %v7220_v49 }
 0x6ed   :  { %13331 = vmatmul.mubr.bf16.vlgmr.msra.gmra.mrb[0].mxu1 %v7220_v49  ;;  %12766 = vmatpush1.bf16.msra.mxu0 %v17962_v57  ;;  %v18046_v57 = vld [vmem:[%s22236_s7 + $0x7c0] ss:$16 sps:$4 sm:$0xff]   ;;  %v18054_v49 = vld [vmem:[%s22236_s7 + $0x7e4] ss:$16 sps:$4 sm:$0xff]  }
 0x6ee   :  { %13340 = vmatpush1.bf16.msra.mxu1 %v17965_v37  ;;  %12767 = vmatprep.subr.bf16.mxu0 %v17970_v59  ;;  %v18049_v37 = vld [vmem:[%s22236_s7 + $0x7c8] ss:$16 sps:$4 sm:$0xff]   ;;  %v18052_v59 = vld [vmem:[%s22236_s7 + $0x7e0] ss:$16 sps:$4 sm:$0xff]  }
 0x6ef   :  { %13341 = vmatprep.subr.bf16.mxu1 %v17973_v20  ;;  %12797 = vmatprep.mubr.bf16.mxu0 %v7223_v60  ;;  %v18055_v20 = vld [vmem:[%s22236_s7 + $0x7e8] ss:$16 sps:$4 sm:$0xff]  }
 0x6f0   :  { %13371 = vmatprep.mubr.bf16.mxu1 %v7223_v60  ;;  %v7194_v60 = vld [vmem:[#allocation2 + $0x30] sm:$0xff] }
 0x6f1   :  { %12768 = vmatpush1.bf16.msra.mxu0 %v17968_v47  ;;  %v18060_v47 = vld [vmem:[%s22236_s7 + $0x804] ss:$16 sps:$4 sm:$0xff]  }
 0x6f2   :  { %13342 = vmatpush1.bf16.msra.mxu1 %v17971_v62  ;;  %12769 = vmatprep.subr.bf16.mxu0 %v17976_v52  ;;  %v18063_v62 = vld [vmem:[%s22236_s7 + $0x80c] ss:$16 sps:$4 sm:$0xff]   ;;  %v7222_v52 = vpack.c.bf16 %v7194_v60, %v7194_v60  ;;  %v18139_v60 = vld [vmem:[%s22236_s7 + $0x9a8] ss:$16 sps:$4 sm:$0xff]  }
 0x6f3   :  { %13343 = vmatprep.subr.bf16.mxu1 %v17979_v56  ;;  %v7197_v56 = vld [vmem:[#allocation2 + $0x48] sm:$0xff] }
 0x6f5   :  { %12770 = vmatpush1.bf16.msra.mxu0 %v17974_v63  ;;  %v18058_v63 = vld [vmem:[%s22236_s7 + $0x800] ss:$16 sps:$4 sm:$0xff]  }
 0x6f6   :  { %13344 = vmatpush1.bf16.msra.mxu1 %v17977_v1  ;;  %12771 = vmatprep.subr.bf16.mxu0 %v17982_v2  ;;  %v18061_v1 = vld [vmem:[%s22236_s7 + $0x808] ss:$16 sps:$4 sm:$0xff]   ;;  %v18066_v2 = vld [vmem:[%s22236_s7 + $0x824] ss:$16 sps:$4 sm:$0xff]  }
 0x6f7   :  { %13345 = vmatprep.subr.bf16.mxu1 %v17985_v4  ;;  %v18069_v4 = vld [vmem:[%s22236_s7 + $0x82c] ss:$16 sps:$4 sm:$0xff]  }
 0x6f9   :  { %12772 = vmatpush1.bf16.msra.mxu0 %v17980_v3  ;;  %v7225_v3 = vpack.c.bf16 %v7197_v56, %v7197_v56  ;;  %v18145_v56 = vld [vmem:[%s22236_s7 + $0x9c8] ss:$16 sps:$4 sm:$0xff]  }
 0x6fa   :  { %13346 = vmatpush1.bf16.msra.mxu1 %v17983_v24  ;;  %12773 = vmatprep.subr.bf16.mxu0 %v17988_v15  ;;  %v18064_v24 = vld [vmem:[%s22236_s7 + $0x820] ss:$16 sps:$4 sm:$0xff]   ;;  %v18067_v15 = vld [vmem:[%s22236_s7 + $0x828] ss:$16 sps:$4 sm:$0xff]  }
 0x6fb   :  { %13347 = vmatprep.subr.bf16.mxu1 %v17991_v11  ;;  %v18072_v11 = vld [vmem:[%s22236_s7 + $0x844] ss:$16 sps:$4 sm:$0xff]  }
 0x6fd   :  { %12774 = vmatpush1.bf16.msra.mxu0 %v17986_v5  ;;  %v18075_v5 = vld [vmem:[%s22236_s7 + $0x84c] ss:$16 sps:$4 sm:$0xff]  }
 0x6fe   :  { %13348 = vmatpush1.bf16.msra.mxu1 %v17989_v22  ;;  %12775 = vmatprep.subr.bf16.mxu0 %v17994_v6  ;;  %v18070_v22 = vld [vmem:[%s22236_s7 + $0x840] ss:$16 sps:$4 sm:$0xff]   ;;  %v18073_v6 = vld [vmem:[%s22236_s7 + $0x848] ss:$16 sps:$4 sm:$0xff]  }
 0x6ff   :  { %13349 = vmatprep.subr.bf16.mxu1 %v17997_v23  ;;  %v18078_v23 = vld [vmem:[%s22236_s7 + $0x864] ss:$16 sps:$4 sm:$0xff]  }
 0x701   :  { %12776 = vmatpush1.bf16.msra.mxu0 %v17992_v32  ;;  %v18081_v32 = vld [vmem:[%s22236_s7 + $0x86c] ss:$16 sps:$4 sm:$0xff]  }
 0x702   :  { %13350 = vmatpush1.bf16.msra.mxu1 %v17995_v8  ;;  %12777 = vmatprep.subr.bf16.mxu0 %v18000_v7  ;;  %v18076_v8 = vld [vmem:[%s22236_s7 + $0x860] ss:$16 sps:$4 sm:$0xff]   ;;  %v18079_v7 = vld [vmem:[%s22236_s7 + $0x868] ss:$16 sps:$4 sm:$0xff]  }
 0x703   :  { %13351 = vmatprep.subr.bf16.mxu1 %v18003_v9  ;;  %v18084_v9 = vld [vmem:[%s22236_s7 + $0x884] ss:$16 sps:$4 sm:$0xff]  }
 0x705   :  { %12778 = vmatpush1.bf16.msra.mxu0 %v17998_v12  ;;  %v18087_v12 = vld [vmem:[%s22236_s7 + $0x88c] ss:$16 sps:$4 sm:$0xff]  }
 0x706   :  { %13352 = vmatpush1.bf16.msra.mxu1 %v18001_v25  ;;  %12779 = vmatprep.subr.bf16.mxu0 %v18006_v16  ;;  %v18082_v25 = vld [vmem:[%s22236_s7 + $0x880] ss:$16 sps:$4 sm:$0xff]   ;;  %v18085_v16 = vld [vmem:[%s22236_s7 + $0x888] ss:$16 sps:$4 sm:$0xff]  }
 0x707   :  { %13353 = vmatprep.subr.bf16.mxu1 %v18009_v17  ;;  %v18090_v17 = vld [vmem:[%s22236_s7 + $0x8a4] ss:$16 sps:$4 sm:$0xff]  }
 0x709   :  { %12780 = vmatpush1.bf16.msra.mxu0 %v18004_v13  ;;  %v18093_v13 = vld [vmem:[%s22236_s7 + $0x8ac] ss:$16 sps:$4 sm:$0xff]  }
 0x70a   :  { %13354 = vmatpush1.bf16.msra.mxu1 %v18007_v18  ;;  %12781 = vmatprep.subr.bf16.mxu0 %v18012_v48  ;;  %v18088_v18 = vld [vmem:[%s22236_s7 + $0x8a0] ss:$16 sps:$4 sm:$0xff]   ;;  %v18091_v48 = vld [vmem:[%s22236_s7 + $0x8a8] ss:$16 sps:$4 sm:$0xff]  }
 0x70b   :  { %13355 = vmatprep.subr.bf16.mxu1 %v18015_v33  ;;  %v18096_v33 = vld [vmem:[%s22236_s7 + $0x8c4] ss:$16 sps:$4 sm:$0xff]  }
 0x70d   :  { %12782 = vmatpush1.bf16.msra.mxu0 %v18010_v14  ;;  %v18099_v14 = vld [vmem:[%s22236_s7 + $0x8cc] ss:$16 sps:$4 sm:$0xff]  }
 0x70e   :  { %13356 = vmatpush1.bf16.msra.mxu1 %v18013_v36  ;;  %12783 = vmatprep.subr.bf16.mxu0 %v18018_v19  ;;  %v18094_v36 = vld [vmem:[%s22236_s7 + $0x8c0] ss:$16 sps:$4 sm:$0xff]   ;;  %v18097_v19 = vld [vmem:[%s22236_s7 + $0x8c8] ss:$16 sps:$4 sm:$0xff]  }
 0x70f   :  { %13357 = vmatprep.subr.bf16.mxu1 %v18021_v29  ;;  %v18102_v29 = vld [vmem:[%s22236_s7 + $0x8e4] ss:$16 sps:$4 sm:$0xff]  }
 0x711   :  { %12784 = vmatpush1.bf16.msra.mxu0 %v18016_v27  ;;  %v18105_v27 = vld [vmem:[%s22236_s7 + $0x8ec] ss:$16 sps:$4 sm:$0xff]  }
 0x712   :  { %13358 = vmatpush1.bf16.msra.mxu1 %v18019_v28  ;;  %12785 = vmatprep.subr.bf16.mxu0 %v18024_v35  ;;  %v18100_v28 = vld [vmem:[%s22236_s7 + $0x8e0] ss:$16 sps:$4 sm:$0xff]   ;;  %v18103_v35 = vld [vmem:[%s22236_s7 + $0x8e8] ss:$16 sps:$4 sm:$0xff]  }
 0x713   :  { %13359 = vmatprep.subr.bf16.mxu1 %v18027_v51  ;;  %v18108_v51 = vld [vmem:[%s22236_s7 + $0x904] ss:$16 sps:$4 sm:$0xff]  }
 0x715   :  { %12786 = vmatpush1.bf16.msra.mxu0 %v18022_v30  ;;  %v18111_v30 = vld [vmem:[%s22236_s7 + $0x90c] ss:$16 sps:$4 sm:$0xff]  }
 0x716   :  { %13360 = vmatpush1.bf16.msra.mxu1 %v18025_v31  ;;  %12787 = vmatprep.subr.bf16.mxu0 %v18030_v34  ;;  %v18106_v31 = vld [vmem:[%s22236_s7 + $0x900] ss:$16 sps:$4 sm:$0xff]   ;;  %v18109_v34 = vld [vmem:[%s22236_s7 + $0x908] ss:$16 sps:$4 sm:$0xff]  }
 0x717   :  { %13361 = vmatprep.subr.bf16.mxu1 %v18033_v38  ;;  %v18114_v38 = vld [vmem:[%s22236_s7 + $0x924] ss:$16 sps:$4 sm:$0xff]  }
 0x719   :  { %12788 = vmatpush1.bf16.msra.mxu0 %v18028_v40  ;;  %v18117_v40 = vld [vmem:[%s22236_s7 + $0x92c] ss:$16 sps:$4 sm:$0xff]  }
 0x71a   :  { %13362 = vmatpush1.bf16.msra.mxu1 %v18031_v41  ;;  %12789 = vmatprep.subr.bf16.mxu0 %v18036_v42  ;;  %v18112_v41 = vld [vmem:[%s22236_s7 + $0x920] ss:$16 sps:$4 sm:$0xff]   ;;  %v18115_v42 = vld [vmem:[%s22236_s7 + $0x928] ss:$16 sps:$4 sm:$0xff]  }
 0x71b   :  { %13363 = vmatprep.subr.bf16.mxu1 %v18039_v44  ;;  %v18120_v44 = vld [vmem:[%s22236_s7 + $0x944] ss:$16 sps:$4 sm:$0xff]  }
 0x71d   :  { %12790 = vmatpush1.bf16.msra.mxu0 %v18034_v45  ;;  %v18123_v45 = vld [vmem:[%s22236_s7 + $0x94c] ss:$16 sps:$4 sm:$0xff]  }
 0x71e   :  { %13364 = vmatpush1.bf16.msra.mxu1 %v18037_v61  ;;  %12791 = vmatprep.subr.bf16.mxu0 %v18042_v46  ;;  %v18118_v61 = vld [vmem:[%s22236_s7 + $0x940] ss:$16 sps:$4 sm:$0xff]   ;;  %v18121_v46 = vld [vmem:[%s22236_s7 + $0x948] ss:$16 sps:$4 sm:$0xff]  }
 0x71f   :  { %13365 = vmatprep.subr.bf16.mxu1 %v18045_v50  ;;  %v18126_v50 = vld [vmem:[%s22236_s7 + $0x964] ss:$16 sps:$4 sm:$0xff]  }
 0x721   :  { %12792 = vmatpush1.bf16.msra.mxu0 %v18040_v53  ;;  %v18129_v53 = vld [vmem:[%s22236_s7 + $0x96c] ss:$16 sps:$4 sm:$0xff]  }
 0x722   :  { %13366 = vmatpush1.bf16.msra.mxu1 %v18043_v54  ;;  %12793 = vmatprep.subr.bf16.mxu0 %v18048_v55  ;;  %v18124_v54 = vld [vmem:[%s22236_s7 + $0x960] ss:$16 sps:$4 sm:$0xff]   ;;  %v18127_v55 = vld [vmem:[%s22236_s7 + $0x968] ss:$16 sps:$4 sm:$0xff]  }
 0x723   :  { %13367 = vmatprep.subr.bf16.mxu1 %v18051_v43  ;;  %v18132_v43 = vld [vmem:[%s22236_s7 + $0x984] ss:$16 sps:$4 sm:$0xff]  }
 0x725   :  { %12794 = vmatpush1.bf16.msra.mxu0 %v18046_v57  ;;  %v18135_v57 = vld [vmem:[%s22236_s7 + $0x98c] ss:$16 sps:$4 sm:$0xff]  }
 0x726   :  { %13368 = vmatpush1.bf16.msra.mxu1 %v18049_v37  ;;  %12795 = vmatprep.subr.bf16.mxu0 %v18054_v49  ;;  %v18130_v37 = vld [vmem:[%s22236_s7 + $0x980] ss:$16 sps:$4 sm:$0xff]   ;;  %v18133_v49 = vld [vmem:[%s22236_s7 + $0x988] ss:$16 sps:$4 sm:$0xff]  }
 0x727   :  { %13369 = vmatprep.subr.bf16.mxu1 %v18057_v58  ;;  %v18138_v58 = vld [vmem:[%s22236_s7 + $0x9a4] ss:$16 sps:$4 sm:$0xff]  }
 0x729   :  { %12796 = vmatpush1.bf16.msra.mxu0 %v18052_v59  ;;  %v18141_v59 = vld [vmem:[%s22236_s7 + $0x9ac] ss:$16 sps:$4 sm:$0xff]  }
 0x72a   :  { %13370 = vmatpush1.bf16.msra.mxu1 %v18055_v20  ;;  %12806 = vmatprep.subr.bf16.mxu0 %v18060_v47  ;;  %v18136_v20 = vld [vmem:[%s22236_s7 + $0x9a0] ss:$16 sps:$4 sm:$0xff]   ;;  %v18144_v47 = vld [vmem:[%s22236_s7 + $0x9c4] ss:$16 sps:$4 sm:$0xff]  }
 0x72b   :  { %13380 = vmatprep.subr.bf16.mxu1 %v18063_v62  ;;  %v18147_v62 = vld [vmem:[%s22236_s7 + $0x9cc] ss:$16 sps:$4 sm:$0xff]  }
 0x72c   :  { %12798 = vmatmul.mubr.bf16.vlgmr.msra.gmra.mrb[0].mxu0 %v7222_v52 }
 0x72d   :  { %13372 = vmatmul.mubr.bf16.vlgmr.msra.gmra.mrb[0].mxu1 %v7222_v52  ;;  %12807 = vmatpush1.bf16.msra.mxu0 %v18058_v63  ;;  %v18142_v52 = vld [vmem:[%s22236_s7 + $0x9c0] ss:$16 sps:$4 sm:$0xff]   ;;  %v18150_v63 = vld [vmem:[%s22236_s7 + $0x9e4] ss:$16 sps:$4 sm:$0xff]  }
 0x72e   :  { %13381 = vmatpush1.bf16.msra.mxu1 %v18061_v1  ;;  %12808 = vmatprep.subr.bf16.mxu0 %v18066_v2  ;;  %v18153_v1 = vld [vmem:[%s22236_s7 + $0x9ec] ss:$16 sps:$4 sm:$0xff]   ;;  %v18148_v2 = vld [vmem:[%s22236_s7 + $0x9e0] ss:$16 sps:$4 sm:$0xff]  }
 0x72f   :  { %13382 = vmatprep.subr.bf16.mxu1 %v18069_v4  ;;  %12838 = vmatprep.mubr.bf16.mxu0 %v7225_v3  ;;  %v18151_v4 = vld [vmem:[%s22236_s7 + $0x9e8] ss:$16 sps:$4 sm:$0xff]  }
 0x730   :  { %13412 = vmatprep.mubr.bf16.mxu1 %v7225_v3  ;;  %v18156_v3 = vld [vmem:[%s22236_s7 + $0xa04] ss:$16 sps:$4 sm:$0xff]  }
 0x731   :  { %12809 = vmatpush1.bf16.msra.mxu0 %v18064_v24  ;;  %v7196_v24 = vld [vmem:[#allocation2 + $0x40] sm:$0xff] }
 0x732   :  { %13383 = vmatpush1.bf16.msra.mxu1 %v18067_v15  ;;  %12810 = vmatprep.subr.bf16.mxu0 %v18072_v11  ;;  %v18159_v15 = vld [vmem:[%s22236_s7 + $0xa0c] ss:$16 sps:$4 sm:$0xff]  }
 0x733   :  { %13384 = vmatprep.subr.bf16.mxu1 %v18075_v5  ;;  %v7199_v11 = vld [vmem:[#allocation2 + $0x58] sm:$0xff]  ;;  %v7224_v5 = vpack.c.bf16 %v7196_v24, %v7196_v24  ;;  %v18240_v24 = vld [vmem:[%s22236_s7 + $0xbc4] ss:$16 sps:$4 sm:$0xff]  }
 0x735   :  { %12811 = vmatpush1.bf16.msra.mxu0 %v18070_v22  ;;  %v18154_v22 = vld [vmem:[%s22236_s7 + $0xa00] ss:$16 sps:$4 sm:$0xff]  }
 0x736   :  { %13385 = vmatpush1.bf16.msra.mxu1 %v18073_v6  ;;  %12812 = vmatprep.subr.bf16.mxu0 %v18078_v23  ;;  %v18157_v6 = vld [vmem:[%s22236_s7 + $0xa08] ss:$16 sps:$4 sm:$0xff]   ;;  %v18162_v23 = vld [vmem:[%s22236_s7 + $0xa24] ss:$16 sps:$4 sm:$0xff]  }
 0x737   :  { %13386 = vmatprep.subr.bf16.mxu1 %v18081_v32  ;;  %v18165_v32 = vld [vmem:[%s22236_s7 + $0xa2c] ss:$16 sps:$4 sm:$0xff]  }
 0x739   :  { %12813 = vmatpush1.bf16.msra.mxu0 %v18076_v8  ;;  %v7227_v8 = vpack.c.bf16 %v7199_v11, %v7199_v11  ;;  %v18238_v11 = vld [vmem:[%s22236_s7 + $0xbc0] ss:$16 sps:$4 sm:$0xff]  }
 0x73a   :  { %13387 = vmatpush1.bf16.msra.mxu1 %v18079_v7  ;;  %12814 = vmatprep.subr.bf16.mxu0 %v18084_v9  ;;  %v18160_v7 = vld [vmem:[%s22236_s7 + $0xa20] ss:$16 sps:$4 sm:$0xff]   ;;  %v18163_v9 = vld [vmem:[%s22236_s7 + $0xa28] ss:$16 sps:$4 sm:$0xff]  }
 0x73b   :  { %13388 = vmatprep.subr.bf16.mxu1 %v18087_v12  ;;  %v18168_v12 = vld [vmem:[%s22236_s7 + $0xa44] ss:$16 sps:$4 sm:$0xff]  }
 0x73d   :  { %12815 = vmatpush1.bf16.msra.mxu0 %v18082_v25  ;;  %v18171_v25 = vld [vmem:[%s22236_s7 + $0xa4c] ss:$16 sps:$4 sm:$0xff]  }
 0x73e   :  { %13389 = vmatpush1.bf16.msra.mxu1 %v18085_v16  ;;  %12816 = vmatprep.subr.bf16.mxu0 %v18090_v17  ;;  %v18166_v16 = vld [vmem:[%s22236_s7 + $0xa40] ss:$16 sps:$4 sm:$0xff]   ;;  %v18169_v17 = vld [vmem:[%s22236_s7 + $0xa48] ss:$16 sps:$4 sm:$0xff]  }
 0x73f   :  { %13390 = vmatprep.subr.bf16.mxu1 %v18093_v13  ;;  %v18174_v13 = vld [vmem:[%s22236_s7 + $0xa64] ss:$16 sps:$4 sm:$0xff]  }
 0x741   :  { %12817 = vmatpush1.bf16.msra.mxu0 %v18088_v18  ;;  %v18177_v18 = vld [vmem:[%s22236_s7 + $0xa6c] ss:$16 sps:$4 sm:$0xff]  }
 0x742   :  { %13391 = vmatpush1.bf16.msra.mxu1 %v18091_v48  ;;  %12818 = vmatprep.subr.bf16.mxu0 %v18096_v33  ;;  %v18172_v48 = vld [vmem:[%s22236_s7 + $0xa60] ss:$16 sps:$4 sm:$0xff]   ;;  %v18175_v33 = vld [vmem:[%s22236_s7 + $0xa68] ss:$16 sps:$4 sm:$0xff]  }
 0x743   :  { %13392 = vmatprep.subr.bf16.mxu1 %v18099_v14  ;;  %v18180_v14 = vld [vmem:[%s22236_s7 + $0xa84] ss:$16 sps:$4 sm:$0xff]  }
 0x745   :  { %12819 = vmatpush1.bf16.msra.mxu0 %v18094_v36  ;;  %v18183_v36 = vld [vmem:[%s22236_s7 + $0xa8c] ss:$16 sps:$4 sm:$0xff]  }
 0x746   :  { %13393 = vmatpush1.bf16.msra.mxu1 %v18097_v19  ;;  %12820 = vmatprep.subr.bf16.mxu0 %v18102_v29  ;;  %v18178_v19 = vld [vmem:[%s22236_s7 + $0xa80] ss:$16 sps:$4 sm:$0xff]   ;;  %v18181_v29 = vld [vmem:[%s22236_s7 + $0xa88] ss:$16 sps:$4 sm:$0xff]  }
 0x747   :  { %13394 = vmatprep.subr.bf16.mxu1 %v18105_v27  ;;  %v18186_v27 = vld [vmem:[%s22236_s7 + $0xaa4] ss:$16 sps:$4 sm:$0xff]  }
 0x749   :  { %12821 = vmatpush1.bf16.msra.mxu0 %v18100_v28  ;;  %v18189_v28 = vld [vmem:[%s22236_s7 + $0xaac] ss:$16 sps:$4 sm:$0xff]  }
 0x74a   :  { %13395 = vmatpush1.bf16.msra.mxu1 %v18103_v35  ;;  %12822 = vmatprep.subr.bf16.mxu0 %v18108_v51  ;;  %v18184_v35 = vld [vmem:[%s22236_s7 + $0xaa0] ss:$16 sps:$4 sm:$0xff]   ;;  %v18187_v51 = vld [vmem:[%s22236_s7 + $0xaa8] ss:$16 sps:$4 sm:$0xff]  }
 0x74b   :  { %13396 = vmatprep.subr.bf16.mxu1 %v18111_v30  ;;  %v18192_v30 = vld [vmem:[%s22236_s7 + $0xac4] ss:$16 sps:$4 sm:$0xff]  }
 0x74d   :  { %12823 = vmatpush1.bf16.msra.mxu0 %v18106_v31  ;;  %v18195_v31 = vld [vmem:[%s22236_s7 + $0xacc] ss:$16 sps:$4 sm:$0xff]  }
 0x74e   :  { %13397 = vmatpush1.bf16.msra.mxu1 %v18109_v34  ;;  %12824 = vmatprep.subr.bf16.mxu0 %v18114_v38  ;;  %v18190_v34 = vld [vmem:[%s22236_s7 + $0xac0] ss:$16 sps:$4 sm:$0xff]   ;;  %v18193_v38 = vld [vmem:[%s22236_s7 + $0xac8] ss:$16 sps:$4 sm:$0xff]  }
 0x74f   :  { %13398 = vmatprep.subr.bf16.mxu1 %v18117_v40  ;;  %v18198_v40 = vld [vmem:[%s22236_s7 + $0xae4] ss:$16 sps:$4 sm:$0xff]  }
 0x751   :  { %12825 = vmatpush1.bf16.msra.mxu0 %v18112_v41  ;;  %v18201_v41 = vld [vmem:[%s22236_s7 + $0xaec] ss:$16 sps:$4 sm:$0xff]  }
 0x752   :  { %13399 = vmatpush1.bf16.msra.mxu1 %v18115_v42  ;;  %12826 = vmatprep.subr.bf16.mxu0 %v18120_v44  ;;  %v18196_v42 = vld [vmem:[%s22236_s7 + $0xae0] ss:$16 sps:$4 sm:$0xff]   ;;  %v18199_v44 = vld [vmem:[%s22236_s7 + $0xae8] ss:$16 sps:$4 sm:$0xff]  }
 0x753   :  { %13400 = vmatprep.subr.bf16.mxu1 %v18123_v45  ;;  %v18204_v45 = vld [vmem:[%s22236_s7 + $0xb04] ss:$16 sps:$4 sm:$0xff]  }
 0x755   :  { %12827 = vmatpush1.bf16.msra.mxu0 %v18118_v61  ;;  %v18207_v61 = vld [vmem:[%s22236_s7 + $0xb0c] ss:$16 sps:$4 sm:$0xff]  }
 0x756   :  { %13401 = vmatpush1.bf16.msra.mxu1 %v18121_v46  ;;  %12828 = vmatprep.subr.bf16.mxu0 %v18126_v50  ;;  %v18202_v46 = vld [vmem:[%s22236_s7 + $0xb00] ss:$16 sps:$4 sm:$0xff]   ;;  %v18205_v50 = vld [vmem:[%s22236_s7 + $0xb08] ss:$16 sps:$4 sm:$0xff]  }
 0x757   :  { %13402 = vmatprep.subr.bf16.mxu1 %v18129_v53  ;;  %v18210_v53 = vld [vmem:[%s22236_s7 + $0xb24] ss:$16 sps:$4 sm:$0xff]  }
 0x759   :  { %12829 = vmatpush1.bf16.msra.mxu0 %v18124_v54  ;;  %v18213_v54 = vld [vmem:[%s22236_s7 + $0xb2c] ss:$16 sps:$4 sm:$0xff]  }
 0x75a   :  { %13403 = vmatpush1.bf16.msra.mxu1 %v18127_v55  ;;  %12830 = vmatprep.subr.bf16.mxu0 %v18132_v43  ;;  %v18208_v55 = vld [vmem:[%s22236_s7 + $0xb20] ss:$16 sps:$4 sm:$0xff]   ;;  %v18211_v43 = vld [vmem:[%s22236_s7 + $0xb28] ss:$16 sps:$4 sm:$0xff]  }
 0x75b   :  { %13404 = vmatprep.subr.bf16.mxu1 %v18135_v57  ;;  %v18216_v57 = vld [vmem:[%s22236_s7 + $0xb44] ss:$16 sps:$4 sm:$0xff]  }
 0x75d   :  { %12831 = vmatpush1.bf16.msra.mxu0 %v18130_v37  ;;  %v18219_v37 = vld [vmem:[%s22236_s7 + $0xb4c] ss:$16 sps:$4 sm:$0xff]  }
 0x75e   :  { %13405 = vmatpush1.bf16.msra.mxu1 %v18133_v49  ;;  %12832 = vmatprep.subr.bf16.mxu0 %v18138_v58  ;;  %v18214_v49 = vld [vmem:[%s22236_s7 + $0xb40] ss:$16 sps:$4 sm:$0xff]   ;;  %v18217_v58 = vld [vmem:[%s22236_s7 + $0xb48] ss:$16 sps:$4 sm:$0xff]  }
 0x75f   :  { %13406 = vmatprep.subr.bf16.mxu1 %v18141_v59  ;;  %v18222_v59 = vld [vmem:[%s22236_s7 + $0xb64] ss:$16 sps:$4 sm:$0xff]  }
 0x761   :  { %12833 = vmatpush1.bf16.msra.mxu0 %v18136_v20  ;;  %v18225_v20 = vld [vmem:[%s22236_s7 + $0xb6c] ss:$16 sps:$4 sm:$0xff]  }
 0x762   :  { %13407 = vmatpush1.bf16.msra.mxu1 %v18139_v60  ;;  %12834 = vmatprep.subr.bf16.mxu0 %v18144_v47  ;;  %v18220_v60 = vld [vmem:[%s22236_s7 + $0xb60] ss:$16 sps:$4 sm:$0xff]   ;;  %v18223_v47 = vld [vmem:[%s22236_s7 + $0xb68] ss:$16 sps:$4 sm:$0xff]  }
 0x763   :  { %13408 = vmatprep.subr.bf16.mxu1 %v18147_v62  ;;  %v18228_v62 = vld [vmem:[%s22236_s7 + $0xb84] ss:$16 sps:$4 sm:$0xff]  }
 0x765   :  { %12835 = vmatpush1.bf16.msra.mxu0 %v18142_v52  ;;  %v18231_v52 = vld [vmem:[%s22236_s7 + $0xb8c] ss:$16 sps:$4 sm:$0xff]  }
 0x766   :  { %13409 = vmatpush1.bf16.msra.mxu1 %v18145_v56  ;;  %12836 = vmatprep.subr.bf16.mxu0 %v18150_v63  ;;  %v18226_v56 = vld [vmem:[%s22236_s7 + $0xb80] ss:$16 sps:$4 sm:$0xff]   ;;  %v18229_v63 = vld [vmem:[%s22236_s7 + $0xb88] ss:$16 sps:$4 sm:$0xff]  }
 0x767   :  { %13410 = vmatprep.subr.bf16.mxu1 %v18153_v1  ;;  %v18234_v1 = vld [vmem:[%s22236_s7 + $0xba4] ss:$16 sps:$4 sm:$0xff]  }
 0x769   :  { %12837 = vmatpush1.bf16.msra.mxu0 %v18148_v2  ;;  %v18237_v2 = vld [vmem:[%s22236_s7 + $0xbac] ss:$16 sps:$4 sm:$0xff]  }
 0x76a   :  { %13411 = vmatpush1.bf16.msra.mxu1 %v18151_v4  ;;  %12847 = vmatprep.subr.bf16.mxu0 %v18156_v3  ;;  %v18232_v4 = vld [vmem:[%s22236_s7 + $0xba0] ss:$16 sps:$4 sm:$0xff]   ;;  %v18235_v3 = vld [vmem:[%s22236_s7 + $0xba8] ss:$16 sps:$4 sm:$0xff]  }
 0x76b   :  { %13421 = vmatprep.subr.bf16.mxu1 %v18159_v15  ;;  %v18243_v15 = vld [vmem:[%s22236_s7 + $0xbcc] ss:$16 sps:$4 sm:$0xff]  }
 0x76c   :  { %12839 = vmatmul.mubr.bf16.vlgmr.msra.gmra.mrb[0].mxu0 %v7224_v5 }
 0x76d   :  { %13413 = vmatmul.mubr.bf16.vlgmr.msra.gmra.mrb[0].mxu1 %v7224_v5  ;;  %12848 = vmatpush1.bf16.msra.mxu0 %v18154_v22  ;;  %v18241_v5 = vld [vmem:[%s22236_s7 + $0xbc8] ss:$16 sps:$4 sm:$0xff]   ;;  %v18246_v22 = vld [vmem:[%s22236_s7 + $0xbe4] ss:$16 sps:$4 sm:$0xff]  }
 0x76e   :  { %13422 = vmatpush1.bf16.msra.mxu1 %v18157_v6  ;;  %12849 = vmatprep.subr.bf16.mxu0 %v18162_v23  ;;  %v18249_v6 = vld [vmem:[%s22236_s7 + $0xbec] ss:$16 sps:$4 sm:$0xff]   ;;  %v18244_v23 = vld [vmem:[%s22236_s7 + $0xbe0] ss:$16 sps:$4 sm:$0xff]  }
 0x76f   :  { %13423 = vmatprep.subr.bf16.mxu1 %v18165_v32  ;;  %12879 = vmatprep.mubr.bf16.mxu0 %v7227_v8  ;;  %v18247_v32 = vld [vmem:[%s22236_s7 + $0xbe8] ss:$16 sps:$4 sm:$0xff]  }
 0x770   :  { %13453 = vmatprep.mubr.bf16.mxu1 %v7227_v8  ;;  %v18252_v8 = vld [vmem:[%s22236_s7 + $0xc04] ss:$16 sps:$4 sm:$0xff]  }
 0x771   :  { %12850 = vmatpush1.bf16.msra.mxu0 %v18160_v7  ;;  %v7198_v7 = vld [vmem:[#allocation2 + $0x50] sm:$0xff] }
 0x772   :  { %13424 = vmatpush1.bf16.msra.mxu1 %v18163_v9  ;;  %12851 = vmatprep.subr.bf16.mxu0 %v18168_v12  ;;  %v18255_v9 = vld [vmem:[%s22236_s7 + $0xc0c] ss:$16 sps:$4 sm:$0xff]  }
 0x773   :  { %13425 = vmatprep.subr.bf16.mxu1 %v18171_v25  ;;  %v7201_v12 = vld [vmem:[#allocation2 + $0x68] sm:$0xff]  ;;  %v7226_v25 = vpack.c.bf16 %v7198_v7, %v7198_v7  ;;  %v18336_v7 = vld [vmem:[%s22236_s7 + $0xdc4] ss:$16 sps:$4 sm:$0xff]  }
 0x775   :  { %12852 = vmatpush1.bf16.msra.mxu0 %v18166_v16  ;;  %v18250_v16 = vld [vmem:[%s22236_s7 + $0xc00] ss:$16 sps:$4 sm:$0xff]  }
 0x776   :  { %13426 = vmatpush1.bf16.msra.mxu1 %v18169_v17  ;;  %12853 = vmatprep.subr.bf16.mxu0 %v18174_v13  ;;  %v18253_v17 = vld [vmem:[%s22236_s7 + $0xc08] ss:$16 sps:$4 sm:$0xff]   ;;  %v18258_v13 = vld [vmem:[%s22236_s7 + $0xc24] ss:$16 sps:$4 sm:$0xff]  }
 0x777   :  { %13427 = vmatprep.subr.bf16.mxu1 %v18177_v18  ;;  %v18261_v18 = vld [vmem:[%s22236_s7 + $0xc2c] ss:$16 sps:$4 sm:$0xff]  }
 0x779   :  { %12854 = vmatpush1.bf16.msra.mxu0 %v18172_v48  ;;  %v7229_v48 = vpack.c.bf16 %v7201_v12, %v7201_v12  ;;  %v18334_v12 = vld [vmem:[%s22236_s7 + $0xdc0] ss:$16 sps:$4 sm:$0xff]  }
 0x77a   :  { %13428 = vmatpush1.bf16.msra.mxu1 %v18175_v33  ;;  %12855 = vmatprep.subr.bf16.mxu0 %v18180_v14  ;;  %v18256_v33 = vld [vmem:[%s22236_s7 + $0xc20] ss:$16 sps:$4 sm:$0xff]   ;;  %v18259_v14 = vld [vmem:[%s22236_s7 + $0xc28] ss:$16 sps:$4 sm:$0xff]  }
 0x77b   :  { %13429 = vmatprep.subr.bf16.mxu1 %v18183_v36  ;;  %v18264_v36 = vld [vmem:[%s22236_s7 + $0xc44] ss:$16 sps:$4 sm:$0xff]  }
 0x77d   :  { %12856 = vmatpush1.bf16.msra.mxu0 %v18178_v19  ;;  %v18267_v19 = vld [vmem:[%s22236_s7 + $0xc4c] ss:$16 sps:$4 sm:$0xff]  }
 0x77e   :  { %13430 = vmatpush1.bf16.msra.mxu1 %v18181_v29  ;;  %12857 = vmatprep.subr.bf16.mxu0 %v18186_v27  ;;  %v18262_v29 = vld [vmem:[%s22236_s7 + $0xc40] ss:$16 sps:$4 sm:$0xff]   ;;  %v18265_v27 = vld [vmem:[%s22236_s7 + $0xc48] ss:$16 sps:$4 sm:$0xff]  }
 0x77f   :  { %13431 = vmatprep.subr.bf16.mxu1 %v18189_v28  ;;  %v18270_v28 = vld [vmem:[%s22236_s7 + $0xc64] ss:$16 sps:$4 sm:$0xff]  }
 0x781   :  { %12858 = vmatpush1.bf16.msra.mxu0 %v18184_v35  ;;  %v18273_v35 = vld [vmem:[%s22236_s7 + $0xc6c] ss:$16 sps:$4 sm:$0xff]  }
 0x782   :  { %13432 = vmatpush1.bf16.msra.mxu1 %v18187_v51  ;;  %12859 = vmatprep.subr.bf16.mxu0 %v18192_v30  ;;  %v18268_v51 = vld [vmem:[%s22236_s7 + $0xc60] ss:$16 sps:$4 sm:$0xff]   ;;  %v18271_v30 = vld [vmem:[%s22236_s7 + $0xc68] ss:$16 sps:$4 sm:$0xff]  }
 0x783   :  { %13433 = vmatprep.subr.bf16.mxu1 %v18195_v31  ;;  %v18276_v31 = vld [vmem:[%s22236_s7 + $0xc84] ss:$16 sps:$4 sm:$0xff]  }
 0x785   :  { %12860 = vmatpush1.bf16.msra.mxu0 %v18190_v34  ;;  %v18279_v34 = vld [vmem:[%s22236_s7 + $0xc8c] ss:$16 sps:$4 sm:$0xff]  }
 0x786   :  { %13434 = vmatpush1.bf16.msra.mxu1 %v18193_v38  ;;  %12861 = vmatprep.subr.bf16.mxu0 %v18198_v40  ;;  %v18274_v38 = vld [vmem:[%s22236_s7 + $0xc80] ss:$16 sps:$4 sm:$0xff]   ;;  %v18277_v40 = vld [vmem:[%s22236_s7 + $0xc88] ss:$16 sps:$4 sm:$0xff]  }
 0x787   :  { %13435 = vmatprep.subr.bf16.mxu1 %v18201_v41  ;;  %v18282_v41 = vld [vmem:[%s22236_s7 + $0xca4] ss:$16 sps:$4 sm:$0xff]  }
 0x789   :  { %12862 = vmatpush1.bf16.msra.mxu0 %v18196_v42  ;;  %v18285_v42 = vld [vmem:[%s22236_s7 + $0xcac] ss:$16 sps:$4 sm:$0xff]  }
 0x78a   :  { %13436 = vmatpush1.bf16.msra.mxu1 %v18199_v44  ;;  %12863 = vmatprep.subr.bf16.mxu0 %v18204_v45  ;;  %v18280_v44 = vld [vmem:[%s22236_s7 + $0xca0] ss:$16 sps:$4 sm:$0xff]   ;;  %v18283_v45 = vld [vmem:[%s22236_s7 + $0xca8] ss:$16 sps:$4 sm:$0xff]  }
 0x78b   :  { %13437 = vmatprep.subr.bf16.mxu1 %v18207_v61  ;;  %v18288_v61 = vld [vmem:[%s22236_s7 + $0xcc4] ss:$16 sps:$4 sm:$0xff]  }
 0x78d   :  { %12864 = vmatpush1.bf16.msra.mxu0 %v18202_v46  ;;  %v18291_v46 = vld [vmem:[%s22236_s7 + $0xccc] ss:$16 sps:$4 sm:$0xff]  }
 0x78e   :  { %13438 = vmatpush1.bf16.msra.mxu1 %v18205_v50  ;;  %12865 = vmatprep.subr.bf16.mxu0 %v18210_v53  ;;  %v18286_v50 = vld [vmem:[%s22236_s7 + $0xcc0] ss:$16 sps:$4 sm:$0xff]   ;;  %v18289_v53 = vld [vmem:[%s22236_s7 + $0xcc8] ss:$16 sps:$4 sm:$0xff]  }
 0x78f   :  { %13439 = vmatprep.subr.bf16.mxu1 %v18213_v54  ;;  %v18294_v54 = vld [vmem:[%s22236_s7 + $0xce4] ss:$16 sps:$4 sm:$0xff]  }
 0x791   :  { %12866 = vmatpush1.bf16.msra.mxu0 %v18208_v55  ;;  %v18297_v55 = vld [vmem:[%s22236_s7 + $0xcec] ss:$16 sps:$4 sm:$0xff]  }
 0x792   :  { %13440 = vmatpush1.bf16.msra.mxu1 %v18211_v43  ;;  %12867 = vmatprep.subr.bf16.mxu0 %v18216_v57  ;;  %v18292_v43 = vld [vmem:[%s22236_s7 + $0xce0] ss:$16 sps:$4 sm:$0xff]   ;;  %v18295_v57 = vld [vmem:[%s22236_s7 + $0xce8] ss:$16 sps:$4 sm:$0xff]  }
 0x793   :  { %13441 = vmatprep.subr.bf16.mxu1 %v18219_v37  ;;  %v18300_v37 = vld [vmem:[%s22236_s7 + $0xd04] ss:$16 sps:$4 sm:$0xff]  }
 0x795   :  { %12868 = vmatpush1.bf16.msra.mxu0 %v18214_v49  ;;  %v18303_v49 = vld [vmem:[%s22236_s7 + $0xd0c] ss:$16 sps:$4 sm:$0xff]  }
 0x796   :  { %13442 = vmatpush1.bf16.msra.mxu1 %v18217_v58  ;;  %12869 = vmatprep.subr.bf16.mxu0 %v18222_v59  ;;  %v18298_v58 = vld [vmem:[%s22236_s7 + $0xd00] ss:$16 sps:$4 sm:$0xff]   ;;  %v18301_v59 = vld [vmem:[%s22236_s7 + $0xd08] ss:$16 sps:$4 sm:$0xff]  }
 0x797   :  { %13443 = vmatprep.subr.bf16.mxu1 %v18225_v20  ;;  %v18306_v20 = vld [vmem:[%s22236_s7 + $0xd24] ss:$16 sps:$4 sm:$0xff]  }
 0x799   :  { %12870 = vmatpush1.bf16.msra.mxu0 %v18220_v60  ;;  %v18309_v60 = vld [vmem:[%s22236_s7 + $0xd2c] ss:$16 sps:$4 sm:$0xff]  }
 0x79a   :  { %13444 = vmatpush1.bf16.msra.mxu1 %v18223_v47  ;;  %12871 = vmatprep.subr.bf16.mxu0 %v18228_v62  ;;  %v18304_v47 = vld [vmem:[%s22236_s7 + $0xd20] ss:$16 sps:$4 sm:$0xff]   ;;  %v18307_v62 = vld [vmem:[%s22236_s7 + $0xd28] ss:$16 sps:$4 sm:$0xff]  }
 0x79b   :  { %13445 = vmatprep.subr.bf16.mxu1 %v18231_v52  ;;  %v18312_v52 = vld [vmem:[%s22236_s7 + $0xd44] ss:$16 sps:$4 sm:$0xff]  }
 0x79d   :  { %12872 = vmatpush1.bf16.msra.mxu0 %v18226_v56  ;;  %v18315_v56 = vld [vmem:[%s22236_s7 + $0xd4c] ss:$16 sps:$4 sm:$0xff]  }
 0x79e   :  { %13446 = vmatpush1.bf16.msra.mxu1 %v18229_v63  ;;  %12873 = vmatprep.subr.bf16.mxu0 %v18234_v1  ;;  %v18310_v63 = vld [vmem:[%s22236_s7 + $0xd40] ss:$16 sps:$4 sm:$0xff]   ;;  %v18313_v1 = vld [vmem:[%s22236_s7 + $0xd48] ss:$16 sps:$4 sm:$0xff]  }
 0x79f   :  { %13447 = vmatprep.subr.bf16.mxu1 %v18237_v2  ;;  %v18318_v2 = vld [vmem:[%s22236_s7 + $0xd64] ss:$16 sps:$4 sm:$0xff]  }
 0x7a1   :  { %12874 = vmatpush1.bf16.msra.mxu0 %v18232_v4  ;;  %v18321_v4 = vld [vmem:[%s22236_s7 + $0xd6c] ss:$16 sps:$4 sm:$0xff]  }
 0x7a2   :  { %13448 = vmatpush1.bf16.msra.mxu1 %v18235_v3  ;;  %12875 = vmatprep.subr.bf16.mxu0 %v18240_v24  ;;  %v18316_v3 = vld [vmem:[%s22236_s7 + $0xd60] ss:$16 sps:$4 sm:$0xff]   ;;  %v18319_v24 = vld [vmem:[%s22236_s7 + $0xd68] ss:$16 sps:$4 sm:$0xff]  }
 0x7a3   :  { %13449 = vmatprep.subr.bf16.mxu1 %v18243_v15  ;;  %v18324_v15 = vld [vmem:[%s22236_s7 + $0xd84] ss:$16 sps:$4 sm:$0xff]  }
 0x7a5   :  { %12876 = vmatpush1.bf16.msra.mxu0 %v18238_v11  ;;  %v18327_v11 = vld [vmem:[%s22236_s7 + $0xd8c] ss:$16 sps:$4 sm:$0xff]  }
 0x7a6   :  { %13450 = vmatpush1.bf16.msra.mxu1 %v18241_v5  ;;  %12877 = vmatprep.subr.bf16.mxu0 %v18246_v22  ;;  %v18322_v5 = vld [vmem:[%s22236_s7 + $0xd80] ss:$16 sps:$4 sm:$0xff]   ;;  %v18325_v22 = vld [vmem:[%s22236_s7 + $0xd88] ss:$16 sps:$4 sm:$0xff]  }
 0x7a7   :  { %13451 = vmatprep.subr.bf16.mxu1 %v18249_v6  ;;  %v18330_v6 = vld [vmem:[%s22236_s7 + $0xda4] ss:$16 sps:$4 sm:$0xff]  }
 0x7a9   :  { %12878 = vmatpush1.bf16.msra.mxu0 %v18244_v23  ;;  %v18333_v23 = vld [vmem:[%s22236_s7 + $0xdac] ss:$16 sps:$4 sm:$0xff]  }
 0x7aa   :  { %13452 = vmatpush1.bf16.msra.mxu1 %v18247_v32  ;;  %12888 = vmatprep.subr.bf16.mxu0 %v18252_v8  ;;  %v18328_v32 = vld [vmem:[%s22236_s7 + $0xda0] ss:$16 sps:$4 sm:$0xff]   ;;  %v18331_v8 = vld [vmem:[%s22236_s7 + $0xda8] ss:$16 sps:$4 sm:$0xff]  }
 0x7ab   :  { %13462 = vmatprep.subr.bf16.mxu1 %v18255_v9  ;;  %v18339_v9 = vld [vmem:[%s22236_s7 + $0xdcc] ss:$16 sps:$4 sm:$0xff]  }
 0x7ac   :  { %12880 = vmatmul.mubr.bf16.vlgmr.msra.gmra.mrb[0].mxu0 %v7226_v25 }
 0x7ad   :  { %13454 = vmatmul.mubr.bf16.vlgmr.msra.gmra.mrb[0].mxu1 %v7226_v25  ;;  %12889 = vmatpush1.bf16.msra.mxu0 %v18250_v16  ;;  %v18337_v25 = vld [vmem:[%s22236_s7 + $0xdc8] ss:$16 sps:$4 sm:$0xff]   ;;  %v18342_v16 = vld [vmem:[%s22236_s7 + $0xde4] ss:$16 sps:$4 sm:$0xff]  }
 0x7ae   :  { %13463 = vmatpush1.bf16.msra.mxu1 %v18253_v17  ;;  %12890 = vmatprep.subr.bf16.mxu0 %v18258_v13  ;;  %v18345_v17 = vld [vmem:[%s22236_s7 + $0xdec] ss:$16 sps:$4 sm:$0xff]   ;;  %v18340_v13 = vld [vmem:[%s22236_s7 + $0xde0] ss:$16 sps:$4 sm:$0xff]  }
 0x7af   :  { %13464 = vmatprep.subr.bf16.mxu1 %v18261_v18  ;;  %12920 = vmatprep.mubr.bf16.mxu0 %v7229_v48  ;;  %v18343_v18 = vld [vmem:[%s22236_s7 + $0xde8] ss:$16 sps:$4 sm:$0xff]  }
 0x7b0   :  { %13494 = vmatprep.mubr.bf16.mxu1 %v7229_v48  ;;  %v18348_v48 = vld [vmem:[%s22236_s7 + $0xe04] ss:$16 sps:$4 sm:$0xff]  }
 0x7b1   :  { %12891 = vmatpush1.bf16.msra.mxu0 %v18256_v33  ;;  %v7200_v33 = vld [vmem:[#allocation2 + $0x60] sm:$0xff] }
 0x7b2   :  { %13465 = vmatpush1.bf16.msra.mxu1 %v18259_v14  ;;  %12892 = vmatprep.subr.bf16.mxu0 %v18264_v36  ;;  %v18351_v14 = vld [vmem:[%s22236_s7 + $0xe0c] ss:$16 sps:$4 sm:$0xff]  }
 0x7b3   :  { %13466 = vmatprep.subr.bf16.mxu1 %v18267_v19  ;;  %v7203_v36 = vld [vmem:[#allocation2 + $0x78] sm:$0xff]  ;;  %v7228_v19 = vpack.c.bf16 %v7200_v33, %v7200_v33  ;;  %v18432_v33 = vld [vmem:[%s22236_s7 + $0xfc4] ss:$16 sps:$4 sm:$0xff]  }
 0x7b5   :  { %12893 = vmatpush1.bf16.msra.mxu0 %v18262_v29  ;;  %v18346_v29 = vld [vmem:[%s22236_s7 + $0xe00] ss:$16 sps:$4 sm:$0xff]  }
 0x7b6   :  { %13467 = vmatpush1.bf16.msra.mxu1 %v18265_v27  ;;  %12894 = vmatprep.subr.bf16.mxu0 %v18270_v28  ;;  %v18349_v27 = vld [vmem:[%s22236_s7 + $0xe08] ss:$16 sps:$4 sm:$0xff]   ;;  %v18354_v28 = vld [vmem:[%s22236_s7 + $0xe24] ss:$16 sps:$4 sm:$0xff]  }
 0x7b7   :  { %13468 = vmatprep.subr.bf16.mxu1 %v18273_v35  ;;  %v18357_v35 = vld [vmem:[%s22236_s7 + $0xe2c] ss:$16 sps:$4 sm:$0xff]  }
 0x7b9   :  { %12895 = vmatpush1.bf16.msra.mxu0 %v18268_v51  ;;  %v7231_v51 = vpack.c.bf16 %v7203_v36, %v7203_v36  ;;  %v18430_v36 = vld [vmem:[%s22236_s7 + $0xfc0] ss:$16 sps:$4 sm:$0xff]  }
 0x7ba   :  { %13469 = vmatpush1.bf16.msra.mxu1 %v18271_v30  ;;  %12896 = vmatprep.subr.bf16.mxu0 %v18276_v31  ;;  %v18352_v30 = vld [vmem:[%s22236_s7 + $0xe20] ss:$16 sps:$4 sm:$0xff]   ;;  %v18355_v31 = vld [vmem:[%s22236_s7 + $0xe28] ss:$16 sps:$4 sm:$0xff]  }
 0x7bb   :  { %13470 = vmatprep.subr.bf16.mxu1 %v18279_v34  ;;  %v18360_v34 = vld [vmem:[%s22236_s7 + $0xe44] ss:$16 sps:$4 sm:$0xff]  }
 0x7bd   :  { %12897 = vmatpush1.bf16.msra.mxu0 %v18274_v38  ;;  %v18363_v38 = vld [vmem:[%s22236_s7 + $0xe4c] ss:$16 sps:$4 sm:$0xff]  }
 0x7be   :  { %13471 = vmatpush1.bf16.msra.mxu1 %v18277_v40  ;;  %12898 = vmatprep.subr.bf16.mxu0 %v18282_v41  ;;  %v18358_v40 = vld [vmem:[%s22236_s7 + $0xe40] ss:$16 sps:$4 sm:$0xff]   ;;  %v18361_v41 = vld [vmem:[%s22236_s7 + $0xe48] ss:$16 sps:$4 sm:$0xff]  }
 0x7bf   :  { %13472 = vmatprep.subr.bf16.mxu1 %v18285_v42  ;;  %v18366_v42 = vld [vmem:[%s22236_s7 + $0xe64] ss:$16 sps:$4 sm:$0xff]  }
 0x7c1   :  { %12899 = vmatpush1.bf16.msra.mxu0 %v18280_v44  ;;  %v18369_v44 = vld [vmem:[%s22236_s7 + $0xe6c] ss:$16 sps:$4 sm:$0xff]  }
 0x7c2   :  { %13473 = vmatpush1.bf16.msra.mxu1 %v18283_v45  ;;  %12900 = vmatprep.subr.bf16.mxu0 %v18288_v61  ;;  %v18364_v45 = vld [vmem:[%s22236_s7 + $0xe60] ss:$16 sps:$4 sm:$0xff]   ;;  %v18367_v61 = vld [vmem:[%s22236_s7 + $0xe68] ss:$16 sps:$4 sm:$0xff]  }
 0x7c3   :  { %13474 = vmatprep.subr.bf16.mxu1 %v18291_v46  ;;  %v18372_v46 = vld [vmem:[%s22236_s7 + $0xe84] ss:$16 sps:$4 sm:$0xff]  }
 0x7c5   :  { %12901 = vmatpush1.bf16.msra.mxu0 %v18286_v50  ;;  %v18375_v50 = vld [vmem:[%s22236_s7 + $0xe8c] ss:$16 sps:$4 sm:$0xff]  }
 0x7c6   :  { %13475 = vmatpush1.bf16.msra.mxu1 %v18289_v53  ;;  %12902 = vmatprep.subr.bf16.mxu0 %v18294_v54  ;;  %v18370_v53 = vld [vmem:[%s22236_s7 + $0xe80] ss:$16 sps:$4 sm:$0xff]   ;;  %v18373_v54 = vld [vmem:[%s22236_s7 + $0xe88] ss:$16 sps:$4 sm:$0xff]  }
 0x7c7   :  { %13476 = vmatprep.subr.bf16.mxu1 %v18297_v55  ;;  %v18378_v55 = vld [vmem:[%s22236_s7 + $0xea4] ss:$16 sps:$4 sm:$0xff]  }
 0x7c9   :  { %12903 = vmatpush1.bf16.msra.mxu0 %v18292_v43  ;;  %v18381_v43 = vld [vmem:[%s22236_s7 + $0xeac] ss:$16 sps:$4 sm:$0xff]  }
 0x7ca   :  { %13477 = vmatpush1.bf16.msra.mxu1 %v18295_v57  ;;  %12904 = vmatprep.subr.bf16.mxu0 %v18300_v37  ;;  %v18376_v57 = vld [vmem:[%s22236_s7 + $0xea0] ss:$16 sps:$4 sm:$0xff]   ;;  %v18379_v37 = vld [vmem:[%s22236_s7 + $0xea8] ss:$16 sps:$4 sm:$0xff]  }
 0x7cb   :  { %13478 = vmatprep.subr.bf16.mxu1 %v18303_v49  ;;  %v18384_v49 = vld [vmem:[%s22236_s7 + $0xec4] ss:$16 sps:$4 sm:$0xff]  }
 0x7cd   :  { %12905 = vmatpush1.bf16.msra.mxu0 %v18298_v58  ;;  %v18387_v58 = vld [vmem:[%s22236_s7 + $0xecc] ss:$16 sps:$4 sm:$0xff]  }
 0x7ce   :  { %13479 = vmatpush1.bf16.msra.mxu1 %v18301_v59  ;;  %12906 = vmatprep.subr.bf16.mxu0 %v18306_v20  ;;  %v18382_v59 = vld [vmem:[%s22236_s7 + $0xec0] ss:$16 sps:$4 sm:$0xff]   ;;  %v18385_v20 = vld [vmem:[%s22236_s7 + $0xec8] ss:$16 sps:$4 sm:$0xff]  }
 0x7cf   :  { %13480 = vmatprep.subr.bf16.mxu1 %v18309_v60  ;;  %v18390_v60 = vld [vmem:[%s22236_s7 + $0xee4] ss:$16 sps:$4 sm:$0xff]  }
 0x7d1   :  { %12907 = vmatpush1.bf16.msra.mxu0 %v18304_v47  ;;  %v18393_v47 = vld [vmem:[%s22236_s7 + $0xeec] ss:$16 sps:$4 sm:$0xff]  }
 0x7d2   :  { %13481 = vmatpush1.bf16.msra.mxu1 %v18307_v62  ;;  %12908 = vmatprep.subr.bf16.mxu0 %v18312_v52  ;;  %v18388_v62 = vld [vmem:[%s22236_s7 + $0xee0] ss:$16 sps:$4 sm:$0xff]   ;;  %v18391_v52 = vld [vmem:[%s22236_s7 + $0xee8] ss:$16 sps:$4 sm:$0xff]  }
 0x7d3   :  { %13482 = vmatprep.subr.bf16.mxu1 %v18315_v56  ;;  %v18396_v56 = vld [vmem:[%s22236_s7 + $0xf04] ss:$16 sps:$4 sm:$0xff]  }
 0x7d5   :  { %12909 = vmatpush1.bf16.msra.mxu0 %v18310_v63  ;;  %v18399_v63 = vld [vmem:[%s22236_s7 + $0xf0c] ss:$16 sps:$4 sm:$0xff]  }
 0x7d6   :  { %13483 = vmatpush1.bf16.msra.mxu1 %v18313_v1  ;;  %12910 = vmatprep.subr.bf16.mxu0 %v18318_v2  ;;  %v18394_v1 = vld [vmem:[%s22236_s7 + $0xf00] ss:$16 sps:$4 sm:$0xff]   ;;  %v18397_v2 = vld [vmem:[%s22236_s7 + $0xf08] ss:$16 sps:$4 sm:$0xff]  }
 0x7d7   :  { %13484 = vmatprep.subr.bf16.mxu1 %v18321_v4  ;;  %v18402_v4 = vld [vmem:[%s22236_s7 + $0xf24] ss:$16 sps:$4 sm:$0xff]  }
 0x7d9   :  { %12911 = vmatpush1.bf16.msra.mxu0 %v18316_v3  ;;  %v18405_v3 = vld [vmem:[%s22236_s7 + $0xf2c] ss:$16 sps:$4 sm:$0xff]  }
 0x7da   :  { %13485 = vmatpush1.bf16.msra.mxu1 %v18319_v24  ;;  %12912 = vmatprep.subr.bf16.mxu0 %v18324_v15  ;;  %v18400_v24 = vld [vmem:[%s22236_s7 + $0xf20] ss:$16 sps:$4 sm:$0xff]   ;;  %v18403_v15 = vld [vmem:[%s22236_s7 + $0xf28] ss:$16 sps:$4 sm:$0xff]  }
 0x7db   :  { %13486 = vmatprep.subr.bf16.mxu1 %v18327_v11  ;;  %v18408_v11 = vld [vmem:[%s22236_s7 + $0xf44] ss:$16 sps:$4 sm:$0xff]  }
 0x7dd   :  { %12913 = vmatpush1.bf16.msra.mxu0 %v18322_v5  ;;  %v18411_v5 = vld [vmem:[%s22236_s7 + $0xf4c] ss:$16 sps:$4 sm:$0xff]  }
 0x7de   :  { %13487 = vmatpush1.bf16.msra.mxu1 %v18325_v22  ;;  %12914 = vmatprep.subr.bf16.mxu0 %v18330_v6  ;;  %v18406_v22 = vld [vmem:[%s22236_s7 + $0xf40] ss:$16 sps:$4 sm:$0xff]   ;;  %v18409_v6 = vld [vmem:[%s22236_s7 + $0xf48] ss:$16 sps:$4 sm:$0xff]  }
 0x7df   :  { %13488 = vmatprep.subr.bf16.mxu1 %v18333_v23  ;;  %v18414_v23 = vld [vmem:[%s22236_s7 + $0xf64] ss:$16 sps:$4 sm:$0xff]  }
 0x7e1   :  { %12915 = vmatpush1.bf16.msra.mxu0 %v18328_v32  ;;  %v18417_v32 = vld [vmem:[%s22236_s7 + $0xf6c] ss:$16 sps:$4 sm:$0xff]  }
 0x7e2   :  { %13489 = vmatpush1.bf16.msra.mxu1 %v18331_v8  ;;  %12916 = vmatprep.subr.bf16.mxu0 %v18336_v7  ;;  %v18412_v8 = vld [vmem:[%s22236_s7 + $0xf60] ss:$16 sps:$4 sm:$0xff]   ;;  %v18415_v7 = vld [vmem:[%s22236_s7 + $0xf68] ss:$16 sps:$4 sm:$0xff]  }
 0x7e3   :  { %13490 = vmatprep.subr.bf16.mxu1 %v18339_v9  ;;  %v18420_v9 = vld [vmem:[%s22236_s7 + $0xf84] ss:$16 sps:$4 sm:$0xff]  }
 0x7e5   :  { %12917 = vmatpush1.bf16.msra.mxu0 %v18334_v12  ;;  %v18423_v12 = vld [vmem:[%s22236_s7 + $0xf8c] ss:$16 sps:$4 sm:$0xff]  }
 0x7e6   :  { %13491 = vmatpush1.bf16.msra.mxu1 %v18337_v25  ;;  %12918 = vmatprep.subr.bf16.mxu0 %v18342_v16  ;;  %v18418_v25 = vld [vmem:[%s22236_s7 + $0xf80] ss:$16 sps:$4 sm:$0xff]   ;;  %v18421_v16 = vld [vmem:[%s22236_s7 + $0xf88] ss:$16 sps:$4 sm:$0xff]  }
 0x7e7   :  { %13492 = vmatprep.subr.bf16.mxu1 %v18345_v17  ;;  %v18426_v17 = vld [vmem:[%s22236_s7 + $0xfa4] ss:$16 sps:$4 sm:$0xff]  }
 0x7e9   :  { %12919 = vmatpush1.bf16.msra.mxu0 %v18340_v13  ;;  %v18429_v13 = vld [vmem:[%s22236_s7 + $0xfac] ss:$16 sps:$4 sm:$0xff]  }
 0x7ea   :  { %13493 = vmatpush1.bf16.msra.mxu1 %v18343_v18  ;;  %12929 = vmatprep.subr.bf16.mxu0 %v18348_v48  ;;  %v18424_v18 = vld [vmem:[%s22236_s7 + $0xfa0] ss:$16 sps:$4 sm:$0xff]   ;;  %v18427_v48 = vld [vmem:[%s22236_s7 + $0xfa8] ss:$16 sps:$4 sm:$0xff]  }
 0x7eb   :  { %13503 = vmatprep.subr.bf16.mxu1 %v18351_v14  ;;  %v18435_v14 = vld [vmem:[%s22236_s7 + $0xfcc] ss:$16 sps:$4 sm:$0xff]  }
 0x7ec   :  { %12921 = vmatmul.mubr.bf16.vlgmr.msra.gmra.mrb[0].mxu0 %v7228_v19 }
 0x7ed   :  { %13495 = vmatmul.mubr.bf16.vlgmr.msra.gmra.mrb[0].mxu1 %v7228_v19  ;;  %12930 = vmatpush1.bf16.msra.mxu0 %v18346_v29  ;;  %v18433_v19 = vld [vmem:[%s22236_s7 + $0xfc8] ss:$16 sps:$4 sm:$0xff]   ;;  %v18438_v29 = vld [vmem:[%s22236_s7 + $0xfe4] ss:$16 sps:$4 sm:$0xff]  }
 0x7ee   :  { %13504 = vmatpush1.bf16.msra.mxu1 %v18349_v27  ;;  %12931 = vmatprep.subr.bf16.mxu0 %v18354_v28  ;;  %v18441_v27 = vld [vmem:[%s22236_s7 + $0xfec] ss:$16 sps:$4 sm:$0xff]   ;;  %v18436_v28 = vld [vmem:[%s22236_s7 + $0xfe0] ss:$16 sps:$4 sm:$0xff]  }
 0x7ef   :  { %13505 = vmatprep.subr.bf16.mxu1 %v18357_v35  ;;  %12961 = vmatprep.mubr.bf16.mxu0 %v7231_v51  ;;  %v18439_v35 = vld [vmem:[%s22236_s7 + $0xfe8] ss:$16 sps:$4 sm:$0xff]  }
 0x7f0   :  { %13535 = vmatprep.mubr.bf16.mxu1 %v7231_v51  ;;  %v18444_v51 = vld [vmem:[%s22236_s7 + $0x1004] ss:$16 sps:$4 sm:$0xff]  }
 0x7f1   :  { %12932 = vmatpush1.bf16.msra.mxu0 %v18352_v30  ;;  %v7202_v30 = vld [vmem:[#allocation2 + $0x70] sm:$0xff] }
 0x7f2   :  { %13506 = vmatpush1.bf16.msra.mxu1 %v18355_v31  ;;  %12933 = vmatprep.subr.bf16.mxu0 %v18360_v34  ;;  %v18447_v31 = vld [vmem:[%s22236_s7 + $0x100c] ss:$16 sps:$4 sm:$0xff]  }
 0x7f3   :  { %13507 = vmatprep.subr.bf16.mxu1 %v18363_v38  ;;  %v7205_v34 = vld [vmem:[#allocation2 + $0x88] sm:$0xff]  ;;  %v7230_v38 = vpack.c.bf16 %v7202_v30, %v7202_v30  ;;  %v18528_v30 = vld [vmem:[%s22236_s7 + $0x11c4] ss:$16 sps:$4 sm:$0xff]  }
 0x7f5   :  { %12934 = vmatpush1.bf16.msra.mxu0 %v18358_v40  ;;  %v18442_v40 = vld [vmem:[%s22236_s7 + $0x1000] ss:$16 sps:$4 sm:$0xff]  }
 0x7f6   :  { %13508 = vmatpush1.bf16.msra.mxu1 %v18361_v41  ;;  %12935 = vmatprep.subr.bf16.mxu0 %v18366_v42  ;;  %v18445_v41 = vld [vmem:[%s22236_s7 + $0x1008] ss:$16 sps:$4 sm:$0xff]   ;;  %v18450_v42 = vld [vmem:[%s22236_s7 + $0x1024] ss:$16 sps:$4 sm:$0xff]  }
 0x7f7   :  { %13509 = vmatprep.subr.bf16.mxu1 %v18369_v44  ;;  %v18453_v44 = vld [vmem:[%s22236_s7 + $0x102c] ss:$16 sps:$4 sm:$0xff]  }
 0x7f9   :  { %12936 = vmatpush1.bf16.msra.mxu0 %v18364_v45  ;;  %v7233_v45 = vpack.c.bf16 %v7205_v34, %v7205_v34  ;;  %v18526_v34 = vld [vmem:[%s22236_s7 + $0x11c0] ss:$16 sps:$4 sm:$0xff]  }
 0x7fa   :  { %13510 = vmatpush1.bf16.msra.mxu1 %v18367_v61  ;;  %12937 = vmatprep.subr.bf16.mxu0 %v18372_v46  ;;  %v18448_v61 = vld [vmem:[%s22236_s7 + $0x1020] ss:$16 sps:$4 sm:$0xff]   ;;  %v18451_v46 = vld [vmem:[%s22236_s7 + $0x1028] ss:$16 sps:$4 sm:$0xff]  }
 0x7fb   :  { %13511 = vmatprep.subr.bf16.mxu1 %v18375_v50  ;;  %v18456_v50 = vld [vmem:[%s22236_s7 + $0x1044] ss:$16 sps:$4 sm:$0xff]  }
 0x7fd   :  { %12938 = vmatpush1.bf16.msra.mxu0 %v18370_v53  ;;  %v18459_v53 = vld [vmem:[%s22236_s7 + $0x104c] ss:$16 sps:$4 sm:$0xff]  }
 0x7fe   :  { %13512 = vmatpush1.bf16.msra.mxu1 %v18373_v54  ;;  %12939 = vmatprep.subr.bf16.mxu0 %v18378_v55  ;;  %v18454_v54 = vld [vmem:[%s22236_s7 + $0x1040] ss:$16 sps:$4 sm:$0xff]   ;;  %v18457_v55 = vld [vmem:[%s22236_s7 + $0x1048] ss:$16 sps:$4 sm:$0xff]  }
 0x7ff   :  { %13513 = vmatprep.subr.bf16.mxu1 %v18381_v43  ;;  %v18462_v43 = vld [vmem:[%s22236_s7 + $0x1064] ss:$16 sps:$4 sm:$0xff]  }
 0x801   :  { %12940 = vmatpush1.bf16.msra.mxu0 %v18376_v57  ;;  %v18465_v57 = vld [vmem:[%s22236_s7 + $0x106c] ss:$16 sps:$4 sm:$0xff]  }
 0x802   :  { %13514 = vmatpush1.bf16.msra.mxu1 %v18379_v37  ;;  %12941 = vmatprep.subr.bf16.mxu0 %v18384_v49  ;;  %v18460_v37 = vld [vmem:[%s22236_s7 + $0x1060] ss:$16 sps:$4 sm:$0xff]   ;;  %v18463_v49 = vld [vmem:[%s22236_s7 + $0x1068] ss:$16 sps:$4 sm:$0xff]  }
 0x803   :  { %13515 = vmatprep.subr.bf16.mxu1 %v18387_v58  ;;  %v18468_v58 = vld [vmem:[%s22236_s7 + $0x1084] ss:$16 sps:$4 sm:$0xff]  }
 0x805   :  { %12942 = vmatpush1.bf16.msra.mxu0 %v18382_v59  ;;  %v18471_v59 = vld [vmem:[%s22236_s7 + $0x108c] ss:$16 sps:$4 sm:$0xff]  }
 0x806   :  { %13516 = vmatpush1.bf16.msra.mxu1 %v18385_v20  ;;  %12943 = vmatprep.subr.bf16.mxu0 %v18390_v60  ;;  %v18466_v20 = vld [vmem:[%s22236_s7 + $0x1080] ss:$16 sps:$4 sm:$0xff]   ;;  %v18469_v60 = vld [vmem:[%s22236_s7 + $0x1088] ss:$16 sps:$4 sm:$0xff]  }
 0x807   :  { %13517 = vmatprep.subr.bf16.mxu1 %v18393_v47  ;;  %v18474_v47 = vld [vmem:[%s22236_s7 + $0x10a4] ss:$16 sps:$4 sm:$0xff]  }
 0x809   :  { %12944 = vmatpush1.bf16.msra.mxu0 %v18388_v62  ;;  %v18477_v62 = vld [vmem:[%s22236_s7 + $0x10ac] ss:$16 sps:$4 sm:$0xff]  }
 0x80a   :  { %13518 = vmatpush1.bf16.msra.mxu1 %v18391_v52  ;;  %12945 = vmatprep.subr.bf16.mxu0 %v18396_v56  ;;  %v18472_v52 = vld [vmem:[%s22236_s7 + $0x10a0] ss:$16 sps:$4 sm:$0xff]   ;;  %v18475_v56 = vld [vmem:[%s22236_s7 + $0x10a8] ss:$16 sps:$4 sm:$0xff]  }
 0x80b   :  { %13519 = vmatprep.subr.bf16.mxu1 %v18399_v63  ;;  %v18480_v63 = vld [vmem:[%s22236_s7 + $0x10c4] ss:$16 sps:$4 sm:$0xff]  }
 0x80d   :  { %12946 = vmatpush1.bf16.msra.mxu0 %v18394_v1  ;;  %v18483_v1 = vld [vmem:[%s22236_s7 + $0x10cc] ss:$16 sps:$4 sm:$0xff]  }
 0x80e   :  { %13520 = vmatpush1.bf16.msra.mxu1 %v18397_v2  ;;  %12947 = vmatprep.subr.bf16.mxu0 %v18402_v4  ;;  %v18478_v2 = vld [vmem:[%s22236_s7 + $0x10c0] ss:$16 sps:$4 sm:$0xff]   ;;  %v18481_v4 = vld [vmem:[%s22236_s7 + $0x10c8] ss:$16 sps:$4 sm:$0xff]  }
 0x80f   :  { %13521 = vmatprep.subr.bf16.mxu1 %v18405_v3  ;;  %v18486_v3 = vld [vmem:[%s22236_s7 + $0x10e4] ss:$16 sps:$4 sm:$0xff]  }
 0x811   :  { %12948 = vmatpush1.bf16.msra.mxu0 %v18400_v24  ;;  %v18489_v24 = vld [vmem:[%s22236_s7 + $0x10ec] ss:$16 sps:$4 sm:$0xff]  }
 0x812   :  { %13522 = vmatpush1.bf16.msra.mxu1 %v18403_v15  ;;  %12949 = vmatprep.subr.bf16.mxu0 %v18408_v11  ;;  %v18484_v15 = vld [vmem:[%s22236_s7 + $0x10e0] ss:$16 sps:$4 sm:$0xff]   ;;  %v18487_v11 = vld [vmem:[%s22236_s7 + $0x10e8] ss:$16 sps:$4 sm:$0xff]  }
 0x813   :  { %13523 = vmatprep.subr.bf16.mxu1 %v18411_v5  ;;  %v18492_v5 = vld [vmem:[%s22236_s7 + $0x1104] ss:$16 sps:$4 sm:$0xff]  }
 0x815   :  { %12950 = vmatpush1.bf16.msra.mxu0 %v18406_v22  ;;  %v18495_v22 = vld [vmem:[%s22236_s7 + $0x110c] ss:$16 sps:$4 sm:$0xff]  }
 0x816   :  { %13524 = vmatpush1.bf16.msra.mxu1 %v18409_v6  ;;  %12951 = vmatprep.subr.bf16.mxu0 %v18414_v23  ;;  %v18490_v6 = vld [vmem:[%s22236_s7 + $0x1100] ss:$16 sps:$4 sm:$0xff]   ;;  %v18493_v23 = vld [vmem:[%s22236_s7 + $0x1108] ss:$16 sps:$4 sm:$0xff]  }
 0x817   :  { %13525 = vmatprep.subr.bf16.mxu1 %v18417_v32  ;;  %v18498_v32 = vld [vmem:[%s22236_s7 + $0x1124] ss:$16 sps:$4 sm:$0xff]  }
 0x819   :  { %12952 = vmatpush1.bf16.msra.mxu0 %v18412_v8  ;;  %v18501_v8 = vld [vmem:[%s22236_s7 + $0x112c] ss:$16 sps:$4 sm:$0xff]  }
 0x81a   :  { %13526 = vmatpush1.bf16.msra.mxu1 %v18415_v7  ;;  %12953 = vmatprep.subr.bf16.mxu0 %v18420_v9  ;;  %v18496_v7 = vld [vmem:[%s22236_s7 + $0x1120] ss:$16 sps:$4 sm:$0xff]   ;;  %v18499_v9 = vld [vmem:[%s22236_s7 + $0x1128] ss:$16 sps:$4 sm:$0xff]  }
 0x81b   :  { %13527 = vmatprep.subr.bf16.mxu1 %v18423_v12  ;;  %v18504_v12 = vld [vmem:[%s22236_s7 + $0x1144] ss:$16 sps:$4 sm:$0xff]  }
 0x81d   :  { %12954 = vmatpush1.bf16.msra.mxu0 %v18418_v25  ;;  %v18507_v25 = vld [vmem:[%s22236_s7 + $0x114c] ss:$16 sps:$4 sm:$0xff]  }
 0x81e   :  { %13528 = vmatpush1.bf16.msra.mxu1 %v18421_v16  ;;  %12955 = vmatprep.subr.bf16.mxu0 %v18426_v17  ;;  %v18502_v16 = vld [vmem:[%s22236_s7 + $0x1140] ss:$16 sps:$4 sm:$0xff]   ;;  %v18505_v17 = vld [vmem:[%s22236_s7 + $0x1148] ss:$16 sps:$4 sm:$0xff]  }
 0x81f   :  { %13529 = vmatprep.subr.bf16.mxu1 %v18429_v13  ;;  %v18510_v13 = vld [vmem:[%s22236_s7 + $0x1164] ss:$16 sps:$4 sm:$0xff]  }
 0x821   :  { %12956 = vmatpush1.bf16.msra.mxu0 %v18424_v18  ;;  %v18513_v18 = vld [vmem:[%s22236_s7 + $0x116c] ss:$16 sps:$4 sm:$0xff]  }
 0x822   :  { %13530 = vmatpush1.bf16.msra.mxu1 %v18427_v48  ;;  %12957 = vmatprep.subr.bf16.mxu0 %v18432_v33  ;;  %v18508_v48 = vld [vmem:[%s22236_s7 + $0x1160] ss:$16 sps:$4 sm:$0xff]   ;;  %v18511_v33 = vld [vmem:[%s22236_s7 + $0x1168] ss:$16 sps:$4 sm:$0xff]  }
 0x823   :  { %13531 = vmatprep.subr.bf16.mxu1 %v18435_v14  ;;  %v18516_v14 = vld [vmem:[%s22236_s7 + $0x1184] ss:$16 sps:$4 sm:$0xff]  }
 0x825   :  { %12958 = vmatpush1.bf16.msra.mxu0 %v18430_v36  ;;  %v18519_v36 = vld [vmem:[%s22236_s7 + $0x118c] ss:$16 sps:$4 sm:$0xff]  }
 0x826   :  { %13532 = vmatpush1.bf16.msra.mxu1 %v18433_v19  ;;  %12959 = vmatprep.subr.bf16.mxu0 %v18438_v29  ;;  %v18514_v19 = vld [vmem:[%s22236_s7 + $0x1180] ss:$16 sps:$4 sm:$0xff]   ;;  %v18517_v29 = vld [vmem:[%s22236_s7 + $0x1188] ss:$16 sps:$4 sm:$0xff]  }
 0x827   :  { %13533 = vmatprep.subr.bf16.mxu1 %v18441_v27  ;;  %v18522_v27 = vld [vmem:[%s22236_s7 + $0x11a4] ss:$16 sps:$4 sm:$0xff]  }
 0x829   :  { %12960 = vmatpush1.bf16.msra.mxu0 %v18436_v28  ;;  %v18525_v28 = vld [vmem:[%s22236_s7 + $0x11ac] ss:$16 sps:$4 sm:$0xff]  }
 0x82a   :  { %13534 = vmatpush1.bf16.msra.mxu1 %v18439_v35  ;;  %12970 = vmatprep.subr.bf16.mxu0 %v18444_v51  ;;  %v18520_v35 = vld [vmem:[%s22236_s7 + $0x11a0] ss:$16 sps:$4 sm:$0xff]   ;;  %v18523_v51 = vld [vmem:[%s22236_s7 + $0x11a8] ss:$16 sps:$4 sm:$0xff]  }
 0x82b   :  { %13544 = vmatprep.subr.bf16.mxu1 %v18447_v31  ;;  %v18531_v31 = vld [vmem:[%s22236_s7 + $0x11cc] ss:$16 sps:$4 sm:$0xff]  }
 0x82c   :  { %12962 = vmatmul.mubr.bf16.vlgmr.msra.gmra.mrb[0].mxu0 %v7230_v38 }
 0x82d   :  { %13536 = vmatmul.mubr.bf16.vlgmr.msra.gmra.mrb[0].mxu1 %v7230_v38  ;;  %12971 = vmatpush1.bf16.msra.mxu0 %v18442_v40  ;;  %v18529_v38 = vld [vmem:[%s22236_s7 + $0x11c8] ss:$16 sps:$4 sm:$0xff]   ;;  %v18534_v40 = vld [vmem:[%s22236_s7 + $0x11e4] ss:$16 sps:$4 sm:$0xff]  }
 0x82e   :  { %13545 = vmatpush1.bf16.msra.mxu1 %v18445_v41  ;;  %12972 = vmatprep.subr.bf16.mxu0 %v18450_v42  ;;  %v18537_v41 = vld [vmem:[%s22236_s7 + $0x11ec] ss:$16 sps:$4 sm:$0xff]   ;;  %v18532_v42 = vld [vmem:[%s22236_s7 + $0x11e0] ss:$16 sps:$4 sm:$0xff]  }
 0x82f   :  { %13546 = vmatprep.subr.bf16.mxu1 %v18453_v44  ;;  %13002 = vmatprep.mubr.bf16.mxu0 %v7233_v45  ;;  %v18535_v44 = vld [vmem:[%s22236_s7 + $0x11e8] ss:$16 sps:$4 sm:$0xff]  }
 0x830   :  { %13576 = vmatprep.mubr.bf16.mxu1 %v7233_v45  ;;  %v7204_v45 = vld [vmem:[#allocation2 + $0x80] sm:$0xff] }
 0x831   :  { %12973 = vmatpush1.bf16.msra.mxu0 %v18448_v61  ;;  %v18540_v61 = vld [vmem:[%s22236_s7 + $0x1204] ss:$16 sps:$4 sm:$0xff]  }
 0x832   :  { %13547 = vmatpush1.bf16.msra.mxu1 %v18451_v46  ;;  %12974 = vmatprep.subr.bf16.mxu0 %v18456_v50  ;;  %v18543_v46 = vld [vmem:[%s22236_s7 + $0x120c] ss:$16 sps:$4 sm:$0xff]   ;;  %v7232_v50 = vpack.c.bf16 %v7204_v45, %v7204_v45  ;;  %v18619_v45 = vld [vmem:[%s22236_s7 + $0x13a8] ss:$16 sps:$4 sm:$0xff]  }
 0x833   :  { %13548 = vmatprep.subr.bf16.mxu1 %v18459_v53  ;;  %v7207_v53 = vld [vmem:[#allocation2 + $0x98] sm:$0xff] }
 0x835   :  { %12975 = vmatpush1.bf16.msra.mxu0 %v18454_v54  ;;  %v18538_v54 = vld [vmem:[%s22236_s7 + $0x1200] ss:$16 sps:$4 sm:$0xff]  }
 0x836   :  { %13549 = vmatpush1.bf16.msra.mxu1 %v18457_v55  ;;  %12976 = vmatprep.subr.bf16.mxu0 %v18462_v43  ;;  %v18541_v55 = vld [vmem:[%s22236_s7 + $0x1208] ss:$16 sps:$4 sm:$0xff]   ;;  %v18546_v43 = vld [vmem:[%s22236_s7 + $0x1224] ss:$16 sps:$4 sm:$0xff]  }
 0x837   :  { %13550 = vmatprep.subr.bf16.mxu1 %v18465_v57  ;;  %v18549_v57 = vld [vmem:[%s22236_s7 + $0x122c] ss:$16 sps:$4 sm:$0xff]  }
 0x839   :  { %12977 = vmatpush1.bf16.msra.mxu0 %v18460_v37  ;;  %v7235_v37 = vpack.c.bf16 %v7207_v53, %v7207_v53  ;;  %v18625_v53 = vld [vmem:[%s22236_s7 + $0x13c8] ss:$16 sps:$4 sm:$0xff]  }
 0x83a   :  { %13551 = vmatpush1.bf16.msra.mxu1 %v18463_v49  ;;  %12978 = vmatprep.subr.bf16.mxu0 %v18468_v58  ;;  %v18544_v49 = vld [vmem:[%s22236_s7 + $0x1220] ss:$16 sps:$4 sm:$0xff]   ;;  %v18547_v58 = vld [vmem:[%s22236_s7 + $0x1228] ss:$16 sps:$4 sm:$0xff]  }
 0x83b   :  { %13552 = vmatprep.subr.bf16.mxu1 %v18471_v59  ;;  %v18552_v59 = vld [vmem:[%s22236_s7 + $0x1244] ss:$16 sps:$4 sm:$0xff]  }
 0x83d   :  { %12979 = vmatpush1.bf16.msra.mxu0 %v18466_v20  ;;  %v18555_v20 = vld [vmem:[%s22236_s7 + $0x124c] ss:$16 sps:$4 sm:$0xff]  }
 0x83e   :  { %13553 = vmatpush1.bf16.msra.mxu1 %v18469_v60  ;;  %12980 = vmatprep.subr.bf16.mxu0 %v18474_v47  ;;  %v18550_v60 = vld [vmem:[%s22236_s7 + $0x1240] ss:$16 sps:$4 sm:$0xff]   ;;  %v18553_v47 = vld [vmem:[%s22236_s7 + $0x1248] ss:$16 sps:$4 sm:$0xff]  }
 0x83f   :  { %13554 = vmatprep.subr.bf16.mxu1 %v18477_v62  ;;  %v18558_v62 = vld [vmem:[%s22236_s7 + $0x1264] ss:$16 sps:$4 sm:$0xff]  }
 0x841   :  { %12981 = vmatpush1.bf16.msra.mxu0 %v18472_v52  ;;  %v18561_v52 = vld [vmem:[%s22236_s7 + $0x126c] ss:$16 sps:$4 sm:$0xff]  }
 0x842   :  { %13555 = vmatpush1.bf16.msra.mxu1 %v18475_v56  ;;  %12982 = vmatprep.subr.bf16.mxu0 %v18480_v63  ;;  %v18556_v56 = vld [vmem:[%s22236_s7 + $0x1260] ss:$16 sps:$4 sm:$0xff]   ;;  %v18559_v63 = vld [vmem:[%s22236_s7 + $0x1268] ss:$16 sps:$4 sm:$0xff]  }
 0x843   :  { %13556 = vmatprep.subr.bf16.mxu1 %v18483_v1  ;;  %v18564_v1 = vld [vmem:[%s22236_s7 + $0x1284] ss:$16 sps:$4 sm:$0xff]  }
 0x845   :  { %12983 = vmatpush1.bf16.msra.mxu0 %v18478_v2  ;;  %v18567_v2 = vld [vmem:[%s22236_s7 + $0x128c] ss:$16 sps:$4 sm:$0xff]  }
 0x846   :  { %13557 = vmatpush1.bf16.msra.mxu1 %v18481_v4  ;;  %12984 = vmatprep.subr.bf16.mxu0 %v18486_v3  ;;  %v18562_v4 = vld [vmem:[%s22236_s7 + $0x1280] ss:$16 sps:$4 sm:$0xff]   ;;  %v18565_v3 = vld [vmem:[%s22236_s7 + $0x1288] ss:$16 sps:$4 sm:$0xff]  }
 0x847   :  { %13558 = vmatprep.subr.bf16.mxu1 %v18489_v24  ;;  %v18570_v24 = vld [vmem:[%s22236_s7 + $0x12a4] ss:$16 sps:$4 sm:$0xff]  }
 0x849   :  { %12985 = vmatpush1.bf16.msra.mxu0 %v18484_v15  ;;  %v18573_v15 = vld [vmem:[%s22236_s7 + $0x12ac] ss:$16 sps:$4 sm:$0xff]  }
 0x84a   :  { %13559 = vmatpush1.bf16.msra.mxu1 %v18487_v11  ;;  %12986 = vmatprep.subr.bf16.mxu0 %v18492_v5  ;;  %v18568_v11 = vld [vmem:[%s22236_s7 + $0x12a0] ss:$16 sps:$4 sm:$0xff]   ;;  %v18571_v5 = vld [vmem:[%s22236_s7 + $0x12a8] ss:$16 sps:$4 sm:$0xff]  }
 0x84b   :  { %13560 = vmatprep.subr.bf16.mxu1 %v18495_v22  ;;  %v18576_v22 = vld [vmem:[%s22236_s7 + $0x12c4] ss:$16 sps:$4 sm:$0xff]  }
 0x84d   :  { %12987 = vmatpush1.bf16.msra.mxu0 %v18490_v6  ;;  %v18579_v6 = vld [vmem:[%s22236_s7 + $0x12cc] ss:$16 sps:$4 sm:$0xff]  }
 0x84e   :  { %13561 = vmatpush1.bf16.msra.mxu1 %v18493_v23  ;;  %12988 = vmatprep.subr.bf16.mxu0 %v18498_v32  ;;  %v18574_v23 = vld [vmem:[%s22236_s7 + $0x12c0] ss:$16 sps:$4 sm:$0xff]   ;;  %v18577_v32 = vld [vmem:[%s22236_s7 + $0x12c8] ss:$16 sps:$4 sm:$0xff]  }
 0x84f   :  { %13562 = vmatprep.subr.bf16.mxu1 %v18501_v8  ;;  %v18582_v8 = vld [vmem:[%s22236_s7 + $0x12e4] ss:$16 sps:$4 sm:$0xff]  }
 0x851   :  { %12989 = vmatpush1.bf16.msra.mxu0 %v18496_v7  ;;  %v18585_v7 = vld [vmem:[%s22236_s7 + $0x12ec] ss:$16 sps:$4 sm:$0xff]  }
 0x852   :  { %13563 = vmatpush1.bf16.msra.mxu1 %v18499_v9  ;;  %12990 = vmatprep.subr.bf16.mxu0 %v18504_v12  ;;  %v18580_v9 = vld [vmem:[%s22236_s7 + $0x12e0] ss:$16 sps:$4 sm:$0xff]   ;;  %v18583_v12 = vld [vmem:[%s22236_s7 + $0x12e8] ss:$16 sps:$4 sm:$0xff]  }
 0x853   :  { %13564 = vmatprep.subr.bf16.mxu1 %v18507_v25  ;;  %v18588_v25 = vld [vmem:[%s22236_s7 + $0x1304] ss:$16 sps:$4 sm:$0xff]  }
 0x855   :  { %12991 = vmatpush1.bf16.msra.mxu0 %v18502_v16  ;;  %v18591_v16 = vld [vmem:[%s22236_s7 + $0x130c] ss:$16 sps:$4 sm:$0xff]  }
 0x856   :  { %13565 = vmatpush1.bf16.msra.mxu1 %v18505_v17  ;;  %12992 = vmatprep.subr.bf16.mxu0 %v18510_v13  ;;  %v18586_v17 = vld [vmem:[%s22236_s7 + $0x1300] ss:$16 sps:$4 sm:$0xff]   ;;  %v18589_v13 = vld [vmem:[%s22236_s7 + $0x1308] ss:$16 sps:$4 sm:$0xff]  }
 0x857   :  { %13566 = vmatprep.subr.bf16.mxu1 %v18513_v18  ;;  %v18594_v18 = vld [vmem:[%s22236_s7 + $0x1324] ss:$16 sps:$4 sm:$0xff]  }
 0x859   :  { %12993 = vmatpush1.bf16.msra.mxu0 %v18508_v48  ;;  %v18597_v48 = vld [vmem:[%s22236_s7 + $0x132c] ss:$16 sps:$4 sm:$0xff]  }
 0x85a   :  { %13567 = vmatpush1.bf16.msra.mxu1 %v18511_v33  ;;  %12994 = vmatprep.subr.bf16.mxu0 %v18516_v14  ;;  %v18592_v33 = vld [vmem:[%s22236_s7 + $0x1320] ss:$16 sps:$4 sm:$0xff]   ;;  %v18595_v14 = vld [vmem:[%s22236_s7 + $0x1328] ss:$16 sps:$4 sm:$0xff]  }
 0x85b   :  { %13568 = vmatprep.subr.bf16.mxu1 %v18519_v36  ;;  %v18600_v36 = vld [vmem:[%s22236_s7 + $0x1344] ss:$16 sps:$4 sm:$0xff]  }
 0x85d   :  { %12995 = vmatpush1.bf16.msra.mxu0 %v18514_v19  ;;  %v18603_v19 = vld [vmem:[%s22236_s7 + $0x134c] ss:$16 sps:$4 sm:$0xff]  }
 0x85e   :  { %13569 = vmatpush1.bf16.msra.mxu1 %v18517_v29  ;;  %12996 = vmatprep.subr.bf16.mxu0 %v18522_v27  ;;  %v18598_v29 = vld [vmem:[%s22236_s7 + $0x1340] ss:$16 sps:$4 sm:$0xff]   ;;  %v18601_v27 = vld [vmem:[%s22236_s7 + $0x1348] ss:$16 sps:$4 sm:$0xff]  }
 0x85f   :  { %13570 = vmatprep.subr.bf16.mxu1 %v18525_v28  ;;  %v18606_v28 = vld [vmem:[%s22236_s7 + $0x1364] ss:$16 sps:$4 sm:$0xff]  }
 0x861   :  { %12997 = vmatpush1.bf16.msra.mxu0 %v18520_v35  ;;  %v18609_v35 = vld [vmem:[%s22236_s7 + $0x136c] ss:$16 sps:$4 sm:$0xff]  }
 0x862   :  { %13571 = vmatpush1.bf16.msra.mxu1 %v18523_v51  ;;  %12998 = vmatprep.subr.bf16.mxu0 %v18528_v30  ;;  %v18604_v51 = vld [vmem:[%s22236_s7 + $0x1360] ss:$16 sps:$4 sm:$0xff]   ;;  %v18607_v30 = vld [vmem:[%s22236_s7 + $0x1368] ss:$16 sps:$4 sm:$0xff]  }
 0x863   :  { %13572 = vmatprep.subr.bf16.mxu1 %v18531_v31  ;;  %v18612_v31 = vld [vmem:[%s22236_s7 + $0x1384] ss:$16 sps:$4 sm:$0xff]  }
 0x865   :  { %12999 = vmatpush1.bf16.msra.mxu0 %v18526_v34  ;;  %v18615_v34 = vld [vmem:[%s22236_s7 + $0x138c] ss:$16 sps:$4 sm:$0xff]  }
 0x866   :  { %13573 = vmatpush1.bf16.msra.mxu1 %v18529_v38  ;;  %13000 = vmatprep.subr.bf16.mxu0 %v18534_v40  ;;  %v18610_v38 = vld [vmem:[%s22236_s7 + $0x1380] ss:$16 sps:$4 sm:$0xff]   ;;  %v18613_v40 = vld [vmem:[%s22236_s7 + $0x1388] ss:$16 sps:$4 sm:$0xff]  }
 0x867   :  { %13574 = vmatprep.subr.bf16.mxu1 %v18537_v41  ;;  %v18618_v41 = vld [vmem:[%s22236_s7 + $0x13a4] ss:$16 sps:$4 sm:$0xff]  }
 0x869   :  { %13001 = vmatpush1.bf16.msra.mxu0 %v18532_v42  ;;  %v18621_v42 = vld [vmem:[%s22236_s7 + $0x13ac] ss:$16 sps:$4 sm:$0xff]  }
 0x86a   :  { %13575 = vmatpush1.bf16.msra.mxu1 %v18535_v44  ;;  %13011 = vmatprep.subr.bf16.mxu0 %v18540_v61  ;;  %v18616_v44 = vld [vmem:[%s22236_s7 + $0x13a0] ss:$16 sps:$4 sm:$0xff]   ;;  %v18624_v61 = vld [vmem:[%s22236_s7 + $0x13c4] ss:$16 sps:$4 sm:$0xff]  }
 0x86b   :  { %13585 = vmatprep.subr.bf16.mxu1 %v18543_v46  ;;  %v18627_v46 = vld [vmem:[%s22236_s7 + $0x13cc] ss:$16 sps:$4 sm:$0xff]  }
 0x86c   :  { %13003 = vmatmul.mubr.bf16.vlgmr.msra.gmra.mrb[0].mxu0 %v7232_v50 }
 0x86d   :  { %13577 = vmatmul.mubr.bf16.vlgmr.msra.gmra.mrb[0].mxu1 %v7232_v50  ;;  %13012 = vmatpush1.bf16.msra.mxu0 %v18538_v54  ;;  %v18622_v50 = vld [vmem:[%s22236_s7 + $0x13c0] ss:$16 sps:$4 sm:$0xff]   ;;  %v18630_v54 = vld [vmem:[%s22236_s7 + $0x13e4] ss:$16 sps:$4 sm:$0xff]  }
 0x86e   :  { %13586 = vmatpush1.bf16.msra.mxu1 %v18541_v55  ;;  %13013 = vmatprep.subr.bf16.mxu0 %v18546_v43  ;;  %v18633_v55 = vld [vmem:[%s22236_s7 + $0x13ec] ss:$16 sps:$4 sm:$0xff]   ;;  %v18628_v43 = vld [vmem:[%s22236_s7 + $0x13e0] ss:$16 sps:$4 sm:$0xff]  }
 0x86f   :  { %13587 = vmatprep.subr.bf16.mxu1 %v18549_v57  ;;  %13043 = vmatprep.mubr.bf16.mxu0 %v7235_v37  ;;  %v18631_v57 = vld [vmem:[%s22236_s7 + $0x13e8] ss:$16 sps:$4 sm:$0xff]  }
 0x870   :  { %13617 = vmatprep.mubr.bf16.mxu1 %v7235_v37  ;;  %v7206_v37 = vld [vmem:[#allocation2 + $0x90] sm:$0xff] }
 0x871   :  { %13014 = vmatpush1.bf16.msra.mxu0 %v18544_v49  ;;  %v18636_v49 = vld [vmem:[%s22236_s7 + $0x1404] ss:$16 sps:$4 sm:$0xff]  }
 0x872   :  { %13588 = vmatpush1.bf16.msra.mxu1 %v18547_v58  ;;  %13015 = vmatprep.subr.bf16.mxu0 %v18552_v59  ;;  %v18639_v58 = vld [vmem:[%s22236_s7 + $0x140c] ss:$16 sps:$4 sm:$0xff]   ;;  %v7234_v59 = vpack.c.bf16 %v7206_v37, %v7206_v37  ;;  %v18715_v37 = vld [vmem:[%s22236_s7 + $0x15a8] ss:$16 sps:$4 sm:$0xff]  }
 0x873   :  { %13589 = vmatprep.subr.bf16.mxu1 %v18555_v20  ;;  %v7209_v20 = vld [vmem:[#allocation2 + $0xa8] sm:$0xff] }
 0x875   :  { %13016 = vmatpush1.bf16.msra.mxu0 %v18550_v60  ;;  %v18634_v60 = vld [vmem:[%s22236_s7 + $0x1400] ss:$16 sps:$4 sm:$0xff]  }
 0x876   :  { %13590 = vmatpush1.bf16.msra.mxu1 %v18553_v47  ;;  %13017 = vmatprep.subr.bf16.mxu0 %v18558_v62  ;;  %v18637_v47 = vld [vmem:[%s22236_s7 + $0x1408] ss:$16 sps:$4 sm:$0xff]   ;;  %v18642_v62 = vld [vmem:[%s22236_s7 + $0x1424] ss:$16 sps:$4 sm:$0xff]  }
 0x877   :  { %13591 = vmatprep.subr.bf16.mxu1 %v18561_v52  ;;  %v18645_v52 = vld [vmem:[%s22236_s7 + $0x142c] ss:$16 sps:$4 sm:$0xff]  }
 0x879   :  { %13018 = vmatpush1.bf16.msra.mxu0 %v18556_v56  ;;  %v7237_v56 = vpack.c.bf16 %v7209_v20, %v7209_v20  ;;  %v18721_v20 = vld [vmem:[%s22236_s7 + $0x15c8] ss:$16 sps:$4 sm:$0xff]  }
 0x87a   :  { %13592 = vmatpush1.bf16.msra.mxu1 %v18559_v63  ;;  %13019 = vmatprep.subr.bf16.mxu0 %v18564_v1  ;;  %v18640_v63 = vld [vmem:[%s22236_s7 + $0x1420] ss:$16 sps:$4 sm:$0xff]   ;;  %v18643_v1 = vld [vmem:[%s22236_s7 + $0x1428] ss:$16 sps:$4 sm:$0xff]  }
 0x87b   :  { %13593 = vmatprep.subr.bf16.mxu1 %v18567_v2  ;;  %v18648_v2 = vld [vmem:[%s22236_s7 + $0x1444] ss:$16 sps:$4 sm:$0xff]  }
 0x87d   :  { %13020 = vmatpush1.bf16.msra.mxu0 %v18562_v4  ;;  %v18651_v4 = vld [vmem:[%s22236_s7 + $0x144c] ss:$16 sps:$4 sm:$0xff]  }
 0x87e   :  { %13594 = vmatpush1.bf16.msra.mxu1 %v18565_v3  ;;  %13021 = vmatprep.subr.bf16.mxu0 %v18570_v24  ;;  %v18646_v3 = vld [vmem:[%s22236_s7 + $0x1440] ss:$16 sps:$4 sm:$0xff]   ;;  %v18649_v24 = vld [vmem:[%s22236_s7 + $0x1448] ss:$16 sps:$4 sm:$0xff]  }
 0x87f   :  { %13595 = vmatprep.subr.bf16.mxu1 %v18573_v15  ;;  %v18654_v15 = vld [vmem:[%s22236_s7 + $0x1464] ss:$16 sps:$4 sm:$0xff]  }
 0x881   :  { %13022 = vmatpush1.bf16.msra.mxu0 %v18568_v11  ;;  %v18657_v11 = vld [vmem:[%s22236_s7 + $0x146c] ss:$16 sps:$4 sm:$0xff]  }
 0x882   :  { %13596 = vmatpush1.bf16.msra.mxu1 %v18571_v5  ;;  %13023 = vmatprep.subr.bf16.mxu0 %v18576_v22  ;;  %v18652_v5 = vld [vmem:[%s22236_s7 + $0x1460] ss:$16 sps:$4 sm:$0xff]   ;;  %v18655_v22 = vld [vmem:[%s22236_s7 + $0x1468] ss:$16 sps:$4 sm:$0xff]  }
 0x883   :  { %13597 = vmatprep.subr.bf16.mxu1 %v18579_v6  ;;  %v18660_v6 = vld [vmem:[%s22236_s7 + $0x1484] ss:$16 sps:$4 sm:$0xff]  }
 0x885   :  { %13024 = vmatpush1.bf16.msra.mxu0 %v18574_v23  ;;  %v18663_v23 = vld [vmem:[%s22236_s7 + $0x148c] ss:$16 sps:$4 sm:$0xff]  }
 0x886   :  { %13598 = vmatpush1.bf16.msra.mxu1 %v18577_v32  ;;  %13025 = vmatprep.subr.bf16.mxu0 %v18582_v8  ;;  %v18658_v32 = vld [vmem:[%s22236_s7 + $0x1480] ss:$16 sps:$4 sm:$0xff]   ;;  %v18661_v8 = vld [vmem:[%s22236_s7 + $0x1488] ss:$16 sps:$4 sm:$0xff]  }
 0x887   :  { %13599 = vmatprep.subr.bf16.mxu1 %v18585_v7  ;;  %v18666_v7 = vld [vmem:[%s22236_s7 + $0x14a4] ss:$16 sps:$4 sm:$0xff]  }
 0x889   :  { %13026 = vmatpush1.bf16.msra.mxu0 %v18580_v9  ;;  %v18669_v9 = vld [vmem:[%s22236_s7 + $0x14ac] ss:$16 sps:$4 sm:$0xff]  }
 0x88a   :  { %13600 = vmatpush1.bf16.msra.mxu1 %v18583_v12  ;;  %13027 = vmatprep.subr.bf16.mxu0 %v18588_v25  ;;  %v18664_v12 = vld [vmem:[%s22236_s7 + $0x14a0] ss:$16 sps:$4 sm:$0xff]   ;;  %v18667_v25 = vld [vmem:[%s22236_s7 + $0x14a8] ss:$16 sps:$4 sm:$0xff]  }
 0x88b   :  { %13601 = vmatprep.subr.bf16.mxu1 %v18591_v16  ;;  %v18672_v16 = vld [vmem:[%s22236_s7 + $0x14c4] ss:$16 sps:$4 sm:$0xff]  }
 0x88d   :  { %13028 = vmatpush1.bf16.msra.mxu0 %v18586_v17  ;;  %v18675_v17 = vld [vmem:[%s22236_s7 + $0x14cc] ss:$16 sps:$4 sm:$0xff]  }
 0x88e   :  { %13602 = vmatpush1.bf16.msra.mxu1 %v18589_v13  ;;  %13029 = vmatprep.subr.bf16.mxu0 %v18594_v18  ;;  %v18670_v13 = vld [vmem:[%s22236_s7 + $0x14c0] ss:$16 sps:$4 sm:$0xff]   ;;  %v18673_v18 = vld [vmem:[%s22236_s7 + $0x14c8] ss:$16 sps:$4 sm:$0xff]  }
 0x88f   :  { %13603 = vmatprep.subr.bf16.mxu1 %v18597_v48  ;;  %v18678_v48 = vld [vmem:[%s22236_s7 + $0x14e4] ss:$16 sps:$4 sm:$0xff]  }
 0x891   :  { %13030 = vmatpush1.bf16.msra.mxu0 %v18592_v33  ;;  %v18681_v33 = vld [vmem:[%s22236_s7 + $0x14ec] ss:$16 sps:$4 sm:$0xff]  }
 0x892   :  { %13604 = vmatpush1.bf16.msra.mxu1 %v18595_v14  ;;  %13031 = vmatprep.subr.bf16.mxu0 %v18600_v36  ;;  %v18676_v14 = vld [vmem:[%s22236_s7 + $0x14e0] ss:$16 sps:$4 sm:$0xff]   ;;  %v18679_v36 = vld [vmem:[%s22236_s7 + $0x14e8] ss:$16 sps:$4 sm:$0xff]  }
 0x893   :  { %13605 = vmatprep.subr.bf16.mxu1 %v18603_v19  ;;  %v18684_v19 = vld [vmem:[%s22236_s7 + $0x1504] ss:$16 sps:$4 sm:$0xff]  }
 0x895   :  { %13032 = vmatpush1.bf16.msra.mxu0 %v18598_v29  ;;  %v18687_v29 = vld [vmem:[%s22236_s7 + $0x150c] ss:$16 sps:$4 sm:$0xff]  }
 0x896   :  { %13606 = vmatpush1.bf16.msra.mxu1 %v18601_v27  ;;  %13033 = vmatprep.subr.bf16.mxu0 %v18606_v28  ;;  %v18682_v27 = vld [vmem:[%s22236_s7 + $0x1500] ss:$16 sps:$4 sm:$0xff]   ;;  %v18685_v28 = vld [vmem:[%s22236_s7 + $0x1508] ss:$16 sps:$4 sm:$0xff]  }
 0x897   :  { %13607 = vmatprep.subr.bf16.mxu1 %v18609_v35  ;;  %v18690_v35 = vld [vmem:[%s22236_s7 + $0x1524] ss:$16 sps:$4 sm:$0xff]  }
 0x899   :  { %13034 = vmatpush1.bf16.msra.mxu0 %v18604_v51  ;;  %v18693_v51 = vld [vmem:[%s22236_s7 + $0x152c] ss:$16 sps:$4 sm:$0xff]  }
 0x89a   :  { %13608 = vmatpush1.bf16.msra.mxu1 %v18607_v30  ;;  %13035 = vmatprep.subr.bf16.mxu0 %v18612_v31  ;;  %v18688_v30 = vld [vmem:[%s22236_s7 + $0x1520] ss:$16 sps:$4 sm:$0xff]   ;;  %v18691_v31 = vld [vmem:[%s22236_s7 + $0x1528] ss:$16 sps:$4 sm:$0xff]  }
 0x89b   :  { %13609 = vmatprep.subr.bf16.mxu1 %v18615_v34  ;;  %v18696_v34 = vld [vmem:[%s22236_s7 + $0x1544] ss:$16 sps:$4 sm:$0xff]  }
 0x89d   :  { %13036 = vmatpush1.bf16.msra.mxu0 %v18610_v38  ;;  %v18699_v38 = vld [vmem:[%s22236_s7 + $0x154c] ss:$16 sps:$4 sm:$0xff]  }
 0x89e   :  { %13610 = vmatpush1.bf16.msra.mxu1 %v18613_v40  ;;  %13037 = vmatprep.subr.bf16.mxu0 %v18618_v41  ;;  %v18694_v40 = vld [vmem:[%s22236_s7 + $0x1540] ss:$16 sps:$4 sm:$0xff]   ;;  %v18697_v41 = vld [vmem:[%s22236_s7 + $0x1548] ss:$16 sps:$4 sm:$0xff]  }
 0x89f   :  { %13611 = vmatprep.subr.bf16.mxu1 %v18621_v42  ;;  %v18702_v42 = vld [vmem:[%s22236_s7 + $0x1564] ss:$16 sps:$4 sm:$0xff]  }
 0x8a1   :  { %13038 = vmatpush1.bf16.msra.mxu0 %v18616_v44  ;;  %v18705_v44 = vld [vmem:[%s22236_s7 + $0x156c] ss:$16 sps:$4 sm:$0xff]  }
 0x8a2   :  { %13612 = vmatpush1.bf16.msra.mxu1 %v18619_v45  ;;  %13039 = vmatprep.subr.bf16.mxu0 %v18624_v61  ;;  %v18700_v45 = vld [vmem:[%s22236_s7 + $0x1560] ss:$16 sps:$4 sm:$0xff]   ;;  %v18703_v61 = vld [vmem:[%s22236_s7 + $0x1568] ss:$16 sps:$4 sm:$0xff]  }
 0x8a3   :  { %13613 = vmatprep.subr.bf16.mxu1 %v18627_v46  ;;  %v18708_v46 = vld [vmem:[%s22236_s7 + $0x1584] ss:$16 sps:$4 sm:$0xff]  }
 0x8a5   :  { %13040 = vmatpush1.bf16.msra.mxu0 %v18622_v50  ;;  %v18711_v50 = vld [vmem:[%s22236_s7 + $0x158c] ss:$16 sps:$4 sm:$0xff]  }
 0x8a6   :  { %13614 = vmatpush1.bf16.msra.mxu1 %v18625_v53  ;;  %13041 = vmatprep.subr.bf16.mxu0 %v18630_v54  ;;  %v18706_v53 = vld [vmem:[%s22236_s7 + $0x1580] ss:$16 sps:$4 sm:$0xff]   ;;  %v18709_v54 = vld [vmem:[%s22236_s7 + $0x1588] ss:$16 sps:$4 sm:$0xff]  }
 0x8a7   :  { %13615 = vmatprep.subr.bf16.mxu1 %v18633_v55  ;;  %v18714_v55 = vld [vmem:[%s22236_s7 + $0x15a4] ss:$16 sps:$4 sm:$0xff]  }
 0x8a9   :  { %13042 = vmatpush1.bf16.msra.mxu0 %v18628_v43  ;;  %v18717_v43 = vld [vmem:[%s22236_s7 + $0x15ac] ss:$16 sps:$4 sm:$0xff]  }
 0x8aa   :  { %13616 = vmatpush1.bf16.msra.mxu1 %v18631_v57  ;;  %13052 = vmatprep.subr.bf16.mxu0 %v18636_v49  ;;  %v18712_v57 = vld [vmem:[%s22236_s7 + $0x15a0] ss:$16 sps:$4 sm:$0xff]   ;;  %v18720_v49 = vld [vmem:[%s22236_s7 + $0x15c4] ss:$16 sps:$4 sm:$0xff]  }
 0x8ab   :  { %13626 = vmatprep.subr.bf16.mxu1 %v18639_v58  ;;  %v18723_v58 = vld [vmem:[%s22236_s7 + $0x15cc] ss:$16 sps:$4 sm:$0xff]  }
 0x8ac   :  { %13044 = vmatmul.mubr.bf16.vlgmr.msra.gmra.mrb[0].mxu0 %v7234_v59 }
 0x8ad   :  { %13618 = vmatmul.mubr.bf16.vlgmr.msra.gmra.mrb[0].mxu1 %v7234_v59  ;;  %13053 = vmatpush1.bf16.msra.mxu0 %v18634_v60  ;;  %v18718_v59 = vld [vmem:[%s22236_s7 + $0x15c0] ss:$16 sps:$4 sm:$0xff]   ;;  %v18726_v60 = vld [vmem:[%s22236_s7 + $0x15e4] ss:$16 sps:$4 sm:$0xff]  }
 0x8ae   :  { %13627 = vmatpush1.bf16.msra.mxu1 %v18637_v47  ;;  %13054 = vmatprep.subr.bf16.mxu0 %v18642_v62  ;;  %v18729_v47 = vld [vmem:[%s22236_s7 + $0x15ec] ss:$16 sps:$4 sm:$0xff]   ;;  %v18724_v62 = vld [vmem:[%s22236_s7 + $0x15e0] ss:$16 sps:$4 sm:$0xff]  }
 0x8af   :  { %13628 = vmatprep.subr.bf16.mxu1 %v18645_v52  ;;  %13084 = vmatprep.mubr.bf16.mxu0 %v7237_v56  ;;  %v18727_v52 = vld [vmem:[%s22236_s7 + $0x15e8] ss:$16 sps:$4 sm:$0xff]  }
 0x8b0   :  { %13658 = vmatprep.mubr.bf16.mxu1 %v7237_v56  ;;  %v7208_v56 = vld [vmem:[#allocation2 + $0xa0] sm:$0xff] }
 0x8b1   :  { %13055 = vmatpush1.bf16.msra.mxu0 %v18640_v63  ;;  %v18732_v63 = vld [vmem:[%s22236_s7 + $0x1604] ss:$16 sps:$4 sm:$0xff]  }
 0x8b2   :  { %13629 = vmatpush1.bf16.msra.mxu1 %v18643_v1  ;;  %13056 = vmatprep.subr.bf16.mxu0 %v18648_v2  ;;  %v18735_v1 = vld [vmem:[%s22236_s7 + $0x160c] ss:$16 sps:$4 sm:$0xff]   ;;  %v7236_v2 = vpack.c.bf16 %v7208_v56, %v7208_v56  ;;  %v18811_v56 = vld [vmem:[%s22236_s7 + $0x17a8] ss:$16 sps:$4 sm:$0xff]  }
 0x8b3   :  { %13630 = vmatprep.subr.bf16.mxu1 %v18651_v4  ;;  %v7211_v4 = vld [vmem:[#allocation2 + $0xb8] sm:$0xff] }
 0x8b5   :  { %13057 = vmatpush1.bf16.msra.mxu0 %v18646_v3  ;;  %v18730_v3 = vld [vmem:[%s22236_s7 + $0x1600] ss:$16 sps:$4 sm:$0xff]  }
 0x8b6   :  { %13631 = vmatpush1.bf16.msra.mxu1 %v18649_v24  ;;  %13058 = vmatprep.subr.bf16.mxu0 %v18654_v15  ;;  %v18733_v24 = vld [vmem:[%s22236_s7 + $0x1608] ss:$16 sps:$4 sm:$0xff]   ;;  %v18738_v15 = vld [vmem:[%s22236_s7 + $0x1624] ss:$16 sps:$4 sm:$0xff]  }
 0x8b7   :  { %13632 = vmatprep.subr.bf16.mxu1 %v18657_v11  ;;  %v18741_v11 = vld [vmem:[%s22236_s7 + $0x162c] ss:$16 sps:$4 sm:$0xff]  }
 0x8b9   :  { %13059 = vmatpush1.bf16.msra.mxu0 %v18652_v5  ;;  %v7239_v5 = vpack.c.bf16 %v7211_v4, %v7211_v4  ;;  %v18817_v4 = vld [vmem:[%s22236_s7 + $0x17c8] ss:$16 sps:$4 sm:$0xff]  }
 0x8ba   :  { %13633 = vmatpush1.bf16.msra.mxu1 %v18655_v22  ;;  %13060 = vmatprep.subr.bf16.mxu0 %v18660_v6  ;;  %v18736_v22 = vld [vmem:[%s22236_s7 + $0x1620] ss:$16 sps:$4 sm:$0xff]   ;;  %v18739_v6 = vld [vmem:[%s22236_s7 + $0x1628] ss:$16 sps:$4 sm:$0xff]  }
 0x8bb   :  { %13634 = vmatprep.subr.bf16.mxu1 %v18663_v23  ;;  %v18744_v23 = vld [vmem:[%s22236_s7 + $0x1644] ss:$16 sps:$4 sm:$0xff]  }
 0x8bd   :  { %13061 = vmatpush1.bf16.msra.mxu0 %v18658_v32  ;;  %v18747_v32 = vld [vmem:[%s22236_s7 + $0x164c] ss:$16 sps:$4 sm:$0xff]  }
 0x8be   :  { %13635 = vmatpush1.bf16.msra.mxu1 %v18661_v8  ;;  %13062 = vmatprep.subr.bf16.mxu0 %v18666_v7  ;;  %v18742_v8 = vld [vmem:[%s22236_s7 + $0x1640] ss:$16 sps:$4 sm:$0xff]   ;;  %v18745_v7 = vld [vmem:[%s22236_s7 + $0x1648] ss:$16 sps:$4 sm:$0xff]  }
 0x8bf   :  { %13636 = vmatprep.subr.bf16.mxu1 %v18669_v9  ;;  %v18750_v9 = vld [vmem:[%s22236_s7 + $0x1664] ss:$16 sps:$4 sm:$0xff]  }
 0x8c1   :  { %13063 = vmatpush1.bf16.msra.mxu0 %v18664_v12  ;;  %v18753_v12 = vld [vmem:[%s22236_s7 + $0x166c] ss:$16 sps:$4 sm:$0xff]  }
 0x8c2   :  { %13637 = vmatpush1.bf16.msra.mxu1 %v18667_v25  ;;  %13064 = vmatprep.subr.bf16.mxu0 %v18672_v16  ;;  %v18748_v25 = vld [vmem:[%s22236_s7 + $0x1660] ss:$16 sps:$4 sm:$0xff]   ;;  %v18751_v16 = vld [vmem:[%s22236_s7 + $0x1668] ss:$16 sps:$4 sm:$0xff]  }
 0x8c3   :  { %13638 = vmatprep.subr.bf16.mxu1 %v18675_v17  ;;  %v18756_v17 = vld [vmem:[%s22236_s7 + $0x1684] ss:$16 sps:$4 sm:$0xff]  }
 0x8c5   :  { %13065 = vmatpush1.bf16.msra.mxu0 %v18670_v13  ;;  %v18759_v13 = vld [vmem:[%s22236_s7 + $0x168c] ss:$16 sps:$4 sm:$0xff]  }
 0x8c6   :  { %13639 = vmatpush1.bf16.msra.mxu1 %v18673_v18  ;;  %13066 = vmatprep.subr.bf16.mxu0 %v18678_v48  ;;  %v18754_v18 = vld [vmem:[%s22236_s7 + $0x1680] ss:$16 sps:$4 sm:$0xff]   ;;  %v18757_v48 = vld [vmem:[%s22236_s7 + $0x1688] ss:$16 sps:$4 sm:$0xff]  }
 0x8c7   :  { %13640 = vmatprep.subr.bf16.mxu1 %v18681_v33  ;;  %v18762_v33 = vld [vmem:[%s22236_s7 + $0x16a4] ss:$16 sps:$4 sm:$0xff]  }
 0x8c9   :  { %13067 = vmatpush1.bf16.msra.mxu0 %v18676_v14  ;;  %v18765_v14 = vld [vmem:[%s22236_s7 + $0x16ac] ss:$16 sps:$4 sm:$0xff]  }
 0x8ca   :  { %13641 = vmatpush1.bf16.msra.mxu1 %v18679_v36  ;;  %13068 = vmatprep.subr.bf16.mxu0 %v18684_v19  ;;  %v18760_v36 = vld [vmem:[%s22236_s7 + $0x16a0] ss:$16 sps:$4 sm:$0xff]   ;;  %v18763_v19 = vld [vmem:[%s22236_s7 + $0x16a8] ss:$16 sps:$4 sm:$0xff]  }
 0x8cb   :  { %13642 = vmatprep.subr.bf16.mxu1 %v18687_v29  ;;  %v18768_v29 = vld [vmem:[%s22236_s7 + $0x16c4] ss:$16 sps:$4 sm:$0xff]  }
 0x8cd   :  { %13069 = vmatpush1.bf16.msra.mxu0 %v18682_v27  ;;  %v18771_v27 = vld [vmem:[%s22236_s7 + $0x16cc] ss:$16 sps:$4 sm:$0xff]  }
 0x8ce   :  { %13643 = vmatpush1.bf16.msra.mxu1 %v18685_v28  ;;  %13070 = vmatprep.subr.bf16.mxu0 %v18690_v35  ;;  %v18766_v28 = vld [vmem:[%s22236_s7 + $0x16c0] ss:$16 sps:$4 sm:$0xff]   ;;  %v18769_v35 = vld [vmem:[%s22236_s7 + $0x16c8] ss:$16 sps:$4 sm:$0xff]  }
 0x8cf   :  { %13644 = vmatprep.subr.bf16.mxu1 %v18693_v51  ;;  %v18774_v51 = vld [vmem:[%s22236_s7 + $0x16e4] ss:$16 sps:$4 sm:$0xff]  }
 0x8d1   :  { %13071 = vmatpush1.bf16.msra.mxu0 %v18688_v30  ;;  %v18777_v30 = vld [vmem:[%s22236_s7 + $0x16ec] ss:$16 sps:$4 sm:$0xff]  }
 0x8d2   :  { %13645 = vmatpush1.bf16.msra.mxu1 %v18691_v31  ;;  %13072 = vmatprep.subr.bf16.mxu0 %v18696_v34  ;;  %v18772_v31 = vld [vmem:[%s22236_s7 + $0x16e0] ss:$16 sps:$4 sm:$0xff]   ;;  %v18775_v34 = vld [vmem:[%s22236_s7 + $0x16e8] ss:$16 sps:$4 sm:$0xff]  }
 0x8d3   :  { %13646 = vmatprep.subr.bf16.mxu1 %v18699_v38  ;;  %v18780_v38 = vld [vmem:[%s22236_s7 + $0x1704] ss:$16 sps:$4 sm:$0xff]  }
 0x8d5   :  { %13073 = vmatpush1.bf16.msra.mxu0 %v18694_v40  ;;  %v18783_v40 = vld [vmem:[%s22236_s7 + $0x170c] ss:$16 sps:$4 sm:$0xff]  }
 0x8d6   :  { %13647 = vmatpush1.bf16.msra.mxu1 %v18697_v41  ;;  %13074 = vmatprep.subr.bf16.mxu0 %v18702_v42  ;;  %v18778_v41 = vld [vmem:[%s22236_s7 + $0x1700] ss:$16 sps:$4 sm:$0xff]   ;;  %v18781_v42 = vld [vmem:[%s22236_s7 + $0x1708] ss:$16 sps:$4 sm:$0xff]  }
 0x8d7   :  { %13648 = vmatprep.subr.bf16.mxu1 %v18705_v44  ;;  %v18786_v44 = vld [vmem:[%s22236_s7 + $0x1724] ss:$16 sps:$4 sm:$0xff]  }
 0x8d9   :  { %13075 = vmatpush1.bf16.msra.mxu0 %v18700_v45  ;;  %v18789_v45 = vld [vmem:[%s22236_s7 + $0x172c] ss:$16 sps:$4 sm:$0xff]  }
 0x8da   :  { %13649 = vmatpush1.bf16.msra.mxu1 %v18703_v61  ;;  %13076 = vmatprep.subr.bf16.mxu0 %v18708_v46  ;;  %v18784_v61 = vld [vmem:[%s22236_s7 + $0x1720] ss:$16 sps:$4 sm:$0xff]   ;;  %v18787_v46 = vld [vmem:[%s22236_s7 + $0x1728] ss:$16 sps:$4 sm:$0xff]  }
 0x8db   :  { %13650 = vmatprep.subr.bf16.mxu1 %v18711_v50  ;;  %v18792_v50 = vld [vmem:[%s22236_s7 + $0x1744] ss:$16 sps:$4 sm:$0xff]  }
 0x8dd   :  { %13077 = vmatpush1.bf16.msra.mxu0 %v18706_v53  ;;  %v18795_v53 = vld [vmem:[%s22236_s7 + $0x174c] ss:$16 sps:$4 sm:$0xff]  }
 0x8de   :  { %13651 = vmatpush1.bf16.msra.mxu1 %v18709_v54  ;;  %13078 = vmatprep.subr.bf16.mxu0 %v18714_v55  ;;  %v18790_v54 = vld [vmem:[%s22236_s7 + $0x1740] ss:$16 sps:$4 sm:$0xff]   ;;  %v18793_v55 = vld [vmem:[%s22236_s7 + $0x1748] ss:$16 sps:$4 sm:$0xff]  }
 0x8df   :  { %13652 = vmatprep.subr.bf16.mxu1 %v18717_v43  ;;  %v18798_v43 = vld [vmem:[%s22236_s7 + $0x1764] ss:$16 sps:$4 sm:$0xff]  }
 0x8e1   :  { %13079 = vmatpush1.bf16.msra.mxu0 %v18712_v57  ;;  %v18801_v57 = vld [vmem:[%s22236_s7 + $0x176c] ss:$16 sps:$4 sm:$0xff]  }
 0x8e2   :  { %13653 = vmatpush1.bf16.msra.mxu1 %v18715_v37  ;;  %13080 = vmatprep.subr.bf16.mxu0 %v18720_v49  ;;  %v18796_v37 = vld [vmem:[%s22236_s7 + $0x1760] ss:$16 sps:$4 sm:$0xff]   ;;  %v18799_v49 = vld [vmem:[%s22236_s7 + $0x1768] ss:$16 sps:$4 sm:$0xff]  }
 0x8e3   :  { %13654 = vmatprep.subr.bf16.mxu1 %v18723_v58  ;;  %v18804_v58 = vld [vmem:[%s22236_s7 + $0x1784] ss:$16 sps:$4 sm:$0xff]  }
 0x8e5   :  { %13081 = vmatpush1.bf16.msra.mxu0 %v18718_v59  ;;  %v18807_v59 = vld [vmem:[%s22236_s7 + $0x178c] ss:$16 sps:$4 sm:$0xff]  }
 0x8e6   :  { %13655 = vmatpush1.bf16.msra.mxu1 %v18721_v20  ;;  %13082 = vmatprep.subr.bf16.mxu0 %v18726_v60  ;;  %v18802_v20 = vld [vmem:[%s22236_s7 + $0x1780] ss:$16 sps:$4 sm:$0xff]   ;;  %v18805_v60 = vld [vmem:[%s22236_s7 + $0x1788] ss:$16 sps:$4 sm:$0xff]  }
 0x8e7   :  { %13656 = vmatprep.subr.bf16.mxu1 %v18729_v47  ;;  %v18810_v47 = vld [vmem:[%s22236_s7 + $0x17a4] ss:$16 sps:$4 sm:$0xff]  }
 0x8e9   :  { %13083 = vmatpush1.bf16.msra.mxu0 %v18724_v62  ;;  %v18813_v62 = vld [vmem:[%s22236_s7 + $0x17ac] ss:$16 sps:$4 sm:$0xff]  }
 0x8ea   :  { %13657 = vmatpush1.bf16.msra.mxu1 %v18727_v52  ;;  %13093 = vmatprep.subr.bf16.mxu0 %v18732_v63  ;;  %v18808_v52 = vld [vmem:[%s22236_s7 + $0x17a0] ss:$16 sps:$4 sm:$0xff]   ;;  %v18816_v63 = vld [vmem:[%s22236_s7 + $0x17c4] ss:$16 sps:$4 sm:$0xff]  }
 0x8eb   :  { %13667 = vmatprep.subr.bf16.mxu1 %v18735_v1  ;;  %v18819_v1 = vld [vmem:[%s22236_s7 + $0x17cc] ss:$16 sps:$4 sm:$0xff]  }
 0x8ec   :  { %13085 = vmatmul.mubr.bf16.vlgmr.msra.gmra.mrb[0].mxu0 %v7236_v2 }
 0x8ed   :  { %13659 = vmatmul.mubr.bf16.vlgmr.msra.gmra.mrb[0].mxu1 %v7236_v2  ;;  %13094 = vmatpush1.bf16.msra.mxu0 %v18730_v3  ;;  %v18814_v2 = vld [vmem:[%s22236_s7 + $0x17c0] ss:$16 sps:$4 sm:$0xff]   ;;  %v18822_v3 = vld [vmem:[%s22236_s7 + $0x17e4] ss:$16 sps:$4 sm:$0xff]  }
 0x8ee   :  { %13668 = vmatpush1.bf16.msra.mxu1 %v18733_v24  ;;  %13095 = vmatprep.subr.bf16.mxu0 %v18738_v15  ;;  %v18825_v24 = vld [vmem:[%s22236_s7 + $0x17ec] ss:$16 sps:$4 sm:$0xff]   ;;  %v18820_v15 = vld [vmem:[%s22236_s7 + $0x17e0] ss:$16 sps:$4 sm:$0xff]  }
 0x8ef   :  { %13669 = vmatprep.subr.bf16.mxu1 %v18741_v11  ;;  %13125 = vmatprep.mubr.bf16.mxu0 %v7239_v5  ;;  %v18823_v11 = vld [vmem:[%s22236_s7 + $0x17e8] ss:$16 sps:$4 sm:$0xff]  }
 0x8f0   :  { %13699 = vmatprep.mubr.bf16.mxu1 %v7239_v5  ;;  %v7210_v5 = vld [vmem:[#allocation2 + $0xb0] sm:$0xff] }
 0x8f1   :  { %13096 = vmatpush1.bf16.msra.mxu0 %v18736_v22  ;;  %v18828_v22 = vld [vmem:[%s22236_s7 + $0x1804] ss:$16 sps:$4 sm:$0xff]  }
 0x8f2   :  { %13670 = vmatpush1.bf16.msra.mxu1 %v18739_v6  ;;  %13097 = vmatprep.subr.bf16.mxu0 %v18744_v23  ;;  %v18831_v6 = vld [vmem:[%s22236_s7 + $0x180c] ss:$16 sps:$4 sm:$0xff]   ;;  %v7238_v23 = vpack.c.bf16 %v7210_v5, %v7210_v5  ;;  %v18907_v5 = vld [vmem:[%s22236_s7 + $0x19a8] ss:$16 sps:$4 sm:$0xff]  }
 0x8f3   :  { %13671 = vmatprep.subr.bf16.mxu1 %v18747_v32  ;;  %v7213_v32 = vld [vmem:[#allocation2 + $0xc8] sm:$0xff] }
 0x8f5   :  { %13098 = vmatpush1.bf16.msra.mxu0 %v18742_v8  ;;  %v18826_v8 = vld [vmem:[%s22236_s7 + $0x1800] ss:$16 sps:$4 sm:$0xff]  }
 0x8f6   :  { %13672 = vmatpush1.bf16.msra.mxu1 %v18745_v7  ;;  %13099 = vmatprep.subr.bf16.mxu0 %v18750_v9  ;;  %v18829_v7 = vld [vmem:[%s22236_s7 + $0x1808] ss:$16 sps:$4 sm:$0xff]   ;;  %v18834_v9 = vld [vmem:[%s22236_s7 + $0x1824] ss:$16 sps:$4 sm:$0xff]  }
 0x8f7   :  { %13673 = vmatprep.subr.bf16.mxu1 %v18753_v12  ;;  %v18837_v12 = vld [vmem:[%s22236_s7 + $0x182c] ss:$16 sps:$4 sm:$0xff]  }
 0x8f9   :  { %13100 = vmatpush1.bf16.msra.mxu0 %v18748_v25  ;;  %v7241_v25 = vpack.c.bf16 %v7213_v32, %v7213_v32  ;;  %v18913_v32 = vld [vmem:[%s22236_s7 + $0x19c8] ss:$16 sps:$4 sm:$0xff]  }
 0x8fa   :  { %13674 = vmatpush1.bf16.msra.mxu1 %v18751_v16  ;;  %13101 = vmatprep.subr.bf16.mxu0 %v18756_v17  ;;  %v18832_v16 = vld [vmem:[%s22236_s7 + $0x1820] ss:$16 sps:$4 sm:$0xff]   ;;  %v18835_v17 = vld [vmem:[%s22236_s7 + $0x1828] ss:$16 sps:$4 sm:$0xff]  }
 0x8fb   :  { %13675 = vmatprep.subr.bf16.mxu1 %v18759_v13  ;;  %v18840_v13 = vld [vmem:[%s22236_s7 + $0x1844] ss:$16 sps:$4 sm:$0xff]  }
 0x8fd   :  { %13102 = vmatpush1.bf16.msra.mxu0 %v18754_v18  ;;  %v18843_v18 = vld [vmem:[%s22236_s7 + $0x184c] ss:$16 sps:$4 sm:$0xff]  }
 0x8fe   :  { %13676 = vmatpush1.bf16.msra.mxu1 %v18757_v48  ;;  %13103 = vmatprep.subr.bf16.mxu0 %v18762_v33  ;;  %v18838_v48 = vld [vmem:[%s22236_s7 + $0x1840] ss:$16 sps:$4 sm:$0xff]   ;;  %v18841_v33 = vld [vmem:[%s22236_s7 + $0x1848] ss:$16 sps:$4 sm:$0xff]  }
 0x8ff   :  { %13677 = vmatprep.subr.bf16.mxu1 %v18765_v14  ;;  %v18846_v14 = vld [vmem:[%s22236_s7 + $0x1864] ss:$16 sps:$4 sm:$0xff]  }
 0x901   :  { %13104 = vmatpush1.bf16.msra.mxu0 %v18760_v36  ;;  %v18849_v36 = vld [vmem:[%s22236_s7 + $0x186c] ss:$16 sps:$4 sm:$0xff]  }
 0x902   :  { %13678 = vmatpush1.bf16.msra.mxu1 %v18763_v19  ;;  %13105 = vmatprep.subr.bf16.mxu0 %v18768_v29  ;;  %v18844_v19 = vld [vmem:[%s22236_s7 + $0x1860] ss:$16 sps:$4 sm:$0xff]   ;;  %v18847_v29 = vld [vmem:[%s22236_s7 + $0x1868] ss:$16 sps:$4 sm:$0xff]  }
 0x903   :  { %13679 = vmatprep.subr.bf16.mxu1 %v18771_v27  ;;  %v18852_v27 = vld [vmem:[%s22236_s7 + $0x1884] ss:$16 sps:$4 sm:$0xff]  }
 0x905   :  { %13106 = vmatpush1.bf16.msra.mxu0 %v18766_v28  ;;  %v18855_v28 = vld [vmem:[%s22236_s7 + $0x188c] ss:$16 sps:$4 sm:$0xff]  }
 0x906   :  { %13680 = vmatpush1.bf16.msra.mxu1 %v18769_v35  ;;  %13107 = vmatprep.subr.bf16.mxu0 %v18774_v51  ;;  %v18850_v35 = vld [vmem:[%s22236_s7 + $0x1880] ss:$16 sps:$4 sm:$0xff]   ;;  %v18853_v51 = vld [vmem:[%s22236_s7 + $0x1888] ss:$16 sps:$4 sm:$0xff]  }
 0x907   :  { %13681 = vmatprep.subr.bf16.mxu1 %v18777_v30  ;;  %v18858_v30 = vld [vmem:[%s22236_s7 + $0x18a4] ss:$16 sps:$4 sm:$0xff]  }
 0x909   :  { %13108 = vmatpush1.bf16.msra.mxu0 %v18772_v31  ;;  %v18861_v31 = vld [vmem:[%s22236_s7 + $0x18ac] ss:$16 sps:$4 sm:$0xff]  }
 0x90a   :  { %13682 = vmatpush1.bf16.msra.mxu1 %v18775_v34  ;;  %13109 = vmatprep.subr.bf16.mxu0 %v18780_v38  ;;  %v18856_v34 = vld [vmem:[%s22236_s7 + $0x18a0] ss:$16 sps:$4 sm:$0xff]   ;;  %v18859_v38 = vld [vmem:[%s22236_s7 + $0x18a8] ss:$16 sps:$4 sm:$0xff]  }
 0x90b   :  { %13683 = vmatprep.subr.bf16.mxu1 %v18783_v40  ;;  %v18864_v40 = vld [vmem:[%s22236_s7 + $0x18c4] ss:$16 sps:$4 sm:$0xff]  }
 0x90d   :  { %13110 = vmatpush1.bf16.msra.mxu0 %v18778_v41  ;;  %v18867_v41 = vld [vmem:[%s22236_s7 + $0x18cc] ss:$16 sps:$4 sm:$0xff]  }
 0x90e   :  { %13684 = vmatpush1.bf16.msra.mxu1 %v18781_v42  ;;  %13111 = vmatprep.subr.bf16.mxu0 %v18786_v44  ;;  %v18862_v42 = vld [vmem:[%s22236_s7 + $0x18c0] ss:$16 sps:$4 sm:$0xff]   ;;  %v18865_v44 = vld [vmem:[%s22236_s7 + $0x18c8] ss:$16 sps:$4 sm:$0xff]  }
 0x90f   :  { %13685 = vmatprep.subr.bf16.mxu1 %v18789_v45  ;;  %v18870_v45 = vld [vmem:[%s22236_s7 + $0x18e4] ss:$16 sps:$4 sm:$0xff]  }
 0x911   :  { %13112 = vmatpush1.bf16.msra.mxu0 %v18784_v61  ;;  %v18873_v61 = vld [vmem:[%s22236_s7 + $0x18ec] ss:$16 sps:$4 sm:$0xff]  }
 0x912   :  { %13686 = vmatpush1.bf16.msra.mxu1 %v18787_v46  ;;  %13113 = vmatprep.subr.bf16.mxu0 %v18792_v50  ;;  %v18868_v46 = vld [vmem:[%s22236_s7 + $0x18e0] ss:$16 sps:$4 sm:$0xff]   ;;  %v18871_v50 = vld [vmem:[%s22236_s7 + $0x18e8] ss:$16 sps:$4 sm:$0xff]  }
 0x913   :  { %13687 = vmatprep.subr.bf16.mxu1 %v18795_v53  ;;  %v18876_v53 = vld [vmem:[%s22236_s7 + $0x1904] ss:$16 sps:$4 sm:$0xff]  }
 0x915   :  { %13114 = vmatpush1.bf16.msra.mxu0 %v18790_v54  ;;  %v18879_v54 = vld [vmem:[%s22236_s7 + $0x190c] ss:$16 sps:$4 sm:$0xff]  }
 0x916   :  { %13688 = vmatpush1.bf16.msra.mxu1 %v18793_v55  ;;  %13115 = vmatprep.subr.bf16.mxu0 %v18798_v43  ;;  %v18874_v55 = vld [vmem:[%s22236_s7 + $0x1900] ss:$16 sps:$4 sm:$0xff]   ;;  %v18877_v43 = vld [vmem:[%s22236_s7 + $0x1908] ss:$16 sps:$4 sm:$0xff]  }
 0x917   :  { %13689 = vmatprep.subr.bf16.mxu1 %v18801_v57  ;;  %v18882_v57 = vld [vmem:[%s22236_s7 + $0x1924] ss:$16 sps:$4 sm:$0xff]  }
 0x919   :  { %13116 = vmatpush1.bf16.msra.mxu0 %v18796_v37  ;;  %v18885_v37 = vld [vmem:[%s22236_s7 + $0x192c] ss:$16 sps:$4 sm:$0xff]  }
 0x91a   :  { %13690 = vmatpush1.bf16.msra.mxu1 %v18799_v49  ;;  %13117 = vmatprep.subr.bf16.mxu0 %v18804_v58  ;;  %v18880_v49 = vld [vmem:[%s22236_s7 + $0x1920] ss:$16 sps:$4 sm:$0xff]   ;;  %v18883_v58 = vld [vmem:[%s22236_s7 + $0x1928] ss:$16 sps:$4 sm:$0xff]  }
 0x91b   :  { %13691 = vmatprep.subr.bf16.mxu1 %v18807_v59  ;;  %v18888_v59 = vld [vmem:[%s22236_s7 + $0x1944] ss:$16 sps:$4 sm:$0xff]  }
 0x91d   :  { %13118 = vmatpush1.bf16.msra.mxu0 %v18802_v20  ;;  %v18891_v20 = vld [vmem:[%s22236_s7 + $0x194c] ss:$16 sps:$4 sm:$0xff]  }
 0x91e   :  { %13692 = vmatpush1.bf16.msra.mxu1 %v18805_v60  ;;  %13119 = vmatprep.subr.bf16.mxu0 %v18810_v47  ;;  %v18886_v60 = vld [vmem:[%s22236_s7 + $0x1940] ss:$16 sps:$4 sm:$0xff]   ;;  %v18889_v47 = vld [vmem:[%s22236_s7 + $0x1948] ss:$16 sps:$4 sm:$0xff]  }
 0x91f   :  { %13693 = vmatprep.subr.bf16.mxu1 %v18813_v62  ;;  %v18894_v62 = vld [vmem:[%s22236_s7 + $0x1964] ss:$16 sps:$4 sm:$0xff]  }
 0x921   :  { %13120 = vmatpush1.bf16.msra.mxu0 %v18808_v52  ;;  %v18897_v52 = vld [vmem:[%s22236_s7 + $0x196c] ss:$16 sps:$4 sm:$0xff]  }
 0x922   :  { %13694 = vmatpush1.bf16.msra.mxu1 %v18811_v56  ;;  %13121 = vmatprep.subr.bf16.mxu0 %v18816_v63  ;;  %v18892_v56 = vld [vmem:[%s22236_s7 + $0x1960] ss:$16 sps:$4 sm:$0xff]   ;;  %v18895_v63 = vld [vmem:[%s22236_s7 + $0x1968] ss:$16 sps:$4 sm:$0xff]  }
 0x923   :  { %13695 = vmatprep.subr.bf16.mxu1 %v18819_v1  ;;  %v18900_v1 = vld [vmem:[%s22236_s7 + $0x1984] ss:$16 sps:$4 sm:$0xff]  }
 0x925   :  { %13122 = vmatpush1.bf16.msra.mxu0 %v18814_v2  ;;  %v18903_v2 = vld [vmem:[%s22236_s7 + $0x198c] ss:$16 sps:$4 sm:$0xff]  }
 0x926   :  { %13696 = vmatpush1.bf16.msra.mxu1 %v18817_v4  ;;  %13123 = vmatprep.subr.bf16.mxu0 %v18822_v3  ;;  %v18898_v4 = vld [vmem:[%s22236_s7 + $0x1980] ss:$16 sps:$4 sm:$0xff]   ;;  %v18901_v3 = vld [vmem:[%s22236_s7 + $0x1988] ss:$16 sps:$4 sm:$0xff]  }
 0x927   :  { %13697 = vmatprep.subr.bf16.mxu1 %v18825_v24  ;;  %v18906_v24 = vld [vmem:[%s22236_s7 + $0x19a4] ss:$16 sps:$4 sm:$0xff]  }
 0x929   :  { %13124 = vmatpush1.bf16.msra.mxu0 %v18820_v15  ;;  %v18909_v15 = vld [vmem:[%s22236_s7 + $0x19ac] ss:$16 sps:$4 sm:$0xff]  }
 0x92a   :  { %13698 = vmatpush1.bf16.msra.mxu1 %v18823_v11  ;;  %13134 = vmatprep.subr.bf16.mxu0 %v18828_v22  ;;  %v18904_v11 = vld [vmem:[%s22236_s7 + $0x19a0] ss:$16 sps:$4 sm:$0xff]   ;;  %v18912_v22 = vld [vmem:[%s22236_s7 + $0x19c4] ss:$16 sps:$4 sm:$0xff]  }
 0x92b   :  { %13708 = vmatprep.subr.bf16.mxu1 %v18831_v6  ;;  %v18915_v6 = vld [vmem:[%s22236_s7 + $0x19cc] ss:$16 sps:$4 sm:$0xff]  }
 0x92c   :  { %13126 = vmatmul.mubr.bf16.vlgmr.msra.gmra.mrb[0].mxu0 %v7238_v23 }
 0x92d   :  { %13700 = vmatmul.mubr.bf16.vlgmr.msra.gmra.mrb[0].mxu1 %v7238_v23  ;;  %13135 = vmatpush1.bf16.msra.mxu0 %v18826_v8  ;;  %v18910_v23 = vld [vmem:[%s22236_s7 + $0x19c0] ss:$16 sps:$4 sm:$0xff]   ;;  %v18918_v8 = vld [vmem:[%s22236_s7 + $0x19e4] ss:$16 sps:$4 sm:$0xff]  }
 0x92e   :  { %13709 = vmatpush1.bf16.msra.mxu1 %v18829_v7  ;;  %13136 = vmatprep.subr.bf16.mxu0 %v18834_v9  ;;  %v18921_v7 = vld [vmem:[%s22236_s7 + $0x19ec] ss:$16 sps:$4 sm:$0xff]   ;;  %v18916_v9 = vld [vmem:[%s22236_s7 + $0x19e0] ss:$16 sps:$4 sm:$0xff]  }
 0x92f   :  { %13710 = vmatprep.subr.bf16.mxu1 %v18837_v12  ;;  %13166 = vmatprep.mubr.bf16.mxu0 %v7241_v25  ;;  %v18919_v12 = vld [vmem:[%s22236_s7 + $0x19e8] ss:$16 sps:$4 sm:$0xff]  }
 0x930   :  { %13740 = vmatprep.mubr.bf16.mxu1 %v7241_v25  ;;  %v7212_v25 = vld [vmem:[#allocation2 + $0xc0] sm:$0xff] }
 0x931   :  { %13137 = vmatpush1.bf16.msra.mxu0 %v18832_v16  ;;  %v18924_v16 = vld [vmem:[%s22236_s7 + $0x1a04] ss:$16 sps:$4 sm:$0xff]  }
 0x932   :  { %13711 = vmatpush1.bf16.msra.mxu1 %v18835_v17  ;;  %13138 = vmatprep.subr.bf16.mxu0 %v18840_v13  ;;  %v18927_v17 = vld [vmem:[%s22236_s7 + $0x1a0c] ss:$16 sps:$4 sm:$0xff]   ;;  %v7240_v13 = vpack.c.bf16 %v7212_v25, %v7212_v25  ;;  %v19003_v25 = vld [vmem:[%s22236_s7 + $0x1ba8] ss:$16 sps:$4 sm:$0xff]  }
 0x933   :  { %13712 = vmatprep.subr.bf16.mxu1 %v18843_v18  ;;  %v7215_v18 = vld [vmem:[#allocation2 + $0xd8] sm:$0xff] }
 0x935   :  { %13139 = vmatpush1.bf16.msra.mxu0 %v18838_v48  ;;  %v18922_v48 = vld [vmem:[%s22236_s7 + $0x1a00] ss:$16 sps:$4 sm:$0xff]  }
 0x936   :  { %13713 = vmatpush1.bf16.msra.mxu1 %v18841_v33  ;;  %13140 = vmatprep.subr.bf16.mxu0 %v18846_v14  ;;  %v18925_v33 = vld [vmem:[%s22236_s7 + $0x1a08] ss:$16 sps:$4 sm:$0xff]   ;;  %v18930_v14 = vld [vmem:[%s22236_s7 + $0x1a24] ss:$16 sps:$4 sm:$0xff]  }
 0x937   :  { %13714 = vmatprep.subr.bf16.mxu1 %v18849_v36  ;;  %v18933_v36 = vld [vmem:[%s22236_s7 + $0x1a2c] ss:$16 sps:$4 sm:$0xff]  }
 0x939   :  { %13141 = vmatpush1.bf16.msra.mxu0 %v18844_v19  ;;  %v7243_v19 = vpack.c.bf16 %v7215_v18, %v7215_v18  ;;  %v19009_v18 = vld [vmem:[%s22236_s7 + $0x1bc8] ss:$16 sps:$4 sm:$0xff]  }
 0x93a   :  { %13715 = vmatpush1.bf16.msra.mxu1 %v18847_v29  ;;  %13142 = vmatprep.subr.bf16.mxu0 %v18852_v27  ;;  %v18928_v29 = vld [vmem:[%s22236_s7 + $0x1a20] ss:$16 sps:$4 sm:$0xff]   ;;  %v18931_v27 = vld [vmem:[%s22236_s7 + $0x1a28] ss:$16 sps:$4 sm:$0xff]  }
 0x93b   :  { %13716 = vmatprep.subr.bf16.mxu1 %v18855_v28  ;;  %v18936_v28 = vld [vmem:[%s22236_s7 + $0x1a44] ss:$16 sps:$4 sm:$0xff]  }
 0x93d   :  { %13143 = vmatpush1.bf16.msra.mxu0 %v18850_v35  ;;  %v18939_v35 = vld [vmem:[%s22236_s7 + $0x1a4c] ss:$16 sps:$4 sm:$0xff]  }
 0x93e   :  { %13717 = vmatpush1.bf16.msra.mxu1 %v18853_v51  ;;  %13144 = vmatprep.subr.bf16.mxu0 %v18858_v30  ;;  %v18934_v51 = vld [vmem:[%s22236_s7 + $0x1a40] ss:$16 sps:$4 sm:$0xff]   ;;  %v18937_v30 = vld [vmem:[%s22236_s7 + $0x1a48] ss:$16 sps:$4 sm:$0xff]  }
 0x93f   :  { %13718 = vmatprep.subr.bf16.mxu1 %v18861_v31  ;;  %v18942_v31 = vld [vmem:[%s22236_s7 + $0x1a64] ss:$16 sps:$4 sm:$0xff]  }
 0x941   :  { %13145 = vmatpush1.bf16.msra.mxu0 %v18856_v34  ;;  %v18945_v34 = vld [vmem:[%s22236_s7 + $0x1a6c] ss:$16 sps:$4 sm:$0xff]  }
 0x942   :  { %13719 = vmatpush1.bf16.msra.mxu1 %v18859_v38  ;;  %13146 = vmatprep.subr.bf16.mxu0 %v18864_v40  ;;  %v18940_v38 = vld [vmem:[%s22236_s7 + $0x1a60] ss:$16 sps:$4 sm:$0xff]   ;;  %v18943_v40 = vld [vmem:[%s22236_s7 + $0x1a68] ss:$16 sps:$4 sm:$0xff]  }
 0x943   :  { %13720 = vmatprep.subr.bf16.mxu1 %v18867_v41  ;;  %v18948_v41 = vld [vmem:[%s22236_s7 + $0x1a84] ss:$16 sps:$4 sm:$0xff]  }
 0x945   :  { %13147 = vmatpush1.bf16.msra.mxu0 %v18862_v42  ;;  %v18951_v42 = vld [vmem:[%s22236_s7 + $0x1a8c] ss:$16 sps:$4 sm:$0xff]  }
 0x946   :  { %13721 = vmatpush1.bf16.msra.mxu1 %v18865_v44  ;;  %13148 = vmatprep.subr.bf16.mxu0 %v18870_v45  ;;  %v18946_v44 = vld [vmem:[%s22236_s7 + $0x1a80] ss:$16 sps:$4 sm:$0xff]   ;;  %v18949_v45 = vld [vmem:[%s22236_s7 + $0x1a88] ss:$16 sps:$4 sm:$0xff]  }
 0x947   :  { %13722 = vmatprep.subr.bf16.mxu1 %v18873_v61  ;;  %v18954_v61 = vld [vmem:[%s22236_s7 + $0x1aa4] ss:$16 sps:$4 sm:$0xff]  }
 0x949   :  { %13149 = vmatpush1.bf16.msra.mxu0 %v18868_v46  ;;  %v18957_v46 = vld [vmem:[%s22236_s7 + $0x1aac] ss:$16 sps:$4 sm:$0xff]  }
 0x94a   :  { %13723 = vmatpush1.bf16.msra.mxu1 %v18871_v50  ;;  %13150 = vmatprep.subr.bf16.mxu0 %v18876_v53  ;;  %v18952_v50 = vld [vmem:[%s22236_s7 + $0x1aa0] ss:$16 sps:$4 sm:$0xff]   ;;  %v18955_v53 = vld [vmem:[%s22236_s7 + $0x1aa8] ss:$16 sps:$4 sm:$0xff]  }
 0x94b   :  { %13724 = vmatprep.subr.bf16.mxu1 %v18879_v54  ;;  %v18960_v54 = vld [vmem:[%s22236_s7 + $0x1ac4] ss:$16 sps:$4 sm:$0xff]  }
 0x94d   :  { %13151 = vmatpush1.bf16.msra.mxu0 %v18874_v55  ;;  %v18963_v55 = vld [vmem:[%s22236_s7 + $0x1acc] ss:$16 sps:$4 sm:$0xff]  }
 0x94e   :  { %13725 = vmatpush1.bf16.msra.mxu1 %v18877_v43  ;;  %13152 = vmatprep.subr.bf16.mxu0 %v18882_v57  ;;  %v18958_v43 = vld [vmem:[%s22236_s7 + $0x1ac0] ss:$16 sps:$4 sm:$0xff]   ;;  %v18961_v57 = vld [vmem:[%s22236_s7 + $0x1ac8] ss:$16 sps:$4 sm:$0xff]  }
 0x94f   :  { %13726 = vmatprep.subr.bf16.mxu1 %v18885_v37  ;;  %v18966_v37 = vld [vmem:[%s22236_s7 + $0x1ae4] ss:$16 sps:$4 sm:$0xff]  }
 0x951   :  { %13153 = vmatpush1.bf16.msra.mxu0 %v18880_v49  ;;  %v18969_v49 = vld [vmem:[%s22236_s7 + $0x1aec] ss:$16 sps:$4 sm:$0xff]  }
 0x952   :  { %13727 = vmatpush1.bf16.msra.mxu1 %v18883_v58  ;;  %13154 = vmatprep.subr.bf16.mxu0 %v18888_v59  ;;  %v18964_v58 = vld [vmem:[%s22236_s7 + $0x1ae0] ss:$16 sps:$4 sm:$0xff]   ;;  %v18967_v59 = vld [vmem:[%s22236_s7 + $0x1ae8] ss:$16 sps:$4 sm:$0xff]  }
 0x953   :  { %13728 = vmatprep.subr.bf16.mxu1 %v18891_v20  ;;  %v18972_v20 = vld [vmem:[%s22236_s7 + $0x1b04] ss:$16 sps:$4 sm:$0xff]  }
 0x955   :  { %13155 = vmatpush1.bf16.msra.mxu0 %v18886_v60  ;;  %v18975_v60 = vld [vmem:[%s22236_s7 + $0x1b0c] ss:$16 sps:$4 sm:$0xff]  }
 0x956   :  { %13729 = vmatpush1.bf16.msra.mxu1 %v18889_v47  ;;  %13156 = vmatprep.subr.bf16.mxu0 %v18894_v62  ;;  %v18970_v47 = vld [vmem:[%s22236_s7 + $0x1b00] ss:$16 sps:$4 sm:$0xff]   ;;  %v18973_v62 = vld [vmem:[%s22236_s7 + $0x1b08] ss:$16 sps:$4 sm:$0xff]  }
 0x957   :  { %13730 = vmatprep.subr.bf16.mxu1 %v18897_v52  ;;  %v18978_v52 = vld [vmem:[%s22236_s7 + $0x1b24] ss:$16 sps:$4 sm:$0xff]  }
 0x959   :  { %13157 = vmatpush1.bf16.msra.mxu0 %v18892_v56  ;;  %v18981_v56 = vld [vmem:[%s22236_s7 + $0x1b2c] ss:$16 sps:$4 sm:$0xff]  }
 0x95a   :  { %13731 = vmatpush1.bf16.msra.mxu1 %v18895_v63  ;;  %13158 = vmatprep.subr.bf16.mxu0 %v18900_v1  ;;  %v18976_v63 = vld [vmem:[%s22236_s7 + $0x1b20] ss:$16 sps:$4 sm:$0xff]   ;;  %v18979_v1 = vld [vmem:[%s22236_s7 + $0x1b28] ss:$16 sps:$4 sm:$0xff]  }
 0x95b   :  { %13732 = vmatprep.subr.bf16.mxu1 %v18903_v2  ;;  %v18984_v2 = vld [vmem:[%s22236_s7 + $0x1b44] ss:$16 sps:$4 sm:$0xff]  }
 0x95d   :  { %13159 = vmatpush1.bf16.msra.mxu0 %v18898_v4  ;;  %v18987_v4 = vld [vmem:[%s22236_s7 + $0x1b4c] ss:$16 sps:$4 sm:$0xff]  }
 0x95e   :  { %13733 = vmatpush1.bf16.msra.mxu1 %v18901_v3  ;;  %13160 = vmatprep.subr.bf16.mxu0 %v18906_v24  ;;  %v18982_v3 = vld [vmem:[%s22236_s7 + $0x1b40] ss:$16 sps:$4 sm:$0xff]   ;;  %v18985_v24 = vld [vmem:[%s22236_s7 + $0x1b48] ss:$16 sps:$4 sm:$0xff]  }
 0x95f   :  { %13734 = vmatprep.subr.bf16.mxu1 %v18909_v15  ;;  %v18990_v15 = vld [vmem:[%s22236_s7 + $0x1b64] ss:$16 sps:$4 sm:$0xff]  }
 0x961   :  { %13161 = vmatpush1.bf16.msra.mxu0 %v18904_v11  ;;  %v18993_v11 = vld [vmem:[%s22236_s7 + $0x1b6c] ss:$16 sps:$4 sm:$0xff]  }
 0x962   :  { %13735 = vmatpush1.bf16.msra.mxu1 %v18907_v5  ;;  %13162 = vmatprep.subr.bf16.mxu0 %v18912_v22  ;;  %v18988_v5 = vld [vmem:[%s22236_s7 + $0x1b60] ss:$16 sps:$4 sm:$0xff]   ;;  %v18991_v22 = vld [vmem:[%s22236_s7 + $0x1b68] ss:$16 sps:$4 sm:$0xff]  }
 0x963   :  { %13736 = vmatprep.subr.bf16.mxu1 %v18915_v6  ;;  %v18996_v6 = vld [vmem:[%s22236_s7 + $0x1b84] ss:$16 sps:$4 sm:$0xff]  }
 0x965   :  { %13163 = vmatpush1.bf16.msra.mxu0 %v18910_v23  ;;  %v18999_v23 = vld [vmem:[%s22236_s7 + $0x1b8c] ss:$16 sps:$4 sm:$0xff]  }
 0x966   :  { %13737 = vmatpush1.bf16.msra.mxu1 %v18913_v32  ;;  %13164 = vmatprep.subr.bf16.mxu0 %v18918_v8  ;;  %v18994_v32 = vld [vmem:[%s22236_s7 + $0x1b80] ss:$16 sps:$4 sm:$0xff]   ;;  %v18997_v8 = vld [vmem:[%s22236_s7 + $0x1b88] ss:$16 sps:$4 sm:$0xff]  }
 0x967   :  { %13738 = vmatprep.subr.bf16.mxu1 %v18921_v7  ;;  %v19002_v7 = vld [vmem:[%s22236_s7 + $0x1ba4] ss:$16 sps:$4 sm:$0xff]  }
 0x969   :  { %13165 = vmatpush1.bf16.msra.mxu0 %v18916_v9  ;;  %v19005_v9 = vld [vmem:[%s22236_s7 + $0x1bac] ss:$16 sps:$4 sm:$0xff]  }
 0x96a   :  { %13739 = vmatpush1.bf16.msra.mxu1 %v18919_v12  ;;  %13175 = vmatprep.subr.bf16.mxu0 %v18924_v16  ;;  %v19000_v12 = vld [vmem:[%s22236_s7 + $0x1ba0] ss:$16 sps:$4 sm:$0xff]   ;;  %v19008_v16 = vld [vmem:[%s22236_s7 + $0x1bc4] ss:$16 sps:$4 sm:$0xff]  }
 0x96b   :  { %13749 = vmatprep.subr.bf16.mxu1 %v18927_v17  ;;  %v19011_v17 = vld [vmem:[%s22236_s7 + $0x1bcc] ss:$16 sps:$4 sm:$0xff]  }
 0x96c   :  { %13167 = vmatmul.mubr.bf16.vlgmr.msra.gmra.mrb[0].mxu0 %v7240_v13 }
 0x96d   :  { %13741 = vmatmul.mubr.bf16.vlgmr.msra.gmra.mrb[0].mxu1 %v7240_v13  ;;  %13176 = vmatpush1.bf16.msra.mxu0 %v18922_v48  ;;  %v19006_v13 = vld [vmem:[%s22236_s7 + $0x1bc0] ss:$16 sps:$4 sm:$0xff]   ;;  %v19014_v48 = vld [vmem:[%s22236_s7 + $0x1be4] ss:$16 sps:$4 sm:$0xff]  }
 0x96e   :  { %13750 = vmatpush1.bf16.msra.mxu1 %v18925_v33  ;;  %13177 = vmatprep.subr.bf16.mxu0 %v18930_v14  ;;  %v19017_v33 = vld [vmem:[%s22236_s7 + $0x1bec] ss:$16 sps:$4 sm:$0xff]   ;;  %v19012_v14 = vld [vmem:[%s22236_s7 + $0x1be0] ss:$16 sps:$4 sm:$0xff]  }
 0x96f   :  { %13751 = vmatprep.subr.bf16.mxu1 %v18933_v36  ;;  %13207 = vmatprep.mubr.bf16.mxu0 %v7243_v19  ;;  %v19015_v36 = vld [vmem:[%s22236_s7 + $0x1be8] ss:$16 sps:$4 sm:$0xff]  }
 0x970   :  { %13781 = vmatprep.mubr.bf16.mxu1 %v7243_v19  ;;  %v7214_v19 = vld [vmem:[#allocation2 + $0xd0] sm:$0xff] }
 0x971   :  { %13178 = vmatpush1.bf16.msra.mxu0 %v18928_v29  ;;  %v19018_v29 = vld [vmem:[#allocation8 + $0x40] sm:$0xff]  }
 0x972   :  { %13752 = vmatpush1.bf16.msra.mxu1 %v18931_v27  ;;  %13179 = vmatprep.subr.bf16.mxu0 %v18936_v28  ;;  %v19019_v27 = vld [vmem:[#allocation8 + $0xc0] sm:$0xff]   ;;  %v7242_v28 = vpack.c.bf16 %v7214_v19, %v7214_v19 }
 0x973   :  { %13753 = vmatprep.subr.bf16.mxu1 %v18939_v35  ;;  %v19020_v35 = vld [vmem:[#allocation8] sm:$0xff]  }
 0x975   :  { %13180 = vmatpush1.bf16.msra.mxu0 %v18934_v51  ;;  %v19021_v51 = vld [vmem:[#allocation8 + $0x80] sm:$0xff]  }
 0x976   :  { %13754 = vmatpush1.bf16.msra.mxu1 %v18937_v30  ;;  %13181 = vmatprep.subr.bf16.mxu0 %v18942_v31  ;;  %v19022_v30 = vld [vmem:[#allocation8 + $0x48] sm:$0xff]  }
 0x977   :  { %13755 = vmatprep.subr.bf16.mxu1 %v18945_v34  ;;  %v19023_v31 = vld [vmem:[#allocation8 + $0xc8] sm:$0xff]  }
 0x978   :  { %v19024_v34 = vld [vmem:[#allocation8 + $0x8] sm:$0xff]  }
 0x979   :  { %13182 = vmatpush1.bf16.msra.mxu0 %v18940_v38  ;;  %v19025_v38 = vld [vmem:[#allocation8 + $0x88] sm:$0xff]  }
 0x97a   :  { %13756 = vmatpush1.bf16.msra.mxu1 %v18943_v40  ;;  %13183 = vmatprep.subr.bf16.mxu0 %v18948_v41  ;;  %v19026_v40 = vld [vmem:[#allocation8 + $0x50] sm:$0xff]  }
 0x97b   :  { %13757 = vmatprep.subr.bf16.mxu1 %v18951_v42  ;;  %v19027_v41 = vld [vmem:[#allocation8 + $0xd0] sm:$0xff]  }
 0x97c   :  { %v19028_v42 = vld [vmem:[#allocation8 + $0x10] sm:$0xff]  }
 0x97d   :  { %13184 = vmatpush1.bf16.msra.mxu0 %v18946_v44  ;;  %v19029_v44 = vld [vmem:[#allocation8 + $0x90] sm:$0xff]  }
 0x97e   :  { %13758 = vmatpush1.bf16.msra.mxu1 %v18949_v45  ;;  %13185 = vmatprep.subr.bf16.mxu0 %v18954_v61  ;;  %v19030_v45 = vld [vmem:[#allocation8 + $0x58] sm:$0xff]  }
 0x97f   :  { %13759 = vmatprep.subr.bf16.mxu1 %v18957_v46  ;;  %v19031_v61 = vld [vmem:[#allocation8 + $0xd8] sm:$0xff]  }
 0x980   :  { %v19032_v46 = vld [vmem:[#allocation8 + $0x18] sm:$0xff]  }
 0x981   :  { %13186 = vmatpush1.bf16.msra.mxu0 %v18952_v50  ;;  %v19033_v50 = vld [vmem:[#allocation8 + $0x98] sm:$0xff]  }
 0x982   :  { %13760 = vmatpush1.bf16.msra.mxu1 %v18955_v53  ;;  %13187 = vmatprep.subr.bf16.mxu0 %v18960_v54  ;;  %v19034_v53 = vld [vmem:[#allocation8 + $0x60] sm:$0xff]  }
 0x983   :  { %13761 = vmatprep.subr.bf16.mxu1 %v18963_v55  ;;  %v19035_v54 = vld [vmem:[#allocation8 + $0xe0] sm:$0xff]  }
 0x984   :  { %v19036_v55 = vld [vmem:[#allocation8 + $0x20] sm:$0xff]  }
 0x985   :  { %13188 = vmatpush1.bf16.msra.mxu0 %v18958_v43  ;;  %v19037_v43 = vld [vmem:[#allocation8 + $0xa0] sm:$0xff]  }
 0x986   :  { %13762 = vmatpush1.bf16.msra.mxu1 %v18961_v57  ;;  %13189 = vmatprep.subr.bf16.mxu0 %v18966_v37  ;;  %v19038_v57 = vld [vmem:[#allocation8 + $0x68] sm:$0xff]  }
 0x987   :  { %13763 = vmatprep.subr.bf16.mxu1 %v18969_v49  ;;  %v19039_v37 = vld [vmem:[#allocation8 + $0xe8] sm:$0xff]  }
 0x988   :  { %v19040_v49 = vld [vmem:[#allocation8 + $0x28] sm:$0xff]  }
 0x989   :  { %13190 = vmatpush1.bf16.msra.mxu0 %v18964_v58  ;;  %v19041_v58 = vld [vmem:[#allocation8 + $0xa8] sm:$0xff]  }
 0x98a   :  { %13764 = vmatpush1.bf16.msra.mxu1 %v18967_v59  ;;  %13191 = vmatprep.subr.bf16.mxu0 %v18972_v20  ;;  %v19042_v59 = vld [vmem:[#allocation8 + $0x70] sm:$0xff]  }
 0x98b   :  { %13765 = vmatprep.subr.bf16.mxu1 %v18975_v60  ;;  %v19043_v20 = vld [vmem:[#allocation8 + $0xf0] sm:$0xff]  }
 0x98c   :  { %v19044_v60 = vld [vmem:[#allocation8 + $0x30] sm:$0xff]  }
 0x98d   :  { %13192 = vmatpush1.bf16.msra.mxu0 %v18970_v47  ;;  %v19045_v47 = vld [vmem:[#allocation8 + $0xb0] sm:$0xff]  }
 0x98e   :  { %13766 = vmatpush1.bf16.msra.mxu1 %v18973_v62  ;;  %13193 = vmatprep.subr.bf16.mxu0 %v18978_v52  ;;  %v19046_v62 = vld [vmem:[#allocation8 + $0x78] sm:$0xff]  }
 0x98f   :  { %13767 = vmatprep.subr.bf16.mxu1 %v18981_v56  ;;  %v19047_v52 = vld [vmem:[#allocation8 + $0xf8] sm:$0xff]  }
 0x990   :  { %v19048_v56 = vld [vmem:[#allocation8 + $0x38] sm:$0xff]  }
 0x991   :  { %13194 = vmatpush1.bf16.msra.mxu0 %v18976_v63  ;;  %v19049_v63 = vld [vmem:[#allocation8 + $0xb8] sm:$0xff]  }
 0x992   :  { %13768 = vmatpush1.bf16.msra.mxu1 %v18979_v1  ;;  %13195 = vmatprep.subr.bf16.mxu0 %v18984_v2  ;;  %v8140_v1 = vld [vmem:[%s22237_s8] sm:$0xf] }
 0x993   :  { %13769 = vmatprep.subr.bf16.mxu1 %v18987_v4  ;;  %v8145_v2 = vrot.slane %v8140_v1, %v19378_v0  ;;  %v8153_v4 = vrot.slane %v8140_v1, %v19357_v26 }
 0x995   :  { %13196 = vmatpush1.bf16.msra.mxu0 %v18982_v3  ;;  %v8149_v3 = vrot.slane %v8140_v1, %v19381_v21 }
 0x996   :  { %13770 = vmatpush1.bf16.msra.mxu1 %v18985_v24  ;;  %13197 = vmatprep.subr.bf16.mxu0 %v18990_v15  ;;  %v8157_v24 = vrot.slane %v8140_v1, %v5200_v39 }
 0x997   :  { %13771 = vmatprep.subr.bf16.mxu1 %v18993_v11 }
 0x999   :  { %13198 = vmatpush1.bf16.msra.mxu0 %v18988_v5 }
 0x99a   :  { %13772 = vmatpush1.bf16.msra.mxu1 %v18991_v22  ;;  %13199 = vmatprep.subr.bf16.mxu0 %v18996_v6 }
 0x99b   :  { %13773 = vmatprep.subr.bf16.mxu1 %v18999_v23 }
 0x99d   :  { %13200 = vmatpush1.bf16.msra.mxu0 %v18994_v32 }
 0x99e   :  { %13774 = vmatpush1.bf16.msra.mxu1 %v18997_v8  ;;  %13201 = vmatprep.subr.bf16.mxu0 %v19002_v7 }
 0x99f   :  { %13775 = vmatprep.subr.bf16.mxu1 %v19005_v9 }
 0x9a1   :  { %13202 = vmatpush1.bf16.msra.mxu0 %v19000_v12 }
 0x9a2   :  { %13776 = vmatpush1.bf16.msra.mxu1 %v19003_v25  ;;  %13203 = vmatprep.subr.bf16.mxu0 %v19008_v16 }
 0x9a3   :  { %13777 = vmatprep.subr.bf16.mxu1 %v19011_v17 }
 0x9a5   :  { %13204 = vmatpush1.bf16.msra.mxu0 %v19006_v13 }
 0x9a6   :  { %13778 = vmatpush1.bf16.msra.mxu1 %v19009_v18  ;;  %13205 = vmatprep.subr.bf16.mxu0 %v19014_v48 }
 0x9a7   :  { %13779 = vmatprep.subr.bf16.mxu1 %v19017_v33  ;;  %v15935_v33 = vld [vmem:[%s22239_s10] ss:$0 sm:$0xff] }
 0x9a9   :  { %13206 = vmatpush1.bf16.msra.mxu0 %v19012_v14 }
 0x9aa   :  { %13780 = vmatpush1.bf16.msra.mxu1 %v19015_v36  ;;  %16241 = vmatprep.subr.bf16.mxu0 %v19018_v29 }
 0x9ab   :  { %16263 = vmatprep.subr.bf16.mxu1 %v19019_v27 }
 0x9ac   :  { %13208 = vmatmul.mubr.bf16.vlgmr.msra.gmra.mrb[0].mxu0 %v7242_v28 }
 0x9ad   :  { %13782 = vmatmul.mubr.bf16.vlgmr.msra.gmra.mrb[0].mxu1 %v7242_v28  ;;  %16242 = vmatpush3.bf16.msra.mxu0 %v19020_v35 }
 0x9ae   :  { %16264 = vmatpush3.bf16.msra.mxu1 %v19021_v51  ;;  %16243 = vmatprep.subr.bf16.mxu0 %v19022_v30 }
 0x9af   :  { %16265 = vmatprep.subr.bf16.mxu1 %v19023_v31 }
 0x9b1   :  { %16244 = vmatpush3.bf16.msra.mxu0 %v19024_v34 }
 0x9b2   :  { %16266 = vmatpush3.bf16.msra.mxu1 %v19025_v38  ;;  %16245 = vmatprep.subr.bf16.mxu0 %v19026_v40 }
 0x9b3   :  { %16267 = vmatprep.subr.bf16.mxu1 %v19027_v41 }
 0x9b5   :  { %16246 = vmatpush3.bf16.msra.mxu0 %v19028_v42 }
 0x9b6   :  { %16268 = vmatpush3.bf16.msra.mxu1 %v19029_v44  ;;  %16247 = vmatprep.subr.bf16.mxu0 %v19030_v45 }
 0x9b7   :  { %16269 = vmatprep.subr.bf16.mxu1 %v19031_v61 }
 0x9b9   :  { %16248 = vmatpush3.bf16.msra.mxu0 %v19032_v46 }
 0x9ba   :  { %16270 = vmatpush3.bf16.msra.mxu1 %v19033_v50  ;;  %16249 = vmatprep.subr.bf16.mxu0 %v19034_v53 }
 0x9bb   :  { %16271 = vmatprep.subr.bf16.mxu1 %v19035_v54 }
 0x9bd   :  { %16250 = vmatpush3.bf16.msra.mxu0 %v19036_v55 }
 0x9be   :  { %16272 = vmatpush3.bf16.msra.mxu1 %v19037_v43  ;;  %16251 = vmatprep.subr.bf16.mxu0 %v19038_v57 }
 0x9bf   :  { %16273 = vmatprep.subr.bf16.mxu1 %v19039_v37 }
 0x9c1   :  { %16252 = vmatpush3.bf16.msra.mxu0 %v19040_v49 }
 0x9c2   :  { %16274 = vmatpush3.bf16.msra.mxu1 %v19041_v58  ;;  %16253 = vmatprep.subr.bf16.mxu0 %v19042_v59 }
 0x9c3   :  { %16275 = vmatprep.subr.bf16.mxu1 %v19043_v20 }
 0x9c5   :  { %16254 = vmatpush3.bf16.msra.mxu0 %v19044_v60 }
 0x9c6   :  { %16276 = vmatpush3.bf16.msra.mxu1 %v19045_v47  ;;  %16255 = vmatprep.subr.bf16.mxu0 %v19046_v62 }
 0x9c7   :  { %16277 = vmatprep.subr.bf16.mxu1 %v19047_v52 }
 0x9c9   :  { %16256 = vmatpush3.bf16.msra.mxu0 %v19048_v56 }
 0x9ca   :  { %16278 = vmatpush3.bf16.msra.mxu1 %v19049_v63 }
 0xa7f   :  { %v13209_v15 = vpop.f32.mrb[0].mxu0 }
 0xa80   :  { %v13783_v11 = vpop.f32.mrb[0].mxu1  ;;  %v16383_v5 = vadd.f32 %v13209_v15, %v8145_v2  ;;  %v13211_v6 = vpop.f32.mrb[1].mxu0 }
 0xa81   :  { %v16385_v22 = vadd.f32 %v13783_v11, %v8153_v4  ;;  %v13785_v23 = vpop.f32.mrb[1].mxu1  ;;  %v16384_v32 = vadd.f32 %v13211_v6, %v8149_v3  ;;  %v13213_v7 = vpop.f32.mrb[2].mxu0 }
 0xa82   :  { %v16386_v8 = vadd.f32 %v13785_v23, %v8157_v24  ;;  %v13787_v9 = vpop.f32.mrb[2].mxu1  ;;  %v13790_v12 = vmax.f32 %v16383_v5, 0.0  ;;  %v13214_v0 = vpop.f32.mrb[3].mxu0 }
 0xa83   :  { %v13792_v25 = vmax.f32 %v16385_v22, 0.0  ;;  %v13788_v16 = vpop.f32.mrb[3].mxu1  ;;  %v13791_v26 = vmax.f32 %v16384_v32, 0.0 }
 0xa84   :  { %v13793_v17 = vmax.f32 %v16386_v8, 0.0  ;;  %v13794_v10 = vpack.c.bf16 %v13790_v12, %v13790_v12 }
 0xa85   :  { %v13795_v21 = vpack.c.bf16 %v13791_v26, %v13791_v26  ;;  %v13796_v39 = vpack.c.bf16 %v13792_v25, %v13792_v25 }
 0xa86   :  { %v13797_v13 = vpack.c.bf16 %v13793_v17, %v13793_v17 }
 0xa87   :  { %14093 = vmatprep.mubr.bf16.mxu0 %v13795_v21 }
 0xa88   :  { %14133 = vmatprep.mubr.bf16.mxu1 %v13797_v13  ;;  %14094 = vmatmul.mubr.bf16.vlgmr.msra.gmra.mrb[4].mxu0 %v13794_v10 }
 0xa89   :  { %14134 = vmatmul.mubr.bf16.vlgmr.msra.gmra.mrb[4].mxu1 %v13796_v39 }
 0xb5b   :  { %v16257_v18 = vpop.f32.mrb[4].mxu0 }
 0xb5c   :  { %v16279_v48 = vpop.f32.mrb[4].mxu1  ;;  %v16258_v14 = vpop.f32.mrb[5].mxu0 }
 0xb5d   :  { %v16280_v36 = vpop.f32.mrb[5].mxu1  ;;  %v16259_v19 = vadd.f32 %v16258_v14, %v16257_v18  ;;  %v16260_v27 = vpop.f32.mrb[6].mxu0 }
 0xb5e   :  { %v16281_v29 = vadd.f32 %v16280_v36, %v16279_v48  ;;  %v16282_v28 = vpop.f32.mrb[6].mxu1  ;;  %v16261_v35 = vpop.f32.mrb[7].mxu0 }
 0xb5f   :  { %v16283_v51 = vpop.f32.mrb[7].mxu1  ;;  %v14096_v30 = vadd.f32 %v16259_v19, %v15935_v33 }
 0xb61   :  { %v14136_v31 = vadd.f32 %v16281_v29, %v14096_v30 }
 0xb63   :  { %14141 = vst [vmem:[%s22240_s11] sm:$0xff] %v14136_v31 }
 0xb64   :  { %14146 = vsyncpa [#allocation4], 1 }
 0xb65   :  { %14147 = vsyncpa [#allocation6], 1 }
 0xb66   :  { %14148 = vsyncpa [#allocation9], 1 }

</bundles_post_ra>
